<compile_context>
chip_gen: v6e
topology: v6e:2x2x1
jax: 0.10.0
libtpu: 0.0.40
codegen_flags: <defaults>
</compile_context>

<pallas_src>
import functools

import jax
import jax.numpy as jnp
from jax.experimental import pallas as pl
from jax.experimental.pallas import tpu as pltpu


# ----------------------------------------------------------------------------
# Fused kernel: attention + fused projection + BatchNorm (batch stats) + PReLU
# ----------------------------------------------------------------------------
def fsa2_fused_kernel(x_ref, wqkv_ref, bqkv_ref, wproj_ref, bproj_ref,
                      gamma_ref, beta_ref, alpha_ref, out_ref,
                      *, batch, t_dim, f_dim, num_heads, head_dim, eps):
    C = num_heads * head_dim
    TF = t_dim * f_dim
    n_seq = batch * t_dim          # independent attention sequences (B*T)
    n_rows = batch * TF            # total (b, t, f) positions

    # --- NCHW -> (N, C): per-batch (C, T*F) -> (T*F, C) transposes (XLU). ---
    chunks = [x_ref[b].T for b in range(batch)]            # each (TF, C) f32
    x = chunks[0] if batch == 1 else jnp.concatenate(chunks, axis=0)
    x16 = x.astype(jnp.bfloat16)                           # (N, C)

    # --- Fused QKV projection (Q columns pre-scaled by 1/sqrt(head_dim)). ---
    qkv = jnp.dot(x16, wqkv_ref[...],
                  preferred_element_type=jnp.float32) + bqkv_ref[...]  # (N,3C)
    q = qkv[:, 0 * C:1 * C].reshape(n_seq, f_dim, C)
    k = qkv[:, 1 * C:2 * C].reshape(n_seq, f_dim, C)
    v = qkv[:, 2 * C:3 * C].reshape(n_seq, f_dim, C)

    # --- Per-head attention; contexts lane-concatenated afterwards. --------
    ctx_heads = []
    for h in range(num_heads):                             # static unroll
        sl = slice(h * head_dim, (h + 1) * head_dim)
        qh = q[:, :, sl].astype(jnp.bfloat16)
        kh = k[:, :, sl].astype(jnp.bfloat16)
        vh = v[:, :, sl].astype(jnp.bfloat16)
        s = jnp.einsum('bqd,bkd->bqk', qh, kh,
                       preferred_element_type=jnp.float32)  # (n_seq, F, F)
        s = s - jnp.max(s, axis=-1, keepdims=True)
        p = jnp.exp(s)
        p = p * (1.0 / jnp.sum(p, axis=-1, keepdims=True))  # exact reciprocal
        ctx_heads.append(jnp.einsum('bqk,bkd->bqd', p.astype(jnp.bfloat16), vh,
                                    preferred_element_type=jnp.float32))
    ctx = ctx_heads[0] if num_heads == 1 else jnp.concatenate(ctx_heads, axis=-1)
    ctx = ctx.reshape(n_rows, C)                           # (N, C) f32

    # --- Single fused (out_proj @ FF) projection. ---------------------------
    y = jnp.dot(ctx.astype(jnp.bfloat16), wproj_ref[...],
                preferred_element_type=jnp.float32) + bproj_ref[...]   # (N, C)

    # --- BatchNorm2d (train-mode batch stats, exact two-pass) + PReLU. ------
    mean = jnp.mean(y, axis=0, keepdims=True)              # (1, C)
    centered = y - mean
    var = jnp.mean(centered * centered, axis=0, keepdims=True)
    scale = gamma_ref[...] * jax.lax.rsqrt(var + eps)      # (1, C)
    z = centered * scale + beta_ref[...]
    alpha = alpha_ref[0, 0]                                # PReLU single param
    z = jnp.where(z >= 0, z, alpha * z)

    # --- (N, C) -> lane-dense NCHW-compatible output (B, C, T*F). -----------
    for b in range(batch):
        out_ref[b] = z[b * TF:(b + 1) * TF, :].T           # (C, TF)


# ----------------------------------------------------------------------------
# Wrapper
# ----------------------------------------------------------------------------
def fsa2_block(x, params, num_heads, eps=1e-5):
    B, C, T, Fdim = x.shape
    assert C % num_heads == 0
    head_dim = C // num_heads
    TF = T * Fdim
    N = B * TF

    # --- one-time parameter prep (tiny XLA ops, outside the kernel) ---------
    q_scale = 1.0 / (head_dim ** 0.5)
    w_in_t = params["w_in"].T                                      # (C, 3C)
    w_qkv_t = jnp.concatenate(
        [w_in_t[:, 0 * C:1 * C] * q_scale, w_in_t[:, 1 * C:3 * C]], axis=1)
    b_qkv = jnp.concatenate(
        [params["b_in"][:, 0 * C:1 * C] * q_scale,
         params["b_in"][:, 1 * C:3 * C]], axis=1).astype(jnp.float32)
    # Fuse out_proj and FF (no nonlinearity / dropout between them):
    #   y = (ctx @ Wout.T + bout) @ Wff.T + bff
    #     = ctx @ (Wout.T @ Wff.T) + (bout @ Wff.T + bff)
    w_proj_t = params["w_out"].T @ params["w_ff"].T                # (C, C)
    b_proj = (params["b_out"] @ params["w_ff"].T
              + params["b_ff"]).astype(jnp.float32)                # (1, C)

    w_qkv_bf = w_qkv_t.astype(jnp.bfloat16)
    w_proj_bf = w_proj_t.astype(jnp.bfloat16)

    # NCHW input goes straight into the kernel; (B,C,T,F)->(B,C,T*F) is free.
    x3 = x.reshape(B, C, TF).astype(jnp.float32)

    # Explicit VMEM budget (v5e default scoped limit is only 16 MiB; v7x
    # physical VMEM is 64 MiB, so stay well under half of it).
    vmem_limit = 32 * 1024 * 1024
    padded_c = ((C + 127) // 128) * 128                    # lane padding of C
    est_live_bytes = 12 * N * padded_c * 4                 # ~live f32 intermediates
    assert est_live_bytes < vmem_limit // 2, (
        "activation too large for the fused single-step kernel; "
        "use a 2-phase tiled grid instead")

    kern = functools.partial(
        fsa2_fused_kernel, batch=B, t_dim=T, f_dim=Fdim,
        num_heads=num_heads, head_dim=head_dim, eps=eps)

    out = pl.pallas_call(
        kern,
        out_shape=jax.ShapeDtypeStruct((B, C, TF), jnp.float32),
        grid=(1,),
        in_specs=[
            pl.BlockSpec((B, C, TF), lambda i: (0, 0, 0)),     # x (NCHW, flat HW)
            pl.BlockSpec((C, 3 * C), lambda i: (0, 0)),        # [Wq|Wk|Wv].T bf16
            pl.BlockSpec((1, 3 * C), lambda i: (0, 0)),        # qkv bias (f32)
            pl.BlockSpec((C, C), lambda i: (0, 0)),            # fused Wout.T@Wff.T
            pl.BlockSpec((1, C), lambda i: (0, 0)),            # fused bias
            pl.BlockSpec((1, C), lambda i: (0, 0)),            # BN gamma
            pl.BlockSpec((1, C), lambda i: (0, 0)),            # BN beta
            pl.BlockSpec(memory_space=pltpu.MemorySpace.SMEM), # PReLU alpha
        ],
        out_specs=pl.BlockSpec((B, C, TF), lambda i: (0, 0, 0)),
        compiler_params=pltpu.CompilerParams(
            dimension_semantics=("arbitrary",),
            vmem_limit_bytes=vmem_limit),
    )(x3, w_qkv_bf, b_qkv, w_proj_bf, b_proj,
      params["gamma"], params["beta"], params["alpha"])

    return out.reshape(B, C, T, Fdim)                      # free reshape


# ----------------------------------------------------------------------------
# Pure-JAX f32 reference (mirrors the PyTorch forward) for a correctness check.
# ----------------------------------------------------------------------------
def fsa2_reference(x, params, num_heads):
    B, C, T, Fdim = x.shape
    head_dim = C // num_heads
    x_ = jnp.transpose(x, (0, 2, 3, 1)).reshape(B * T, Fdim, C).astype(jnp.float32)

    qkv = x_ @ params["w_in"].T + params["b_in"][0]
    q, k, v = jnp.split(qkv, 3, axis=-1)

    def split_heads(t):
        return t.reshape(B * T, Fdim, num_heads, head_dim).transpose(0, 2, 1, 3)

    qh, kh, vh = split_heads(q), split_heads(k), split_heads(v)
    s = jnp.einsum("bhqd,bhkd->bhqk", qh, kh) / jnp.sqrt(head_dim)
    p = jax.nn.softmax(s, axis=-1)
    ctx = jnp.einsum("bhqk,bhkd->bhqd", p, vh)
    ctx = ctx.transpose(0, 2, 1, 3).reshape(B * T, Fdim, C)
    attn_out = ctx @ params["w_out"].T + params["b_out"][0]
    y = attn_out @ params["w_ff"].T + params["b_ff"][0]

    y4 = y.reshape(B, T, Fdim, C)
    out = jnp.transpose(y4, (0, 3, 1, 2))                  # (B, C, T, F)
    mean = out.mean(axis=(0, 2, 3), keepdims=True)
    var = ((out - mean) ** 2).mean(axis=(0, 2, 3), keepdims=True)
    z = (out - mean) / jnp.sqrt(var + 1e-5)
    z = z * params["gamma"][0].reshape(1, C, 1, 1) + params["beta"][0].reshape(1, C, 1, 1)
    alpha = params["alpha"][0, 0]
    return jnp.where(z >= 0, z, alpha * z)


if __name__ == "__main__":
    # Small shapes consistent with the module:
    #   in_channels C = 32, hidden_size (= num_heads) = 4, B = 2, T = 8, F = 16
    B, C, T, Fdim = 2, 32, 8, 16
    num_heads = 4

    key = jax.random.PRNGKey(0)
    keys = jax.random.split(key, 9)
    params = {
        "w_in":  (0.1 * jax.random.normal(keys[0], (3 * C, C))).astype(jnp.float32),
        "b_in":  (0.05 * jax.random.normal(keys[1], (1, 3 * C))).astype(jnp.float32),
        "w_out": (0.1 * jax.random.normal(keys[2], (C, C))).astype(jnp.float32),
        "b_out": (0.05 * jax.random.normal(keys[3], (1, C))).astype(jnp.float32),
        "w_ff":  (0.1 * jax.random.normal(keys[4], (C, C))).astype(jnp.float32),
        "b_ff":  (0.05 * jax.random.normal(keys[5], (1, C))).astype(jnp.float32),
        "gamma": (1.0 + 0.1 * jax.random.normal(keys[6], (1, C))).astype(jnp.float32),
        "beta":  (0.1 * jax.random.normal(keys[7], (1, C))).astype(jnp.float32),
        "alpha": jnp.full((1, 1), 0.25, dtype=jnp.float32),    # PReLU default init
    }

    x = jax.random.normal(keys[8], (B, C, T, Fdim), dtype=jnp.float32)

    out = jax.block_until_ready(fsa2_block(x, params, num_heads))
    ref = jax.block_until_ready(fsa2_reference(x, params, num_heads))

    assert out.shape == (B, C, T, Fdim), out.shape
    # Tolerance accounts for bf16 MXU operands in the kernel (f32 accumulation)
    # vs. the pure-f32 reference, amplified by the BatchNorm 1/std scaling.
    assert jnp.allclose(out, ref, atol=5e-2, rtol=5e-2), \
        float(jnp.max(jnp.abs(out - ref)))
    print("KERNEL_OK")
</pallas_src>

<mosaic_0001>
module attributes {stable_mosaic.version = 11 : i64} {
  func.func @fsa2_fused_kernel(%arg0: i32, %arg1: memref<2x32x128xf32, #tpu.memory_space<vmem>>, %arg2: memref<32x96xbf16, #tpu.memory_space<vmem>>, %arg3: memref<1x96xf32, #tpu.memory_space<vmem>>, %arg4: memref<32x32xbf16, #tpu.memory_space<vmem>>, %arg5: memref<1x32xf32, #tpu.memory_space<vmem>>, %arg6: memref<1x32xf32, #tpu.memory_space<vmem>>, %arg7: memref<1x32xf32, #tpu.memory_space<vmem>>, %arg8: memref<1x1xf32, #tpu.memory_space<smem>>, %arg9: memref<2x32x128xf32, #tpu.memory_space<vmem>>) attributes {dimension_semantics = [#tpu.dimension_semantics<arbitrary>], iteration_bounds = array<i64: 1>, scalar_prefetch = 0 : i64, scratch_operands = 0 : i64, tpu.core_type = #tpu.core_type<tc>, window_params = [{pipeline_mode = #tpu.pipeline_mode<synchronous>, transform_indices = @transform_0, window_bounds = array<i64: 2, 32, 128>}, {pipeline_mode = #tpu.pipeline_mode<synchronous>, transform_indices = @transform_1, window_bounds = array<i64: 32, 96>}, {pipeline_mode = #tpu.pipeline_mode<synchronous>, transform_indices = @transform_2, window_bounds = array<i64: 1, 96>}, {pipeline_mode = #tpu.pipeline_mode<synchronous>, transform_indices = @transform_3, window_bounds = array<i64: 32, 32>}, {pipeline_mode = #tpu.pipeline_mode<synchronous>, transform_indices = @transform_4, window_bounds = array<i64: 1, 32>}, {pipeline_mode = #tpu.pipeline_mode<synchronous>, transform_indices = @transform_5, window_bounds = array<i64: 1, 32>}, {pipeline_mode = #tpu.pipeline_mode<synchronous>, transform_indices = @transform_6, window_bounds = array<i64: 1, 32>}, {transform_indices = @transform_7, window_bounds = array<i64: 1, 1>}, {pipeline_mode = #tpu.pipeline_mode<synchronous>, transform_indices = @transform_8, window_bounds = array<i64: 2, 32, 128>}]} {
    %c0 = arith.constant 0 : index
    %c0_0 = arith.constant 0 : index
    %c0_1 = arith.constant 0 : index
    %0 = vector.load %arg1[%c0, %c0_0, %c0_1] : memref<2x32x128xf32, #tpu.memory_space<vmem>>, vector<1x32x128xf32>
    %1 = vector.shape_cast %0 : vector<1x32x128xf32> to vector<32x128xf32>
    %2 = tpu.transpose %1, [1, 0] : vector<32x128xf32> -> vector<128x32xf32>
    %c1 = arith.constant 1 : index
    %c0_2 = arith.constant 0 : index
    %c0_3 = arith.constant 0 : index
    %3 = vector.load %arg1[%c1, %c0_2, %c0_3] : memref<2x32x128xf32, #tpu.memory_space<vmem>>, vector<1x32x128xf32>
    %4 = vector.shape_cast %3 : vector<1x32x128xf32> to vector<32x128xf32>
    %5 = tpu.transpose %4, [1, 0] : vector<32x128xf32> -> vector<128x32xf32>
    %6 = tpu.concatenate %2, %5 in 0 : vector<128x32xf32>, vector<128x32xf32> -> vector<256x32xf32>
    %7 = arith.truncf %6 : vector<256x32xf32> to vector<256x32xbf16>
    %c0_4 = arith.constant 0 : index
    %c0_5 = arith.constant 0 : index
    %8 = vector.load %arg2[%c0_4, %c0_5] : memref<32x96xbf16, #tpu.memory_space<vmem>>, vector<32x96xbf16>
    %cst = arith.constant dense<0.000000e+00> : vector<256x96xf32>
    %9 = tpu.matmul %7, %8, %cst {dimension_numbers = #tpu.dot_dimension_numbers<[1], [0], [0], [1], [0, 0, 1, 1], [], []>} : vector<256x32xbf16>, vector<32x96xbf16>, vector<256x96xf32> -> vector<256x96xf32>
    %c0_6 = arith.constant 0 : index
    %c0_7 = arith.constant 0 : index
    %10 = vector.load %arg3[%c0_6, %c0_7] : memref<1x96xf32, #tpu.memory_space<vmem>>, vector<1x96xf32>
    %11 = vector.broadcast %10 : vector<1x96xf32> to vector<256x96xf32>
    %12 = arith.addf %9, %11 : vector<256x96xf32>
    %13 = vector.extract_strided_slice %12 {offsets = [0, 0], sizes = [256, 32], strides = [1, 1]} : vector<256x96xf32> to vector<256x32xf32>
    %14 = vector.shape_cast %13 : vector<256x32xf32> to vector<16x16x32xf32>
    %15 = vector.extract_strided_slice %12 {offsets = [0, 32], sizes = [256, 32], strides = [1, 1]} : vector<256x96xf32> to vector<256x32xf32>
    %16 = vector.shape_cast %15 : vector<256x32xf32> to vector<16x16x32xf32>
    %17 = vector.extract_strided_slice %12 {offsets = [0, 64], sizes = [256, 32], strides = [1, 1]} : vector<256x96xf32> to vector<256x32xf32>
    %18 = vector.shape_cast %17 : vector<256x32xf32> to vector<16x16x32xf32>
    %19 = vector.extract_strided_slice %14 {offsets = [0, 0, 0], sizes = [16, 16, 8], strides = [1, 1, 1]} : vector<16x16x32xf32> to vector<16x16x8xf32>
    %20 = arith.truncf %19 : vector<16x16x8xf32> to vector<16x16x8xbf16>
    %21 = vector.extract_strided_slice %16 {offsets = [0, 0, 0], sizes = [16, 16, 8], strides = [1, 1, 1]} : vector<16x16x32xf32> to vector<16x16x8xf32>
    %22 = arith.truncf %21 : vector<16x16x8xf32> to vector<16x16x8xbf16>
    %23 = vector.extract_strided_slice %18 {offsets = [0, 0, 0], sizes = [16, 16, 8], strides = [1, 1, 1]} : vector<16x16x32xf32> to vector<16x16x8xf32>
    %24 = arith.truncf %23 : vector<16x16x8xf32> to vector<16x16x8xbf16>
    "tpu.trace_start"() <{level = 10 : i32, message = "bqd,bkd->bqk"}> : () -> ()
    %cst_8 = arith.constant dense<0.000000e+00> : vector<16x16x16xf32>
    %25 = tpu.matmul %20, %22, %cst_8 {dimension_numbers = #tpu.dot_dimension_numbers<[2], [2], [1], [1], [0, 0, 0, 1, 1, 1], [0], [0]>} : vector<16x16x8xbf16>, vector<16x16x8xbf16>, vector<16x16x16xf32> -> vector<16x16x16xf32>
    "tpu.trace_stop"() : () -> ()
    %cst_9 = arith.constant dense<0xFF800000> : vector<16x16xf32>
    %26 = vector.multi_reduction <maximumf>, %25, %cst_9 [2] : vector<16x16x16xf32> to vector<16x16xf32>
    %27 = vector.shape_cast %26 : vector<16x16xf32> to vector<16x16x1xf32>
    %28 = vector.broadcast %27 : vector<16x16x1xf32> to vector<16x16x16xf32>
    %29 = arith.subf %25, %28 : vector<16x16x16xf32>
    %30 = math.exp %29 : vector<16x16x16xf32>
    %cst_10 = arith.constant dense<0.000000e+00> : vector<16x16xf32>
    %31 = vector.multi_reduction <add>, %30, %cst_10 [2] : vector<16x16x16xf32> to vector<16x16xf32>
    %32 = vector.shape_cast %31 : vector<16x16xf32> to vector<16x16x1xf32>
    %cst_11 = arith.constant 1.000000e+00 : f32
    %33 = vector.broadcast %cst_11 : f32 to vector<16x16x1xf32>
    %34 = arith.divf %33, %32 : vector<16x16x1xf32>
    %35 = vector.broadcast %34 : vector<16x16x1xf32> to vector<16x16x16xf32>
    %36 = arith.mulf %30, %35 : vector<16x16x16xf32>
    %37 = arith.truncf %36 : vector<16x16x16xf32> to vector<16x16x16xbf16>
    "tpu.trace_start"() <{level = 10 : i32, message = "bqk,bkd->bqd"}> : () -> ()
    %cst_12 = arith.constant dense<0.000000e+00> : vector<16x16x8xf32>
    %38 = tpu.matmul %37, %24, %cst_12 {dimension_numbers = #tpu.dot_dimension_numbers<[2], [1], [1], [2], [0, 0, 0, 1, 1, 2], [0], [0]>} : vector<16x16x16xbf16>, vector<16x16x8xbf16>, vector<16x16x8xf32> -> vector<16x16x8xf32>
    "tpu.trace_stop"() : () -> ()
    %39 = vector.extract_strided_slice %14 {offsets = [0, 0, 8], sizes = [16, 16, 8], strides = [1, 1, 1]} : vector<16x16x32xf32> to vector<16x16x8xf32>
    %40 = arith.truncf %39 : vector<16x16x8xf32> to vector<16x16x8xbf16>
    %41 = vector.extract_strided_slice %16 {offsets = [0, 0, 8], sizes = [16, 16, 8], strides = [1, 1, 1]} : vector<16x16x32xf32> to vector<16x16x8xf32>
    %42 = arith.truncf %41 : vector<16x16x8xf32> to vector<16x16x8xbf16>
    %43 = vector.extract_strided_slice %18 {offsets = [0, 0, 8], sizes = [16, 16, 8], strides = [1, 1, 1]} : vector<16x16x32xf32> to vector<16x16x8xf32>
    %44 = arith.truncf %43 : vector<16x16x8xf32> to vector<16x16x8xbf16>
    "tpu.trace_start"() <{level = 10 : i32, message = "bqd,bkd->bqk"}> : () -> ()
    %cst_13 = arith.constant dense<0.000000e+00> : vector<16x16x16xf32>
    %45 = tpu.matmul %40, %42, %cst_13 {dimension_numbers = #tpu.dot_dimension_numbers<[2], [2], [1], [1], [0, 0, 0, 1, 1, 1], [0], [0]>} : vector<16x16x8xbf16>, vector<16x16x8xbf16>, vector<16x16x16xf32> -> vector<16x16x16xf32>
    "tpu.trace_stop"() : () -> ()
    %cst_14 = arith.constant dense<0xFF800000> : vector<16x16xf32>
    %46 = vector.multi_reduction <maximumf>, %45, %cst_14 [2] : vector<16x16x16xf32> to vector<16x16xf32>
    %47 = vector.shape_cast %46 : vector<16x16xf32> to vector<16x16x1xf32>
    %48 = vector.broadcast %47 : vector<16x16x1xf32> to vector<16x16x16xf32>
    %49 = arith.subf %45, %48 : vector<16x16x16xf32>
    %50 = math.exp %49 : vector<16x16x16xf32>
    %cst_15 = arith.constant dense<0.000000e+00> : vector<16x16xf32>
    %51 = vector.multi_reduction <add>, %50, %cst_15 [2] : vector<16x16x16xf32> to vector<16x16xf32>
    %52 = vector.shape_cast %51 : vector<16x16xf32> to vector<16x16x1xf32>
    %cst_16 = arith.constant 1.000000e+00 : f32
    %53 = vector.broadcast %cst_16 : f32 to vector<16x16x1xf32>
    %54 = arith.divf %53, %52 : vector<16x16x1xf32>
    %55 = vector.broadcast %54 : vector<16x16x1xf32> to vector<16x16x16xf32>
    %56 = arith.mulf %50, %55 : vector<16x16x16xf32>
    %57 = arith.truncf %56 : vector<16x16x16xf32> to vector<16x16x16xbf16>
    "tpu.trace_start"() <{level = 10 : i32, message = "bqk,bkd->bqd"}> : () -> ()
    %cst_17 = arith.constant dense<0.000000e+00> : vector<16x16x8xf32>
    %58 = tpu.matmul %57, %44, %cst_17 {dimension_numbers = #tpu.dot_dimension_numbers<[2], [1], [1], [2], [0, 0, 0, 1, 1, 2], [0], [0]>} : vector<16x16x16xbf16>, vector<16x16x8xbf16>, vector<16x16x8xf32> -> vector<16x16x8xf32>
    "tpu.trace_stop"() : () -> ()
    %59 = vector.extract_strided_slice %14 {offsets = [0, 0, 16], sizes = [16, 16, 8], strides = [1, 1, 1]} : vector<16x16x32xf32> to vector<16x16x8xf32>
    %60 = arith.truncf %59 : vector<16x16x8xf32> to vector<16x16x8xbf16>
    %61 = vector.extract_strided_slice %16 {offsets = [0, 0, 16], sizes = [16, 16, 8], strides = [1, 1, 1]} : vector<16x16x32xf32> to vector<16x16x8xf32>
    %62 = arith.truncf %61 : vector<16x16x8xf32> to vector<16x16x8xbf16>
    %63 = vector.extract_strided_slice %18 {offsets = [0, 0, 16], sizes = [16, 16, 8], strides = [1, 1, 1]} : vector<16x16x32xf32> to vector<16x16x8xf32>
    %64 = arith.truncf %63 : vector<16x16x8xf32> to vector<16x16x8xbf16>
    "tpu.trace_start"() <{level = 10 : i32, message = "bqd,bkd->bqk"}> : () -> ()
    %cst_18 = arith.constant dense<0.000000e+00> : vector<16x16x16xf32>
    %65 = tpu.matmul %60, %62, %cst_18 {dimension_numbers = #tpu.dot_dimension_numbers<[2], [2], [1], [1], [0, 0, 0, 1, 1, 1], [0], [0]>} : vector<16x16x8xbf16>, vector<16x16x8xbf16>, vector<16x16x16xf32> -> vector<16x16x16xf32>
    "tpu.trace_stop"() : () -> ()
    %cst_19 = arith.constant dense<0xFF800000> : vector<16x16xf32>
    %66 = vector.multi_reduction <maximumf>, %65, %cst_19 [2] : vector<16x16x16xf32> to vector<16x16xf32>
    %67 = vector.shape_cast %66 : vector<16x16xf32> to vector<16x16x1xf32>
    %68 = vector.broadcast %67 : vector<16x16x1xf32> to vector<16x16x16xf32>
    %69 = arith.subf %65, %68 : vector<16x16x16xf32>
    %70 = math.exp %69 : vector<16x16x16xf32>
    %cst_20 = arith.constant dense<0.000000e+00> : vector<16x16xf32>
    %71 = vector.multi_reduction <add>, %70, %cst_20 [2] : vector<16x16x16xf32> to vector<16x16xf32>
    %72 = vector.shape_cast %71 : vector<16x16xf32> to vector<16x16x1xf32>
    %cst_21 = arith.constant 1.000000e+00 : f32
    %73 = vector.broadcast %cst_21 : f32 to vector<16x16x1xf32>
    %74 = arith.divf %73, %72 : vector<16x16x1xf32>
    %75 = vector.broadcast %74 : vector<16x16x1xf32> to vector<16x16x16xf32>
    %76 = arith.mulf %70, %75 : vector<16x16x16xf32>
    %77 = arith.truncf %76 : vector<16x16x16xf32> to vector<16x16x16xbf16>
    "tpu.trace_start"() <{level = 10 : i32, message = "bqk,bkd->bqd"}> : () -> ()
    %cst_22 = arith.constant dense<0.000000e+00> : vector<16x16x8xf32>
    %78 = tpu.matmul %77, %64, %cst_22 {dimension_numbers = #tpu.dot_dimension_numbers<[2], [1], [1], [2], [0, 0, 0, 1, 1, 2], [0], [0]>} : vector<16x16x16xbf16>, vector<16x16x8xbf16>, vector<16x16x8xf32> -> vector<16x16x8xf32>
    "tpu.trace_stop"() : () -> ()
    %79 = vector.extract_strided_slice %14 {offsets = [0, 0, 24], sizes = [16, 16, 8], strides = [1, 1, 1]} : vector<16x16x32xf32> to vector<16x16x8xf32>
    %80 = arith.truncf %79 : vector<16x16x8xf32> to vector<16x16x8xbf16>
    %81 = vector.extract_strided_slice %16 {offsets = [0, 0, 24], sizes = [16, 16, 8], strides = [1, 1, 1]} : vector<16x16x32xf32> to vector<16x16x8xf32>
    %82 = arith.truncf %81 : vector<16x16x8xf32> to vector<16x16x8xbf16>
    %83 = vector.extract_strided_slice %18 {offsets = [0, 0, 24], sizes = [16, 16, 8], strides = [1, 1, 1]} : vector<16x16x32xf32> to vector<16x16x8xf32>
    %84 = arith.truncf %83 : vector<16x16x8xf32> to vector<16x16x8xbf16>
    "tpu.trace_start"() <{level = 10 : i32, message = "bqd,bkd->bqk"}> : () -> ()
    %cst_23 = arith.constant dense<0.000000e+00> : vector<16x16x16xf32>
    %85 = tpu.matmul %80, %82, %cst_23 {dimension_numbers = #tpu.dot_dimension_numbers<[2], [2], [1], [1], [0, 0, 0, 1, 1, 1], [0], [0]>} : vector<16x16x8xbf16>, vector<16x16x8xbf16>, vector<16x16x16xf32> -> vector<16x16x16xf32>
    "tpu.trace_stop"() : () -> ()
    %cst_24 = arith.constant dense<0xFF800000> : vector<16x16xf32>
    %86 = vector.multi_reduction <maximumf>, %85, %cst_24 [2] : vector<16x16x16xf32> to vector<16x16xf32>
    %87 = vector.shape_cast %86 : vector<16x16xf32> to vector<16x16x1xf32>
    %88 = vector.broadcast %87 : vector<16x16x1xf32> to vector<16x16x16xf32>
    %89 = arith.subf %85, %88 : vector<16x16x16xf32>
    %90 = math.exp %89 : vector<16x16x16xf32>
    %cst_25 = arith.constant dense<0.000000e+00> : vector<16x16xf32>
    %91 = vector.multi_reduction <add>, %90, %cst_25 [2] : vector<16x16x16xf32> to vector<16x16xf32>
    %92 = vector.shape_cast %91 : vector<16x16xf32> to vector<16x16x1xf32>
    %cst_26 = arith.constant 1.000000e+00 : f32
    %93 = vector.broadcast %cst_26 : f32 to vector<16x16x1xf32>
    %94 = arith.divf %93, %92 : vector<16x16x1xf32>
    %95 = vector.broadcast %94 : vector<16x16x1xf32> to vector<16x16x16xf32>
    %96 = arith.mulf %90, %95 : vector<16x16x16xf32>
    %97 = arith.truncf %96 : vector<16x16x16xf32> to vector<16x16x16xbf16>
    "tpu.trace_start"() <{level = 10 : i32, message = "bqk,bkd->bqd"}> : () -> ()
    %cst_27 = arith.constant dense<0.000000e+00> : vector<16x16x8xf32>
    %98 = tpu.matmul %97, %84, %cst_27 {dimension_numbers = #tpu.dot_dimension_numbers<[2], [1], [1], [2], [0, 0, 0, 1, 1, 2], [0], [0]>} : vector<16x16x16xbf16>, vector<16x16x8xbf16>, vector<16x16x8xf32> -> vector<16x16x8xf32>
    "tpu.trace_stop"() : () -> ()
    %99 = tpu.concatenate %38, %58, %78, %98 in 2 : vector<16x16x8xf32>, vector<16x16x8xf32>, vector<16x16x8xf32>, vector<16x16x8xf32> -> vector<16x16x32xf32>
    %100 = vector.shape_cast %99 : vector<16x16x32xf32> to vector<256x32xf32>
    %101 = arith.truncf %100 : vector<256x32xf32> to vector<256x32xbf16>
    %c0_28 = arith.constant 0 : index
    %c0_29 = arith.constant 0 : index
    %102 = vector.load %arg4[%c0_28, %c0_29] : memref<32x32xbf16, #tpu.memory_space<vmem>>, vector<32x32xbf16>
    %cst_30 = arith.constant dense<0.000000e+00> : vector<256x32xf32>
    %103 = tpu.matmul %101, %102, %cst_30 {dimension_numbers = #tpu.dot_dimension_numbers<[1], [0], [0], [1], [0, 0, 1, 1], [], []>} : vector<256x32xbf16>, vector<32x32xbf16>, vector<256x32xf32> -> vector<256x32xf32>
    %c0_31 = arith.constant 0 : index
    %c0_32 = arith.constant 0 : index
    %104 = vector.load %arg5[%c0_31, %c0_32] : memref<1x32xf32, #tpu.memory_space<vmem>>, vector<1x32xf32>
    %105 = vector.broadcast %104 : vector<1x32xf32> to vector<256x32xf32>
    %106 = arith.addf %103, %105 : vector<256x32xf32>
    %cst_33 = arith.constant dense<0.000000e+00> : vector<32xf32>
    %107 = vector.multi_reduction <add>, %106, %cst_33 [0] : vector<256x32xf32> to vector<32xf32>
    %108 = vector.shape_cast %107 : vector<32xf32> to vector<1x32xf32>
    %cst_34 = arith.constant 2.560000e+02 : f32
    %109 = vector.broadcast %cst_34 : f32 to vector<1x32xf32>
    %110 = arith.divf %108, %109 : vector<1x32xf32>
    %111 = vector.broadcast %110 : vector<1x32xf32> to vector<256x32xf32>
    %112 = arith.subf %106, %111 : vector<256x32xf32>
    %113 = arith.mulf %112, %112 : vector<256x32xf32>
    %cst_35 = arith.constant dense<0.000000e+00> : vector<32xf32>
    %114 = vector.multi_reduction <add>, %113, %cst_35 [0] : vector<256x32xf32> to vector<32xf32>
    %115 = vector.shape_cast %114 : vector<32xf32> to vector<1x32xf32>
    %cst_36 = arith.constant 2.560000e+02 : f32
    %116 = vector.broadcast %cst_36 : f32 to vector<1x32xf32>
    %117 = arith.divf %115, %116 : vector<1x32xf32>
    %c0_37 = arith.constant 0 : index
    %c0_38 = arith.constant 0 : index
    %118 = vector.load %arg6[%c0_37, %c0_38] : memref<1x32xf32, #tpu.memory_space<vmem>>, vector<1x32xf32>
    %cst_39 = arith.constant 9.99999974E-6 : f32
    %119 = vector.broadcast %cst_39 : f32 to vector<1x32xf32>
    %120 = arith.addf %117, %119 : vector<1x32xf32>
    %121 = math.rsqrt %120 : vector<1x32xf32>
    %122 = arith.mulf %118, %121 : vector<1x32xf32>
    %123 = vector.broadcast %122 : vector<1x32xf32> to vector<256x32xf32>
    %124 = arith.mulf %112, %123 : vector<256x32xf32>
    %c0_40 = arith.constant 0 : index
    %c0_41 = arith.constant 0 : index
    %125 = vector.load %arg7[%c0_40, %c0_41] : memref<1x32xf32, #tpu.memory_space<vmem>>, vector<1x32xf32>
    %126 = vector.broadcast %125 : vector<1x32xf32> to vector<256x32xf32>
    %127 = arith.addf %124, %126 : vector<256x32xf32>
    %c0_42 = arith.constant 0 : index
    %c0_43 = arith.constant 0 : index
    %128 = memref.load %arg8[%c0_42, %c0_43] : memref<1x1xf32, #tpu.memory_space<smem>>
    %cst_44 = arith.constant 0.000000e+00 : f32
    %129 = vector.broadcast %cst_44 : f32 to vector<256x32xf32>
    %130 = arith.cmpf oge, %127, %129 : vector<256x32xf32>
    %131 = vector.broadcast %128 : f32 to vector<256x32xf32>
    %132 = arith.mulf %131, %127 : vector<256x32xf32>
    %133 = arith.select %130, %127, %132 : vector<256x32xi1>, vector<256x32xf32>
    %134 = vector.extract_strided_slice %133 {offsets = [0, 0], sizes = [128, 32], strides = [1, 1]} : vector<256x32xf32> to vector<128x32xf32>
    %135 = tpu.transpose %134, [1, 0] : vector<128x32xf32> -> vector<32x128xf32>
    %c0_45 = arith.constant 0 : index
    %c0_46 = arith.constant 0 : index
    %c0_47 = arith.constant 0 : index
    %136 = vector.load %arg9[%c0_45, %c0_46, %c0_47] : memref<2x32x128xf32, #tpu.memory_space<vmem>>, vector<1x32x128xf32>
    %137 = vector.shape_cast %136 : vector<1x32x128xf32> to vector<32x128xf32>
    %138 = vector.shape_cast %135 : vector<32x128xf32> to vector<1x32x128xf32>
    tpu.vector_store %arg9[%c0_45, %c0_46, %c0_47], %138 {strides = array<i32>} : memref<2x32x128xf32, #tpu.memory_space<vmem>>, vector<1x32x128xf32>,
    %139 = vector.extract_strided_slice %133 {offsets = [128, 0], sizes = [128, 32], strides = [1, 1]} : vector<256x32xf32> to vector<128x32xf32>
    %140 = tpu.transpose %139, [1, 0] : vector<128x32xf32> -> vector<32x128xf32>
    %c1_48 = arith.constant 1 : index
    %c0_49 = arith.constant 0 : index
    %c0_50 = arith.constant 0 : index
    %141 = vector.load %arg9[%c1_48, %c0_49, %c0_50] : memref<2x32x128xf32, #tpu.memory_space<vmem>>, vector<1x32x128xf32>
    %142 = vector.shape_cast %141 : vector<1x32x128xf32> to vector<32x128xf32>
    %143 = vector.shape_cast %140 : vector<32x128xf32> to vector<1x32x128xf32>
    tpu.vector_store %arg9[%c1_48, %c0_49, %c0_50], %143 {strides = array<i32>} : memref<2x32x128xf32, #tpu.memory_space<vmem>>, vector<1x32x128xf32>,
    return
  }
  func.func @transform_0(%arg0: i32) -> (i32, i32, i32) {
    %c0_i32 = arith.constant 0 : i32
    %c0_i32_0 = arith.constant 0 : i32
    %c0_i32_1 = arith.constant 0 : i32
    %c0_i32_2 = arith.constant 0 : i32
    return %c0_i32, %c0_i32_0, %c0_i32_1 : i32, i32, i32
  }
  func.func @transform_1(%arg0: i32) -> (i32, i32) {
    %c0_i32 = arith.constant 0 : i32
    %c0_i32_0 = arith.constant 0 : i32
    %c0_i32_1 = arith.constant 0 : i32
    return %c0_i32, %c0_i32_0 : i32, i32
  }
  func.func @transform_2(%arg0: i32) -> (i32, i32) {
    %c0_i32 = arith.constant 0 : i32
    %c0_i32_0 = arith.constant 0 : i32
    %c0_i32_1 = arith.constant 0 : i32
    return %c0_i32, %c0_i32_0 : i32, i32
  }
  func.func @transform_3(%arg0: i32) -> (i32, i32) {
    %c0_i32 = arith.constant 0 : i32
    %c0_i32_0 = arith.constant 0 : i32
    %c0_i32_1 = arith.constant 0 : i32
    return %c0_i32, %c0_i32_0 : i32, i32
  }
  func.func @transform_4(%arg0: i32) -> (i32, i32) {
    %c0_i32 = arith.constant 0 : i32
    %c0_i32_0 = arith.constant 0 : i32
    %c0_i32_1 = arith.constant 0 : i32
    return %c0_i32, %c0_i32_0 : i32, i32
  }
  func.func @transform_5(%arg0: i32) -> (i32, i32) {
    %c0_i32 = arith.constant 0 : i32
    %c0_i32_0 = arith.constant 0 : i32
    %c0_i32_1 = arith.constant 0 : i32
    return %c0_i32, %c0_i32_0 : i32, i32
  }
  func.func @transform_6(%arg0: i32) -> (i32, i32) {
    %c0_i32 = arith.constant 0 : i32
    %c0_i32_0 = arith.constant 0 : i32
    %c0_i32_1 = arith.constant 0 : i32
    return %c0_i32, %c0_i32_0 : i32, i32
  }
  func.func @transform_7(%arg0: i32) -> (i32, i32) {
    %c0_i32 = arith.constant 0 : i32
    %c0_i32_0 = arith.constant 0 : i32
    %c0_i32_1 = arith.constant 0 : i32
    return %c0_i32, %c0_i32_0 : i32, i32
  }
  func.func @transform_8(%arg0: i32) -> (i32, i32, i32) {
    %c0_i32 = arith.constant 0 : i32
    %c0_i32_0 = arith.constant 0 : i32
    %c0_i32_1 = arith.constant 0 : i32
    %c0_i32_2 = arith.constant 0 : i32
    return %c0_i32, %c0_i32_0, %c0_i32_1 : i32, i32, i32
  }
}

</mosaic_0001>

<bundles_post_ra>
// kernel: tpu_custom_call.1
= control target key start
LH: loop header
LB: loop body
LE: loop exit
PB: predicated region body
PF: predicated region fallthrough
CT: control target
= control target key end

     0   :  { %14 = vsyncpa [#allocation4], 0  ;;  %s15409_s0 = inlined_call_operand.hbm [shape: f32[2,32,128], index: 0, kind: input, shape index: {}]   ;;  %s15410_s1 = inlined_call_operand.hbm [shape: bf16[32,96], index: 1, kind: input, shape index: {}]   ;;  %s15411_s2 = inlined_call_operand.vmem [shape: f32[1,96], index: 2, kind: input, shape index: {}]   ;;  %s15412_s3 = inlined_call_operand.hbm [shape: bf16[32,32], index: 3, kind: input, shape index: {}]   ;;  %s15413_s4 = inlined_call_operand.vmem [shape: f32[1,32], index: 4, kind: input, shape index: {}]   ;;  %s15414_s5 = inlined_call_operand.vmem [shape: f32[1,32], index: 5, kind: input, shape index: {}]   ;;  %s15415_s6 = inlined_call_operand.vmem [shape: f32[1,32], index: 6, kind: input, shape index: {}]   ;;  %s15416_s7 = inlined_call_operand.<no memory space> [shape: f32[1,1], index: 7, kind: input, shape index: {}]   ;;  %s15417_s8 = inlined_call_operand.hbm [shape: f32[2,32,128], index: 8, kind: output, shape index: {}]  }
   0x1   :  { %15 = vsyncpa [#allocation7], 0 }
   0x2   :  { %16 = vsyncpa [#allocation5], 0  ;;  %s11642_s27 = smov [#allocation6]  }
   0x3   :  { %s34_s28 = sshll.u32 %s11642_s27, 4  ;;  %s35_s28 = int_to_ptr.vmem [resolvable:$true] %s34_s28 }
   0x4   :  { %s11564_s29 = scalar_lea.vmem %s35_s28, 256  ;;  %p11569_p1 = scmp.lt.s32.totalorder %s35_s28, %s35_s28 }
   0x5   :  { %p11565_p0 = scmp.ne.s32.totalorder %s35_s28, %s11564_s29  ;;  %p11570_p2 = scmp.lt.s32.totalorder %s11564_s29, %s11564_s29 }
   0x7   :  { %p11571_p3 = por %p11570_p2, %p11569_p1 }
   0x9   :  { %p11572_p4 = pnand %p11571_p3, %p11565_p0 }
   0xb   :  { %11575 = shalt.err (!%p11572_p4)
}
   0xc   :  { %s11643_s30 = smov 64   ;;  %s11644_s9 = smov 4  }
   0xd   :  { %40 = dma.hbm_to_vmem [thread:$0]  %s15410_s1, 256, %s35_s28, [#allocation7], %s11643_s30, %s11643_s30, %s11644_s9  }
   0xe   :  { %s11645_s12 = smov [#allocation3]  }
   0xf   :  { %s22_s13 = sshll.u32 %s11645_s12, 4  ;;  %s23_s13 = int_to_ptr.vmem [resolvable:$true] %s22_s13 }
  0x10   :  { %s11584_s14 = scalar_lea.vmem %s23_s13, 1024  ;;  %p11589_p6 = scmp.lt.s32.totalorder %s23_s13, %s23_s13 }
  0x11   :  { %p11585_p5 = scmp.ne.s32.totalorder %s23_s13, %s11584_s14  ;;  %p11590_p7 = scmp.lt.s32.totalorder %s11584_s14, %s11584_s14 }
  0x13   :  { %p11591_p8 = por %p11590_p7, %p11589_p6 }
  0x15   :  { %p11592_p9 = pnand %p11591_p8, %p11585_p5 }
  0x17   :  { %11595 = shalt.err (!%p11592_p9)
}
  0x18   :  { %s11646_s15 = smov 128   ;;  %s11647_s16 = smov 8  }
  0x19   :  { %28 = dma.hbm_to_vmem [thread:$0]  %s15409_s0, 1024, %s23_s13, [#allocation4], %s11646_s15, %s11646_s15, %s11647_s16  }
  0x1a   :  { %s11648_s1 = smov [#allocation8]  }
  0x1b   :  { %s48_s19 = sshll.u32 %s11648_s1, 4  ;;  %s49_s19 = int_to_ptr.vmem [resolvable:$true] %s48_s19 }
  0x1c   :  { %s11604_s20 = scalar_lea.vmem %s49_s19, 256  ;;  %p11609_p11 = scmp.lt.s32.totalorder %s49_s19, %s49_s19 }
  0x1d   :  { %p11605_p10 = scmp.ne.s32.totalorder %s49_s19, %s11604_s20  ;;  %p11610_p12 = scmp.lt.s32.totalorder %s11604_s20, %s11604_s20 }
  0x1f   :  { %p11611_p13 = por %p11610_p12, %p11609_p11 }
  0x21   :  { %p11612_p0 = pnand %p11611_p13, %p11605_p10 }
  0x23   :  { %11615 = shalt.err (!%p11612_p0)
}
  0x24   :  { %54 = dma.hbm_to_vmem [thread:$0]  %s15412_s3, 256, %s49_s19, [#allocation7], %s11643_s30, %s11643_s30, %s11644_s9  }
  0x25   :  { %11636 = dma.done.wait [#allocation4], 1024  }
  0x26   :  { %11637 = vsyncadd [#allocation4], 4294966272 }
  0x27   :  { %11638 = dma.done.wait [#allocation7], 512  }
  0x28   :  { %11639 = vsyncadd [#allocation7], 4294966784  ;;  %v73_v0 = vld [vmem:[#allocation3] sm:$0xff]  ;;  %v74_v2 = vld [vmem:[#allocation3 + $0x8] sm:$0xff]  ;;  %vm185_vm0 = vcmask 261120   ;;  %v15418_v58 = vmov 0.0  }
  0x29   :  { %77 = vxpose.xlu0.b32.start [1/4] (short) %v73_v0, 128  ;;  %v110_v1 = vld [vmem:[#allocation3 + $0x20] sm:$0xff]  ;;  %v111_v3 = vld [vmem:[#allocation3 + $0x28] sm:$0xff]  ;;  %v75_v6 = vld [vmem:[#allocation3 + $0x10] sm:$0xff]  ;;  %vm11650_vm1 = vmmov 0   ;;  %s11651_s23 = smov 96   ;;  %vm414_vm2 = vcmask 64512  }
  0x2a   :  { %114 = vxpose.xlu1.b32.start [1/4] (short) %v110_v1, 128  ;;  %v11038_v4 = vld [vmem:[#allocation6 + $0x8] sm:$0xff]   ;;  %v11039_v5 = vld [vmem:[#allocation6] sm:$0xff]   ;;  %v112_v7 = vld [vmem:[#allocation3 + $0x30] sm:$0xff]  ;;  %vm1212_vm3 = vcmask 130048   ;;  %s11653_s24 = smov 120   ;;  %s11654_s25 = smov 56  }
  0x2b   :  { %9932 = vmatprep.subr.bf16.mxu0 %v11038_v4  ;;  %10772 = vmatprep.subr.bf16.mxu1 %v11038_v4  ;;  %v76_v8 = vld [vmem:[#allocation3 + $0x18] sm:$0xff]  ;;  %v11750_v60 = vld [vmem:[%s15411_s2] ss:$0 sm:$0xff]  ;;  %s11652_s2 = smov 88   ;;  %s11655_s26 = smov 80   ;;  %vm8717_vm4 = vcmask 195584  }
  0x2c   :  { %9933 = vmatpush3.bf16.msra.mxu0 %v11038_v4  ;;  %10774 = vmatpush3.bf16.msra.mxu1 %v11038_v4  ;;  %v113_v9 = vld [vmem:[#allocation3 + $0x38] sm:$0xff]  ;;  %s11656_s27 = smov 112   ;;  %s11657_s28 = smov 48  }
  0x2d   :  { %78 = vxpose.xlu0.b32.cont [2/4] (short) %v74_v2, 128  ;;  %9934 = vmatprep.subr.bf16.mxu0 %v11039_v5  ;;  %s11658_s29 = smov 72   ;;  %s11660_s9 = smov 40  }
  0x2e   :  { %115 = vxpose.xlu1.b32.cont [2/4] (short) %v111_v3, 128  ;;  %10773 = vmatprep.subr.bf16.mxu1 %v11039_v5  ;;  %s11661_s10 = smov 16   ;;  %s11662_s11 = smov 24  }
  0x30   :  { %9935 = vmatpush3.bf16.msra.mxu0 %v11039_v5  ;;  %10775 = vmatpush3.bf16.msra.mxu1 %v11039_v5 }
  0x31   :  { %79 = vxpose.xlu0.b32.cont [3/4] (short) %v75_v6, 128  ;;  %9968 = vmatprep.subr.bf16.mxu1 %v15418_v58 }
  0x32   :  { %116 = vxpose.xlu1.b32.cont [3/4] (short) %v112_v7, 128  ;;  %10016 = vmatprep.subr.bf16.mxu0 %v15418_v58 }
  0x35   :  { %80 = vxpose.xlu0.b32.end [4/4] (short) %v76_v8, 128 }
  0x36   :  { %117 = vxpose.xlu1.b32.end [4/4] (short) %v113_v9, 128 }
  0xa5   :  { %v93_v10 = vpop.trf.xlu0 }
  0xa6   :  { %v130_v11 = vpop.trf.xlu1 }
  0xa9   :  { %v94_v12 = vpop.trf.xlu0 }
  0xaa   :  { %v146_v13 = vpack.c.bf16 %v94_v12, %v93_v10  ;;  %v131_v14 = vpop.trf.xlu1 }
  0xab   :  { %v154_v15 = vpack.c.bf16 %v131_v14, %v130_v11 }
  0xac   :  { %9936 = vmatprep.mubr.msk.bf16.mxu0 %vm185_vm0, %v146_v13 }
  0xad   :  { %v95_v16 = vpop.trf.xlu0  ;;  %9952 = vmatprep.mubr.msk.bf16.mxu1 %vm185_vm0, %v154_v15 }
  0xae   :  { %v132_v17 = vpop.trf.xlu1 }
  0xb1   :  { %v96_v18 = vpop.trf.xlu0 }
  0xb2   :  { %v147_v19 = vpack.c.bf16 %v96_v18, %v95_v16  ;;  %v133_v20 = vpop.trf.xlu1 }
  0xb3   :  { %v155_v21 = vpack.c.bf16 %v133_v20, %v132_v17 }
  0xb4   :  { %9937 = vmatmul.mubr.msk.bf16.vlgmr.msra.gmra.mxu0 %vm185_vm0, %v147_v19 }
  0xb5   :  { %v97_v22 = vpop.trf.xlu0  ;;  %9953 = vmatmul.mubr.msk.bf16.vlgmr.msra.gmra.mxu1 %vm185_vm0, %v155_v21 }
  0xb6   :  { %v134_v23 = vpop.trf.xlu1 }
  0xb9   :  { %v98_v24 = vpop.trf.xlu0 }
  0xba   :  { %v148_v25 = vpack.c.bf16 %v98_v24, %v97_v22  ;;  %v135_v26 = vpop.trf.xlu1 }
  0xbb   :  { %v156_v27 = vpack.c.bf16 %v135_v26, %v134_v23 }
  0xbc   :  { %9940 = vmatprep.mubr.msk.bf16.mxu0 %vm185_vm0, %v148_v25 }
  0xbd   :  { %v99_v28 = vpop.trf.xlu0  ;;  %9956 = vmatprep.mubr.msk.bf16.mxu1 %vm185_vm0, %v156_v27 }
  0xbe   :  { %v136_v29 = vpop.trf.xlu1 }
  0xc1   :  { %v100_v30 = vpop.trf.xlu0 }
  0xc2   :  { %v149_v31 = vpack.c.bf16 %v100_v30, %v99_v28  ;;  %v137_v32 = vpop.trf.xlu1 }
  0xc3   :  { %v157_v33 = vpack.c.bf16 %v137_v32, %v136_v29 }
  0xc4   :  { %9941 = vmatmul.mubr.msk.bf16.gmra.mxu0 %vm185_vm0, %v149_v31 }
  0xc5   :  { %v101_v34 = vpop.trf.xlu0  ;;  %9957 = vmatmul.mubr.msk.bf16.gmra.mxu1 %vm185_vm0, %v157_v33 }
  0xc6   :  { %v138_v35 = vpop.trf.xlu1 }
  0xc9   :  { %v102_v36 = vpop.trf.xlu0 }
  0xca   :  { %v150_v37 = vpack.c.bf16 %v102_v36, %v101_v34  ;;  %v139_v38 = vpop.trf.xlu1 }
  0xcb   :  { %v158_v39 = vpack.c.bf16 %v139_v38, %v138_v35 }
  0xcc   :  { %9944 = vmatprep.mubr.msk.bf16.mxu0 %vm185_vm0, %v150_v37 }
  0xcd   :  { %v103_v40 = vpop.trf.xlu0  ;;  %9960 = vmatprep.mubr.msk.bf16.mxu1 %vm185_vm0, %v158_v39 }
  0xce   :  { %v140_v41 = vpop.trf.xlu1 }
  0xd1   :  { %v104_v42 = vpop.trf.xlu0 }
  0xd2   :  { %v151_v43 = vpack.c.bf16 %v104_v42, %v103_v40  ;;  %v141_v44 = vpop.trf.xlu1 }
  0xd3   :  { %v159_v45 = vpack.c.bf16 %v141_v44, %v140_v41 }
  0xd4   :  { %9945 = vmatmul.mubr.msk.bf16.gmra.mxu0 %vm185_vm0, %v151_v43 }
  0xd5   :  { %v105_v46 = vpop.trf.xlu0  ;;  %9961 = vmatmul.mubr.msk.bf16.gmra.mxu1 %vm185_vm0, %v159_v45 }
  0xd6   :  { %v142_v47 = vpop.trf.xlu1 }
  0xd9   :  { %v106_v48 = vpop.trf.xlu0 }
  0xda   :  { %v152_v49 = vpack.c.bf16 %v106_v48, %v105_v46  ;;  %v143_v50 = vpop.trf.xlu1 }
  0xdb   :  { %v160_v51 = vpack.c.bf16 %v143_v50, %v142_v47 }
  0xdc   :  { %9948 = vmatprep.mubr.msk.bf16.mxu0 %vm185_vm0, %v152_v49 }
  0xdd   :  { %v107_v52 = vpop.trf.xlu0  ;;  %9964 = vmatprep.mubr.msk.bf16.mxu1 %vm185_vm0, %v160_v51 }
  0xde   :  { %v144_v53 = vpop.trf.xlu1 }
  0xe1   :  { %v108_v54 = vpop.trf.xlu0 }
  0xe2   :  { %v153_v55 = vpack.c.bf16 %v108_v54, %v107_v52  ;;  %v145_v56 = vpop.trf.xlu1 }
  0xe3   :  { %v161_v57 = vpack.c.bf16 %v145_v56, %v144_v53 }
  0xe4   :  { %9949 = vmatmul.mubr.msk.bf16.gmra.mxu0 %vm185_vm0, %v153_v55 }
  0xe5   :  { %9965 = vmatmul.mubr.msk.bf16.gmra.mxu1 %vm185_vm0, %v161_v57  ;;  %10018 = vmatprep.mubr.msk.bf16.mxu0 %vm11650_vm1, %v15418_v58 }
  0xe6   :  { %9970 = vmatprep.mubr.msk.bf16.mxu1 %vm11650_vm1, %v15418_v58 }
 0x174   :  { %v9938_v59 = vpop.f32.mrf.mxu0 }
 0x175   :  { %v277_v63 = vadd.f32 %v9938_v59, %v11750_v60  ;;  %v9954_v2 = vpop.f32.mrf.mxu1 }
 0x176   :  { %v268_v61 = vpop.f32.mrf.mxu0  ;;  %v341_v44 = vadd.f32 %v9954_v2, %v11750_v60 }
 0x177   :  { %v269_v3 = vadd.f32 %v11750_v60, %v268_v61  ;;  %v332_v7 = vpop.f32.mrf.mxu1 }
 0x178   :  { %v9939_v62 = vpop.f32.mrf.mxu0  ;;  %v333_v50 = vadd.f32 %v11750_v60, %v332_v7 }
 0x179   :  { %v280_v0 = vadd.f32 %v9939_v62, %v11750_v60  ;;  %v9955_v8 = vpop.f32.mrf.mxu1 }
 0x17a   :  { %v271_v1 = vpop.f32.mrf.mxu0  ;;  %v344_v46 = vadd.f32 %v9955_v8, %v11750_v60 }
 0x17b   :  { %v11755_v4 = vpack.c.bf16 %v280_v0, %v277_v63  ;;  %v272_v5 = vadd.f32 %v11750_v60, %v271_v1  ;;  %v335_v11 = vpop.f32.mrf.mxu1 }
 0x17c   :  { %v336_v51 = vadd.f32 %v11750_v60, %v335_v11  ;;  %v11802_v54 = vpack.c.bf16 %v344_v46, %v341_v44 }
 0x17d   :  { %v11758_v6 = vpack.c.bf16 %v272_v5, %v269_v3  ;;  %463 = vrot.lane.b32.xlu1 %v11755_v4, %s11651_s23 }
 0x17e   :  { %v11808_v57 = vpack.c.bf16 %v336_v51, %v333_v50 }
 0x17f   :  { %412 = vrot.lane.b32.xlu0 %v11758_v6, %s11651_s23 }
 0x184   :  { %v9942_v9 = vpop.f32.mrf.mxu0 }
 0x185   :  { %v9958_v13 = vpop.f32.mrf.mxu1  ;;  %v293_v20 = vadd.f32 %v9942_v9, %v11750_v60 }
 0x186   :  { %v284_v10 = vpop.f32.mrf.mxu0  ;;  %v357_v55 = vadd.f32 %v9958_v13, %v11750_v60 }
 0x187   :  { %v285_v15 = vadd.f32 %v11750_v60, %v284_v10  ;;  %v348_v17 = vpop.f32.mrf.mxu1 }
 0x188   :  { %v9943_v12 = vpop.f32.mrf.mxu0  ;;  %v349_v61 = vadd.f32 %v11750_v60, %v348_v17 }
 0x189   :  { %v296_v18 = vadd.f32 %v9943_v12, %v11750_v60  ;;  %v9959_v21 = vpop.f32.mrf.mxu1 }
 0x18a   :  { %v287_v14 = vpop.f32.mrf.mxu0  ;;  %v360_v56 = vadd.f32 %v9959_v21, %v11750_v60 }
 0x18b   :  { %v288_v16 = vadd.f32 %v11750_v60, %v287_v14  ;;  %v11772_v22 = vpack.c.bf16 %v296_v18, %v293_v20  ;;  %v351_v24 = vpop.f32.mrf.mxu1 }
 0x18c   :  { %v352_v62 = vadd.f32 %v11750_v60, %v351_v24  ;;  %v11816_v1 = vpack.c.bf16 %v360_v56, %v357_v55 }
 0x18d   :  { %v11767_v19 = vpack.c.bf16 %v288_v16, %v285_v15 }
 0x18e   :  { %v11822_v7 = vpack.c.bf16 %v352_v62, %v349_v61 }
 0x18f   :  { %513 = vrot.lane.b32.xlu1 %v11767_v19, %s11651_s23 }
 0x193   :  { %563 = vrot.lane.b32.xlu1 %v11772_v22, %s11651_s23 }
 0x194   :  { %v9946_v23 = vpop.f32.mrf.mxu0 }
 0x195   :  { %v9962_v27 = vpop.f32.mrf.mxu1  ;;  %v309_v28 = vadd.f32 %v9946_v23, %v11750_v60 }
 0x196   :  { %v300_v25 = vpop.f32.mrf.mxu0  ;;  %v373_v63 = vadd.f32 %v9962_v27, %v11750_v60 }
 0x197   :  { %v301_v31 = vadd.f32 %v11750_v60, %v300_v25  ;;  %v364_v34 = vpop.f32.mrf.mxu1 }
 0x198   :  { %v9947_v26 = vpop.f32.mrf.mxu0  ;;  %v365_v2 = vadd.f32 %v11750_v60, %v364_v34 }
 0x199   :  { %v312_v29 = vadd.f32 %v9947_v26, %v11750_v60  ;;  %v9963_v36 = vpop.f32.mrf.mxu1 }
 0x19a   :  { %v303_v30 = vpop.f32.mrf.mxu0  ;;  %v376_v0 = vadd.f32 %v9963_v36, %v11750_v60 }
 0x19b   :  { %v11779_v32 = vpack.c.bf16 %v312_v29, %v309_v28  ;;  %v304_v33 = vadd.f32 %v11750_v60, %v303_v30  ;;  %v367_v38 = vpop.f32.mrf.mxu1 }
 0x19c   :  { %v368_v3 = vadd.f32 %v11750_v60, %v367_v38  ;;  %v11824_v8 = vpack.c.bf16 %v376_v0, %v373_v63 }
 0x19d   :  { %v11782_v35 = vpack.c.bf16 %v304_v33, %v301_v31  ;;  %663 = vrot.lane.b32.xlu0 %v11779_v32, %s11651_s23 }
 0x19e   :  { %v11830_v11 = vpack.c.bf16 %v368_v3, %v365_v2 }
 0x19f   :  { %613 = vrot.lane.b32.xlu1 %v11782_v35, %s11651_s23 }
 0x1a4   :  { %v9950_v37 = vpop.f32.mrf.mxu0 }
 0x1a5   :  { %v9966_v41 = vpop.f32.mrf.mxu1  ;;  %v325_v42 = vadd.f32 %v9950_v37, %v11750_v60 }
 0x1a6   :  { %v316_v39 = vpop.f32.mrf.mxu0  ;;  %v389_v9 = vadd.f32 %v9966_v41, %v11750_v60 }
 0x1a7   :  { %v317_v47 = vadd.f32 %v11750_v60, %v316_v39  ;;  %v380_v52 = vpop.f32.mrf.mxu1 }
 0x1a8   :  { %v9951_v40 = vpop.f32.mrf.mxu0  ;;  %v381_v12 = vadd.f32 %v11750_v60, %v380_v52 }
 0x1a9   :  { %v328_v43 = vadd.f32 %v9951_v40, %v11750_v60  ;;  %v9967_v59 = vpop.f32.mrf.mxu1 }
 0x1aa   :  { %v319_v45 = vpop.f32.mrf.mxu0  ;;  %v392_v10 = vadd.f32 %v9967_v59, %v11750_v60 }
 0x1ab   :  { %v11793_v48 = vpack.c.bf16 %v328_v43, %v325_v42  ;;  %v320_v49 = vadd.f32 %v11750_v60, %v319_v45  ;;  %v383_v5 = vpop.f32.mrf.mxu1 }
 0x1ac   :  { %v384_v13 = vadd.f32 %v11750_v60, %v383_v5  ;;  %v11836_v14 = vpack.c.bf16 %v392_v10, %v389_v9 }
 0x1ad   :  { %v11798_v53 = vpack.c.bf16 %v320_v49, %v317_v47  ;;  %763 = vrot.lane.b32.xlu0 %v11793_v48, %s11651_s23 }
 0x1ae   :  { %v11840_v15 = vpack.c.bf16 %v384_v13, %v381_v12 }
 0x1af   :  { %713 = vrot.lane.b32.xlu1 %v11798_v53, %s11651_s23 }
 0x1b0   :  { %15471 = vst [vmem:[#allocation13_spill] sm:$0xff] %v11840_v15 }
 0x1b1   :  { %863 = vrot.lane.b32.xlu0 %v11802_v54, %s11651_s23 }
 0x1b3   :  { %813 = vrot.lane.b32.xlu1 %v11808_v57, %s11651_s23 }
 0x1b5   :  { %963 = vrot.lane.b32.xlu0 %v11816_v1, %s11651_s23 }
 0x1b7   :  { %913 = vrot.lane.b32.xlu1 %v11822_v7, %s11651_s23 }
 0x1b9   :  { %1063 = vrot.lane.b32.xlu0 %v11824_v8, %s11651_s23 }
 0x1bb   :  { %1013 = vrot.lane.b32.xlu1 %v11830_v11, %s11651_s23 }
 0x1bd   :  { %1163 = vrot.lane.b32.xlu0 %v11836_v14, %s11651_s23 }
 0x1bf   :  { %1113 = vrot.lane.b32.xlu1 %v11840_v15, %s11651_s23 }
 0x1c1   :  { %1613 = vrot.lane.b32.xlu0 %v11758_v6, %s11643_s30 }
 0x1c3   :  { %1660 = vrot.lane.b32.xlu1 %v11755_v4, %s11643_s30 }
 0x1c5   :  { %1707 = vrot.lane.b32.xlu0 %v11767_v19, %s11643_s30 }
 0x1c7   :  { %1754 = vrot.lane.b32.xlu1 %v11772_v22, %s11643_s30 }
 0x1c9   :  { %1801 = vrot.lane.b32.xlu0 %v11782_v35, %s11643_s30 }
 0x1cb   :  { %1848 = vrot.lane.b32.xlu1 %v11779_v32, %s11643_s30 }
 0x1cd   :  { %1989 = vrot.lane.b32.xlu0 %v11808_v57, %s11643_s30 }
 0x1cf   :  { %1942 = vrot.lane.b32.xlu1 %v11793_v48, %s11643_s30 }
 0x1d1   :  { %2130 = vrot.lane.b32.xlu0 %v11816_v1, %s11643_s30 }
 0x1d3   :  { %2036 = vrot.lane.b32.xlu1 %v11802_v54, %s11643_s30 }
 0x1d5   :  { %2224 = vrot.lane.b32.xlu0 %v11824_v8, %s11643_s30 }
 0x1d7   :  { %2083 = vrot.lane.b32.xlu1 %v11822_v7, %s11643_s30 }
 0x1d9   :  { %1895 = vrot.lane.b32.xlu0 %v11798_v53, %s11643_s30 }
 0x1db   :  { %2177 = vrot.lane.b32.xlu1 %v11830_v11, %s11643_s30 }
 0x1df   :  { %2271 = vrot.lane.b32.xlu1 %v11840_v15, %s11643_s30 }
 0x1ef   :  { %v464_v17 = vpop.permute.xlu1 %463 }
 0x1f0   :  { %v469_v18 = vsel %vm414_vm2, %v464_v17, 0 }
 0x1f1   :  { %v413_v60 = vpop.permute.xlu0 %412 }
 0x1f2   :  { %v419_v16 = vsel %vm414_vm2, %v413_v60, 0 }
 0x1f3   :  { %9969 = vmatpush3.bf16.xpose.msra.mxu1 %v419_v16 }
 0x1f4   :  { %9974 = vmatprep.subr.bf16.mxu1 %v15418_v58 }
 0x1fa   :  { %9971 = vmatmul.mubr.msk.bf16.vlgmr.msra.gmra.mxu1 %vm414_vm2, %v11758_v6 }
 0x1fb   :  { %9975 = vmatpush3.bf16.xpose.msra.mxu1 %v469_v18  ;;  %9976 = vmatprep.mubr.msk.bf16.mxu1 %vm11650_vm1, %v15418_v58 }
 0x1fc   :  { %9980 = vmatprep.subr.bf16.mxu1 %v15418_v58 }
 0x201   :  { %v514_v20 = vpop.permute.xlu1 %513 }
 0x202   :  { %v519_v21 = vsel %vm414_vm2, %v514_v20, 0  ;;  %9977 = vmatmul.mubr.msk.bf16.vlgmr.msra.gmra.mxu1 %vm414_vm2, %v11755_v4 }
 0x203   :  { %9981 = vmatpush3.bf16.xpose.msra.mxu1 %v519_v21  ;;  %9982 = vmatprep.mubr.msk.bf16.mxu1 %vm11650_vm1, %v15418_v58 }
 0x204   :  { %9986 = vmatprep.subr.bf16.mxu1 %v15418_v58 }
 0x205   :  { %v564_v23 = vpop.permute.xlu1 %563 }
 0x206   :  { %v569_v24 = vsel %vm414_vm2, %v564_v23, 0 }
 0x20a   :  { %9983 = vmatmul.mubr.msk.bf16.vlgmr.msra.gmra.mxu1 %vm414_vm2, %v11767_v19 }
 0x20b   :  { %9987 = vmatpush3.bf16.xpose.msra.mxu1 %v569_v24  ;;  %9988 = vmatprep.mubr.msk.bf16.mxu1 %vm11650_vm1, %v15418_v58 }
 0x20c   :  { %9992 = vmatprep.subr.bf16.mxu1 %v15418_v58 }
 0x20f   :  { %v664_v27 = vpop.permute.xlu0 %663 }
 0x210   :  { %v669_v28 = vsel %vm414_vm2, %v664_v27, 0 }
 0x211   :  { %v614_v25 = vpop.permute.xlu1 %613 }
 0x212   :  { %v619_v26 = vsel %vm414_vm2, %v614_v25, 0  ;;  %9989 = vmatmul.mubr.msk.bf16.vlgmr.msra.gmra.mxu1 %vm414_vm2, %v11772_v22 }
 0x213   :  { %9993 = vmatpush3.bf16.xpose.msra.mxu1 %v619_v26  ;;  %9994 = vmatprep.mubr.msk.bf16.mxu1 %vm11650_vm1, %v15418_v58 }
 0x214   :  { %9998 = vmatprep.subr.bf16.mxu1 %v15418_v58 }
 0x21a   :  { %9995 = vmatmul.mubr.msk.bf16.vlgmr.msra.gmra.mxu1 %vm414_vm2, %v11782_v35 }
 0x21b   :  { %9999 = vmatpush3.bf16.xpose.msra.mxu1 %v669_v28  ;;  %10000 = vmatprep.mubr.msk.bf16.mxu1 %vm11650_vm1, %v15418_v58 }
 0x21c   :  { %10004 = vmatprep.subr.bf16.mxu1 %v15418_v58 }
 0x21f   :  { %v764_v34 = vpop.permute.xlu0 %763 }
 0x220   :  { %v769_v36 = vsel %vm414_vm2, %v764_v34, 0 }
 0x221   :  { %v714_v29 = vpop.permute.xlu1 %713 }
 0x222   :  { %v719_v30 = vsel %vm414_vm2, %v714_v29, 0  ;;  %10001 = vmatmul.mubr.msk.bf16.vlgmr.msra.gmra.mxu1 %vm414_vm2, %v11779_v32 }
 0x223   :  { %10005 = vmatpush3.bf16.xpose.msra.mxu1 %v719_v30  ;;  %10006 = vmatprep.mubr.msk.bf16.mxu1 %vm11650_vm1, %v15418_v58  ;;  %v864_v38 = vpop.permute.xlu0 %863 }
 0x224   :  { %10010 = vmatprep.subr.bf16.mxu1 %v15418_v58  ;;  %v869_v40 = vsel %vm414_vm2, %v864_v38, 0 }
 0x225   :  { %v814_v31 = vpop.permute.xlu1 %813 }
 0x226   :  { %v819_v33 = vsel %vm414_vm2, %v814_v31, 0 }
 0x227   :  { %10017 = vmatpush3.bf16.xpose.msra.mxu0 %v819_v33  ;;  %v964_v41 = vpop.permute.xlu0 %963 }
 0x228   :  { %10028 = vmatprep.subr.bf16.mxu0 %v15418_v58  ;;  %v969_v44 = vsel %vm414_vm2, %v964_v41, 0 }
 0x229   :  { %v914_v37 = vpop.permute.xlu1 %913 }
 0x22a   :  { %10007 = vmatmul.mubr.msk.bf16.vlgmr.msra.gmra.mxu1 %vm414_vm2, %v11798_v53  ;;  %v919_v39 = vsel %vm414_vm2, %v914_v37, 0 }
 0x22b   :  { %10011 = vmatpush3.bf16.xpose.msra.mxu1 %v769_v36  ;;  %10012 = vmatprep.mubr.msk.bf16.mxu1 %vm11650_vm1, %v15418_v58  ;;  %v1064_v45 = vpop.permute.xlu0 %1063 }
 0x22c   :  { %10022 = vmatprep.subr.bf16.mxu1 %v15418_v58  ;;  %v1069_v50 = vsel %vm414_vm2, %v1064_v45, 0 }
 0x22d   :  { %v1014_v42 = vpop.permute.xlu1 %1013 }
 0x22e   :  { %10019 = vmatmul.mubr.msk.bf16.vlgmr.msra.gmra.mxu0 %vm414_vm2, %v11808_v57  ;;  %v1019_v43 = vsel %vm414_vm2, %v1014_v42, 0 }
 0x22f   :  { %10029 = vmatpush3.bf16.xpose.msra.mxu0 %v919_v39  ;;  %10030 = vmatprep.mubr.msk.bf16.mxu0 %vm11650_vm1, %v15418_v58  ;;  %v1164_v49 = vpop.permute.xlu0 %1163 }
 0x230   :  { %10040 = vmatprep.subr.bf16.mxu0 %v15418_v58  ;;  %v1169_v52 = vsel %vm414_vm2, %v1164_v49, 0 }
 0x231   :  { %v1114_v46 = vpop.permute.xlu1 %1113 }
 0x232   :  { %10013 = vmatmul.mubr.msk.bf16.vlgmr.msra.gmra.mxu1 %vm414_vm2, %v11793_v48  ;;  %v1119_v47 = vsel %vm414_vm2, %v1114_v46, 0 }
 0x233   :  { %10023 = vmatpush3.bf16.xpose.msra.mxu1 %v869_v40  ;;  %10024 = vmatprep.mubr.msk.bf16.mxu1 %vm11650_vm1, %v15418_v58  ;;  %v1614_v51 = vpop.permute.xlu0 %1613 }
 0x234   :  { %10034 = vmatprep.subr.bf16.mxu1 %v15418_v58 }
 0x235   :  { %v1661_v55 = vpop.permute.xlu1 %1660 }
 0x236   :  { %10031 = vmatmul.mubr.msk.bf16.vlgmr.msra.gmra.mxu0 %vm414_vm2, %v11822_v7 }
 0x237   :  { %10041 = vmatpush3.bf16.xpose.msra.mxu0 %v1019_v43  ;;  %10042 = vmatprep.mubr.msk.bf16.mxu0 %vm11650_vm1, %v15418_v58 }
 0x238   :  { %10052 = vmatprep.subr.bf16.mxu0 %v15418_v58 }
 0x23a   :  { %10025 = vmatmul.mubr.msk.bf16.vlgmr.msra.gmra.mxu1 %vm414_vm2, %v11802_v54 }
 0x23b   :  { %10035 = vmatpush3.bf16.xpose.msra.mxu1 %v969_v44  ;;  %10036 = vmatprep.mubr.msk.bf16.mxu1 %vm11650_vm1, %v15418_v58 }
 0x23c   :  { %10046 = vmatprep.subr.bf16.mxu1 %v15418_v58 }
 0x23e   :  { %10043 = vmatmul.mubr.msk.bf16.vlgmr.msra.gmra.mxu0 %vm414_vm2, %v11830_v11 }
 0x23f   :  { %10053 = vmatpush3.bf16.xpose.msra.mxu0 %v1119_v47  ;;  %10054 = vmatprep.mubr.msk.bf16.mxu0 %vm11650_vm1, %v15418_v58 }
 0x240   :  { %10064 = vmatprep.subr.bf16.mxu0 %v15418_v58 }
 0x242   :  { %10037 = vmatmul.mubr.msk.bf16.vlgmr.msra.gmra.mxu1 %vm414_vm2, %v11816_v1 }
 0x243   :  { %10047 = vmatpush3.bf16.xpose.msra.mxu1 %v1069_v50  ;;  %10048 = vmatprep.mubr.msk.bf16.mxu1 %vm11650_vm1, %v15418_v58 }
 0x244   :  { %10058 = vmatprep.subr.bf16.mxu1 %v15418_v58 }
 0x246   :  { %10055 = vmatmul.mubr.msk.bf16.vlgmr.msra.gmra.mxu0 %vm414_vm2, %v11840_v15 }
 0x247   :  { %10065 = vmatpush3.bf16.msra.mxu0 %v1614_v51  ;;  %10066 = vmatprep.mubr.msk.bf16.mxu0 %vm11650_vm1, %v15418_v58 }
 0x248   :  { %10076 = vmatprep.subr.bf16.mxu0 %v15418_v58 }
 0x24a   :  { %10049 = vmatmul.mubr.msk.bf16.vlgmr.msra.gmra.mxu1 %vm414_vm2, %v11824_v8 }
 0x24b   :  { %10059 = vmatpush3.bf16.xpose.msra.mxu1 %v1169_v52  ;;  %10060 = vmatprep.mubr.msk.bf16.mxu1 %vm11650_vm1, %v15418_v58 }
 0x24c   :  { %10070 = vmatprep.subr.bf16.mxu1 %v15418_v58 }
 0x252   :  { %10061 = vmatmul.mubr.msk.bf16.vlgmr.msra.gmra.mxu1 %vm414_vm2, %v11836_v14 }
 0x253   :  { %10071 = vmatpush3.bf16.msra.mxu1 %v1661_v55  ;;  %10072 = vmatprep.mubr.msk.bf16.mxu1 %vm11650_vm1, %v15418_v58 }
 0x254   :  { %10082 = vmatprep.subr.bf16.mxu1 %v15418_v58 }
 0x2ba   :  { %v11976_v56 = vpop.f32.mrf.mxu1 }
 0x2bb   :  { %v1213_v59 = vsel %vm1212_vm3, %v11976_v56, -inf }
 0x2bc   :  { %1214 = vmax.xlane.f32.xlu1 %v1213_v59  ;;  %v9972_v61 = vpop.f32.mrf.mxu1 }
 0x2be   :  { %v11980_v62 = vpop.f32.mrf.mxu1 }
 0x2bf   :  { %v1216_v41 = vsel %vm1212_vm3, %v11980_v62, -inf }
 0x2c0   :  { %v9973_v63 = vpop.f32.mrf.mxu1 }
 0x2c2   :  { %v11982_v0 = vpop.f32.mrf.mxu1 }
 0x2c3   :  { %v1219_v46 = vsel %vm1212_vm3, %v11982_v0, -inf }
 0x2c4   :  { %v9978_v2 = vpop.f32.mrf.mxu1 }
 0x2c6   :  { %v11984_v3 = vpop.f32.mrf.mxu1 }
 0x2c7   :  { %v1222_v47 = vsel %vm1212_vm3, %v11984_v3, -inf }
 0x2c8   :  { %v9979_v5 = vpop.f32.mrf.mxu1 }
 0x2ca   :  { %v11986_v9 = vpop.f32.mrf.mxu1 }
 0x2cb   :  { %v1225_v55 = vsel %vm1212_vm3, %v11986_v9, -inf }
 0x2cc   :  { %v9984_v10 = vpop.f32.mrf.mxu1 }
 0x2ce   :  { %v11988_v12 = vpop.f32.mrf.mxu1 }
 0x2cf   :  { %v1228_v59 = vsel %vm1212_vm3, %v11988_v12, -inf }
 0x2d0   :  { %v9985_v13 = vpop.f32.mrf.mxu1 }
 0x2d2   :  { %v11990_v60 = vpop.f32.mrf.mxu1 }
 0x2d4   :  { %v9990_v16 = vpop.f32.mrf.mxu1 }
 0x2d6   :  { %v11992_v17 = vpop.f32.mrf.mxu1 }
 0x2d8   :  { %v9991_v18 = vpop.f32.mrf.mxu1 }
 0x2da   :  { %v11994_v20 = vpop.f32.mrf.mxu1 }
 0x2dc   :  { %v9996_v21 = vpop.f32.mrf.mxu1 }
 0x2de   :  { %v11996_v23 = vpop.f32.mrf.mxu1 }
 0x2e0   :  { %v9997_v24 = vpop.f32.mrf.mxu1 }
 0x2e2   :  { %v11998_v25 = vpop.f32.mrf.mxu1 }
 0x2e4   :  { %v10002_v26 = vpop.f32.mrf.mxu1 }
 0x2e5   :  { %v1231_v26 = vsel %vm1212_vm3, %v11990_v60, -inf }
 0x2e6   :  { %v12000_v27 = vpop.f32.mrf.mxu1 }
 0x2e8   :  { %v10003_v28 = vpop.f32.mrf.mxu1 }
 0x2e9   :  { %v1234_v28 = vsel %vm1212_vm3, %v11992_v17, -inf }
 0x2ea   :  { %v12002_v29 = vpop.f32.mrf.mxu1 }
 0x2ec   :  { %v10008_v30 = vpop.f32.mrf.mxu1 }
 0x2ee   :  { %v12004_v31 = vpop.f32.mrf.mxu1  ;;  %v12006_v33 = vpop.f32.mrf.mxu0 }
 0x2ef   :  { %v1261_v34 = vsel %vm1212_vm3, %v12006_v33, -inf }
 0x2f0   :  { %1262 = vmax.xlane.f32.xlu0 %v1261_v34  ;;  %v10009_v36 = vpop.f32.mrf.mxu1  ;;  %v10020_v37 = vpop.f32.mrf.mxu0 }
 0x2f2   :  { %v12010_v38 = vpop.f32.mrf.mxu1  ;;  %v12012_v39 = vpop.f32.mrf.mxu0 }
 0x2f3   :  { %v1264_v40 = vsel %vm1212_vm3, %v12012_v39, -inf }
 0x2f4   :  { %v10021_v42 = vpop.f32.mrf.mxu0  ;;  %1265 = vmax.xlane.f32.xlu1 %v1264_v40  ;;  %1217 = vmax.xlane.f32.xlu0 %v1216_v41  ;;  %v10014_v43 = vpop.f32.mrf.mxu1  ;;  %v1237_v40 = vsel %vm1212_vm3, %v11994_v20, -inf  ;;  %v1240_v41 = vsel %vm1212_vm3, %v11996_v23, -inf }
 0x2f6   :  { %v12018_v44 = vpop.f32.mrf.mxu1  ;;  %v12020_v45 = vpop.f32.mrf.mxu0 }
 0x2f7   :  { %v1273_v10 = vsel %vm1212_vm3, %v12020_v45, -inf }
 0x2f8   :  { %v10032_v49 = vpop.f32.mrf.mxu0  ;;  %1220 = vmax.xlane.f32.xlu0 %v1219_v46  ;;  %1223 = vmax.xlane.f32.xlu1 %v1222_v47  ;;  %v10015_v50 = vpop.f32.mrf.mxu1 }
 0x2fa   :  { %v12026_v51 = vpop.f32.mrf.mxu1  ;;  %v12028_v52 = vpop.f32.mrf.mxu0 }
 0x2fb   :  { %v1276_v13 = vsel %vm1212_vm3, %v12028_v52, -inf }
 0x2fc   :  { %v10033_v61 = vpop.f32.mrf.mxu0  ;;  %1226 = vmax.xlane.f32.xlu0 %v1225_v55  ;;  %1229 = vmax.xlane.f32.xlu1 %v1228_v59  ;;  %v10026_v63 = vpop.f32.mrf.mxu1 }
 0x2fd   :  { %v1243_v63 = vsel %vm1212_vm3, %v11998_v25, -inf }
 0x2fe   :  { %v12034_v2 = vpop.f32.mrf.mxu1  ;;  %v12036_v5 = vpop.f32.mrf.mxu0 }
 0x2ff   :  { %v1285_v49 = vsel %vm1212_vm3, %v12036_v5, -inf }
 0x300   :  { %v10044_v16 = vpop.f32.mrf.mxu0  ;;  %1274 = vmax.xlane.f32.xlu0 %v1273_v10  ;;  %1277 = vmax.xlane.f32.xlu1 %v1276_v13  ;;  %v10027_v18 = vpop.f32.mrf.mxu1  ;;  %v1246_v10 = vsel %vm1212_vm3, %v12000_v27, -inf }
 0x301   :  { %v1249_v18 = vsel %vm1212_vm3, %v12002_v29, -inf }
 0x302   :  { %v12042_v21 = vpop.f32.mrf.mxu1  ;;  %v12044_v24 = vpop.f32.mrf.mxu0 }
 0x303   :  { %v1288_v50 = vsel %vm1212_vm3, %v12044_v24, -inf }
 0x304   :  { %v10045_v30 = vpop.f32.mrf.mxu0  ;;  %1232 = vmax.xlane.f32.xlu0 %v1231_v26  ;;  %1235 = vmax.xlane.f32.xlu1 %v1234_v28  ;;  %v10038_v34 = vpop.f32.mrf.mxu1  ;;  %v1252_v26 = vsel %vm1212_vm3, %v12004_v31, -inf }
 0x306   :  { %v12050_v36 = vpop.f32.mrf.mxu1  ;;  %v12052_v37 = vpop.f32.mrf.mxu0 }
 0x307   :  { %v1297_v34 = vsel %vm1212_vm3, %v12052_v37, -inf }
 0x308   :  { %v10056_v42 = vpop.f32.mrf.mxu0  ;;  %1238 = vmax.xlane.f32.xlu0 %v1237_v40  ;;  %1241 = vmax.xlane.f32.xlu1 %v1240_v41  ;;  %v10039_v43 = vpop.f32.mrf.mxu1 }
 0x309   :  { %v1255_v42 = vsel %vm1212_vm3, %v12010_v38, -inf  ;;  %v1258_v43 = vsel %vm1212_vm3, %v12018_v44, -inf }
 0x30a   :  { %v12058_v46 = vpop.f32.mrf.mxu1  ;;  %v12060_v47 = vpop.f32.mrf.mxu0 }
 0x30b   :  { %v1300_v40 = vsel %vm1212_vm3, %v12060_v47, -inf }
 0x30c   :  { %v10057_v55 = vpop.f32.mrf.mxu0  ;;  %1286 = vmax.xlane.f32.xlu0 %v1285_v49  ;;  %1289 = vmax.xlane.f32.xlu1 %v1288_v50  ;;  %v10050_v59 = vpop.f32.mrf.mxu1  ;;  %v1267_v50 = vsel %vm1212_vm3, %v12026_v51, -inf }
 0x30d   :  { %v12088_v49 = vpop.permute.xlu1 %1754  ;;  %v1270_v55 = vsel %vm1212_vm3, %v12034_v2, -inf }
 0x30e   :  { %v12066_v61 = vpop.f32.mrf.mxu1 }
 0x310   :  { %1244 = vmax.xlane.f32.xlu0 %v1243_v63  ;;  %1247 = vmax.xlane.f32.xlu1 %v1246_v10  ;;  %v10051_v13 = vpop.f32.mrf.mxu1  ;;  %v1279_v63 = vsel %vm1212_vm3, %v12042_v21, -inf  ;;  %v1282_v10 = vsel %vm1212_vm3, %v12050_v36, -inf }
 0x311   :  { %v12094_v59 = vpop.permute.xlu1 %1848  ;;  %v1291_v13 = vsel %vm1212_vm3, %v12058_v46, -inf }
 0x312   :  { %v12072_v16 = vpop.f32.mrf.mxu1  ;;  %15472 = vst [vmem:[#allocation14_spill] sm:$0xff] %v12094_v59 }
 0x314   :  { %1250 = vmax.xlane.f32.xlu0 %v1249_v18  ;;  %1253 = vmax.xlane.f32.xlu1 %v1252_v26  ;;  %v10062_v28 = vpop.f32.mrf.mxu1  ;;  %v1294_v18 = vsel %vm1212_vm3, %v12066_v61, -inf }
 0x315   :  { %v12104_v26 = vpop.permute.xlu1 %1942  ;;  %v1303_v28 = vsel %vm1212_vm3, %v12072_v16, -inf }
 0x316   :  { %v12078_v30 = vpop.f32.mrf.mxu1  ;;  %15473 = vst [vmem:[#allocation15_spill] sm:$0xff] %v12104_v26 }
 0x318   :  { %1298 = vmax.xlane.f32.xlu0 %v1297_v34  ;;  %1301 = vmax.xlane.f32.xlu1 %v1300_v40  ;;  %v10063_v41 = vpop.f32.mrf.mxu1  ;;  %v1306_v34 = vsel %vm1212_vm3, %v12078_v30, -inf }
 0x319   :  { %v12110_v40 = vpop.permute.xlu1 %2036 }
 0x31a   :  { %15474 = vst [vmem:[#allocation16_spill] sm:$0xff] %v12110_v40 }
 0x31c   :  { %1256 = vmax.xlane.f32.xlu0 %v1255_v42  ;;  %1259 = vmax.xlane.f32.xlu1 %v1258_v43 }
 0x31d   :  { %v12112_v41 = vpop.permute.xlu1 %2083 }
 0x31e   :  { %15475 = vst [vmem:[#allocation17_spill] sm:$0xff] %v12112_v41 }
 0x320   :  { %1268 = vmax.xlane.f32.xlu0 %v1267_v50  ;;  %1271 = vmax.xlane.f32.xlu1 %v1270_v55 }
 0x321   :  { %v12114_v42 = vpop.permute.xlu1 %2177 }
 0x322   :  { %15476 = vst [vmem:[#allocation18_spill] sm:$0xff] %v12114_v42 }
 0x324   :  { %1280 = vmax.xlane.f32.xlu0 %v1279_v63  ;;  %1283 = vmax.xlane.f32.xlu1 %v1282_v10 }
 0x325   :  { %v12116_v43 = vpop.permute.xlu1 %2271 }
 0x326   :  { %15477 = vst [vmem:[#allocation19_spill] sm:$0xff] %v12116_v43 }
 0x328   :  { %1292 = vmax.xlane.f32.xlu0 %v1291_v13  ;;  %1295 = vmax.xlane.f32.xlu1 %v1294_v18  ;;  %v12121_v13 = vpop.permute.xlu0 %1707 }
 0x32c   :  { %1304 = vmax.xlane.f32.xlu0 %v1303_v28  ;;  %1307 = vmax.xlane.f32.xlu1 %v1306_v34  ;;  %v12125_v28 = vpop.permute.xlu0 %1801 }
 0x330   :  { %v12127_v34 = vpop.permute.xlu0 %1989 }
 0x331   :  { %15478 = vst [vmem:[#allocation20_spill] sm:$0xff] %v12127_v34 }
 0x334   :  { %v12129_v58 = vpop.permute.xlu0 %2130 }
 0x335   :  { %15479 = vst [vmem:[#allocation21_spill] sm:$0xff] %v12129_v58 }
 0x338   :  { %v12131_v43 = vpop.permute.xlu0 %2224 }
 0x339   :  { %15480 = vst [vmem:[#allocation22_spill] sm:$0xff] %v12131_v43 }
 0x33c   :  { %v12133_v42 = vpop.permute.xlu0 %1895 }
 0x33d   :  { %15481 = vst [vmem:[#allocation23_spill] sm:$0xff] %v12133_v42 }
 0x345   :  { %v1215_v50 = vpop.xlane.xlu1 %1214 }
 0x346   :  { %v1309_v55 = vsub.f32 %v11976_v56, %v1215_v50 }
 0x348   :  { %v1341_v63 = vmul.f32 1.442695, %v1309_v55 }
 0x34a   :  { %11042 = vpow2.f32 %v1341_v63 }
 0x357   :  { %v12119_v10 = vpop.eup %11042 }
 0x358   :  { %v1405_v18 = vsel %vm1212_vm3, %v12119_v10, 0.0 }
 0x359   :  { %1406 = vadd.xlane.f32.xlu0 %v1405_v18 }
 0x379   :  { %v1263_v56 = vpop.xlane.xlu0 %1262 }
 0x37a   :  { %v1325_v50 = vsub.f32 %v12006_v33, %v1263_v56 }
 0x37c   :  { %v1373_v55 = vmul.f32 1.442695, %v1325_v50 }
 0x37d   :  { %v1266_v63 = vpop.xlane.xlu1 %1265  ;;  %v1218_v41 = vpop.xlane.xlu0 %1217 }
 0x37e   :  { %11044 = vpow2.f32 %v1373_v55  ;;  %v1326_v40 = vsub.f32 %v12012_v39, %v1266_v63  ;;  %v1310_v18 = vsub.f32 %v11980_v62, %v1218_v41 }
 0x380   :  { %v1375_v26 = vmul.f32 1.442695, %v1326_v40  ;;  %v1343_v15 = vmul.f32 1.442695, %v1310_v18 }
 0x381   :  { %v1224_v34 = vpop.xlane.xlu1 %1223  ;;  %v1221_v59 = vpop.xlane.xlu0 %1220 }
 0x382   :  { %11046 = vpow2.f32 %v1375_v26  ;;  %v1312_v43 = vsub.f32 %v11984_v3, %v1224_v34  ;;  %v1311_v58 = vsub.f32 %v11982_v0, %v1221_v59 }
 0x383   :  { %11048 = vpow2.f32 %v1343_v15 }
 0x384   :  { %v1347_v42 = vmul.f32 1.442695, %v1312_v43  ;;  %v1345_v33 = vmul.f32 1.442695, %v1311_v58 }
 0x385   :  { %v1230_v56 = vpop.xlane.xlu1 %1229  ;;  %v1227_v50 = vpop.xlane.xlu0 %1226 }
 0x386   :  { %11050 = vpow2.f32 %v1347_v42  ;;  %v1313_v55 = vsub.f32 %v11986_v9, %v1227_v50  ;;  %v1314_v62 = vsub.f32 %v11988_v12, %v1230_v56 }
 0x387   :  { %11052 = vpow2.f32 %v1345_v33 }
 0x388   :  { %v1349_v39 = vmul.f32 1.442695, %v1313_v55  ;;  %v1351_v59 = vmul.f32 1.442695, %v1314_v62 }
 0x389   :  { %v1278_v40 = vpop.xlane.xlu1 %1277  ;;  %v1275_v41 = vpop.xlane.xlu0 %1274 }
 0x38a   :  { %v1330_v26 = vsub.f32 %v12028_v52, %v1278_v40  ;;  %v1329_v3 = vsub.f32 %v12020_v45, %v1275_v41  ;;  %11054 = vpow2.f32 %v1349_v39 }
 0x38b   :  { %v12144_v34 = vpop.eup %11044 }
 0x38c   :  { %v1383_v15 = vmul.f32 1.442695, %v1330_v26  ;;  %v1381_v58 = vmul.f32 1.442695, %v1329_v3  ;;  %v1453_v0 = vsel %vm1212_vm3, %v12144_v34, 0.0 }
 0x38d   :  { %v1236_v9 = vpop.xlane.xlu1 %1235  ;;  %1454 = vadd.xlane.f32.xlu1 %v1453_v0  ;;  %v1233_v42 = vpop.xlane.xlu0 %1232 }
 0x38e   :  { %11056 = vpow2.f32 %v1383_v15  ;;  %v1316_v12 = vsub.f32 %v11992_v17, %v1236_v9  ;;  %v1315_v43 = vsub.f32 %v11990_v60, %v1233_v42 }
 0x38f   :  { %v12150_v52 = vpop.eup %11046  ;;  %11058 = vpow2.f32 %v1381_v58 }
 0x390   :  { %v12152_v45 = vpop.eup %11048  ;;  %v1353_v63 = vmul.f32 1.442695, %v1315_v43  ;;  %v1456_v18 = vsel %vm1212_vm3, %v12150_v52, 0.0  ;;  %11060 = vpow2.f32 %v1351_v59  ;;  %v1355_v33 = vmul.f32 1.442695, %v1316_v12 }
 0x391   :  { %v1242_v56 = vpop.xlane.xlu1 %1241  ;;  %1457 = vadd.xlane.f32.xlu0 %v1456_v18  ;;  %v1408_v50 = vsel %vm1212_vm3, %v12152_v45, 0.0  ;;  %v1239_v55 = vpop.xlane.xlu0 %1238 }
 0x392   :  { %1409 = vadd.xlane.f32.xlu1 %v1408_v50  ;;  %v1317_v60 = vsub.f32 %v11994_v20, %v1239_v55  ;;  %11062 = vpow2.f32 %v1353_v63  ;;  %v1318_v41 = vsub.f32 %v11996_v23, %v1242_v56 }
 0x393   :  { %v12159_v17 = vpop.eup %11050  ;;  %11064 = vpow2.f32 %v1355_v33 }
 0x394   :  { %v12161_v39 = vpop.eup %11052  ;;  %v1357_v62 = vmul.f32 1.442695, %v1317_v60  ;;  %v1414_v40 = vsel %vm1212_vm3, %v12159_v17, 0.0  ;;  %v1359_v42 = vmul.f32 1.442695, %v1318_v41 }
 0x395   :  { %v1290_v26 = vpop.xlane.xlu1 %1289  ;;  %v1411_v3 = vsel %vm1212_vm3, %v12161_v39, 0.0  ;;  %v1287_v15 = vpop.xlane.xlu0 %1286 }
 0x396   :  { %v1334_v58 = vsub.f32 %v12044_v24, %v1290_v26  ;;  %1415 = vadd.xlane.f32.xlu1 %v1414_v40  ;;  %1412 = vadd.xlane.f32.xlu0 %v1411_v3  ;;  %v1333_v20 = vsub.f32 %v12036_v5, %v1287_v15  ;;  %11066 = vpow2.f32 %v1357_v62 }
 0x397   :  { %v12170_v0 = vpop.eup %11054 }
 0x398   :  { %v1391_v59 = vmul.f32 1.442695, %v1334_v58  ;;  %v1389_v9 = vmul.f32 1.442695, %v1333_v20  ;;  %v1417_v23 = vsel %vm1212_vm3, %v12170_v0, 0.0 }
 0x399   :  { %v1248_v12 = vpop.xlane.xlu1 %1247  ;;  %v1245_v43 = vpop.xlane.xlu0 %1244 }
 0x39a   :  { %11068 = vpow2.f32 %v1391_v59  ;;  %v1320_v63 = vsub.f32 %v12000_v27, %v1248_v12  ;;  %1418 = vadd.xlane.f32.xlu0 %v1417_v23  ;;  %v1319_v24 = vsub.f32 %v11998_v25, %v1245_v43 }
 0x39b   :  { %v12176_v18 = vpop.eup %11056  ;;  %11070 = vpow2.f32 %v1389_v9 }
 0x39c   :  { %v12178_v5 = vpop.eup %11058  ;;  %v1361_v33 = vmul.f32 1.442695, %v1319_v24  ;;  %v1468_v56 = vsel %vm1212_vm3, %v12176_v18, 0.0  ;;  %11072 = vpow2.f32 %v1359_v42  ;;  %v1363_v50 = vmul.f32 1.442695, %v1320_v63 }
 0x39d   :  { %v1254_v55 = vpop.xlane.xlu1 %1253  ;;  %v1465_v60 = vsel %vm1212_vm3, %v12178_v5, 0.0  ;;  %v1251_v62 = vpop.xlane.xlu0 %1250 }
 0x39e   :  { %v12184_v27 = vpop.eup %11060  ;;  %1469 = vadd.xlane.f32.xlu0 %v1468_v56  ;;  %1466 = vadd.xlane.f32.xlu1 %v1465_v60  ;;  %v1321_v25 = vsub.f32 %v12002_v29, %v1251_v62  ;;  %11074 = vpow2.f32 %v1361_v33  ;;  %v1322_v26 = vsub.f32 %v12004_v31, %v1254_v55 }
 0x39f   :  { %v12187_v40 = vpop.eup %11062  ;;  %11076 = vpow2.f32 %v1363_v50  ;;  %v1420_v15 = vsel %vm1212_vm3, %v12184_v27, 0.0 }
 0x3a0   :  { %v1365_v41 = vmul.f32 1.442695, %v1321_v25  ;;  %v1423_v58 = vsel %vm1212_vm3, %v12187_v40, 0.0  ;;  %v12194_v59 = vpop.eup %11064  ;;  %v1367_v23 = vmul.f32 1.442695, %v1322_v26 }
 0x3a1   :  { %v1302_v3 = vpop.xlane.xlu1 %1301  ;;  %v1299_v20 = vpop.xlane.xlu0 %1298  ;;  %v1426_v63 = vsel %vm1212_vm3, %v12194_v59, 0.0 }
 0x3a2   :  { %v1338_v9 = vsub.f32 %v12060_v47, %v1302_v3  ;;  %1421 = vadd.xlane.f32.xlu1 %v1420_v15  ;;  %1424 = vadd.xlane.f32.xlu0 %v1423_v58  ;;  %v1337_v29 = vsub.f32 %v12052_v37, %v1299_v20  ;;  %11078 = vpow2.f32 %v1365_v41 }
 0x3a3   :  { %v12198_v42 = vpop.eup %11066 }
 0x3a4   :  { %v1399_v31 = vmul.f32 1.442695, %v1338_v9  ;;  %v1397_v12 = vmul.f32 1.442695, %v1337_v29  ;;  %v1429_v24 = vsel %vm1212_vm3, %v12198_v42, 0.0 }
 0x3a5   :  { %v1260_v43 = vpop.xlane.xlu1 %1259  ;;  %v1257_v33 = vpop.xlane.xlu0 %1256 }
 0x3a6   :  { %11080 = vpow2.f32 %v1399_v31  ;;  %v1324_v47 = vsub.f32 %v12018_v44, %v1260_v43  ;;  %1427 = vadd.xlane.f32.xlu1 %v1426_v63  ;;  %1430 = vadd.xlane.f32.xlu0 %v1429_v24  ;;  %v1323_v37 = vsub.f32 %v12010_v38, %v1257_v33 }
 0x3a7   :  { %v12206_v56 = vpop.eup %11068  ;;  %11082 = vpow2.f32 %v1397_v12 }
 0x3a8   :  { %v12208_v50 = vpop.eup %11070  ;;  %v1369_v55 = vmul.f32 1.442695, %v1323_v37  ;;  %v1480_v60 = vsel %vm1212_vm3, %v12206_v56, 0.0  ;;  %11084 = vpow2.f32 %v1367_v23  ;;  %v1371_v62 = vmul.f32 1.442695, %v1324_v47 }
 0x3a9   :  { %v1272_v25 = vpop.xlane.xlu1 %1271  ;;  %v1477_v41 = vsel %vm1212_vm3, %v12208_v50, 0.0  ;;  %v1269_v44 = vpop.xlane.xlu0 %1268 }
 0x3aa   :  { %v12214_v26 = vpop.eup %11072  ;;  %v1328_v38 = vsub.f32 %v12034_v2, %v1272_v25  ;;  %1481 = vadd.xlane.f32.xlu0 %v1480_v60  ;;  %1478 = vadd.xlane.f32.xlu1 %v1477_v41  ;;  %v1327_v3 = vsub.f32 %v12026_v51, %v1269_v44  ;;  %11086 = vpow2.f32 %v1369_v55 }
 0x3ab   :  { %v12218_v15 = vpop.eup %11074  ;;  %11088 = vpow2.f32 %v1371_v62  ;;  %v1432_v29 = vsel %vm1212_vm3, %v12214_v26, 0.0 }
 0x3ac   :  { %v1377_v58 = vmul.f32 1.442695, %v1327_v3  ;;  %v1379_v20 = vmul.f32 1.442695, %v1328_v38  ;;  %v1435_v31 = vsel %vm1212_vm3, %v12218_v15, 0.0  ;;  %v12224_v23 = vpop.eup %11076 }
 0x3ad   :  { %v1284_v9 = vpop.xlane.xlu1 %1283  ;;  %v1281_v12 = vpop.xlane.xlu0 %1280  ;;  %v1438_v47 = vsel %vm1212_vm3, %v12224_v23, 0.0 }
 0x3ae   :  { %v1332_v2 = vsub.f32 %v12050_v36, %v1284_v9  ;;  %1433 = vadd.xlane.f32.xlu1 %v1432_v29  ;;  %1436 = vadd.xlane.f32.xlu0 %v1435_v31  ;;  %v1331_v51 = vsub.f32 %v12042_v21, %v1281_v12  ;;  %11090 = vpow2.f32 %v1377_v58 }
 0x3af   :  { %v12228_v43 = vpop.eup %11078  ;;  %11092 = vpow2.f32 %v1379_v20 }
 0x3b0   :  { %v1385_v63 = vmul.f32 1.442695, %v1331_v51  ;;  %v1387_v24 = vmul.f32 1.442695, %v1332_v2  ;;  %v1441_v37 = vsel %vm1212_vm3, %v12228_v43, 0.0 }
 0x3b1   :  { %v1296_v33 = vpop.xlane.xlu1 %1295  ;;  %v1293_v55 = vpop.xlane.xlu0 %1292 }
 0x3b2   :  { %v1336_v36 = vsub.f32 %v12066_v61, %v1296_v33  ;;  %1439 = vadd.xlane.f32.xlu1 %v1438_v47  ;;  %1442 = vadd.xlane.f32.xlu0 %v1441_v37  ;;  %v1335_v21 = vsub.f32 %v12058_v46, %v1293_v55  ;;  %11094 = vpow2.f32 %v1385_v63 }
 0x3b3   :  { %v12236_v60 = vpop.eup %11080  ;;  %11096 = vpow2.f32 %v1387_v24 }
 0x3b4   :  { %v12238_v62 = vpop.eup %11082  ;;  %v1393_v25 = vmul.f32 1.442695, %v1335_v21  ;;  %v1492_v41 = vsel %vm1212_vm3, %v12236_v60, 0.0  ;;  %v1395_v44 = vmul.f32 1.442695, %v1336_v36 }
 0x3b5   :  { %v1489_v38 = vsel %vm1212_vm3, %v12238_v62, 0.0  ;;  %v12244_v3 = vpop.eup %11084  ;;  %v1305_v21 = vpop.xlane.xlu0 %1304 }
 0x3b6   :  { %1493 = vadd.xlane.f32.xlu0 %v1492_v41  ;;  %1490 = vadd.xlane.f32.xlu1 %v1489_v38  ;;  %11098 = vpow2.f32 %v1393_v25  ;;  %v1444_v61 = vsel %vm1212_vm3, %v12244_v3, 0.0  ;;  %v1339_v25 = vsub.f32 %v12072_v16, %v1305_v21  ;;  %v1308_v41 = vpop.xlane.xlu1 %1307 }
 0x3b7   :  { %v12246_v46 = vpop.eup %11086  ;;  %11100 = vpow2.f32 %v1395_v44  ;;  %v1340_v44 = vsub.f32 %v12078_v30, %v1308_v41 }
 0x3b8   :  { %v1447_v58 = vsel %vm1212_vm3, %v12246_v46, 0.0  ;;  %v12252_v20 = vpop.eup %11088  ;;  %v1401_v38 = vmul.f32 1.442695, %v1339_v25 }
 0x3b9   :  { %v1450_v29 = vsel %vm1212_vm3, %v12252_v20, 0.0 }
 0x3ba   :  { %1445 = vadd.xlane.f32.xlu1 %v1444_v61  ;;  %1448 = vadd.xlane.f32.xlu0 %v1447_v58  ;;  %v1403_v61 = vmul.f32 1.442695, %v1340_v44  ;;  %11102 = vpow2.f32 %v1401_v38 }
 0x3bb   :  { %v12254_v9 = vpop.eup %11090 }
 0x3bc   :  { %v1459_v31 = vsel %vm1212_vm3, %v12254_v9, 0.0  ;;  %v12260_v12 = vpop.eup %11092  ;;  %11104 = vpow2.f32 %v1403_v61 }
 0x3bd   :  { %v1462_v51 = vsel %vm1212_vm3, %v12260_v12, 0.0 }
 0x3be   :  { %1451 = vadd.xlane.f32.xlu1 %v1450_v29  ;;  %1460 = vadd.xlane.f32.xlu0 %v1459_v31 }
 0x3bf   :  { %v12262_v2 = vpop.eup %11094 }
 0x3c0   :  { %v1471_v63 = vsel %vm1212_vm3, %v12262_v2, 0.0  ;;  %v12268_v24 = vpop.eup %11096 }
 0x3c1   :  { %v1474_v47 = vsel %vm1212_vm3, %v12268_v24, 0.0 }
 0x3c2   :  { %1463 = vadd.xlane.f32.xlu1 %v1462_v51  ;;  %1472 = vadd.xlane.f32.xlu0 %v1471_v63 }
 0x3c3   :  { %v12270_v33 = vpop.eup %11098 }
 0x3c4   :  { %v1483_v37 = vsel %vm1212_vm3, %v12270_v33, 0.0  ;;  %v12276_v55 = vpop.eup %11100 }
 0x3c5   :  { %v1486_v36 = vsel %vm1212_vm3, %v12276_v55, 0.0 }
 0x3c6   :  { %1475 = vadd.xlane.f32.xlu1 %v1474_v47  ;;  %1484 = vadd.xlane.f32.xlu0 %v1483_v37 }
 0x3c7   :  { %v12286_v58 = vpop.eup %11102 }
 0x3c8   :  { %v1495_v29 = vsel %vm1212_vm3, %v12286_v58, 0.0 }
 0x3c9   :  { %v12290_v31 = vpop.eup %11104 }
 0x3ca   :  { %1487 = vadd.xlane.f32.xlu1 %v1486_v36  ;;  %v1498_v51 = vsel %vm1212_vm3, %v12290_v31, 0.0 }
 0x3db   :  { %2367 = vrot.lane.b32.xlu1 %v11758_v6, %s11652_s2 }
 0x3dc   :  { %2318 = vrot.lane.b32.xlu0 %v11836_v14, %s11643_s30  ;;  %s11659_s30 = smov 104  }
 0x3e2   :  { %v1407_v16 = vpop.xlane.xlu0 %1406 }
 0x3e3   :  { %11106 = vrcp.f32 %v1407_v16 }
 0x3f0   :  { %v11107_v25 = vpop.eup %11106 }
 0x3f1   :  { %v1565_v61 = vmul.f32 %v11107_v25, %v12119_v10 }
 0x3fb   :  { %1496 = vadd.xlane.f32.xlu0 %v1495_v29 }
 0x3ff   :  { %1499 = vadd.xlane.f32.xlu1 %v1498_v51 }
 0x410   :  { %2365 = vrot.lane.b32.xlu1 %v11758_v6, %s11653_s24 }
 0x411   :  { %2418 = vrot.lane.b32.xlu0 %v11755_v4, %s11652_s2 }
 0x414   :  { %2416 = vrot.lane.b32.xlu1 %v11755_v4, %s11653_s24 }
 0x415   :  { %2469 = vrot.lane.b32.xlu0 %v11767_v19, %s11652_s2 }
 0x416   :  { %v12302_v30 = vpop.xlane.xlu1 %1454 }
 0x418   :  { %2467 = vrot.lane.b32.xlu1 %v11767_v19, %s11653_s24 }
 0x419   :  { %2520 = vrot.lane.b32.xlu0 %v11772_v22, %s11652_s2 }
 0x41a   :  { %v12308_v63 = vpop.xlane.xlu0 %1457 }
 0x41b   :  { %v1410_v47 = vpop.xlane.xlu1 %1409 }
 0x41c   :  { %11108 = vrcp.f32 %v1410_v47  ;;  %2518 = vrot.lane.b32.xlu1 %v11772_v22, %s11653_s24 }
 0x41d   :  { %2571 = vrot.lane.b32.xlu0 %v11782_v35, %s11652_s2 }
 0x41f   :  { %v1416_v37 = vpop.xlane.xlu1 %1415  ;;  %v1413_v36 = vpop.xlane.xlu0 %1412 }
 0x420   :  { %11110 = vrcp.f32 %v1416_v37  ;;  %2569 = vrot.lane.b32.xlu1 %v11782_v35, %s11653_s24 }
 0x421   :  { %11112 = vrcp.f32 %v1413_v36  ;;  %2622 = vrot.lane.b32.xlu0 %v11779_v32, %s11652_s2 }
 0x423   :  { %v1419_v21 = vpop.xlane.xlu0 %1418 }
 0x424   :  { %2620 = vrot.lane.b32.xlu1 %v11779_v32, %s11653_s24  ;;  %11114 = vrcp.f32 %v1419_v21 }
 0x425   :  { %2673 = vrot.lane.b32.xlu0 %v11798_v53, %s11652_s2 }
 0x427   :  { %v12322_v41 = vpop.xlane.xlu1 %1466  ;;  %v12324_v44 = vpop.xlane.xlu0 %1469 }
 0x428   :  { %2671 = vrot.lane.b32.xlu1 %v11798_v53, %s11653_s24 }
 0x429   :  { %v11109_v38 = vpop.eup %11108  ;;  %2724 = vrot.lane.b32.xlu0 %v11793_v48, %s11652_s2 }
 0x42a   :  { %v1566_v29 = vmul.f32 %v11109_v38, %v12152_v45  ;;  %v15482_v38 = vmov 0.0  }
 0x42b   :  { %v1422_v51 = vpop.xlane.xlu1 %1421  ;;  %v1425_v16 = vpop.xlane.xlu0 %1424 }
 0x42c   :  { %11116 = vrcp.f32 %v1422_v51  ;;  %2722 = vrot.lane.b32.xlu1 %v11793_v48, %s11653_s24  ;;  %v1597_v47 = vpack.c.bf16 %v1566_v29, %v1565_v61 }
 0x42d   :  { %v11111_v37 = vpop.eup %11110  ;;  %2775 = vrot.lane.b32.xlu0 %v11808_v57, %s11652_s2  ;;  %11118 = vrcp.f32 %v1425_v16 }
 0x42e   :  { %v11113_v36 = vpop.eup %11112  ;;  %10067 = vmatmul.mubr.msk.bf16.vlgmr.msra.gmra.mxu0 %vm1212_vm3, %v1597_v47  ;;  %v1568_v21 = vmul.f32 %v11111_v37, %v12159_v17 }
 0x42f   :  { %10077 = vmatpush3.bf16.msra.mxu0 %v12121_v13  ;;  %v1428_v10 = vpop.xlane.xlu1 %1427  ;;  %v1431_v45 = vpop.xlane.xlu0 %1430  ;;  %v1567_v25 = vmul.f32 %v11113_v36, %v12161_v39  ;;  %10078 = vmatprep.mubr.msk.bf16.mxu0 %vm11650_vm1, %v15482_v38 }
 0x430   :  { %11120 = vrcp.f32 %v1428_v10  ;;  %2773 = vrot.lane.b32.xlu1 %v11808_v57, %s11653_s24  ;;  %10088 = vmatprep.subr.bf16.mxu0 %v15482_v38 }
 0x431   :  { %2826 = vrot.lane.b32.xlu0 %v11802_v54, %s11652_s2  ;;  %v1598_v61 = vpack.c.bf16 %v1568_v21, %v1567_v25  ;;  %11122 = vrcp.f32 %v1431_v45  ;;  %v11115_v39 = vpop.eup %11114 }
 0x432   :  { %v1569_v16 = vmul.f32 %v11115_v39, %v12170_v0 }
 0x433   :  { %10073 = vmatmul.mubr.msk.bf16.vlgmr.msra.gmra.mxu1 %vm1212_vm3, %v1598_v61  ;;  %v12348_v13 = vpop.xlane.xlu1 %1478  ;;  %v12350_v17 = vpop.xlane.xlu0 %1481 }
 0x434   :  { %10083 = vmatpush3.bf16.msra.mxu1 %v12088_v49  ;;  %2824 = vrot.lane.b32.xlu1 %v11802_v54, %s11653_s24 }
 0x435   :  { %2877 = vrot.lane.b32.xlu0 %v11822_v7, %s11652_s2  ;;  %10084 = vmatprep.mubr.msk.bf16.mxu1 %vm11650_vm1, %v15482_v38 }
 0x436   :  { %10094 = vmatprep.subr.bf16.mxu1 %v15482_v38 }
 0x437   :  { %v1434_v29 = vpop.xlane.xlu1 %1433  ;;  %v1437_v51 = vpop.xlane.xlu0 %1436 }
 0x438   :  { %11124 = vrcp.f32 %v1434_v29  ;;  %2875 = vrot.lane.b32.xlu1 %v11822_v7, %s11653_s24 }
 0x439   :  { %v11117_v49 = vpop.eup %11116  ;;  %2928 = vrot.lane.b32.xlu0 %v11816_v1, %s11652_s2  ;;  %11126 = vrcp.f32 %v1437_v51 }
 0x43a   :  { %v1570_v47 = vmul.f32 %v11117_v49, %v12184_v27  ;;  %v11119_v37 = vpop.eup %11118  ;;  %v15484_v49 = vld [vmem:[#allocation13_spill] sm:$0xff] }
 0x43b   :  { %v1440_v36 = vpop.xlane.xlu1 %1439  ;;  %v1443_v21 = vpop.xlane.xlu0 %1442  ;;  %v1571_v25 = vmul.f32 %v11119_v37, %v12187_v40  ;;  %v15483_v40 = vld [vmem:[#allocation14_spill] sm:$0xff] }
 0x43c   :  { %11128 = vrcp.f32 %v1440_v36  ;;  %2926 = vrot.lane.b32.xlu1 %v11816_v1, %s11653_s24  ;;  %v1599_v10 = vpack.c.bf16 %v1570_v47, %v1569_v16 }
 0x43d   :  { %v11121_v45 = vpop.eup %11120  ;;  %2979 = vrot.lane.b32.xlu0 %v11830_v11, %s11652_s2  ;;  %11130 = vrcp.f32 %v1443_v21 }
 0x43e   :  { %10079 = vmatmul.mubr.msk.bf16.vlgmr.msra.gmra.mxu0 %vm1212_vm3, %v1599_v10  ;;  %v1572_v0 = vmul.f32 %v11121_v45, %v12194_v59 }
 0x43f   :  { %10089 = vmatpush3.bf16.msra.mxu0 %v12125_v28  ;;  %v12374_v27 = vpop.xlane.xlu1 %1490  ;;  %v12376_v61 = vpop.xlane.xlu0 %1493  ;;  %10090 = vmatprep.mubr.msk.bf16.mxu0 %vm11650_vm1, %v15482_v38 }
 0x440   :  { %2977 = vrot.lane.b32.xlu1 %v11830_v11, %s11653_s24  ;;  %v1600_v39 = vpack.c.bf16 %v1572_v0, %v1571_v25  ;;  %10100 = vmatprep.subr.bf16.mxu0 %v15482_v38  ;;  %v11123_v28 = vpop.eup %11122 }
 0x441   :  { %3030 = vrot.lane.b32.xlu0 %v11824_v8, %s11652_s2  ;;  %v1573_v16 = vmul.f32 %v11123_v28, %v12198_v42 }
 0x442   :  { %10085 = vmatmul.mubr.msk.bf16.vlgmr.msra.gmra.mxu1 %vm1212_vm3, %v1600_v39 }
 0x443   :  { %10095 = vmatpush3.bf16.msra.mxu1 %v15483_v40  ;;  %v1446_v59 = vpop.xlane.xlu1 %1445  ;;  %v1449_v29 = vpop.xlane.xlu0 %1448  ;;  %10096 = vmatprep.mubr.msk.bf16.mxu1 %vm11650_vm1, %v15482_v38 }
 0x444   :  { %11132 = vrcp.f32 %v1446_v59  ;;  %3028 = vrot.lane.b32.xlu1 %v11824_v8, %s11653_s24  ;;  %10106 = vmatprep.subr.bf16.mxu1 %v15482_v38 }
 0x445   :  { %v11125_v51 = vpop.eup %11124  ;;  %3081 = vrot.lane.b32.xlu0 %v15484_v49, %s11652_s2  ;;  %11134 = vrcp.f32 %v1449_v29 }
 0x446   :  { %v1574_v47 = vmul.f32 %v11125_v51, %v12214_v26  ;;  %v11127_v37 = vpop.eup %11126  ;;  %11136 = vrcp.f32 %v12308_v63  ;;  %v15485_v63 = vld [vmem:[#allocation23_spill] sm:$0xff] }
 0x447   :  { %v1452_v36 = vpop.xlane.xlu1 %1451  ;;  %v1575_v42 = vmul.f32 %v11127_v37, %v12218_v15  ;;  %v1461_v45 = vpop.xlane.xlu0 %1460 }
 0x448   :  { %11138 = vrcp.f32 %v1452_v36  ;;  %3079 = vrot.lane.b32.xlu1 %v15484_v49, %s11653_s24  ;;  %v1601_v21 = vpack.c.bf16 %v1574_v47, %v1573_v16  ;;  %v15487_v47 = vld [vmem:[#allocation20_spill] sm:$0xff] }
 0x449   :  { %v11129_v10 = vpop.eup %11128  ;;  %3132 = vrot.lane.b32.xlu0 %v11836_v14, %s11652_s2  ;;  %11140 = vrcp.f32 %v12302_v30 }
 0x44a   :  { %10091 = vmatmul.mubr.msk.bf16.vlgmr.msra.gmra.mxu0 %vm1212_vm3, %v1601_v21  ;;  %v1576_v26 = vmul.f32 %v11129_v10, %v12224_v23  ;;  %v11131_v15 = vpop.eup %11130  ;;  %v15486_v23 = vld [vmem:[#allocation15_spill] sm:$0xff] }
 0x44b   :  { %10101 = vmatpush3.bf16.msra.mxu0 %v15485_v63  ;;  %v1464_v25 = vpop.xlane.xlu1 %1463  ;;  %10102 = vmatprep.mubr.msk.bf16.mxu0 %vm11650_vm1, %v15482_v38  ;;  %v1577_v28 = vmul.f32 %v11131_v15, %v12228_v43  ;;  %v1473_v59 = vpop.xlane.xlu0 %1472  ;;  %v15489_v63 = vld [vmem:[#allocation17_spill] sm:$0xff] }
 0x44c   :  { %11142 = vrcp.f32 %v1464_v25  ;;  %3628 = vrot.lane.b32.xlu1 %v11755_v4, %s11654_s25  ;;  %v1602_v0 = vpack.c.bf16 %v1576_v26, %v1575_v42  ;;  %10112 = vmatprep.subr.bf16.mxu0 %v15482_v38  ;;  %v15490_v15 = vld [vmem:[#allocation21_spill] sm:$0xff] }
 0x44d   :  { %3130 = vrot.lane.b32.xlu0 %v11836_v14, %s11653_s24  ;;  %11144 = vrcp.f32 %v1461_v45 }
 0x44e   :  { %10097 = vmatmul.mubr.msk.bf16.vlgmr.msra.gmra.mxu1 %vm1212_vm3, %v1602_v0  ;;  %11146 = vrcp.f32 %v12322_v41 }
 0x44f   :  { %10107 = vmatpush3.bf16.msra.mxu1 %v15486_v23  ;;  %10108 = vmatprep.mubr.msk.bf16.mxu1 %vm11650_vm1, %v15482_v38  ;;  %11148 = vrcp.f32 %v12324_v44  ;;  %v1476_v39 = vpop.xlane.xlu1 %1475  ;;  %v1485_v10 = vpop.xlane.xlu0 %1484 }
 0x450   :  { %3722 = vrot.lane.b32.xlu1 %v11772_v22, %s11654_s25  ;;  %10118 = vmatprep.subr.bf16.mxu1 %v15482_v38  ;;  %11150 = vrcp.f32 %v1476_v39  ;;  %v15491_v39 = vld [vmem:[#allocation18_spill] sm:$0xff] }
 0x451   :  { %v11133_v30 = vpop.eup %11132  ;;  %3581 = vrot.lane.b32.xlu0 %v11758_v6, %s11654_s25  ;;  %11152 = vrcp.f32 %v1473_v59  ;;  %v15492_v59 = vld [vmem:[#allocation22_spill] sm:$0xff] }
 0x452   :  { %v1578_v41 = vmul.f32 %v11133_v30, %v12244_v3  ;;  %v11135_v40 = vpop.eup %11134  ;;  %11154 = vrcp.f32 %v12348_v13 }
 0x453   :  { %v11137_v29 = vpop.eup %11136  ;;  %v1579_v16 = vmul.f32 %v11135_v40, %v12246_v46  ;;  %11156 = vrcp.f32 %v12350_v17  ;;  %v15488_v17 = vld [vmem:[#allocation16_spill] sm:$0xff] }
 0x454   :  { %3816 = vrot.lane.b32.xlu1 %v11779_v32, %s11654_s25  ;;  %v1603_v44 = vpack.c.bf16 %v1578_v41, %v1577_v28  ;;  %v1582_v46 = vmul.f32 %v11137_v29, %v12150_v52 }
 0x455   :  { %v11139_v51 = vpop.eup %11138  ;;  %3675 = vrot.lane.b32.xlu0 %v11767_v19, %s11654_s25 }
 0x456   :  { %10103 = vmatmul.mubr.msk.bf16.vlgmr.msra.gmra.mxu0 %vm1212_vm3, %v1603_v44  ;;  %v1580_v43 = vmul.f32 %v11139_v51, %v12252_v20  ;;  %v11141_v3 = vpop.eup %11140  ;;  %v1488_v20 = vpop.xlane.xlu1 %1487 }
 0x457   :  { %10113 = vmatpush3.bf16.msra.mxu0 %v15487_v47  ;;  %10114 = vmatprep.mubr.msk.bf16.mxu0 %vm11650_vm1, %v15482_v38  ;;  %v1581_v13 = vmul.f32 %v11141_v3, %v12144_v34  ;;  %11158 = vrcp.f32 %v1488_v20 }
 0x458   :  { %3910 = vrot.lane.b32.xlu1 %v11793_v48, %s11654_s25  ;;  %v1604_v37 = vpack.c.bf16 %v1580_v43, %v1579_v16  ;;  %10124 = vmatprep.subr.bf16.mxu0 %v15482_v38  ;;  %11160 = vrcp.f32 %v1485_v10  ;;  %v15493_v16 = vld [vmem:[#allocation19_spill] sm:$0xff] }
 0x459   :  { %v11143_v36 = vpop.eup %11142  ;;  %3769 = vrot.lane.b32.xlu0 %v11782_v35, %s11654_s25  ;;  %v1605_v52 = vpack.c.bf16 %v1582_v46, %v1581_v13  ;;  %11162 = vrcp.f32 %v12374_v27 }
 0x45a   :  { %10109 = vmatmul.mubr.msk.bf16.vlgmr.msra.gmra.mxu1 %vm1212_vm3, %v1604_v37  ;;  %v11145_v21 = vpop.eup %11144  ;;  %v1584_v26 = vmul.f32 %v11143_v36, %v12260_v12  ;;  %11164 = vrcp.f32 %v12376_v61  ;;  %v2319_v37 = vpop.permute.xlu0 %2318 }
 0x45b   :  { %10119 = vmatpush3.bf16.msra.mxu1 %v15488_v17  ;;  %10120 = vmatprep.mubr.msk.bf16.mxu1 %vm11650_vm1, %v15482_v38  ;;  %v11147_v42 = vpop.eup %11146  ;;  %v1583_v34 = vmul.f32 %v11145_v21, %v12254_v9 }
 0x45c   :  { %4004 = vrot.lane.b32.xlu1 %v11802_v54, %s11654_s25  ;;  %10130 = vmatprep.subr.bf16.mxu1 %v15482_v38  ;;  %v11149_v45 = vpop.eup %11148  ;;  %v1585_v25 = vmul.f32 %v11147_v42, %v12178_v5 }
 0x45d   :  { %3863 = vrot.lane.b32.xlu0 %v11798_v53, %s11654_s25  ;;  %v1606_v12 = vpack.c.bf16 %v1584_v26, %v1583_v34  ;;  %v1586_v0 = vmul.f32 %v11149_v45, %v12176_v18  ;;  %v11151_v9 = vpop.eup %11150 }
 0x45e   :  { %10115 = vmatmul.mubr.msk.bf16.vlgmr.msra.gmra.mxu0 %vm1212_vm3, %v1605_v52  ;;  %v11153_v27 = vpop.eup %11152  ;;  %v1588_v18 = vmul.f32 %v11151_v9, %v12268_v24 }
 0x45f   :  { %10125 = vmatpush3.bf16.msra.mxu0 %v15489_v63  ;;  %10126 = vmatprep.mubr.msk.bf16.mxu0 %vm11650_vm1, %v15482_v38  ;;  %v11155_v61 = vpop.eup %11154  ;;  %v1607_v23 = vpack.c.bf16 %v1586_v0, %v1585_v25  ;;  %v1587_v30 = vmul.f32 %v11153_v27, %v12262_v2 }
 0x460   :  { %4051 = vrot.lane.b32.xlu1 %v11822_v7, %s11654_s25  ;;  %10136 = vmatprep.subr.bf16.mxu0 %v15482_v38  ;;  %v11157_v5 = vpop.eup %11156  ;;  %v1589_v24 = vmul.f32 %v11155_v61, %v12208_v50 }
 0x461   :  { %3957 = vrot.lane.b32.xlu0 %v11808_v57, %s11654_s25  ;;  %v1608_v28 = vpack.c.bf16 %v1588_v18, %v1587_v30  ;;  %v1590_v41 = vmul.f32 %v11157_v5, %v12206_v56 }
 0x462   :  { %10121 = vmatmul.mubr.msk.bf16.vlgmr.msra.gmra.mxu1 %vm1212_vm3, %v1606_v12 }
 0x463   :  { %10131 = vmatpush3.bf16.msra.mxu1 %v15490_v15  ;;  %10132 = vmatprep.mubr.msk.bf16.mxu1 %vm11650_vm1, %v15482_v38  ;;  %v1609_v44 = vpack.c.bf16 %v1590_v41, %v1589_v24 }
 0x464   :  { %4145 = vrot.lane.b32.xlu1 %v11830_v11, %s11654_s25  ;;  %10142 = vmatprep.subr.bf16.mxu1 %v15482_v38  ;;  %v11159_v40 = vpop.eup %11158 }
 0x465   :  { %4098 = vrot.lane.b32.xlu0 %v11816_v1, %s11654_s25  ;;  %v11161_v2 = vpop.eup %11160  ;;  %v1592_v50 = vmul.f32 %v11159_v40, %v12276_v55  ;;  %v2368_v55 = vpop.permute.xlu1 %2367 }
 0x466   :  { %10127 = vmatmul.mubr.msk.bf16.vlgmr.msra.gmra.mxu0 %vm1212_vm3, %v1607_v23  ;;  %v11163_v29 = vpop.eup %11162  ;;  %v1591_v56 = vmul.f32 %v11161_v2, %v12270_v33  ;;  %v2373_v46 = vsel %vm414_vm2, %v2368_v55, 0 }
 0x467   :  { %10137 = vmatpush3.bf16.msra.mxu0 %v15491_v39  ;;  %10138 = vmatprep.mubr.msk.bf16.mxu0 %vm11650_vm1, %v15482_v38  ;;  %v11165_v51 = vpop.eup %11164  ;;  %v1593_v3 = vmul.f32 %v11163_v29, %v12238_v62 }
 0x468   :  { %4239 = vrot.lane.b32.xlu1 %v15484_v49, %s11654_s25  ;;  %10148 = vmatprep.subr.bf16.mxu0 %v15482_v38  ;;  %v1610_v43 = vpack.c.bf16 %v1592_v50, %v1591_v56  ;;  %v1594_v47 = vmul.f32 %v11165_v51, %v12236_v60 }
 0x469   :  { %4192 = vrot.lane.b32.xlu0 %v11824_v8, %s11654_s25 }
 0x46a   :  { %10133 = vmatmul.mubr.msk.bf16.vlgmr.msra.gmra.mxu1 %vm1212_vm3, %v1608_v28  ;;  %v1611_v33 = vpack.c.bf16 %v1594_v47, %v1593_v3 }
 0x46b   :  { %10143 = vmatpush3.bf16.msra.mxu1 %v15492_v59  ;;  %10144 = vmatprep.mubr.msk.bf16.mxu1 %vm11650_vm1, %v15482_v38 }
 0x46c   :  { %10154 = vmatprep.subr.bf16.mxu1 %v15482_v38 }
 0x46e   :  { %10139 = vmatmul.mubr.msk.bf16.vlgmr.msra.gmra.mxu0 %vm1212_vm3, %v1609_v44 }
 0x46f   :  { %10149 = vmatpush3.bf16.msra.mxu0 %v15493_v16  ;;  %10150 = vmatprep.mubr.msk.bf16.mxu0 %vm11650_vm1, %v15482_v38 }
 0x470   :  { %10160 = vmatprep.subr.bf16.mxu0 %v15482_v38 }
 0x472   :  { %10145 = vmatmul.mubr.msk.bf16.vlgmr.msra.gmra.mxu1 %vm1212_vm3, %v1610_v43 }
 0x473   :  { %10155 = vmatpush3.bf16.msra.mxu1 %v2319_v37  ;;  %10156 = vmatprep.mubr.msk.bf16.mxu1 %vm11650_vm1, %v15482_v38 }
 0x474   :  { %10166 = vmatprep.subr.bf16.mxu1 %v15482_v38 }
 0x476   :  { %10151 = vmatmul.mubr.msk.bf16.vlgmr.msra.gmra.mxu0 %vm1212_vm3, %v1611_v33 }
 0x477   :  { %10161 = vmatpush3.bf16.xpose.msra.mxu0 %v2373_v46  ;;  %10162 = vmatprep.mubr.msk.bf16.mxu0 %vm11650_vm1, %v15482_v38 }
 0x478   :  { %10172 = vmatprep.subr.bf16.mxu0 %v15482_v38 }
 0x484   :  { %v1497_v60 = vpop.xlane.xlu0 %1496 }
 0x485   :  { %11166 = vrcp.f32 %v1497_v60 }
 0x488   :  { %v1500_v62 = vpop.xlane.xlu1 %1499  ;;  %v2419_v36 = vpop.permute.xlu0 %2418 }
 0x489   :  { %11168 = vrcp.f32 %v1500_v62  ;;  %v2424_v27 = vsel %vm414_vm2, %v2419_v36, 0 }
 0x48c   :  { %v2366_v20 = vpop.permute.xlu1 %2365  ;;  %v2470_v13 = vpop.permute.xlu0 %2469 }
 0x48d   :  { %v2475_v21 = vsel %vm414_vm2, %v2470_v13, 0  ;;  %10163 = vmatmul.mubr.msk.bf16.vlgmr.msra.gmra.mxu0 %vm414_vm2, %v2366_v20 }
 0x48e   :  { %10173 = vmatpush3.bf16.xpose.msra.mxu0 %v2475_v21  ;;  %10174 = vmatprep.mubr.msk.bf16.mxu0 %vm11650_vm1, %v15482_v38 }
 0x48f   :  { %10184 = vmatprep.subr.bf16.mxu0 %v15482_v38 }
 0x490   :  { %v2417_v10 = vpop.permute.xlu1 %2416  ;;  %v2521_v17 = vpop.permute.xlu0 %2520 }
 0x491   :  { %v2526_v18 = vsel %vm414_vm2, %v2521_v17, 0 }
 0x492   :  { %v11167_v42 = vpop.eup %11166 }
 0x493   :  { %v1595_v63 = vmul.f32 %v11167_v42, %v12286_v58 }
 0x494   :  { %v2468_v52 = vpop.permute.xlu1 %2467  ;;  %v2572_v26 = vpop.permute.xlu0 %2571 }
 0x495   :  { %v2577_v45 = vsel %vm414_vm2, %v2572_v26, 0  ;;  %10175 = vmatmul.mubr.msk.bf16.vlgmr.msra.gmra.mxu0 %vm414_vm2, %v2468_v52 }
 0x496   :  { %v11169_v34 = vpop.eup %11168  ;;  %10185 = vmatpush3.bf16.xpose.msra.mxu0 %v2577_v45  ;;  %10186 = vmatprep.mubr.msk.bf16.mxu0 %vm11650_vm1, %v15482_v38 }
 0x497   :  { %v1596_v12 = vmul.f32 %v11169_v34, %v12290_v31  ;;  %10196 = vmatprep.subr.bf16.mxu0 %v15482_v38 }
 0x498   :  { %v2519_v25 = vpop.permute.xlu1 %2518  ;;  %v2623_v0 = vpop.permute.xlu0 %2622 }
 0x499   :  { %v1612_v9 = vpack.c.bf16 %v1596_v12, %v1595_v63  ;;  %v2628_v41 = vsel %vm414_vm2, %v2623_v0, 0 }
 0x49b   :  { %10157 = vmatmul.mubr.msk.bf16.vlgmr.msra.gmra.mxu1 %vm1212_vm3, %v1612_v9 }
 0x49c   :  { %10167 = vmatpush3.bf16.xpose.msra.mxu1 %v2424_v27  ;;  %v2570_v15 = vpop.permute.xlu1 %2569  ;;  %v2674_v61 = vpop.permute.xlu0 %2673  ;;  %10168 = vmatprep.mubr.msk.bf16.mxu1 %vm11650_vm1, %v15482_v38 }
 0x49d   :  { %v2679_v23 = vsel %vm414_vm2, %v2674_v61, 0  ;;  %10187 = vmatmul.mubr.msk.bf16.vlgmr.msra.gmra.mxu0 %vm414_vm2, %v2570_v15  ;;  %10178 = vmatprep.subr.bf16.mxu1 %v15482_v38 }
 0x49e   :  { %10197 = vmatpush3.bf16.xpose.msra.mxu0 %v2679_v23  ;;  %10198 = vmatprep.mubr.msk.bf16.mxu0 %vm11650_vm1, %v15482_v38 }
 0x49f   :  { %10208 = vmatprep.subr.bf16.mxu0 %v15482_v38 }
 0x4a0   :  { %v2621_v58 = vpop.permute.xlu1 %2620  ;;  %v2725_v31 = vpop.permute.xlu0 %2724 }
 0x4a1   :  { %v2730_v50 = vsel %vm414_vm2, %v2725_v31, 0 }
 0x4a3   :  { %10169 = vmatmul.mubr.msk.bf16.vlgmr.msra.gmra.mxu1 %vm414_vm2, %v2417_v10 }
 0x4a4   :  { %10179 = vmatpush3.bf16.xpose.msra.mxu1 %v2526_v18  ;;  %v2672_v5 = vpop.permute.xlu1 %2671  ;;  %v2776_v30 = vpop.permute.xlu0 %2775  ;;  %10180 = vmatprep.mubr.msk.bf16.mxu1 %vm11650_vm1, %v15482_v38 }
 0x4a5   :  { %v2781_v39 = vsel %vm414_vm2, %v2776_v30, 0  ;;  %10199 = vmatmul.mubr.msk.bf16.vlgmr.msra.gmra.mxu0 %vm414_vm2, %v2672_v5  ;;  %10190 = vmatprep.subr.bf16.mxu1 %v15482_v38 }
 0x4a6   :  { %10209 = vmatpush3.bf16.xpose.msra.mxu0 %v2781_v39  ;;  %10210 = vmatprep.mubr.msk.bf16.mxu0 %vm11650_vm1, %v15482_v38 }
 0x4a7   :  { %10220 = vmatprep.subr.bf16.mxu0 %v15482_v38 }
 0x4a8   :  { %v2723_v28 = vpop.permute.xlu1 %2722  ;;  %v2827_v24 = vpop.permute.xlu0 %2826 }
 0x4a9   :  { %v2832_v47 = vsel %vm414_vm2, %v2827_v24, 0 }
 0x4ab   :  { %10181 = vmatmul.mubr.msk.bf16.vlgmr.msra.gmra.mxu1 %vm414_vm2, %v2519_v25 }
 0x4ac   :  { %10191 = vmatpush3.bf16.xpose.msra.mxu1 %v2628_v41  ;;  %v2774_v40 = vpop.permute.xlu1 %2773  ;;  %v2878_v2 = vpop.permute.xlu0 %2877  ;;  %10192 = vmatprep.mubr.msk.bf16.mxu1 %vm11650_vm1, %v15482_v38 }
 0x4ad   :  { %v2883_v59 = vsel %vm414_vm2, %v2878_v2, 0  ;;  %10211 = vmatmul.mubr.msk.bf16.vlgmr.msra.gmra.mxu0 %vm414_vm2, %v2774_v40  ;;  %10202 = vmatprep.subr.bf16.mxu1 %v15482_v38 }
 0x4ae   :  { %10221 = vmatpush3.bf16.xpose.msra.mxu0 %v2883_v59  ;;  %10222 = vmatprep.mubr.msk.bf16.mxu0 %vm11650_vm1, %v15482_v38 }
 0x4af   :  { %10232 = vmatprep.subr.bf16.mxu0 %v15482_v38 }
 0x4b0   :  { %v2825_v29 = vpop.permute.xlu1 %2824  ;;  %v2929_v44 = vpop.permute.xlu0 %2928 }
 0x4b1   :  { %v2934_v62 = vsel %vm414_vm2, %v2929_v44, 0 }
 0x4b3   :  { %10193 = vmatmul.mubr.msk.bf16.vlgmr.msra.gmra.mxu1 %vm414_vm2, %v2621_v58 }
 0x4b4   :  { %10203 = vmatpush3.bf16.xpose.msra.mxu1 %v2730_v50  ;;  %v2876_v51 = vpop.permute.xlu1 %2875  ;;  %v2980_v56 = vpop.permute.xlu0 %2979  ;;  %10204 = vmatprep.mubr.msk.bf16.mxu1 %vm11650_vm1, %v15482_v38 }
 0x4b5   :  { %v2985_v16 = vsel %vm414_vm2, %v2980_v56, 0  ;;  %10223 = vmatmul.mubr.msk.bf16.vlgmr.msra.gmra.mxu0 %vm414_vm2, %v2876_v51  ;;  %10214 = vmatprep.subr.bf16.mxu1 %v15482_v38 }
 0x4b6   :  { %10233 = vmatpush3.bf16.xpose.msra.mxu0 %v2985_v16  ;;  %10234 = vmatprep.mubr.msk.bf16.mxu0 %vm11650_vm1, %v15482_v38 }
 0x4b7   :  { %10244 = vmatprep.subr.bf16.mxu0 %v15482_v38 }
 0x4b8   :  { %v2927_v43 = vpop.permute.xlu1 %2926  ;;  %v3031_v3 = vpop.permute.xlu0 %3030 }
 0x4b9   :  { %v3036_v21 = vsel %vm414_vm2, %v3031_v3, 0 }
 0x4bb   :  { %10205 = vmatmul.mubr.msk.bf16.vlgmr.msra.gmra.mxu1 %vm414_vm2, %v2723_v28 }
 0x4bc   :  { %10215 = vmatpush3.bf16.xpose.msra.mxu1 %v2832_v47  ;;  %v2978_v37 = vpop.permute.xlu1 %2977  ;;  %v3082_v55 = vpop.permute.xlu0 %3081  ;;  %10216 = vmatprep.mubr.msk.bf16.mxu1 %vm11650_vm1, %v15482_v38 }
 0x4bd   :  { %v3087_v33 = vsel %vm414_vm2, %v3082_v55, 0  ;;  %10235 = vmatmul.mubr.msk.bf16.vlgmr.msra.gmra.mxu0 %vm414_vm2, %v2978_v37  ;;  %10226 = vmatprep.subr.bf16.mxu1 %v15482_v38 }
 0x4be   :  { %10245 = vmatpush3.bf16.xpose.msra.mxu0 %v3087_v33  ;;  %10246 = vmatprep.mubr.msk.bf16.mxu0 %vm11650_vm1, %v15482_v38 }
 0x4bf   :  { %10256 = vmatprep.subr.bf16.mxu0 %v15482_v38 }
 0x4c0   :  { %v3029_v46 = vpop.permute.xlu1 %3028  ;;  %v3133_v60 = vpop.permute.xlu0 %3132 }
 0x4c1   :  { %v3138_v10 = vsel %vm414_vm2, %v3133_v60, 0 }
 0x4c3   :  { %10217 = vmatmul.mubr.msk.bf16.vlgmr.msra.gmra.mxu1 %vm414_vm2, %v2825_v29 }
 0x4c4   :  { %10227 = vmatpush3.bf16.xpose.msra.mxu1 %v2934_v62  ;;  %v3080_v36 = vpop.permute.xlu1 %3079  ;;  %v3131_v20 = vpop.permute.xlu0 %3130  ;;  %10228 = vmatprep.mubr.msk.bf16.mxu1 %vm11650_vm1, %v15482_v38 }
 0x4c5   :  { %10247 = vmatmul.mubr.msk.bf16.vlgmr.msra.gmra.mxu0 %vm414_vm2, %v3080_v36  ;;  %10238 = vmatprep.subr.bf16.mxu1 %v15482_v38 }
 0x4c6   :  { %10258 = vmatprep.mubr.msk.bf16.mxu0 %vm11650_vm1, %v15482_v38 }
 0x4c8   :  { %v3582_v13 = vpop.permute.xlu0 %3581  ;;  %v3629_v17 = vpop.permute.xlu1 %3628 }
 0x4c9   :  { %10257 = vmatpush3.bf16.msra.mxu0 %v3582_v13 }
 0x4ca   :  { %10268 = vmatprep.subr.bf16.mxu0 %v15482_v38 }
 0x4cb   :  { %10229 = vmatmul.mubr.msk.bf16.vlgmr.msra.gmra.mxu1 %vm414_vm2, %v2927_v43 }
 0x4cc   :  { %10239 = vmatpush3.bf16.xpose.msra.mxu1 %v3036_v21  ;;  %10240 = vmatprep.mubr.msk.bf16.mxu1 %vm11650_vm1, %v15482_v38 }
 0x4cd   :  { %10250 = vmatprep.subr.bf16.mxu1 %v15482_v38 }
 0x4d3   :  { %10241 = vmatmul.mubr.msk.bf16.vlgmr.msra.gmra.mxu1 %vm414_vm2, %v3029_v46 }
 0x4d4   :  { %10251 = vmatpush3.bf16.xpose.msra.mxu1 %v3138_v10  ;;  %10252 = vmatprep.mubr.msk.bf16.mxu1 %vm11650_vm1, %v15482_v38 }
 0x4d5   :  { %10262 = vmatprep.subr.bf16.mxu1 %v15482_v38 }
 0x4db   :  { %10253 = vmatmul.mubr.msk.bf16.vlgmr.msra.gmra.mxu1 %vm414_vm2, %v3131_v20 }
 0x4dc   :  { %10263 = vmatpush3.bf16.msra.mxu1 %v3629_v17  ;;  %10264 = vmatprep.mubr.msk.bf16.mxu1 %vm11650_vm1, %v15482_v38 }
 0x4dd   :  { %10274 = vmatprep.subr.bf16.mxu1 %v15482_v38 }
 0x4ee   :  { %v12599_v42 = vpop.f32.mrf.mxu0 }
 0x4ef   :  { %15494 = vst [vmem:[#allocation14_spill] sm:$0xff] %v12599_v42 }
 0x4f0   :  { %v10068_v52 = vpop.f32.mrf.mxu0 }
 0x4f2   :  { %v12601_v26 = vpop.f32.mrf.mxu0 }
 0x4f3   :  { %15495 = vst [vmem:[#allocation13_spill] sm:$0xff] %v12601_v26  ;;  %v12603_v45 = vpop.f32.mrf.mxu1 }
 0x4f4   :  { %15496 = vst [vmem:[#allocation23_spill] sm:$0xff] %v12603_v45  ;;  %v10069_v34 = vpop.f32.mrf.mxu0 }
 0x4f5   :  { %v10074_v63 = vpop.f32.mrf.mxu1 }
 0x4f7   :  { %v12605_v12 = vpop.f32.mrf.mxu1 }
 0x4f8   :  { %15497 = vst [vmem:[#allocation15_spill] sm:$0xff] %v12605_v12 }
 0x4f9   :  { %v10075_v25 = vpop.f32.mrf.mxu1 }
 0x4fe   :  { %v12607_v0 = vpop.f32.mrf.mxu0 }
 0x4ff   :  { %15498 = vst [vmem:[#allocation20_spill] sm:$0xff] %v12607_v0 }
 0x500   :  { %v10080_v9 = vpop.f32.mrf.mxu0 }
 0x502   :  { %v12609_v27 = vpop.f32.mrf.mxu0  ;;  %v12611_v15 = vpop.f32.mrf.mxu1 }
 0x503   :  { %15499 = vst [vmem:[#allocation16_spill] sm:$0xff] %v12609_v27  ;;  %15500 = vst [vmem:[#allocation17_spill] sm:$0xff] %v12611_v15  ;;  %v12797_v15 = vpop.permute.xlu0 %3675 }
 0x504   :  { %v10081_v61 = vpop.f32.mrf.mxu0  ;;  %v10086_v23 = vpop.f32.mrf.mxu1 }
 0x506   :  { %v12613_v58 = vpop.f32.mrf.mxu1 }
 0x507   :  { %15501 = vst [vmem:[#allocation21_spill] sm:$0xff] %v12613_v58 }
 0x508   :  { %v10087_v31 = vpop.f32.mrf.mxu1 }
 0x50a   :  { %v12615_v18 = vpop.f32.mrf.mxu0 }
 0x50b   :  { %15502 = vst [vmem:[#allocation18_spill] sm:$0xff] %v12615_v18 }
 0x50c   :  { %v10092_v5 = vpop.f32.mrf.mxu0 }
 0x50e   :  { %v12617_v30 = vpop.f32.mrf.mxu0  ;;  %v12619_v39 = vpop.f32.mrf.mxu1 }
 0x50f   :  { %15503 = vst [vmem:[#allocation22_spill] sm:$0xff] %v12617_v30  ;;  %15504 = vst [vmem:[#allocation19_spill] sm:$0xff] %v12619_v39 }
 0x510   :  { %v10093_v28 = vpop.f32.mrf.mxu0  ;;  %v10098_v24 = vpop.f32.mrf.mxu1 }
 0x512   :  { %v12621_v41 = vpop.f32.mrf.mxu1 }
 0x513   :  { %15505 = vst [vmem:[#allocation24_spill] sm:$0xff] %v12621_v41 }
 0x514   :  { %v10099_v40 = vpop.f32.mrf.mxu1 }
 0x516   :  { %v12623_v2 = vpop.f32.mrf.mxu0 }
 0x517   :  { %15506 = vst [vmem:[#allocation25_spill] sm:$0xff] %v12623_v2 }
 0x518   :  { %v10104_v59 = vpop.f32.mrf.mxu0 }
 0x51a   :  { %v12625_v29 = vpop.f32.mrf.mxu0  ;;  %v12627_v44 = vpop.f32.mrf.mxu1 }
 0x51b   :  { %15507 = vst [vmem:[#allocation26_spill] sm:$0xff] %v12625_v29  ;;  %15508 = vst [vmem:[#allocation27_spill] sm:$0xff] %v12627_v44 }
 0x51c   :  { %v10105_v50 = vpop.f32.mrf.mxu0  ;;  %v10110_v51 = vpop.f32.mrf.mxu1 }
 0x51e   :  { %v12629_v56 = vpop.f32.mrf.mxu1  ;;  %v12631_v16 = vpop.f32.mrf.mxu0 }
 0x51f   :  { %15509 = vst [vmem:[#allocation28_spill] sm:$0xff] %v12629_v56  ;;  %15510 = vst [vmem:[#allocation29_spill] sm:$0xff] %v12631_v16 }
 0x520   :  { %v10111_v43 = vpop.f32.mrf.mxu1  ;;  %v10116_v3 = vpop.f32.mrf.mxu0 }
 0x522   :  { %v12633_v47 = vpop.f32.mrf.mxu0  ;;  %v12635_v37 = vpop.f32.mrf.mxu1 }
 0x523   :  { %15511 = vst [vmem:[#allocation30_spill] sm:$0xff] %v12633_v47  ;;  %15512 = vst [vmem:[#allocation31_spill] sm:$0xff] %v12635_v37 }
 0x524   :  { %v10117_v55 = vpop.f32.mrf.mxu0  ;;  %v10122_v33 = vpop.f32.mrf.mxu1 }
 0x526   :  { %v12637_v46 = vpop.f32.mrf.mxu1  ;;  %v12639_v60 = vpop.f32.mrf.mxu0 }
 0x527   :  { %15513 = vst [vmem:[#allocation32_spill] sm:$0xff] %v12637_v46  ;;  %15514 = vst [vmem:[#allocation33_spill] sm:$0xff] %v12639_v60 }
 0x528   :  { %v10123_v62 = vpop.f32.mrf.mxu1  ;;  %v10128_v36 = vpop.f32.mrf.mxu0 }
 0x52a   :  { %v12641_v20 = vpop.f32.mrf.mxu0  ;;  %v12643_v13 = vpop.f32.mrf.mxu1 }
 0x52b   :  { %15515 = vst [vmem:[#allocation34_spill] sm:$0xff] %v12641_v20  ;;  %15516 = vst [vmem:[#allocation35_spill] sm:$0xff] %v12643_v13 }
 0x52c   :  { %v10129_v21 = vpop.f32.mrf.mxu0  ;;  %v10134_v10 = vpop.f32.mrf.mxu1 }
 0x52e   :  { %v12645_v17 = vpop.f32.mrf.mxu1  ;;  %v12647_v52 = vpop.f32.mrf.mxu0 }
 0x52f   :  { %15517 = vst [vmem:[#allocation36_spill] sm:$0xff] %v12645_v17  ;;  %15518 = vst [vmem:[#allocation37_spill] sm:$0xff] %v12647_v52 }
 0x530   :  { %v10135_v34 = vpop.f32.mrf.mxu1  ;;  %v10140_v63 = vpop.f32.mrf.mxu0 }
 0x532   :  { %v12649_v25 = vpop.f32.mrf.mxu0  ;;  %v12651_v9 = vpop.f32.mrf.mxu1 }
 0x533   :  { %15519 = vst [vmem:[#allocation38_spill] sm:$0xff] %v12649_v25  ;;  %15520 = vst [vmem:[#allocation39_spill] sm:$0xff] %v12651_v9 }
 0x534   :  { %v10141_v61 = vpop.f32.mrf.mxu0  ;;  %v10146_v23 = vpop.f32.mrf.mxu1 }
 0x536   :  { %v12653_v31 = vpop.f32.mrf.mxu1  ;;  %v12655_v5 = vpop.f32.mrf.mxu0 }
 0x537   :  { %15521 = vst [vmem:[#allocation40_spill] sm:$0xff] %v12653_v31  ;;  %15522 = vst [vmem:[#allocation41_spill] sm:$0xff] %v12655_v5 }
 0x538   :  { %v10147_v28 = vpop.f32.mrf.mxu1  ;;  %v10152_v24 = vpop.f32.mrf.mxu0 }
 0x53a   :  { %v12657_v40 = vpop.f32.mrf.mxu0 }
 0x53b   :  { %15523 = vst [vmem:[#allocation42_spill] sm:$0xff] %v12657_v40 }
 0x53c   :  { %v10153_v59 = vpop.f32.mrf.mxu0 }
 0x54d   :  { %v12659_v50 = vpop.f32.mrf.mxu0 }
 0x54e   :  { %v3181_v51 = vsel %vm1212_vm3, %v12659_v50, -inf }
 0x54f   :  { %3182 = vmax.xlane.f32.xlu1 %v3181_v51  ;;  %v10164_v43 = vpop.f32.mrf.mxu0 }
 0x551   :  { %v12663_v3 = vpop.f32.mrf.mxu0 }
 0x552   :  { %v3184_v55 = vsel %vm1212_vm3, %v12663_v3, -inf }
 0x553   :  { %3185 = vmax.xlane.f32.xlu0 %v3184_v55  ;;  %v10165_v33 = vpop.f32.mrf.mxu0 }
 0x555   :  { %v12667_v62 = vpop.f32.mrf.mxu0 }
 0x557   :  { %v10176_v36 = vpop.f32.mrf.mxu0 }
 0x559   :  { %v12669_v21 = vpop.f32.mrf.mxu0 }
 0x55b   :  { %v12671_v10 = vpop.f32.mrf.mxu1  ;;  %v10177_v34 = vpop.f32.mrf.mxu0 }
 0x55c   :  { %15524 = vst [vmem:[#allocation43_spill] sm:$0xff] %v12671_v10 }
 0x55d   :  { %v10158_v63 = vpop.f32.mrf.mxu1  ;;  %v12673_v61 = vpop.f32.mrf.mxu0 }
 0x55f   :  { %v12675_v23 = vpop.f32.mrf.mxu1  ;;  %v10188_v28 = vpop.f32.mrf.mxu0 }
 0x560   :  { %15525 = vst [vmem:[#allocation44_spill] sm:$0xff] %v12675_v23  ;;  %v3193_v28 = vsel %vm1212_vm3, %v12667_v62, -inf }
 0x561   :  { %v10159_v24 = vpop.f32.mrf.mxu1  ;;  %v12677_v59 = vpop.f32.mrf.mxu0 }
 0x563   :  { %v12679_v51 = vpop.f32.mrf.mxu1  ;;  %v10189_v43 = vpop.f32.mrf.mxu0 }
 0x564   :  { %v3187_v55 = vsel %vm1212_vm3, %v12679_v51, -inf }
 0x565   :  { %3188 = vmax.xlane.f32.xlu0 %v3187_v55  ;;  %v10170_v33 = vpop.f32.mrf.mxu1  ;;  %v12683_v36 = vpop.f32.mrf.mxu0 }
 0x566   :  { %v3196_v33 = vsel %vm1212_vm3, %v12669_v21, -inf }
 0x567   :  { %v12685_v34 = vpop.f32.mrf.mxu1  ;;  %v10200_v63 = vpop.f32.mrf.mxu0 }
 0x568   :  { %v3190_v10 = vsel %vm1212_vm3, %v12685_v34, -inf }
 0x569   :  { %3191 = vmax.xlane.f32.xlu1 %v3190_v10  ;;  %v10171_v24 = vpop.f32.mrf.mxu1  ;;  %3194 = vmax.xlane.f32.xlu0 %v3193_v28  ;;  %v12691_v43 = vpop.f32.mrf.mxu0 }
 0x56a   :  { %v3205_v24 = vsel %vm1212_vm3, %v12673_v61, -inf }
 0x56b   :  { %v12693_v23 = vpop.f32.mrf.mxu1  ;;  %v10201_v55 = vpop.f32.mrf.mxu0 }
 0x56c   :  { %v3199_v63 = vsel %vm1212_vm3, %v12693_v23, -inf }
 0x56d   :  { %3197 = vmax.xlane.f32.xlu1 %v3196_v33  ;;  %3200 = vmax.xlane.f32.xlu0 %v3199_v63  ;;  %v10182_v5 = vpop.f32.mrf.mxu1  ;;  %v12699_v40 = vpop.f32.mrf.mxu0 }
 0x56e   :  { %v3208_v5 = vsel %vm1212_vm3, %v12677_v59, -inf }
 0x56f   :  { %v12701_v9 = vpop.f32.mrf.mxu1  ;;  %v10212_v10 = vpop.f32.mrf.mxu0 }
 0x570   :  { %v3202_v28 = vsel %vm1212_vm3, %v12701_v9, -inf }
 0x571   :  { %3203 = vmax.xlane.f32.xlu1 %v3202_v28  ;;  %v10183_v55 = vpop.f32.mrf.mxu1  ;;  %3206 = vmax.xlane.f32.xlu0 %v3205_v24  ;;  %v12707_v31 = vpop.f32.mrf.mxu0 }
 0x572   :  { %v3217_v55 = vsel %vm1212_vm3, %v12683_v36, -inf }
 0x573   :  { %v12709_v52 = vpop.f32.mrf.mxu1  ;;  %v10213_v33 = vpop.f32.mrf.mxu0 }
 0x574   :  { %v3211_v63 = vsel %vm1212_vm3, %v12709_v52, -inf }
 0x575   :  { %3209 = vmax.xlane.f32.xlu1 %v3208_v5  ;;  %3212 = vmax.xlane.f32.xlu0 %v3211_v63  ;;  %v10194_v10 = vpop.f32.mrf.mxu1  ;;  %v12715_v25 = vpop.f32.mrf.mxu0  ;;  %v3220_v63 = vsel %vm1212_vm3, %v12691_v43, -inf }
 0x577   :  { %v12717_v17 = vpop.f32.mrf.mxu1  ;;  %v10224_v28 = vpop.f32.mrf.mxu0 }
 0x578   :  { %v3214_v24 = vsel %vm1212_vm3, %v12717_v17, -inf }
 0x579   :  { %3215 = vmax.xlane.f32.xlu1 %v3214_v24  ;;  %v10195_v33 = vpop.f32.mrf.mxu1  ;;  %3218 = vmax.xlane.f32.xlu0 %v3217_v55  ;;  %v12723_v13 = vpop.f32.mrf.mxu0 }
 0x57a   :  { %v3229_v33 = vsel %vm1212_vm3, %v12699_v40, -inf }
 0x57b   :  { %v12725_v60 = vpop.f32.mrf.mxu1  ;;  %v10225_v5 = vpop.f32.mrf.mxu0 }
 0x57c   :  { %v3223_v10 = vsel %vm1212_vm3, %v12725_v60, -inf }
 0x57d   :  { %3221 = vmax.xlane.f32.xlu1 %v3220_v63  ;;  %3224 = vmax.xlane.f32.xlu0 %v3223_v10  ;;  %v10206_v28 = vpop.f32.mrf.mxu1  ;;  %v12731_v20 = vpop.f32.mrf.mxu0  ;;  %v3232_v10 = vsel %vm1212_vm3, %v12707_v31, -inf }
 0x57f   :  { %v12733_v37 = vpop.f32.mrf.mxu1  ;;  %v10236_v24 = vpop.f32.mrf.mxu0 }
 0x580   :  { %v3226_v55 = vsel %vm1212_vm3, %v12733_v37, -inf }
 0x581   :  { %3227 = vmax.xlane.f32.xlu1 %v3226_v55  ;;  %v10207_v5 = vpop.f32.mrf.mxu1  ;;  %3230 = vmax.xlane.f32.xlu0 %v3229_v33  ;;  %v12739_v46 = vpop.f32.mrf.mxu0 }
 0x582   :  { %v3241_v5 = vsel %vm1212_vm3, %v12715_v25, -inf  ;;  %v3256_v39 = vsel %vm1212_vm3, %v12739_v46, -inf }
 0x583   :  { %v12741_v16 = vpop.f32.mrf.mxu1  ;;  %v10237_v63 = vpop.f32.mrf.mxu0 }
 0x584   :  { %v3235_v28 = vsel %vm1212_vm3, %v12741_v16, -inf }
 0x585   :  { %3233 = vmax.xlane.f32.xlu1 %v3232_v10  ;;  %3236 = vmax.xlane.f32.xlu0 %v3235_v28  ;;  %v10218_v24 = vpop.f32.mrf.mxu1  ;;  %v12747_v47 = vpop.f32.mrf.mxu0  ;;  %v3244_v28 = vsel %vm1212_vm3, %v12723_v13, -inf }
 0x587   :  { %v12749_v44 = vpop.f32.mrf.mxu1  ;;  %v10248_v55 = vpop.f32.mrf.mxu0 }
 0x588   :  { %v3238_v33 = vsel %vm1212_vm3, %v12749_v44, -inf }
 0x589   :  { %3239 = vmax.xlane.f32.xlu1 %v3238_v33  ;;  %v10219_v63 = vpop.f32.mrf.mxu1  ;;  %3242 = vmax.xlane.f32.xlu0 %v3241_v5  ;;  %v12755_v56 = vpop.f32.mrf.mxu0  ;;  %v3253_v5 = vsel %vm1212_vm3, %v12731_v20, -inf }
 0x58a   :  { %v3268_v18 = vsel %vm1212_vm3, %v12755_v56, -inf }
 0x58b   :  { %v12757_v2 = vpop.f32.mrf.mxu1  ;;  %v10249_v10 = vpop.f32.mrf.mxu0 }
 0x58c   :  { %v3247_v24 = vsel %vm1212_vm3, %v12757_v2, -inf }
 0x58d   :  { %3245 = vmax.xlane.f32.xlu1 %v3244_v28  ;;  %3248 = vmax.xlane.f32.xlu0 %v3247_v24  ;;  %v10230_v55 = vpop.f32.mrf.mxu1 }
 0x58f   :  { %v12763_v29 = vpop.f32.mrf.mxu1 }
 0x590   :  { %v3250_v33 = vsel %vm1212_vm3, %v12763_v29, -inf }
 0x591   :  { %3251 = vmax.xlane.f32.xlu1 %v3250_v33  ;;  %v10231_v63 = vpop.f32.mrf.mxu1  ;;  %3254 = vmax.xlane.f32.xlu0 %v3253_v5  ;;  %v3265_v33 = vsel %vm1212_vm3, %v12747_v47, -inf }
 0x593   :  { %v12769_v10 = vpop.f32.mrf.mxu1 }
 0x594   :  { %v3259_v28 = vsel %vm1212_vm3, %v12769_v10, -inf }
 0x595   :  { %3257 = vmax.xlane.f32.xlu1 %v3256_v39  ;;  %3260 = vmax.xlane.f32.xlu0 %v3259_v28  ;;  %v10242_v24 = vpop.f32.mrf.mxu1 }
 0x597   :  { %v12775_v55 = vpop.f32.mrf.mxu1 }
 0x598   :  { %v3262_v41 = vsel %vm1212_vm3, %v12775_v55, -inf }
 0x599   :  { %3263 = vmax.xlane.f32.xlu1 %v3262_v41  ;;  %v10243_v5 = vpop.f32.mrf.mxu1  ;;  %3266 = vmax.xlane.f32.xlu0 %v3265_v33 }
 0x59a   :  { %v12791_v5 = vpop.permute.xlu1 %3722 }
 0x59b   :  { %v12781_v63 = vpop.f32.mrf.mxu1  ;;  %15526 = vst [vmem:[#allocation45_spill] sm:$0xff] %v12791_v5 }
 0x59c   :  { %v3271_v39 = vsel %vm1212_vm3, %v12781_v63, -inf }
 0x59d   :  { %3269 = vmax.xlane.f32.xlu1 %v3268_v18  ;;  %3272 = vmax.xlane.f32.xlu0 %v3271_v39  ;;  %v10254_v28 = vpop.f32.mrf.mxu1  ;;  %v12801_v18 = vpop.permute.xlu0 %3769 }
 0x59e   :  { %v12795_v33 = vpop.permute.xlu1 %3816  ;;  %15529 = vst [vmem:[#allocation48_spill] sm:$0xff] %v12801_v18 }
 0x59f   :  { %v12787_v24 = vpop.f32.mrf.mxu1  ;;  %15527 = vst [vmem:[#allocation46_spill] sm:$0xff] %v12795_v33 }
 0x5a0   :  { %v3274_v30 = vsel %vm1212_vm3, %v12787_v24, -inf }
 0x5a1   :  { %3275 = vmax.xlane.f32.xlu1 %v3274_v30  ;;  %v10255_v41 = vpop.f32.mrf.mxu1  ;;  %v12805_v28 = vpop.permute.xlu0 %3863 }
 0x5a2   :  { %v12799_v58 = vpop.permute.xlu1 %3910  ;;  %15531 = vst [vmem:[#allocation50_spill] sm:$0xff] %v12805_v28 }
 0x5a3   :  { %15528 = vst [vmem:[#allocation47_spill] sm:$0xff] %v12799_v58 }
 0x5a5   :  { %v12809_v30 = vpop.permute.xlu0 %3957 }
 0x5a6   :  { %v12803_v39 = vpop.permute.xlu1 %4004  ;;  %15533 = vst [vmem:[#allocation52_spill] sm:$0xff] %v12809_v30 }
 0x5a7   :  { %15530 = vst [vmem:[#allocation49_spill] sm:$0xff] %v12803_v39 }
 0x5a9   :  { %v12813_v27 = vpop.permute.xlu0 %4098 }
 0x5aa   :  { %v12807_v0 = vpop.permute.xlu1 %4051  ;;  %15535 = vst [vmem:[#allocation54_spill] sm:$0xff] %v12813_v27 }
 0x5ab   :  { %15532 = vst [vmem:[#allocation51_spill] sm:$0xff] %v12807_v0 }
 0x5ad   :  { %v12817_v12 = vpop.permute.xlu0 %4192 }
 0x5ae   :  { %v12811_v41 = vpop.permute.xlu1 %4145  ;;  %15537 = vst [vmem:[#allocation56_spill] sm:$0xff] %v12817_v12 }
 0x5af   :  { %15534 = vst [vmem:[#allocation53_spill] sm:$0xff] %v12811_v41 }
 0x5b2   :  { %v12815_v45 = vpop.permute.xlu1 %4239 }
 0x5b3   :  { %4286 = vrot.lane.b32.xlu0 %v11836_v14, %s11654_s25  ;;  %15536 = vst [vmem:[#allocation55_spill] sm:$0xff] %v12815_v45 }
 0x5d8   :  { %v3183_v42 = vpop.xlane.xlu1 %3182 }
 0x5d9   :  { %v3277_v26 = vsub.f32 %v12659_v50, %v3183_v42 }
 0x5db   :  { %v3309_v58 = vmul.f32 1.442695, %v3277_v26 }
 0x5dc   :  { %v3186_v33 = vpop.xlane.xlu0 %3185 }
 0x5dd   :  { %11170 = vpow2.f32 %v3309_v58  ;;  %v3278_v39 = vsub.f32 %v12663_v3, %v3186_v33 }
 0x5df   :  { %v3311_v28 = vmul.f32 1.442695, %v3278_v39 }
 0x5e1   :  { %11172 = vpow2.f32 %v3311_v28 }
 0x5ea   :  { %v12821_v0 = vpop.eup %11170 }
 0x5eb   :  { %v3373_v41 = vsel %vm1212_vm3, %v12821_v0, 0.0 }
 0x5ec   :  { %3374 = vadd.xlane.f32.xlu0 %v3373_v41 }
 0x5ee   :  { %v12825_v27 = vpop.eup %11172  ;;  %v3189_v45 = vpop.xlane.xlu0 %3188 }
 0x5ef   :  { %v3279_v12 = vsub.f32 %v12679_v51, %v3189_v45  ;;  %v3376_v42 = vsel %vm1212_vm3, %v12825_v27, 0.0 }
 0x5f0   :  { %3377 = vadd.xlane.f32.xlu1 %v3376_v42 }
 0x5f1   :  { %v3313_v26 = vmul.f32 1.442695, %v3279_v12 }
 0x5f2   :  { %v3192_v58 = vpop.xlane.xlu1 %3191  ;;  %v3195_v50 = vpop.xlane.xlu0 %3194 }
 0x5f3   :  { %11174 = vpow2.f32 %v3313_v26  ;;  %v3280_v3 = vsub.f32 %v12685_v34, %v3192_v58  ;;  %v3281_v33 = vsub.f32 %v12667_v62, %v3195_v50 }
 0x5f5   :  { %v3315_v39 = vmul.f32 1.442695, %v3280_v3  ;;  %v3317_v28 = vmul.f32 1.442695, %v3281_v33 }
 0x5f6   :  { %v3198_v41 = vpop.xlane.xlu1 %3197  ;;  %v3201_v30 = vpop.xlane.xlu0 %3200 }
 0x5f7   :  { %11176 = vpow2.f32 %v3315_v39  ;;  %v3282_v18 = vsub.f32 %v12669_v21, %v3198_v41  ;;  %v3283_v45 = vsub.f32 %v12693_v23, %v3201_v30 }
 0x5f8   :  { %11178 = vpow2.f32 %v3317_v28 }
 0x5f9   :  { %v3319_v51 = vmul.f32 1.442695, %v3282_v18  ;;  %v3321_v42 = vmul.f32 1.442695, %v3283_v45 }
 0x5fa   :  { %v3204_v12 = vpop.xlane.xlu1 %3203  ;;  %v3207_v5 = vpop.xlane.xlu0 %3206 }
 0x5fb   :  { %11180 = vpow2.f32 %v3319_v51  ;;  %v3284_v26 = vsub.f32 %v12701_v9, %v3204_v12  ;;  %v3285_v34 = vsub.f32 %v12673_v61, %v3207_v5 }
 0x5fc   :  { %11182 = vpow2.f32 %v3321_v42 }
 0x5fd   :  { %v3323_v62 = vmul.f32 1.442695, %v3284_v26  ;;  %v3325_v58 = vmul.f32 1.442695, %v3285_v34 }
 0x5fe   :  { %v3210_v50 = vpop.xlane.xlu1 %3209  ;;  %v3213_v3 = vpop.xlane.xlu0 %3212 }
 0x5ff   :  { %11184 = vpow2.f32 %v3323_v62  ;;  %v3286_v21 = vsub.f32 %v12677_v59, %v3210_v50  ;;  %v3287_v23 = vsub.f32 %v12709_v52, %v3213_v3 }
 0x600   :  { %v12838_v30 = vpop.eup %11174  ;;  %11186 = vpow2.f32 %v3325_v58 }
 0x601   :  { %v3327_v18 = vmul.f32 1.442695, %v3286_v21  ;;  %v3329_v33 = vmul.f32 1.442695, %v3287_v23  ;;  %v3379_v9 = vsel %vm1212_vm3, %v12838_v30, 0.0 }
 0x602   :  { %v3216_v39 = vpop.xlane.xlu1 %3215  ;;  %3380 = vadd.xlane.f32.xlu0 %v3379_v9  ;;  %v3219_v61 = vpop.xlane.xlu0 %3218 }
 0x603   :  { %11188 = vpow2.f32 %v3327_v18  ;;  %v3288_v5 = vsub.f32 %v12717_v17, %v3216_v39  ;;  %v3289_v28 = vsub.f32 %v12683_v36, %v3219_v61 }
 0x604   :  { %v12844_v41 = vpop.eup %11176  ;;  %11190 = vpow2.f32 %v3329_v33 }
 0x605   :  { %v12846_v52 = vpop.eup %11178  ;;  %v3331_v59 = vmul.f32 1.442695, %v3288_v5  ;;  %v3333_v45 = vmul.f32 1.442695, %v3289_v28  ;;  %v3382_v51 = vsel %vm1212_vm3, %v12844_v41, 0.0 }
 0x606   :  { %v3222_v42 = vpop.xlane.xlu1 %3221  ;;  %3383 = vadd.xlane.f32.xlu1 %v3382_v51  ;;  %v3385_v12 = vsel %vm1212_vm3, %v12846_v52, 0.0  ;;  %v3225_v26 = vpop.xlane.xlu0 %3224 }
 0x607   :  { %11192 = vpow2.f32 %v3331_v59  ;;  %v3290_v17 = vsub.f32 %v12691_v43, %v3222_v42  ;;  %3386 = vadd.xlane.f32.xlu0 %v3385_v12  ;;  %v3291_v36 = vsub.f32 %v12725_v60, %v3225_v26 }
 0x608   :  { %v12854_v34 = vpop.eup %11180  ;;  %11194 = vpow2.f32 %v3333_v45 }
 0x609   :  { %v12856_v62 = vpop.eup %11182  ;;  %v3335_v58 = vmul.f32 1.442695, %v3290_v17  ;;  %v3337_v50 = vmul.f32 1.442695, %v3291_v36  ;;  %v3388_v3 = vsel %vm1212_vm3, %v12854_v34, 0.0 }
 0x60a   :  { %v3228_v21 = vpop.xlane.xlu1 %3227  ;;  %3389 = vadd.xlane.f32.xlu1 %v3388_v3  ;;  %v3391_v23 = vsel %vm1212_vm3, %v12856_v62, 0.0  ;;  %v3231_v18 = vpop.xlane.xlu0 %3230 }
 0x60b   :  { %11196 = vpow2.f32 %v3335_v58  ;;  %v3292_v43 = vsub.f32 %v12733_v37, %v3228_v21  ;;  %3392 = vadd.xlane.f32.xlu0 %v3391_v23  ;;  %v3293_v60 = vsub.f32 %v12699_v40, %v3231_v18 }
 0x60c   :  { %v12864_v33 = vpop.eup %11184  ;;  %11198 = vpow2.f32 %v3337_v50 }
 0x60d   :  { %v12866_v9 = vpop.eup %11186  ;;  %v3341_v39 = vmul.f32 1.442695, %v3293_v60  ;;  %v3394_v61 = vsel %vm1212_vm3, %v12864_v33, 0.0  ;;  %v3339_v5 = vmul.f32 1.442695, %v3292_v43 }
 0x60e   :  { %v3234_v28 = vpop.xlane.xlu1 %3233  ;;  %3395 = vadd.xlane.f32.xlu1 %v3394_v61  ;;  %v3397_v59 = vsel %vm1212_vm3, %v12866_v9, 0.0  ;;  %v3237_v45 = vpop.xlane.xlu0 %3236 }
 0x60f   :  { %v3294_v37 = vsub.f32 %v12707_v31, %v3234_v28  ;;  %3398 = vadd.xlane.f32.xlu0 %v3397_v59  ;;  %v3295_v40 = vsub.f32 %v12741_v16, %v3237_v45  ;;  %11200 = vpow2.f32 %v3341_v39 }
 0x610   :  { %v12874_v51 = vpop.eup %11188  ;;  %11202 = vpow2.f32 %v3339_v5 }
 0x611   :  { %v12876_v42 = vpop.eup %11190  ;;  %v3343_v12 = vmul.f32 1.442695, %v3294_v37  ;;  %v3345_v26 = vmul.f32 1.442695, %v3295_v40  ;;  %v3400_v17 = vsel %vm1212_vm3, %v12874_v51, 0.0 }
 0x612   :  { %v3240_v36 = vpop.xlane.xlu1 %3239  ;;  %3401 = vadd.xlane.f32.xlu1 %v3400_v17  ;;  %v3403_v58 = vsel %vm1212_vm3, %v12876_v42, 0.0  ;;  %v3243_v31 = vpop.xlane.xlu0 %3242 }
 0x613   :  { %11204 = vpow2.f32 %v3343_v12  ;;  %v3296_v16 = vsub.f32 %v12749_v44, %v3240_v36  ;;  %3404 = vadd.xlane.f32.xlu0 %v3403_v58  ;;  %v3297_v50 = vsub.f32 %v12715_v25, %v3243_v31 }
 0x614   :  { %v12884_v3 = vpop.eup %11192  ;;  %11206 = vpow2.f32 %v3345_v26 }
 0x615   :  { %v12886_v21 = vpop.eup %11194  ;;  %v3349_v23 = vmul.f32 1.442695, %v3297_v50  ;;  %v3406_v18 = vsel %vm1212_vm3, %v12884_v3, 0.0  ;;  %v3347_v43 = vmul.f32 1.442695, %v3296_v16 }
 0x616   :  { %v3246_v60 = vpop.xlane.xlu1 %3245  ;;  %3407 = vadd.xlane.f32.xlu1 %v3406_v18  ;;  %v3409_v39 = vsel %vm1212_vm3, %v12886_v21, 0.0  ;;  %v3249_v61 = vpop.xlane.xlu0 %3248 }
 0x617   :  { %v3298_v44 = vsub.f32 %v12723_v13, %v3246_v60  ;;  %3410 = vadd.xlane.f32.xlu0 %v3409_v39  ;;  %v3299_v25 = vsub.f32 %v12757_v2, %v3249_v61  ;;  %11208 = vpow2.f32 %v3349_v23 }
 0x618   :  { %v12894_v5 = vpop.eup %11196  ;;  %11210 = vpow2.f32 %v3347_v43 }
 0x619   :  { %v12896_v28 = vpop.eup %11198  ;;  %v3351_v59 = vmul.f32 1.442695, %v3298_v44  ;;  %v3353_v45 = vmul.f32 1.442695, %v3299_v25  ;;  %v3412_v37 = vsel %vm1212_vm3, %v12894_v5, 0.0 }
 0x61a   :  { %v3252_v40 = vpop.xlane.xlu1 %3251  ;;  %3413 = vadd.xlane.f32.xlu1 %v3412_v37  ;;  %v3415_v12 = vsel %vm1212_vm3, %v12896_v28, 0.0  ;;  %v3255_v13 = vpop.xlane.xlu0 %3254 }
 0x61b   :  { %11212 = vpow2.f32 %v3351_v59  ;;  %v3300_v2 = vsub.f32 %v12763_v29, %v3252_v40  ;;  %3416 = vadd.xlane.f32.xlu0 %v3415_v12  ;;  %v3301_v26 = vsub.f32 %v12731_v20, %v3255_v13 }
 0x61c   :  { %v12904_v17 = vpop.eup %11200  ;;  %11214 = vpow2.f32 %v3353_v45 }
 0x61d   :  { %v3357_v36 = vmul.f32 1.442695, %v3301_v26  ;;  %v3355_v58 = vmul.f32 1.442695, %v3300_v2  ;;  %v3421_v16 = vsel %vm1212_vm3, %v12904_v17, 0.0  ;;  %v12908_v23 = vpop.eup %11202 }
 0x61e   :  { %v3258_v31 = vpop.xlane.xlu1 %3257  ;;  %v3261_v50 = vpop.xlane.xlu0 %3260  ;;  %3422 = vadd.xlane.f32.xlu1 %v3421_v16  ;;  %v3418_v25 = vsel %vm1212_vm3, %v12908_v23, 0.0 }
 0x61f   :  { %v3302_v18 = vsub.f32 %v12739_v46, %v3258_v31  ;;  %v3303_v29 = vsub.f32 %v12769_v10, %v3261_v50  ;;  %11216 = vpow2.f32 %v3357_v36 }
 0x620   :  { %v12912_v43 = vpop.eup %11204  ;;  %11218 = vpow2.f32 %v3355_v58 }
 0x621   :  { %v3359_v20 = vmul.f32 1.442695, %v3302_v18  ;;  %v3361_v60 = vmul.f32 1.442695, %v3303_v29  ;;  %v3424_v39 = vsel %vm1212_vm3, %v12912_v43, 0.0  ;;  %v12916_v61 = vpop.eup %11206 }
 0x622   :  { %v3264_v44 = vpop.xlane.xlu1 %3263  ;;  %3425 = vadd.xlane.f32.xlu0 %v3424_v39  ;;  %v3267_v46 = vpop.xlane.xlu0 %3266  ;;  %3419 = vadd.xlane.f32.xlu1 %v3418_v25  ;;  %v3427_v40 = vsel %vm1212_vm3, %v12916_v61, 0.0 }
 0x623   :  { %11220 = vpow2.f32 %v3359_v20  ;;  %v3304_v10 = vsub.f32 %v12775_v55, %v3264_v44  ;;  %v3305_v59 = vsub.f32 %v12747_v47, %v3267_v46 }
 0x624   :  { %v12922_v45 = vpop.eup %11208  ;;  %11222 = vpow2.f32 %v3361_v60 }
 0x625   :  { %v3365_v37 = vmul.f32 1.442695, %v3305_v59  ;;  %v3363_v12 = vmul.f32 1.442695, %v3304_v10  ;;  %v3433_v2 = vsel %vm1212_vm3, %v12922_v45, 0.0  ;;  %v12928_v36 = vpop.eup %11210 }
 0x626   :  { %v3270_v13 = vpop.xlane.xlu1 %3269  ;;  %3428 = vadd.xlane.f32.xlu0 %v3427_v40  ;;  %v3273_v26 = vpop.xlane.xlu0 %3272  ;;  %3434 = vadd.xlane.f32.xlu1 %v3433_v2  ;;  %v3430_v29 = vsel %vm1212_vm3, %v12928_v36, 0.0 }
 0x627   :  { %v3306_v55 = vsub.f32 %v12755_v56, %v3270_v13  ;;  %v3307_v47 = vsub.f32 %v12781_v63, %v3273_v26  ;;  %11224 = vpow2.f32 %v3365_v37 }
 0x628   :  { %v12932_v58 = vpop.eup %11212  ;;  %11226 = vpow2.f32 %v3363_v12 }
 0x629   :  { %v3367_v31 = vmul.f32 1.442695, %v3306_v55  ;;  %v3369_v16 = vmul.f32 1.442695, %v3307_v47  ;;  %v3436_v50 = vsel %vm1212_vm3, %v12932_v58, 0.0  ;;  %v12936_v18 = vpop.eup %11214 }
 0x62a   :  { %3437 = vadd.xlane.f32.xlu0 %v3436_v50  ;;  %3431 = vadd.xlane.f32.xlu1 %v3430_v29  ;;  %v3439_v63 = vsel %vm1212_vm3, %v12936_v18, 0.0  ;;  %v3276_v47 = vpop.xlane.xlu1 %3275  ;;  %v12997_v29 = vpop.permute.xlu0 %4286 }
 0x62b   :  { %11228 = vpow2.f32 %v3367_v31  ;;  %v3308_v31 = vsub.f32 %v12787_v24, %v3276_v47 }
 0x62c   :  { %v12940_v56 = vpop.eup %11216  ;;  %11230 = vpow2.f32 %v3369_v16 }
 0x62d   :  { %v3445_v20 = vsel %vm1212_vm3, %v12940_v56, 0.0  ;;  %v12946_v60 = vpop.eup %11218  ;;  %v3371_v16 = vmul.f32 1.442695, %v3308_v31 }
 0x62e   :  { %3440 = vadd.xlane.f32.xlu0 %v3439_v63  ;;  %3446 = vadd.xlane.f32.xlu1 %v3445_v20  ;;  %v3442_v46 = vsel %vm1212_vm3, %v12946_v60, 0.0 }
 0x62f   :  { %11232 = vpow2.f32 %v3371_v16 }
 0x630   :  { %v12948_v39 = vpop.eup %11220 }
 0x631   :  { %v3448_v44 = vsel %vm1212_vm3, %v12948_v39, 0.0  ;;  %v12952_v25 = vpop.eup %11222 }
 0x632   :  { %3449 = vadd.xlane.f32.xlu0 %v3448_v44  ;;  %3443 = vadd.xlane.f32.xlu1 %v3442_v46  ;;  %v3451_v59 = vsel %vm1212_vm3, %v12952_v25, 0.0 }
 0x634   :  { %v12956_v10 = vpop.eup %11224 }
 0x635   :  { %v3457_v37 = vsel %vm1212_vm3, %v12956_v10, 0.0  ;;  %v12962_v40 = vpop.eup %11226 }
 0x636   :  { %3452 = vadd.xlane.f32.xlu0 %v3451_v59  ;;  %3458 = vadd.xlane.f32.xlu1 %v3457_v37  ;;  %v3454_v26 = vsel %vm1212_vm3, %v12962_v40, 0.0 }
 0x638   :  { %v12964_v12 = vpop.eup %11228 }
 0x639   :  { %v3460_v13 = vsel %vm1212_vm3, %v12964_v12, 0.0  ;;  %v12968_v2 = vpop.eup %11230 }
 0x63a   :  { %3461 = vadd.xlane.f32.xlu0 %v3460_v13  ;;  %3455 = vadd.xlane.f32.xlu1 %v3454_v26  ;;  %v3463_v55 = vsel %vm1212_vm3, %v12968_v2, 0.0 }
 0x63c   :  { %v12989_v50 = vpop.eup %11232 }
 0x63d   :  { %v3466_v24 = vsel %vm1212_vm3, %v12989_v50, 0.0 }
 0x63e   :  { %3464 = vadd.xlane.f32.xlu0 %v3463_v55 }
 0x64b   :  { %4335 = vrot.lane.b32.xlu1 %v11758_v6, %s11655_s26 }
 0x654   :  { %4386 = vrot.lane.b32.xlu0 %v11755_v4, %s11655_s26 }
 0x658   :  { %4437 = vrot.lane.b32.xlu0 %v11767_v19, %s11655_s26 }
 0x65c   :  { %4488 = vrot.lane.b32.xlu0 %v11772_v22, %s11655_s26 }
 0x660   :  { %4539 = vrot.lane.b32.xlu0 %v11782_v35, %s11655_s26 }
 0x664   :  { %4590 = vrot.lane.b32.xlu0 %v11779_v32, %s11655_s26 }
 0x668   :  { %4641 = vrot.lane.b32.xlu0 %v11798_v53, %s11655_s26 }
 0x66c   :  { %4692 = vrot.lane.b32.xlu0 %v11793_v48, %s11655_s26 }
 0x66f   :  { %3467 = vadd.xlane.f32.xlu1 %v3466_v24 }
 0x670   :  { %4743 = vrot.lane.b32.xlu0 %v11808_v57, %s11655_s26 }
 0x674   :  { %4794 = vrot.lane.b32.xlu0 %v11802_v54, %s11655_s26 }
 0x675   :  { %v3375_v63 = vpop.xlane.xlu0 %3374 }
 0x676   :  { %11234 = vrcp.f32 %v3375_v63 }
 0x678   :  { %4845 = vrot.lane.b32.xlu0 %v11822_v7, %s11655_s26 }
 0x679   :  { %v3378_v20 = vpop.xlane.xlu1 %3377 }
 0x67a   :  { %11236 = vrcp.f32 %v3378_v20 }
 0x67c   :  { %4896 = vrot.lane.b32.xlu0 %v11816_v1, %s11655_s26 }
 0x680   :  { %4947 = vrot.lane.b32.xlu0 %v11830_v11, %s11655_s26  ;;  %4333 = vrot.lane.b32.xlu1 %v11758_v6, %s11656_s27 }
 0x683   :  { %v11235_v44 = vpop.eup %11234 }
 0x684   :  { %4998 = vrot.lane.b32.xlu0 %v11824_v8, %s11655_s26  ;;  %4384 = vrot.lane.b32.xlu1 %v11755_v4, %s11656_s27  ;;  %v3533_v59 = vmul.f32 %v11235_v44, %v12821_v0 }
 0x687   :  { %v11237_v46 = vpop.eup %11236 }
 0x688   :  { %5049 = vrot.lane.b32.xlu0 %v15484_v49, %s11655_s26  ;;  %v3534_v37 = vmul.f32 %v11237_v46, %v12825_v27  ;;  %4435 = vrot.lane.b32.xlu1 %v11767_v19, %s11656_s27 }
 0x68a   :  { %v3565_v13 = vpack.c.bf16 %v3534_v37, %v3533_v59 }
 0x68b   :  { %v3381_v26 = vpop.xlane.xlu0 %3380 }
 0x68c   :  { %5100 = vrot.lane.b32.xlu0 %v11836_v14, %s11655_s26  ;;  %10259 = vmatmul.mubr.msk.bf16.vlgmr.msra.gmra.mxu0 %vm1212_vm3, %v3565_v13  ;;  %11238 = vrcp.f32 %v3381_v26 }
 0x68d   :  { %4486 = vrot.lane.b32.xlu1 %v11772_v22, %s11656_s27  ;;  %10269 = vmatpush3.bf16.msra.mxu0 %v12797_v15 }
 0x68e   :  { %10270 = vmatprep.mubr.msk.bf16.mxu0 %vm11650_vm1, %v15482_v38  ;;  %10280 = vmatprep.subr.bf16.mxu0 %v15482_v38 }
 0x68f   :  { %v3384_v0 = vpop.xlane.xlu1 %3383 }
 0x690   :  { %11240 = vrcp.f32 %v3384_v0  ;;  %v3387_v27 = vpop.xlane.xlu0 %3386  ;;  %5098 = vrot.lane.b32.xlu0 %v11836_v14, %s11656_s27 }
 0x691   :  { %4537 = vrot.lane.b32.xlu1 %v11782_v35, %s11656_s27  ;;  %11242 = vrcp.f32 %v3387_v27 }
 0x693   :  { %v3390_v55 = vpop.xlane.xlu1 %3389 }
 0x694   :  { %11244 = vrcp.f32 %v3390_v55  ;;  %v3393_v47 = vpop.xlane.xlu0 %3392  ;;  %5549 = vrot.lane.b32.xlu0 %v11758_v6, %s11657_s28  ;;  %v15538_v55 = vld [vmem:[#allocation45_spill] sm:$0xff] }
 0x695   :  { %4588 = vrot.lane.b32.xlu1 %v11779_v32, %s11656_s27  ;;  %11246 = vrcp.f32 %v3393_v47 }
 0x697   :  { %v3396_v15 = vpop.xlane.xlu1 %3395 }
 0x698   :  { %11248 = vrcp.f32 %v3396_v15  ;;  %v3399_v31 = vpop.xlane.xlu0 %3398  ;;  %5643 = vrot.lane.b32.xlu0 %v11767_v19, %s11657_s28 }
 0x699   :  { %4639 = vrot.lane.b32.xlu1 %v11798_v53, %s11656_s27  ;;  %11250 = vrcp.f32 %v3399_v31  ;;  %v11239_v16 = vpop.eup %11238 }
 0x69a   :  { %v3535_v44 = vmul.f32 %v11239_v16, %v12838_v30 }
 0x69b   :  { %v3402_v24 = vpop.xlane.xlu1 %3401 }
 0x69c   :  { %11252 = vrcp.f32 %v3402_v24  ;;  %v3405_v63 = vpop.xlane.xlu0 %3404  ;;  %5737 = vrot.lane.b32.xlu0 %v11782_v35, %s11657_s28 }
 0x69d   :  { %v11241_v20 = vpop.eup %11240  ;;  %4690 = vrot.lane.b32.xlu1 %v11793_v48, %s11656_s27  ;;  %11254 = vrcp.f32 %v3405_v63  ;;  %v15539_v63 = vld [vmem:[#allocation48_spill] sm:$0xff] }
 0x69e   :  { %v3536_v46 = vmul.f32 %v11241_v20, %v12844_v41  ;;  %v11243_v59 = vpop.eup %11242 }
 0x69f   :  { %v3408_v37 = vpop.xlane.xlu1 %3407  ;;  %v3537_v30 = vmul.f32 %v11243_v59, %v12846_v52 }
 0x6a0   :  { %11256 = vrcp.f32 %v3408_v37  ;;  %v3411_v13 = vpop.xlane.xlu0 %3410  ;;  %5831 = vrot.lane.b32.xlu0 %v11798_v53, %s11657_s28  ;;  %v3566_v26 = vpack.c.bf16 %v3536_v46, %v3535_v44  ;;  %v15540_v37 = vld [vmem:[#allocation46_spill] sm:$0xff] }
 0x6a1   :  { %v11245_v0 = vpop.eup %11244  ;;  %4741 = vrot.lane.b32.xlu1 %v11808_v57, %s11656_s27  ;;  %11258 = vrcp.f32 %v3411_v13 }
 0x6a2   :  { %10265 = vmatmul.mubr.msk.bf16.vlgmr.msra.gmra.mxu1 %vm1212_vm3, %v3566_v26  ;;  %v3538_v41 = vmul.f32 %v11245_v0, %v12854_v34  ;;  %v11247_v27 = vpop.eup %11246 }
 0x6a3   :  { %10275 = vmatpush3.bf16.msra.mxu1 %v15538_v55  ;;  %v3414_v47 = vpop.xlane.xlu1 %3413  ;;  %10276 = vmatprep.mubr.msk.bf16.mxu1 %vm11650_vm1, %v15482_v38  ;;  %v3539_v52 = vmul.f32 %v11247_v27, %v12856_v62  ;;  %v15541_v27 = vld [vmem:[#allocation50_spill] sm:$0xff] }
 0x6a4   :  { %11260 = vrcp.f32 %v3414_v47  ;;  %5925 = vrot.lane.b32.xlu0 %v11808_v57, %s11657_s28  ;;  %v3567_v15 = vpack.c.bf16 %v3538_v41, %v3537_v30  ;;  %10286 = vmatprep.subr.bf16.mxu1 %v15482_v38  ;;  %v3417_v24 = vpop.xlane.xlu0 %3416 }
 0x6a5   :  { %v11249_v31 = vpop.eup %11248  ;;  %4792 = vrot.lane.b32.xlu1 %v11802_v54, %s11656_s27 }
 0x6a6   :  { %v3540_v34 = vmul.f32 %v11249_v31, %v12864_v33  ;;  %10271 = vmatmul.mubr.msk.bf16.vlgmr.msra.gmra.mxu0 %vm1212_vm3, %v3567_v15  ;;  %v11251_v16 = vpop.eup %11250 }
 0x6a7   :  { %10281 = vmatpush3.bf16.msra.mxu0 %v15539_v63  ;;  %10282 = vmatprep.mubr.msk.bf16.mxu0 %vm11650_vm1, %v15482_v38  ;;  %v3423_v20 = vpop.xlane.xlu1 %3422  ;;  %v3541_v62 = vmul.f32 %v11251_v16, %v12866_v9 }
 0x6a8   :  { %6066 = vrot.lane.b32.xlu0 %v11816_v1, %s11657_s28  ;;  %v3568_v44 = vpack.c.bf16 %v3540_v34, %v3539_v52  ;;  %10292 = vmatprep.subr.bf16.mxu0 %v15482_v38  ;;  %11262 = vrcp.f32 %v3423_v20  ;;  %v15542_v52 = vld [vmem:[#allocation47_spill] sm:$0xff] }
 0x6a9   :  { %v11253_v46 = vpop.eup %11252  ;;  %4843 = vrot.lane.b32.xlu1 %v11822_v7, %s11656_s27  ;;  %11264 = vrcp.f32 %v3417_v24 }
 0x6aa   :  { %10277 = vmatmul.mubr.msk.bf16.vlgmr.msra.gmra.mxu1 %vm1212_vm3, %v3568_v44  ;;  %v3542_v33 = vmul.f32 %v11253_v46, %v12874_v51  ;;  %v11255_v59 = vpop.eup %11254 }
 0x6ab   :  { %10287 = vmatpush3.bf16.msra.mxu1 %v15540_v37  ;;  %v3426_v13 = vpop.xlane.xlu0 %3425  ;;  %10288 = vmatprep.mubr.msk.bf16.mxu1 %vm11650_vm1, %v15482_v38  ;;  %v3420_v26 = vpop.xlane.xlu1 %3419  ;;  %v3543_v9 = vmul.f32 %v11255_v59, %v12876_v42 }
 0x6ac   :  { %11266 = vrcp.f32 %v3426_v13  ;;  %6160 = vrot.lane.b32.xlu0 %v11824_v8, %s11657_s28  ;;  %v3569_v0 = vpack.c.bf16 %v3542_v33, %v3541_v62  ;;  %10298 = vmatprep.subr.bf16.mxu1 %v15482_v38 }
 0x6ad   :  { %v11257_v30 = vpop.eup %11256  ;;  %11268 = vrcp.f32 %v3420_v26  ;;  %4894 = vrot.lane.b32.xlu1 %v11816_v1, %s11656_s27 }
 0x6ae   :  { %v3544_v51 = vmul.f32 %v11257_v30, %v12884_v3  ;;  %10283 = vmatmul.mubr.msk.bf16.vlgmr.msra.gmra.mxu0 %vm1212_vm3, %v3569_v0  ;;  %v11259_v41 = vpop.eup %11258 }
 0x6af   :  { %10293 = vmatpush3.bf16.msra.mxu0 %v15541_v27  ;;  %v3429_v55 = vpop.xlane.xlu0 %3428  ;;  %10294 = vmatprep.mubr.msk.bf16.mxu0 %vm11650_vm1, %v15482_v38  ;;  %v3435_v47 = vpop.xlane.xlu1 %3434  ;;  %v3545_v42 = vmul.f32 %v11259_v41, %v12886_v21 }
 0x6b0   :  { %v3570_v15 = vpack.c.bf16 %v3544_v51, %v3543_v9  ;;  %10304 = vmatprep.subr.bf16.mxu0 %v15482_v38  ;;  %11270 = vrcp.f32 %v3435_v47 }
 0x6b1   :  { %v11261_v31 = vpop.eup %11260  ;;  %4945 = vrot.lane.b32.xlu1 %v11830_v11, %s11656_s27  ;;  %11272 = vrcp.f32 %v3429_v55 }
 0x6b2   :  { %10289 = vmatmul.mubr.msk.bf16.vlgmr.msra.gmra.mxu1 %vm1212_vm3, %v3570_v15  ;;  %v3546_v3 = vmul.f32 %v11261_v31, %v12894_v5  ;;  %v15543_v5 = vld [vmem:[#allocation52_spill] sm:$0xff] }
 0x6b3   :  { %10299 = vmatpush3.bf16.msra.mxu1 %v15542_v52  ;;  %v3438_v34 = vpop.xlane.xlu0 %3437  ;;  %10300 = vmatprep.mubr.msk.bf16.mxu1 %vm11650_vm1, %v15482_v38  ;;  %v3432_v16 = vpop.xlane.xlu1 %3431 }
 0x6b4   :  { %11274 = vrcp.f32 %v3438_v34  ;;  %v3571_v24 = vpack.c.bf16 %v3546_v3, %v3545_v42  ;;  %10310 = vmatprep.subr.bf16.mxu1 %v15482_v38 }
 0x6b5   :  { %11276 = vrcp.f32 %v3432_v16  ;;  %4996 = vrot.lane.b32.xlu1 %v11824_v8, %s11656_s27  ;;  %v11263_v21 = vpop.eup %11262  ;;  %v15546_v16 = vld [vmem:[#allocation53_spill] sm:$0xff] }
 0x6b6   :  { %10295 = vmatmul.mubr.msk.bf16.vlgmr.msra.gmra.mxu0 %vm1212_vm3, %v3571_v24  ;;  %v11265_v20 = vpop.eup %11264  ;;  %v3549_v33 = vmul.f32 %v11263_v21, %v12904_v17  ;;  %v15547_v24 = vld [vmem:[#allocation54_spill] sm:$0xff] }
 0x6b7   :  { %10305 = vmatpush3.bf16.msra.mxu0 %v15543_v5  ;;  %v3441_v63 = vpop.xlane.xlu0 %3440  ;;  %10306 = vmatprep.mubr.msk.bf16.mxu0 %vm11650_vm1, %v15482_v38  ;;  %v3447_v44 = vpop.xlane.xlu1 %3446  ;;  %v3547_v37 = vmul.f32 %v11265_v20, %v12896_v28 }
 0x6b8   :  { %10316 = vmatprep.subr.bf16.mxu0 %v15482_v38  ;;  %11278 = vrcp.f32 %v3447_v44 }
 0x6b9   :  { %v11267_v46 = vpop.eup %11266  ;;  %5047 = vrot.lane.b32.xlu1 %v15484_v49, %s11656_s27  ;;  %11280 = vrcp.f32 %v3441_v63 }
 0x6ba   :  { %v11269_v62 = vpop.eup %11268  ;;  %v3550_v59 = vmul.f32 %v11267_v46, %v12912_v43  ;;  %v15544_v43 = vld [vmem:[#allocation51_spill] sm:$0xff] }
 0x6bb   :  { %v3548_v13 = vmul.f32 %v11269_v62, %v12908_v23  ;;  %v3450_v26 = vpop.xlane.xlu0 %3449  ;;  %v3444_v0 = vpop.xlane.xlu1 %3443  ;;  %v15545_v23 = vld [vmem:[#allocation49_spill] sm:$0xff] }
 0x6bc   :  { %11282 = vrcp.f32 %v3450_v26  ;;  %v3573_v30 = vpack.c.bf16 %v3550_v59, %v3549_v33 }
 0x6bd   :  { %11284 = vrcp.f32 %v3444_v0  ;;  %5596 = vrot.lane.b32.xlu1 %v11755_v4, %s11657_s28  ;;  %v3572_v9 = vpack.c.bf16 %v3548_v13, %v3547_v37  ;;  %v11271_v17 = vpop.eup %11270  ;;  %v15549_v37 = vld [vmem:[#allocation56_spill] sm:$0xff] }
 0x6be   :  { %10307 = vmatmul.mubr.msk.bf16.vlgmr.msra.gmra.mxu0 %vm1212_vm3, %v3573_v30  ;;  %v11273_v51 = vpop.eup %11272  ;;  %v3553_v47 = vmul.f32 %v11271_v17, %v12922_v45 }
 0x6bf   :  { %10301 = vmatmul.mubr.msk.bf16.vlgmr.msra.gmra.mxu1 %vm1212_vm3, %v3572_v9  ;;  %10317 = vmatpush3.bf16.msra.mxu0 %v15544_v43  ;;  %v3453_v28 = vpop.xlane.xlu0 %3452  ;;  %v3459_v41 = vpop.xlane.xlu1 %3458  ;;  %v3551_v31 = vmul.f32 %v11273_v51, %v12916_v61 }
 0x6c0   :  { %10311 = vmatpush3.bf16.msra.mxu1 %v15545_v23  ;;  %10312 = vmatprep.mubr.msk.bf16.mxu1 %vm11650_vm1, %v15482_v38  ;;  %11286 = vrcp.f32 %v3459_v41 }
 0x6c1   :  { %v11275_v27 = vpop.eup %11274  ;;  %5690 = vrot.lane.b32.xlu1 %v11772_v22, %s11657_s28  ;;  %10318 = vmatprep.mubr.msk.bf16.mxu0 %vm11650_vm1, %v15482_v38  ;;  %11288 = vrcp.f32 %v3453_v28 }
 0x6c2   :  { %v11277_v55 = vpop.eup %11276  ;;  %v3554_v15 = vmul.f32 %v11275_v27, %v12932_v58  ;;  %10322 = vmatprep.subr.bf16.mxu1 %v15482_v38  ;;  %10328 = vmatprep.subr.bf16.mxu0 %v15482_v38 }
 0x6c3   :  { %v3552_v42 = vmul.f32 %v11277_v55, %v12928_v36  ;;  %v3462_v3 = vpop.xlane.xlu0 %3461  ;;  %v3456_v52 = vpop.xlane.xlu1 %3455 }
 0x6c4   :  { %11290 = vrcp.f32 %v3462_v3  ;;  %v3575_v34 = vpack.c.bf16 %v3554_v15, %v3553_v47 }
 0x6c5   :  { %11292 = vrcp.f32 %v3456_v52  ;;  %5784 = vrot.lane.b32.xlu1 %v11779_v32, %s11657_s28  ;;  %v3574_v45 = vpack.c.bf16 %v3552_v42, %v3551_v31  ;;  %v11279_v58 = vpop.eup %11278 }
 0x6c6   :  { %10319 = vmatmul.mubr.msk.bf16.vlgmr.msra.gmra.mxu0 %vm1212_vm3, %v3575_v34  ;;  %v11281_v61 = vpop.eup %11280  ;;  %v3557_v5 = vmul.f32 %v11279_v58, %v12940_v56  ;;  %v15548_v56 = vld [vmem:[#allocation55_spill] sm:$0xff] }
 0x6c7   :  { %10313 = vmatmul.mubr.msk.bf16.vlgmr.msra.gmra.mxu1 %vm1212_vm3, %v3574_v45  ;;  %10329 = vmatpush3.bf16.msra.mxu0 %v15546_v16  ;;  %v3555_v20 = vmul.f32 %v11281_v61, %v12936_v18  ;;  %v3465_v59 = vpop.xlane.xlu0 %3464  ;;  %v4336_v9 = vpop.permute.xlu1 %4335 }
 0x6c8   :  { %10323 = vmatpush3.bf16.msra.mxu1 %v15547_v24  ;;  %10324 = vmatprep.mubr.msk.bf16.mxu1 %vm11650_vm1, %v15482_v38  ;;  %v4341_v28 = vsel %vm414_vm2, %v4336_v9, 0  ;;  %11294 = vrcp.f32 %v3465_v59 }
 0x6c9   :  { %v11283_v36 = vpop.eup %11282  ;;  %5878 = vrot.lane.b32.xlu1 %v11793_v48, %s11657_s28  ;;  %10330 = vmatprep.mubr.msk.bf16.mxu0 %vm11650_vm1, %v15482_v38 }
 0x6ca   :  { %v11285_v21 = vpop.eup %11284  ;;  %v3558_v63 = vmul.f32 %v11283_v36, %v12948_v39  ;;  %10334 = vmatprep.subr.bf16.mxu1 %v15482_v38  ;;  %10340 = vmatprep.subr.bf16.mxu0 %v15482_v38 }
 0x6cb   :  { %v3556_v44 = vmul.f32 %v11285_v21, %v12946_v60  ;;  %v4387_v51 = vpop.permute.xlu0 %4386 }
 0x6cc   :  { %v3577_v46 = vpack.c.bf16 %v3558_v63, %v3557_v5  ;;  %v4392_v24 = vsel %vm414_vm2, %v4387_v51, 0 }
 0x6cd   :  { %5972 = vrot.lane.b32.xlu1 %v11802_v54, %s11657_s28  ;;  %v3576_v62 = vpack.c.bf16 %v3556_v44, %v3555_v20  ;;  %v11287_v33 = vpop.eup %11286 }
 0x6ce   :  { %10331 = vmatmul.mubr.msk.bf16.vlgmr.msra.gmra.mxu0 %vm1212_vm3, %v3577_v46  ;;  %v11289_v39 = vpop.eup %11288  ;;  %v3561_v13 = vmul.f32 %v11287_v33, %v12956_v10 }
 0x6cf   :  { %10325 = vmatmul.mubr.msk.bf16.vlgmr.msra.gmra.mxu1 %vm1212_vm3, %v3576_v62  ;;  %10341 = vmatpush3.bf16.msra.mxu0 %v15548_v56  ;;  %v3559_v0 = vmul.f32 %v11289_v39, %v12952_v25  ;;  %v4438_v25 = vpop.permute.xlu0 %4437 }
 0x6d0   :  { %10335 = vmatpush3.bf16.msra.mxu1 %v15549_v37  ;;  %10336 = vmatprep.mubr.msk.bf16.mxu1 %vm11650_vm1, %v15482_v38  ;;  %v4443_v55 = vsel %vm414_vm2, %v4438_v25, 0 }
 0x6d1   :  { %v11291_v18 = vpop.eup %11290  ;;  %6019 = vrot.lane.b32.xlu1 %v11822_v7, %s11657_s28  ;;  %10342 = vmatprep.mubr.msk.bf16.mxu0 %vm11650_vm1, %v15482_v38 }
 0x6d2   :  { %v11293_v60 = vpop.eup %11292  ;;  %v3562_v26 = vmul.f32 %v11291_v18, %v12964_v12  ;;  %10346 = vmatprep.subr.bf16.mxu1 %v15482_v38  ;;  %10352 = vmatprep.subr.bf16.mxu0 %v15482_v38 }
 0x6d3   :  { %v3560_v30 = vmul.f32 %v11293_v60, %v12962_v40  ;;  %v4489_v10 = vpop.permute.xlu0 %4488 }
 0x6d4   :  { %v3579_v17 = vpack.c.bf16 %v3562_v26, %v3561_v13  ;;  %v4494_v63 = vsel %vm414_vm2, %v4489_v10, 0 }
 0x6d5   :  { %6113 = vrot.lane.b32.xlu1 %v11830_v11, %s11657_s28  ;;  %v3578_v43 = vpack.c.bf16 %v3560_v30, %v3559_v0  ;;  %v11295_v31 = vpop.eup %11294 }
 0x6d6   :  { %10343 = vmatmul.mubr.msk.bf16.vlgmr.msra.gmra.mxu0 %vm1212_vm3, %v3579_v17  ;;  %v3563_v45 = vmul.f32 %v11295_v31, %v12968_v2 }
 0x6d7   :  { %10337 = vmatmul.mubr.msk.bf16.vlgmr.msra.gmra.mxu1 %vm1212_vm3, %v3578_v43  ;;  %10353 = vmatpush3.bf16.xpose.msra.mxu0 %v4341_v28  ;;  %v4540_v40 = vpop.permute.xlu0 %4539 }
 0x6d8   :  { %10347 = vmatpush3.bf16.msra.mxu1 %v12997_v29  ;;  %10354 = vmatprep.mubr.msk.bf16.mxu0 %vm11650_vm1, %v15482_v38  ;;  %v4545_v3 = vsel %vm414_vm2, %v4540_v40, 0 }
 0x6d9   :  { %6207 = vrot.lane.b32.xlu1 %v15484_v49, %s11657_s28  ;;  %10364 = vmatprep.subr.bf16.mxu0 %v15482_v38 }
 0x6da   :  { %10348 = vmatprep.mubr.msk.bf16.mxu1 %vm11650_vm1, %v15482_v38  ;;  %10358 = vmatprep.subr.bf16.mxu1 %v15482_v38 }
 0x6db   :  { %v4591_v12 = vpop.permute.xlu0 %4590 }
 0x6dc   :  { %v4596_v33 = vsel %vm414_vm2, %v4591_v12, 0 }
 0x6df   :  { %v4642_v23 = vpop.permute.xlu0 %4641 }
 0x6e0   :  { %v4647_v5 = vsel %vm414_vm2, %v4642_v23, 0 }
 0x6e3   :  { %v13180_v41 = vpop.permute.xlu0 %4692 }
 0x6e4   :  { %v4698_v18 = vsel %vm414_vm2, %v13180_v41, 0 }
 0x6e7   :  { %v4744_v47 = vpop.permute.xlu0 %4743 }
 0x6e8   :  { %v4749_v44 = vsel %vm414_vm2, %v4744_v47, 0 }
 0x6eb   :  { %v13188_v52 = vpop.permute.xlu0 %4794 }
 0x6ec   :  { %v4800_v9 = vsel %vm414_vm2, %v13188_v52, 0 }
 0x6ef   :  { %v4846_v36 = vpop.permute.xlu0 %4845 }
 0x6f0   :  { %v4851_v39 = vsel %vm414_vm2, %v4846_v36, 0 }
 0x6f8   :  { %v3468_v29 = vpop.xlane.xlu1 %3467 }
 0x6f9   :  { %11296 = vrcp.f32 %v3468_v29 }
 0x6fc   :  { %v4334_v27 = vpop.permute.xlu1 %4333 }
 0x6fd   :  { %10355 = vmatmul.mubr.msk.bf16.vlgmr.msra.gmra.mxu0 %vm414_vm2, %v4334_v27 }
 0x6fe   :  { %10365 = vmatpush3.bf16.xpose.msra.mxu0 %v4443_v55  ;;  %10366 = vmatprep.mubr.msk.bf16.mxu0 %vm11650_vm1, %v15482_v38 }
 0x6ff   :  { %10376 = vmatprep.subr.bf16.mxu0 %v15482_v38 }
 0x700   :  { %v4385_v15 = vpop.permute.xlu1 %4384 }
 0x704   :  { %v4436_v42 = vpop.permute.xlu1 %4435 }
 0x705   :  { %10367 = vmatmul.mubr.msk.bf16.vlgmr.msra.gmra.mxu0 %vm414_vm2, %v4436_v42 }
 0x706   :  { %v11297_v34 = vpop.eup %11296  ;;  %10377 = vmatpush3.bf16.xpose.msra.mxu0 %v4545_v3  ;;  %10378 = vmatprep.mubr.msk.bf16.mxu0 %vm11650_vm1, %v15482_v38 }
 0x707   :  { %v3564_v58 = vmul.f32 %v11297_v34, %v12989_v50  ;;  %10388 = vmatprep.subr.bf16.mxu0 %v15482_v38  ;;  %v4897_v50 = vpop.permute.xlu0 %4896 }
 0x708   :  { %v4487_v16 = vpop.permute.xlu1 %4486  ;;  %v4902_v25 = vsel %vm414_vm2, %v4897_v50, 0 }
 0x709   :  { %v3580_v61 = vpack.c.bf16 %v3564_v58, %v3563_v45 }
 0x70b   :  { %10349 = vmatmul.mubr.msk.bf16.vlgmr.msra.gmra.mxu1 %vm1212_vm3, %v3580_v61  ;;  %v4948_v46 = vpop.permute.xlu0 %4947 }
 0x70c   :  { %10359 = vmatpush3.bf16.xpose.msra.mxu1 %v4392_v24  ;;  %v4538_v21 = vpop.permute.xlu1 %4537  ;;  %10360 = vmatprep.mubr.msk.bf16.mxu1 %vm11650_vm1, %v15482_v38  ;;  %v4953_v26 = vsel %vm414_vm2, %v4948_v46, 0 }
 0x70d   :  { %10379 = vmatmul.mubr.msk.bf16.vlgmr.msra.gmra.mxu0 %vm414_vm2, %v4538_v21  ;;  %10370 = vmatprep.subr.bf16.mxu1 %v15482_v38 }
 0x70e   :  { %10389 = vmatpush3.bf16.xpose.msra.mxu0 %v4647_v5  ;;  %10390 = vmatprep.mubr.msk.bf16.mxu0 %vm11650_vm1, %v15482_v38 }
 0x70f   :  { %10400 = vmatprep.subr.bf16.mxu0 %v15482_v38  ;;  %v4999_v59 = vpop.permute.xlu0 %4998 }
 0x710   :  { %v4589_v2 = vpop.permute.xlu1 %4588  ;;  %v5004_v12 = vsel %vm414_vm2, %v4999_v59, 0 }
 0x713   :  { %10361 = vmatmul.mubr.msk.bf16.vlgmr.msra.gmra.mxu1 %vm414_vm2, %v4385_v15  ;;  %v5050_v60 = vpop.permute.xlu0 %5049 }
 0x714   :  { %10371 = vmatpush3.bf16.xpose.msra.mxu1 %v4494_v63  ;;  %v4640_v20 = vpop.permute.xlu1 %4639  ;;  %10372 = vmatprep.mubr.msk.bf16.mxu1 %vm11650_vm1, %v15482_v38  ;;  %v5055_v43 = vsel %vm414_vm2, %v5050_v60, 0 }
 0x715   :  { %10391 = vmatmul.mubr.msk.bf16.vlgmr.msra.gmra.mxu0 %vm414_vm2, %v4640_v20  ;;  %10382 = vmatprep.subr.bf16.mxu1 %v15482_v38 }
 0x716   :  { %10401 = vmatpush3.bf16.xpose.msra.mxu0 %v4749_v44  ;;  %10402 = vmatprep.mubr.msk.bf16.mxu0 %vm11650_vm1, %v15482_v38 }
 0x717   :  { %10412 = vmatprep.subr.bf16.mxu0 %v15482_v38  ;;  %v5101_v30 = vpop.permute.xlu0 %5100 }
 0x718   :  { %v4691_v62 = vpop.permute.xlu1 %4690  ;;  %v5106_v23 = vsel %vm414_vm2, %v5101_v30, 0 }
 0x71b   :  { %10373 = vmatmul.mubr.msk.bf16.vlgmr.msra.gmra.mxu1 %vm414_vm2, %v4487_v16  ;;  %v5099_v28 = vpop.permute.xlu0 %5098 }
 0x71c   :  { %10383 = vmatpush3.bf16.xpose.msra.mxu1 %v4596_v33  ;;  %v4742_v56 = vpop.permute.xlu1 %4741  ;;  %10384 = vmatprep.mubr.msk.bf16.mxu1 %vm11650_vm1, %v15482_v38 }
 0x71d   :  { %10403 = vmatmul.mubr.msk.bf16.vlgmr.msra.gmra.mxu0 %vm414_vm2, %v4742_v56  ;;  %10394 = vmatprep.subr.bf16.mxu1 %v15482_v38 }
 0x71e   :  { %10413 = vmatpush3.bf16.xpose.msra.mxu0 %v4851_v39  ;;  %10414 = vmatprep.mubr.msk.bf16.mxu0 %vm11650_vm1, %v15482_v38 }
 0x71f   :  { %10424 = vmatprep.subr.bf16.mxu0 %v15482_v38  ;;  %v5550_v40 = vpop.permute.xlu0 %5549 }
 0x720   :  { %v4793_v37 = vpop.permute.xlu1 %4792 }
 0x723   :  { %10385 = vmatmul.mubr.msk.bf16.vlgmr.msra.gmra.mxu1 %vm414_vm2, %v4589_v2 }
 0x724   :  { %10395 = vmatpush3.bf16.xpose.msra.mxu1 %v4698_v18  ;;  %v4844_v13 = vpop.permute.xlu1 %4843  ;;  %10396 = vmatprep.mubr.msk.bf16.mxu1 %vm11650_vm1, %v15482_v38 }
 0x725   :  { %10415 = vmatmul.mubr.msk.bf16.vlgmr.msra.gmra.mxu0 %vm414_vm2, %v4844_v13  ;;  %10406 = vmatprep.subr.bf16.mxu1 %v15482_v38 }
 0x726   :  { %10425 = vmatpush3.bf16.xpose.msra.mxu0 %v4953_v26  ;;  %10426 = vmatprep.mubr.msk.bf16.mxu0 %vm11650_vm1, %v15482_v38 }
 0x727   :  { %10436 = vmatprep.subr.bf16.mxu0 %v15482_v38 }
 0x728   :  { %v4895_v0 = vpop.permute.xlu1 %4894 }
 0x72b   :  { %10397 = vmatmul.mubr.msk.bf16.vlgmr.msra.gmra.mxu1 %vm414_vm2, %v4691_v62 }
 0x72c   :  { %10407 = vmatpush3.bf16.xpose.msra.mxu1 %v4800_v9  ;;  %v4946_v17 = vpop.permute.xlu1 %4945  ;;  %10408 = vmatprep.mubr.msk.bf16.mxu1 %vm11650_vm1, %v15482_v38 }
 0x72d   :  { %10427 = vmatmul.mubr.msk.bf16.vlgmr.msra.gmra.mxu0 %vm414_vm2, %v4946_v17  ;;  %10418 = vmatprep.subr.bf16.mxu1 %v15482_v38 }
 0x72e   :  { %10437 = vmatpush3.bf16.xpose.msra.mxu0 %v5055_v43  ;;  %10438 = vmatprep.mubr.msk.bf16.mxu0 %vm11650_vm1, %v15482_v38 }
 0x72f   :  { %10448 = vmatprep.subr.bf16.mxu0 %v15482_v38 }
 0x730   :  { %v4997_v51 = vpop.permute.xlu1 %4996 }
 0x733   :  { %10409 = vmatmul.mubr.msk.bf16.vlgmr.msra.gmra.mxu1 %vm414_vm2, %v4793_v37 }
 0x734   :  { %10419 = vmatpush3.bf16.xpose.msra.mxu1 %v4902_v25  ;;  %v5048_v10 = vpop.permute.xlu1 %5047  ;;  %10420 = vmatprep.mubr.msk.bf16.mxu1 %vm11650_vm1, %v15482_v38 }
 0x735   :  { %10439 = vmatmul.mubr.msk.bf16.vlgmr.msra.gmra.mxu0 %vm414_vm2, %v5048_v10  ;;  %10430 = vmatprep.subr.bf16.mxu1 %v15482_v38 }
 0x736   :  { %10449 = vmatpush3.bf16.msra.mxu0 %v5550_v40  ;;  %10450 = vmatprep.mubr.msk.bf16.mxu0 %vm11650_vm1, %v15482_v38 }
 0x737   :  { %10460 = vmatprep.subr.bf16.mxu0 %v15482_v38 }
 0x738   :  { %v5597_v29 = vpop.permute.xlu1 %5596 }
 0x73b   :  { %10421 = vmatmul.mubr.msk.bf16.vlgmr.msra.gmra.mxu1 %vm414_vm2, %v4895_v0 }
 0x73c   :  { %10431 = vmatpush3.bf16.xpose.msra.mxu1 %v5004_v12  ;;  %10432 = vmatprep.mubr.msk.bf16.mxu1 %vm11650_vm1, %v15482_v38 }
 0x73d   :  { %10442 = vmatprep.subr.bf16.mxu1 %v15482_v38 }
 0x743   :  { %10433 = vmatmul.mubr.msk.bf16.vlgmr.msra.gmra.mxu1 %vm414_vm2, %v4997_v51 }
 0x744   :  { %10443 = vmatpush3.bf16.xpose.msra.mxu1 %v5106_v23  ;;  %10444 = vmatprep.mubr.msk.bf16.mxu1 %vm11650_vm1, %v15482_v38 }
 0x745   :  { %10454 = vmatprep.subr.bf16.mxu1 %v15482_v38 }
 0x74b   :  { %10445 = vmatmul.mubr.msk.bf16.vlgmr.msra.gmra.mxu1 %vm414_vm2, %v5099_v28 }
 0x74c   :  { %v13268_v41 = vpop.f32.mrf.mxu0  ;;  %10455 = vmatpush3.bf16.msra.mxu1 %v5597_v29  ;;  %10456 = vmatprep.mubr.msk.bf16.mxu1 %vm11650_vm1, %v15482_v38 }
 0x74d   :  { %15550 = vst [vmem:[#allocation45_spill] sm:$0xff] %v13268_v41  ;;  %10466 = vmatprep.subr.bf16.mxu1 %v15482_v38 }
 0x74e   :  { %v10260_v27 = vpop.f32.mrf.mxu0 }
 0x750   :  { %v13273_v55 = vpop.f32.mrf.mxu0 }
 0x751   :  { %15551 = vst [vmem:[#allocation48_spill] sm:$0xff] %v13273_v55 }
 0x752   :  { %v10261_v15 = vpop.f32.mrf.mxu0 }
 0x762   :  { %v13277_v31 = vpop.f32.mrf.mxu1 }
 0x763   :  { %15552 = vst [vmem:[#allocation46_spill] sm:$0xff] %v13277_v31 }
 0x764   :  { %v10266_v42 = vpop.f32.mrf.mxu1 }
 0x766   :  { %v13279_v3 = vpop.f32.mrf.mxu1  ;;  %v13281_v52 = vpop.f32.mrf.mxu0 }
 0x767   :  { %15553 = vst [vmem:[#allocation50_spill] sm:$0xff] %v13279_v3  ;;  %15554 = vst [vmem:[#allocation47_spill] sm:$0xff] %v13281_v52 }
 0x768   :  { %v10267_v45 = vpop.f32.mrf.mxu1  ;;  %v10272_v58 = vpop.f32.mrf.mxu0 }
 0x76a   :  { %v13285_v16 = vpop.f32.mrf.mxu0  ;;  %v13287_v61 = vpop.f32.mrf.mxu1 }
 0x76b   :  { %15555 = vst [vmem:[#allocation52_spill] sm:$0xff] %v13285_v16  ;;  %15556 = vst [vmem:[#allocation51_spill] sm:$0xff] %v13287_v61  ;;  %v13501_v61 = vpop.permute.xlu0 %5643 }
 0x76c   :  { %v10273_v36 = vpop.f32.mrf.mxu0  ;;  %v10278_v21 = vpop.f32.mrf.mxu1 }
 0x76e   :  { %v13291_v5 = vpop.f32.mrf.mxu1  ;;  %v13293_v2 = vpop.f32.mrf.mxu0 }
 0x76f   :  { %15557 = vst [vmem:[#allocation49_spill] sm:$0xff] %v13291_v5  ;;  %15558 = vst [vmem:[#allocation53_spill] sm:$0xff] %v13293_v2 }
 0x770   :  { %v10279_v63 = vpop.f32.mrf.mxu1  ;;  %v10284_v20 = vpop.f32.mrf.mxu0 }
 0x772   :  { %v13297_v44 = vpop.f32.mrf.mxu0  ;;  %v13299_v46 = vpop.f32.mrf.mxu1 }
 0x773   :  { %15559 = vst [vmem:[#allocation54_spill] sm:$0xff] %v13297_v44  ;;  %15560 = vst [vmem:[#allocation55_spill] sm:$0xff] %v13299_v46 }
 0x774   :  { %v10285_v33 = vpop.f32.mrf.mxu0  ;;  %v10290_v56 = vpop.f32.mrf.mxu1 }
 0x776   :  { %v13303_v39 = vpop.f32.mrf.mxu1  ;;  %v13305_v59 = vpop.f32.mrf.mxu0 }
 0x777   :  { %15561 = vst [vmem:[#allocation56_spill] sm:$0xff] %v13303_v39  ;;  %15562 = vst [vmem:[#allocation57_spill] sm:$0xff] %v13305_v59 }
 0x778   :  { %v10291_v18 = vpop.f32.mrf.mxu1  ;;  %v10296_v60 = vpop.f32.mrf.mxu0 }
 0x77a   :  { %v13309_v13 = vpop.f32.mrf.mxu0 }
 0x77b   :  { %15563 = vst [vmem:[#allocation58_spill] sm:$0xff] %v13309_v13 }
 0x77c   :  { %v10297_v0 = vpop.f32.mrf.mxu0 }
 0x77e   :  { %v13313_v30 = vpop.f32.mrf.mxu0 }
 0x77f   :  { %15564 = vst [vmem:[#allocation59_spill] sm:$0xff] %v13313_v30  ;;  %v13315_v9 = vpop.f32.mrf.mxu1 }
 0x780   :  { %15565 = vst [vmem:[#allocation60_spill] sm:$0xff] %v13315_v9  ;;  %v10308_v17 = vpop.f32.mrf.mxu0 }
 0x781   :  { %v10302_v43 = vpop.f32.mrf.mxu1 }
 0x782   :  { %v13317_v28 = vpop.f32.mrf.mxu0 }
 0x783   :  { %15566 = vst [vmem:[#allocation61_spill] sm:$0xff] %v13317_v28  ;;  %v13319_v51 = vpop.f32.mrf.mxu1 }
 0x784   :  { %15567 = vst [vmem:[#allocation62_spill] sm:$0xff] %v13319_v51  ;;  %v10309_v40 = vpop.f32.mrf.mxu0 }
 0x785   :  { %v10303_v12 = vpop.f32.mrf.mxu1 }
 0x786   :  { %v13325_v23 = vpop.f32.mrf.mxu0 }
 0x787   :  { %15568 = vst [vmem:[#allocation63_spill] sm:$0xff] %v13325_v23  ;;  %v13327_v29 = vpop.f32.mrf.mxu1 }
 0x788   :  { %15569 = vst [vmem:[#allocation64_spill] sm:$0xff] %v13327_v29  ;;  %v10320_v27 = vpop.f32.mrf.mxu0 }
 0x789   :  { %v10314_v15 = vpop.f32.mrf.mxu1 }
 0x78a   :  { %v13329_v42 = vpop.f32.mrf.mxu0 }
 0x78b   :  { %15570 = vst [vmem:[#allocation65_spill] sm:$0xff] %v13329_v42  ;;  %v13331_v45 = vpop.f32.mrf.mxu1 }
 0x78c   :  { %15571 = vst [vmem:[#allocation66_spill] sm:$0xff] %v13331_v45  ;;  %v10321_v21 = vpop.f32.mrf.mxu0 }
 0x78d   :  { %v10315_v63 = vpop.f32.mrf.mxu1 }
 0x78e   :  { %v13337_v20 = vpop.f32.mrf.mxu0 }
 0x78f   :  { %15572 = vst [vmem:[#allocation67_spill] sm:$0xff] %v13337_v20  ;;  %v13339_v33 = vpop.f32.mrf.mxu1 }
 0x790   :  { %15573 = vst [vmem:[#allocation68_spill] sm:$0xff] %v13339_v33  ;;  %v10332_v56 = vpop.f32.mrf.mxu0 }
 0x791   :  { %v10326_v18 = vpop.f32.mrf.mxu1 }
 0x792   :  { %v13341_v60 = vpop.f32.mrf.mxu0 }
 0x793   :  { %15574 = vst [vmem:[#allocation69_spill] sm:$0xff] %v13341_v60  ;;  %v13343_v0 = vpop.f32.mrf.mxu1 }
 0x794   :  { %15575 = vst [vmem:[#allocation70_spill] sm:$0xff] %v13343_v0  ;;  %v10333_v40 = vpop.f32.mrf.mxu0 }
 0x795   :  { %v10327_v12 = vpop.f32.mrf.mxu1 }
 0x796   :  { %v13349_v27 = vpop.f32.mrf.mxu0 }
 0x797   :  { %15576 = vst [vmem:[#allocation71_spill] sm:$0xff] %v13349_v27  ;;  %v13351_v15 = vpop.f32.mrf.mxu1 }
 0x798   :  { %15577 = vst [vmem:[#allocation72_spill] sm:$0xff] %v13351_v15  ;;  %v10344_v21 = vpop.f32.mrf.mxu0 }
 0x799   :  { %v10338_v63 = vpop.f32.mrf.mxu1 }
 0x79a   :  { %v13353_v56 = vpop.f32.mrf.mxu0 }
 0x79b   :  { %15578 = vst [vmem:[#allocation73_spill] sm:$0xff] %v13353_v56  ;;  %v13355_v18 = vpop.f32.mrf.mxu1 }
 0x79c   :  { %15579 = vst [vmem:[#allocation74_spill] sm:$0xff] %v13355_v18  ;;  %v10345_v36 = vpop.f32.mrf.mxu0 }
 0x79d   :  { %v10339_v43 = vpop.f32.mrf.mxu1 }
 0x7bd   :  { %v13361_v40 = vpop.f32.mrf.mxu0 }
 0x7be   :  { %v5149_v12 = vsel %vm1212_vm3, %v13361_v40, -inf }
 0x7bf   :  { %5150 = vmax.xlane.f32.xlu1 %v5149_v12  ;;  %v10356_v21 = vpop.f32.mrf.mxu0 }
 0x7c1   :  { %v13365_v63 = vpop.f32.mrf.mxu0 }
 0x7c2   :  { %v5152_v25 = vsel %vm1212_vm3, %v13365_v63, -inf }
 0x7c3   :  { %5153 = vmax.xlane.f32.xlu0 %v5152_v25  ;;  %v10357_v10 = vpop.f32.mrf.mxu0 }
 0x7c5   :  { %v13369_v58 = vpop.f32.mrf.mxu0 }
 0x7c7   :  { %v10368_v26 = vpop.f32.mrf.mxu0 }
 0x7c9   :  { %v13371_v17 = vpop.f32.mrf.mxu0 }
 0x7cb   :  { %v13373_v36 = vpop.f32.mrf.mxu1  ;;  %v10369_v43 = vpop.f32.mrf.mxu0 }
 0x7cc   :  { %15580 = vst [vmem:[#allocation75_spill] sm:$0xff] %v13373_v36 }
 0x7cd   :  { %v10350_v37 = vpop.f32.mrf.mxu1  ;;  %v13375_v62 = vpop.f32.mrf.mxu0 }
 0x7cf   :  { %v13377_v12 = vpop.f32.mrf.mxu1  ;;  %v10380_v21 = vpop.f32.mrf.mxu0 }
 0x7d0   :  { %15581 = vst [vmem:[#allocation76_spill] sm:$0xff] %v13377_v12 }
 0x7d1   :  { %v10351_v24 = vpop.f32.mrf.mxu1  ;;  %v13381_v25 = vpop.f32.mrf.mxu0 }
 0x7d2   :  { %v5161_v24 = vsel %vm1212_vm3, %v13369_v58, -inf }
 0x7d3   :  { %v13383_v10 = vpop.f32.mrf.mxu1  ;;  %v10381_v26 = vpop.f32.mrf.mxu0 }
 0x7d4   :  { %v5155_v34 = vsel %vm1212_vm3, %v13383_v10, -inf }
 0x7d5   :  { %5156 = vmax.xlane.f32.xlu0 %v5155_v34  ;;  %v10362_v43 = vpop.f32.mrf.mxu1  ;;  %v13387_v37 = vpop.f32.mrf.mxu0 }
 0x7d6   :  { %v5164_v43 = vsel %vm1212_vm3, %v13371_v17, -inf }
 0x7d7   :  { %v13389_v47 = vpop.f32.mrf.mxu1  ;;  %v10392_v27 = vpop.f32.mrf.mxu0 }
 0x7d8   :  { %v5158_v21 = vsel %vm1212_vm3, %v13389_v47, -inf }
 0x7d9   :  { %5159 = vmax.xlane.f32.xlu1 %v5158_v21  ;;  %v10363_v50 = vpop.f32.mrf.mxu1  ;;  %5162 = vmax.xlane.f32.xlu0 %v5161_v24  ;;  %v13395_v26 = vpop.f32.mrf.mxu0  ;;  %v5173_v24 = vsel %vm1212_vm3, %v13375_v62, -inf }
 0x7db   :  { %v13397_v36 = vpop.f32.mrf.mxu1  ;;  %v10393_v34 = vpop.f32.mrf.mxu0 }
 0x7dc   :  { %v5167_v27 = vsel %vm1212_vm3, %v13397_v36, -inf }
 0x7dd   :  { %5165 = vmax.xlane.f32.xlu1 %v5164_v43  ;;  %5168 = vmax.xlane.f32.xlu0 %v5167_v27  ;;  %v10374_v12 = vpop.f32.mrf.mxu1  ;;  %v13403_v56 = vpop.f32.mrf.mxu0 }
 0x7de   :  { %v5176_v12 = vsel %vm1212_vm3, %v13381_v25, -inf }
 0x7df   :  { %v13405_v15 = vpop.f32.mrf.mxu1  ;;  %v10404_v50 = vpop.f32.mrf.mxu0 }
 0x7e0   :  { %v5170_v21 = vsel %vm1212_vm3, %v13405_v15, -inf }
 0x7e1   :  { %5171 = vmax.xlane.f32.xlu1 %v5170_v21  ;;  %v10375_v34 = vpop.f32.mrf.mxu1  ;;  %5174 = vmax.xlane.f32.xlu0 %v5173_v24  ;;  %v13411_v18 = vpop.f32.mrf.mxu0 }
 0x7e2   :  { %v5185_v34 = vsel %vm1212_vm3, %v13387_v37, -inf }
 0x7e3   :  { %v13413_v20 = vpop.f32.mrf.mxu1  ;;  %v10405_v43 = vpop.f32.mrf.mxu0 }
 0x7e4   :  { %v5179_v27 = vsel %vm1212_vm3, %v13413_v20, -inf }
 0x7e5   :  { %5177 = vmax.xlane.f32.xlu1 %v5176_v12  ;;  %5180 = vmax.xlane.f32.xlu0 %v5179_v27  ;;  %v10386_v50 = vpop.f32.mrf.mxu1  ;;  %v13419_v60 = vpop.f32.mrf.mxu0  ;;  %v5188_v27 = vsel %vm1212_vm3, %v13395_v26, -inf }
 0x7e7   :  { %v13421_v33 = vpop.f32.mrf.mxu1  ;;  %v10416_v21 = vpop.f32.mrf.mxu0 }
 0x7e8   :  { %v5182_v24 = vsel %vm1212_vm3, %v13421_v33, -inf }
 0x7e9   :  { %5183 = vmax.xlane.f32.xlu1 %v5182_v24  ;;  %v10387_v43 = vpop.f32.mrf.mxu1  ;;  %5186 = vmax.xlane.f32.xlu0 %v5185_v34  ;;  %v13427_v0 = vpop.f32.mrf.mxu0 }
 0x7ea   :  { %v5197_v43 = vsel %vm1212_vm3, %v13403_v56, -inf }
 0x7eb   :  { %v13429_v23 = vpop.f32.mrf.mxu1  ;;  %v10417_v12 = vpop.f32.mrf.mxu0 }
 0x7ec   :  { %v5191_v50 = vsel %vm1212_vm3, %v13429_v23, -inf }
 0x7ed   :  { %5189 = vmax.xlane.f32.xlu1 %v5188_v27  ;;  %5192 = vmax.xlane.f32.xlu0 %v5191_v50  ;;  %v10398_v21 = vpop.f32.mrf.mxu1  ;;  %v13435_v42 = vpop.f32.mrf.mxu0  ;;  %v5200_v50 = vsel %vm1212_vm3, %v13411_v18, -inf }
 0x7ef   :  { %v13437_v29 = vpop.f32.mrf.mxu1  ;;  %v10428_v24 = vpop.f32.mrf.mxu0 }
 0x7f0   :  { %v5194_v34 = vsel %vm1212_vm3, %v13437_v29, -inf }
 0x7f1   :  { %5195 = vmax.xlane.f32.xlu1 %v5194_v34  ;;  %v10399_v12 = vpop.f32.mrf.mxu1  ;;  %5198 = vmax.xlane.f32.xlu0 %v5197_v43  ;;  %v13443_v45 = vpop.f32.mrf.mxu0 }
 0x7f2   :  { %v5209_v12 = vsel %vm1212_vm3, %v13419_v60, -inf  ;;  %v5224_v46 = vsel %vm1212_vm3, %v13443_v45, -inf }
 0x7f3   :  { %v13445_v30 = vpop.f32.mrf.mxu1  ;;  %v10429_v27 = vpop.f32.mrf.mxu0 }
 0x7f4   :  { %v5203_v21 = vsel %vm1212_vm3, %v13445_v30, -inf }
 0x7f5   :  { %5201 = vmax.xlane.f32.xlu1 %v5200_v50  ;;  %5204 = vmax.xlane.f32.xlu0 %v5203_v21  ;;  %v10410_v24 = vpop.f32.mrf.mxu1  ;;  %v13451_v28 = vpop.f32.mrf.mxu0  ;;  %v5212_v21 = vsel %vm1212_vm3, %v13427_v0, -inf }
 0x7f7   :  { %v13453_v9 = vpop.f32.mrf.mxu1  ;;  %v10440_v34 = vpop.f32.mrf.mxu0 }
 0x7f8   :  { %v5206_v43 = vsel %vm1212_vm3, %v13453_v9, -inf }
 0x7f9   :  { %5207 = vmax.xlane.f32.xlu1 %v5206_v43  ;;  %v10411_v27 = vpop.f32.mrf.mxu1  ;;  %5210 = vmax.xlane.f32.xlu0 %v5209_v12  ;;  %v13459_v51 = vpop.f32.mrf.mxu0  ;;  %v5221_v12 = vsel %vm1212_vm3, %v13435_v42, -inf }
 0x7fa   :  { %v5236_v2 = vsel %vm1212_vm3, %v13459_v51, -inf }
 0x7fb   :  { %v13461_v59 = vpop.f32.mrf.mxu1  ;;  %v10441_v50 = vpop.f32.mrf.mxu0 }
 0x7fc   :  { %v5215_v24 = vsel %vm1212_vm3, %v13461_v59, -inf }
 0x7fd   :  { %5213 = vmax.xlane.f32.xlu1 %v5212_v21  ;;  %5216 = vmax.xlane.f32.xlu0 %v5215_v24  ;;  %v10422_v34 = vpop.f32.mrf.mxu1 }
 0x7ff   :  { %v13467_v13 = vpop.f32.mrf.mxu1 }
 0x800   :  { %v5218_v43 = vsel %vm1212_vm3, %v13467_v13, -inf }
 0x801   :  { %5219 = vmax.xlane.f32.xlu1 %v5218_v43  ;;  %v10423_v27 = vpop.f32.mrf.mxu1  ;;  %5222 = vmax.xlane.f32.xlu0 %v5221_v12  ;;  %v5233_v43 = vsel %vm1212_vm3, %v13451_v28, -inf }
 0x803   :  { %v13473_v50 = vpop.f32.mrf.mxu1 }
 0x804   :  { %v5227_v21 = vsel %vm1212_vm3, %v13473_v50, -inf }
 0x805   :  { %5225 = vmax.xlane.f32.xlu1 %v5224_v46  ;;  %5228 = vmax.xlane.f32.xlu0 %v5227_v21  ;;  %v10434_v24 = vpop.f32.mrf.mxu1 }
 0x807   :  { %v13479_v34 = vpop.f32.mrf.mxu1 }
 0x808   :  { %v5230_v39 = vsel %vm1212_vm3, %v13479_v34, -inf }
 0x809   :  { %5231 = vmax.xlane.f32.xlu1 %v5230_v39  ;;  %v10435_v12 = vpop.f32.mrf.mxu1  ;;  %5234 = vmax.xlane.f32.xlu0 %v5233_v43 }
 0x80a   :  { %v13495_v12 = vpop.permute.xlu1 %5690 }
 0x80b   :  { %v13485_v27 = vpop.f32.mrf.mxu1  ;;  %15582 = vst [vmem:[#allocation77_spill] sm:$0xff] %v13495_v12 }
 0x80c   :  { %v5239_v46 = vsel %vm1212_vm3, %v13485_v27, -inf }
 0x80d   :  { %5237 = vmax.xlane.f32.xlu1 %v5236_v2  ;;  %5240 = vmax.xlane.f32.xlu0 %v5239_v46  ;;  %v10446_v21 = vpop.f32.mrf.mxu1  ;;  %v13505_v2 = vpop.permute.xlu0 %5737 }
 0x80e   :  { %v13499_v43 = vpop.permute.xlu1 %5784  ;;  %15585 = vst [vmem:[#allocation80_spill] sm:$0xff] %v13505_v2 }
 0x80f   :  { %v13491_v24 = vpop.f32.mrf.mxu1  ;;  %15583 = vst [vmem:[#allocation78_spill] sm:$0xff] %v13499_v43 }
 0x810   :  { %v5242_v44 = vsel %vm1212_vm3, %v13491_v24, -inf }
 0x811   :  { %5243 = vmax.xlane.f32.xlu1 %v5242_v44  ;;  %v10447_v39 = vpop.f32.mrf.mxu1  ;;  %v13509_v21 = vpop.permute.xlu0 %5831 }
 0x812   :  { %v13503_v5 = vpop.permute.xlu1 %5878  ;;  %15587 = vst [vmem:[#allocation82_spill] sm:$0xff] %v13509_v21 }
 0x813   :  { %15584 = vst [vmem:[#allocation79_spill] sm:$0xff] %v13503_v5 }
 0x815   :  { %v13513_v44 = vpop.permute.xlu0 %5925 }
 0x816   :  { %v13507_v46 = vpop.permute.xlu1 %5972  ;;  %15589 = vst [vmem:[#allocation84_spill] sm:$0xff] %v13513_v44 }
 0x817   :  { %15586 = vst [vmem:[#allocation81_spill] sm:$0xff] %v13507_v46 }
 0x819   :  { %v13517_v16 = vpop.permute.xlu0 %6066 }
 0x81a   :  { %v13511_v52 = vpop.permute.xlu1 %6019  ;;  %15591 = vst [vmem:[#allocation86_spill] sm:$0xff] %v13517_v16 }
 0x81b   :  { %15588 = vst [vmem:[#allocation83_spill] sm:$0xff] %v13511_v52 }
 0x81d   :  { %v13521_v3 = vpop.permute.xlu0 %6160 }
 0x81e   :  { %v13515_v39 = vpop.permute.xlu1 %6113  ;;  %15593 = vst [vmem:[#allocation88_spill] sm:$0xff] %v13521_v3 }
 0x81f   :  { %15590 = vst [vmem:[#allocation85_spill] sm:$0xff] %v13515_v39 }
 0x822   :  { %v13519_v31 = vpop.permute.xlu1 %6207 }
 0x823   :  { %6254 = vrot.lane.b32.xlu0 %v11836_v14, %s11657_s28  ;;  %15592 = vst [vmem:[#allocation87_spill] sm:$0xff] %v13519_v31 }
 0x848   :  { %v5151_v41 = vpop.xlane.xlu1 %5150 }
 0x849   :  { %v5245_v55 = vsub.f32 %v13361_v40, %v5151_v41 }
 0x84b   :  { %v5277_v5 = vmul.f32 1.442695, %v5245_v55 }
 0x84c   :  { %v5154_v43 = vpop.xlane.xlu0 %5153 }
 0x84d   :  { %11298 = vpow2.f32 %v5277_v5  ;;  %v5246_v46 = vsub.f32 %v13365_v63, %v5154_v43 }
 0x84f   :  { %v5279_v21 = vmul.f32 1.442695, %v5246_v46 }
 0x851   :  { %11300 = vpow2.f32 %v5279_v21 }
 0x85a   :  { %v13525_v52 = vpop.eup %11298 }
 0x85b   :  { %v5341_v39 = vsel %vm1212_vm3, %v13525_v52, 0.0 }
 0x85c   :  { %5342 = vadd.xlane.f32.xlu0 %v5341_v39 }
 0x85e   :  { %v13529_v16 = vpop.eup %11300  ;;  %v5157_v31 = vpop.xlane.xlu0 %5156 }
 0x85f   :  { %v5247_v3 = vsub.f32 %v13383_v10, %v5157_v31  ;;  %v5344_v41 = vsel %vm1212_vm3, %v13529_v16, 0.0 }
 0x860   :  { %5345 = vadd.xlane.f32.xlu1 %v5344_v41 }
 0x861   :  { %v5281_v55 = vmul.f32 1.442695, %v5247_v3 }
 0x862   :  { %v5160_v5 = vpop.xlane.xlu1 %5159  ;;  %v5163_v40 = vpop.xlane.xlu0 %5162 }
 0x863   :  { %11302 = vpow2.f32 %v5281_v55  ;;  %v5248_v63 = vsub.f32 %v13389_v47, %v5160_v5  ;;  %v5249_v43 = vsub.f32 %v13369_v58, %v5163_v40 }
 0x865   :  { %v5283_v46 = vmul.f32 1.442695, %v5248_v63  ;;  %v5285_v21 = vmul.f32 1.442695, %v5249_v43 }
 0x866   :  { %v5166_v39 = vpop.xlane.xlu1 %5165  ;;  %v5169_v44 = vpop.xlane.xlu0 %5168 }
 0x867   :  { %11304 = vpow2.f32 %v5283_v46  ;;  %v5250_v2 = vsub.f32 %v13371_v17, %v5166_v39  ;;  %v5251_v31 = vsub.f32 %v13397_v36, %v5169_v44 }
 0x868   :  { %11306 = vpow2.f32 %v5285_v21 }
 0x869   :  { %v5287_v10 = vmul.f32 1.442695, %v5250_v2  ;;  %v5289_v41 = vmul.f32 1.442695, %v5251_v31 }
 0x86a   :  { %v5172_v3 = vpop.xlane.xlu1 %5171  ;;  %v5175_v12 = vpop.xlane.xlu0 %5174 }
 0x86b   :  { %11308 = vpow2.f32 %v5287_v10  ;;  %v5252_v55 = vsub.f32 %v13405_v15, %v5172_v3  ;;  %v5253_v47 = vsub.f32 %v13375_v62, %v5175_v12 }
 0x86c   :  { %11310 = vpow2.f32 %v5289_v41 }
 0x86d   :  { %v5291_v58 = vmul.f32 1.442695, %v5252_v55  ;;  %v5293_v5 = vmul.f32 1.442695, %v5253_v47 }
 0x86e   :  { %v5178_v40 = vpop.xlane.xlu1 %5177  ;;  %v5181_v63 = vpop.xlane.xlu0 %5180 }
 0x86f   :  { %11312 = vpow2.f32 %v5291_v58  ;;  %v5254_v17 = vsub.f32 %v13381_v25, %v5178_v40  ;;  %v5255_v36 = vsub.f32 %v13413_v20, %v5181_v63 }
 0x870   :  { %v13542_v44 = vpop.eup %11302  ;;  %11314 = vpow2.f32 %v5293_v5 }
 0x871   :  { %v5295_v2 = vmul.f32 1.442695, %v5254_v17  ;;  %v5297_v43 = vmul.f32 1.442695, %v5255_v36  ;;  %v5347_v15 = vsel %vm1212_vm3, %v13542_v44, 0.0 }
 0x872   :  { %v5184_v46 = vpop.xlane.xlu1 %5183  ;;  %5348 = vadd.xlane.f32.xlu0 %v5347_v15  ;;  %v5187_v62 = vpop.xlane.xlu0 %5186 }
 0x873   :  { %11316 = vpow2.f32 %v5295_v2  ;;  %v5256_v12 = vsub.f32 %v13421_v33, %v5184_v46  ;;  %v5257_v21 = vsub.f32 %v13387_v37, %v5187_v62 }
 0x874   :  { %v13548_v39 = vpop.eup %11304  ;;  %11318 = vpow2.f32 %v5297_v43 }
 0x875   :  { %v13550_v20 = vpop.eup %11306  ;;  %v5299_v25 = vmul.f32 1.442695, %v5256_v12  ;;  %v5301_v31 = vmul.f32 1.442695, %v5257_v21  ;;  %v5350_v10 = vsel %vm1212_vm3, %v13548_v39, 0.0 }
 0x876   :  { %v5190_v41 = vpop.xlane.xlu1 %5189  ;;  %5351 = vadd.xlane.f32.xlu1 %v5350_v10  ;;  %v5353_v3 = vsel %vm1212_vm3, %v13550_v20, 0.0  ;;  %v5193_v55 = vpop.xlane.xlu0 %5192 }
 0x877   :  { %11320 = vpow2.f32 %v5299_v25  ;;  %v5258_v33 = vsub.f32 %v13395_v26, %v5190_v41  ;;  %5354 = vadd.xlane.f32.xlu0 %v5353_v3  ;;  %v5259_v37 = vsub.f32 %v13429_v23, %v5193_v55 }
 0x878   :  { %v13558_v47 = vpop.eup %11308  ;;  %11322 = vpow2.f32 %v5301_v31 }
 0x879   :  { %v13560_v58 = vpop.eup %11310  ;;  %v5303_v5 = vmul.f32 1.442695, %v5258_v33  ;;  %v5305_v40 = vmul.f32 1.442695, %v5259_v37  ;;  %v5356_v63 = vsel %vm1212_vm3, %v13558_v47, 0.0 }
 0x87a   :  { %v5196_v17 = vpop.xlane.xlu1 %5195  ;;  %5357 = vadd.xlane.f32.xlu1 %v5356_v63  ;;  %v5359_v36 = vsel %vm1212_vm3, %v13560_v58, 0.0  ;;  %v5199_v2 = vpop.xlane.xlu0 %5198 }
 0x87b   :  { %11324 = vpow2.f32 %v5303_v5  ;;  %v5260_v26 = vsub.f32 %v13437_v29, %v5196_v17  ;;  %5360 = vadd.xlane.f32.xlu0 %v5359_v36  ;;  %v5261_v23 = vsub.f32 %v13403_v56, %v5199_v2 }
 0x87c   :  { %v13568_v43 = vpop.eup %11312  ;;  %11326 = vpow2.f32 %v5305_v40 }
 0x87d   :  { %v13570_v15 = vpop.eup %11314  ;;  %v5309_v46 = vmul.f32 1.442695, %v5261_v23  ;;  %v5362_v62 = vsel %vm1212_vm3, %v13568_v43, 0.0  ;;  %v5307_v12 = vmul.f32 1.442695, %v5260_v26 }
 0x87e   :  { %v5202_v21 = vpop.xlane.xlu1 %5201  ;;  %5363 = vadd.xlane.f32.xlu1 %v5362_v62  ;;  %v5365_v25 = vsel %vm1212_vm3, %v13570_v15, 0.0  ;;  %v5205_v31 = vpop.xlane.xlu0 %5204 }
 0x87f   :  { %v5262_v29 = vsub.f32 %v13411_v18, %v5202_v21  ;;  %5366 = vadd.xlane.f32.xlu0 %v5365_v25  ;;  %v5263_v56 = vsub.f32 %v13445_v30, %v5205_v31  ;;  %11328 = vpow2.f32 %v5309_v46 }
 0x880   :  { %v13578_v10 = vpop.eup %11316  ;;  %11330 = vpow2.f32 %v5307_v12 }
 0x881   :  { %v13580_v41 = vpop.eup %11318  ;;  %v5311_v3 = vmul.f32 1.442695, %v5262_v29  ;;  %v5313_v55 = vmul.f32 1.442695, %v5263_v56  ;;  %v5368_v33 = vsel %vm1212_vm3, %v13578_v10, 0.0 }
 0x882   :  { %v5208_v37 = vpop.xlane.xlu1 %5207  ;;  %5369 = vadd.xlane.f32.xlu1 %v5368_v33  ;;  %v5371_v5 = vsel %vm1212_vm3, %v13580_v41, 0.0  ;;  %v5211_v18 = vpop.xlane.xlu0 %5210 }
 0x883   :  { %11332 = vpow2.f32 %v5311_v3  ;;  %v5264_v30 = vsub.f32 %v13453_v9, %v5208_v37  ;;  %5372 = vadd.xlane.f32.xlu0 %v5371_v5  ;;  %v5265_v40 = vsub.f32 %v13419_v60, %v5211_v18 }
 0x884   :  { %v13588_v63 = vpop.eup %11320  ;;  %11334 = vpow2.f32 %v5313_v55 }
 0x885   :  { %v13590_v17 = vpop.eup %11322  ;;  %v5317_v36 = vmul.f32 1.442695, %v5265_v40  ;;  %v5374_v2 = vsel %vm1212_vm3, %v13588_v63, 0.0  ;;  %v5315_v26 = vmul.f32 1.442695, %v5264_v30 }
 0x886   :  { %v5214_v23 = vpop.xlane.xlu1 %5213  ;;  %5375 = vadd.xlane.f32.xlu1 %v5374_v2  ;;  %v5377_v46 = vsel %vm1212_vm3, %v13590_v17, 0.0  ;;  %v5217_v62 = vpop.xlane.xlu0 %5216 }
 0x887   :  { %v5266_v9 = vsub.f32 %v13427_v0, %v5214_v23  ;;  %5378 = vadd.xlane.f32.xlu0 %v5377_v46  ;;  %v5267_v60 = vsub.f32 %v13461_v59, %v5217_v62  ;;  %11336 = vpow2.f32 %v5317_v36 }
 0x888   :  { %v13598_v12 = vpop.eup %11324  ;;  %11338 = vpow2.f32 %v5315_v26 }
 0x889   :  { %v13600_v21 = vpop.eup %11326  ;;  %v5319_v25 = vmul.f32 1.442695, %v5266_v9  ;;  %v5321_v31 = vmul.f32 1.442695, %v5267_v60  ;;  %v5380_v29 = vsel %vm1212_vm3, %v13598_v12, 0.0 }
 0x88a   :  { %v5220_v56 = vpop.xlane.xlu1 %5219  ;;  %5381 = vadd.xlane.f32.xlu1 %v5380_v29  ;;  %v5383_v3 = vsel %vm1212_vm3, %v13600_v21, 0.0  ;;  %v5223_v0 = vpop.xlane.xlu0 %5222 }
 0x88b   :  { %11340 = vpow2.f32 %v5319_v25  ;;  %v5268_v59 = vsub.f32 %v13467_v13, %v5220_v56  ;;  %5384 = vadd.xlane.f32.xlu0 %v5383_v3  ;;  %v5269_v55 = vsub.f32 %v13435_v42, %v5223_v0 }
 0x88c   :  { %v13608_v33 = vpop.eup %11328  ;;  %11342 = vpow2.f32 %v5321_v31 }
 0x88d   :  { %v5325_v37 = vmul.f32 1.442695, %v5269_v55  ;;  %v5323_v5 = vmul.f32 1.442695, %v5268_v59  ;;  %v5389_v30 = vsel %vm1212_vm3, %v13608_v33, 0.0  ;;  %v13612_v36 = vpop.eup %11330 }
 0x88e   :  { %v5226_v18 = vpop.xlane.xlu1 %5225  ;;  %v5229_v40 = vpop.xlane.xlu0 %5228  ;;  %5390 = vadd.xlane.f32.xlu1 %v5389_v30  ;;  %v5386_v60 = vsel %vm1212_vm3, %v13612_v36, 0.0 }
 0x88f   :  { %v5270_v2 = vsub.f32 %v13443_v45, %v5226_v18  ;;  %v5271_v13 = vsub.f32 %v13473_v50, %v5229_v40  ;;  %11344 = vpow2.f32 %v5325_v37 }
 0x890   :  { %v13616_v26 = vpop.eup %11332  ;;  %11346 = vpow2.f32 %v5323_v5 }
 0x891   :  { %v5327_v42 = vmul.f32 1.442695, %v5270_v2  ;;  %v5329_v23 = vmul.f32 1.442695, %v5271_v13  ;;  %v5392_v46 = vsel %vm1212_vm3, %v13616_v26, 0.0  ;;  %v13620_v62 = vpop.eup %11334 }
 0x892   :  { %v5232_v9 = vpop.xlane.xlu1 %5231  ;;  %5393 = vadd.xlane.f32.xlu0 %v5392_v46  ;;  %v5235_v45 = vpop.xlane.xlu0 %5234  ;;  %5387 = vadd.xlane.f32.xlu1 %v5386_v60  ;;  %v5395_v56 = vsel %vm1212_vm3, %v13620_v62, 0.0 }
 0x893   :  { %11348 = vpow2.f32 %v5327_v42  ;;  %v5272_v50 = vsub.f32 %v13479_v34, %v5232_v9  ;;  %v5273_v25 = vsub.f32 %v13451_v28, %v5235_v45 }
 0x894   :  { %v13626_v31 = vpop.eup %11336  ;;  %11350 = vpow2.f32 %v5329_v23 }
 0x895   :  { %v5333_v29 = vmul.f32 1.442695, %v5273_v25  ;;  %v5331_v3 = vmul.f32 1.442695, %v5272_v50  ;;  %v5401_v59 = vsel %vm1212_vm3, %v13626_v31, 0.0  ;;  %v13632_v37 = vpop.eup %11338 }
 0x896   :  { %v5238_v0 = vpop.xlane.xlu1 %5237  ;;  %5396 = vadd.xlane.f32.xlu0 %v5395_v56  ;;  %v5241_v55 = vpop.xlane.xlu0 %5240  ;;  %5402 = vadd.xlane.f32.xlu1 %v5401_v59  ;;  %v5398_v13 = vsel %vm1212_vm3, %v13632_v37, 0.0 }
 0x897   :  { %v5274_v34 = vsub.f32 %v13459_v51, %v5238_v0  ;;  %v5275_v28 = vsub.f32 %v13485_v27, %v5241_v55  ;;  %11352 = vpow2.f32 %v5333_v29 }
 0x898   :  { %v13636_v5 = vpop.eup %11340  ;;  %11354 = vpow2.f32 %v5331_v3 }
 0x899   :  { %v5335_v18 = vmul.f32 1.442695, %v5274_v34  ;;  %v5337_v30 = vmul.f32 1.442695, %v5275_v28  ;;  %v5404_v40 = vsel %vm1212_vm3, %v13636_v5, 0.0  ;;  %v13640_v2 = vpop.eup %11342 }
 0x89a   :  { %5405 = vadd.xlane.f32.xlu0 %v5404_v40  ;;  %5399 = vadd.xlane.f32.xlu1 %v5398_v13  ;;  %v5407_v27 = vsel %vm1212_vm3, %v13640_v2, 0.0  ;;  %v5244_v28 = vpop.xlane.xlu1 %5243  ;;  %v13701_v13 = vpop.permute.xlu0 %6254 }
 0x89b   :  { %11356 = vpow2.f32 %v5335_v18  ;;  %v5276_v18 = vsub.f32 %v13491_v24, %v5244_v28 }
 0x89c   :  { %v13644_v51 = vpop.eup %11344  ;;  %11358 = vpow2.f32 %v5337_v30 }
 0x89d   :  { %v5413_v42 = vsel %vm1212_vm3, %v13644_v51, 0.0  ;;  %v13650_v23 = vpop.eup %11346  ;;  %v5339_v30 = vmul.f32 1.442695, %v5276_v18 }
 0x89e   :  { %5408 = vadd.xlane.f32.xlu0 %v5407_v27  ;;  %5414 = vadd.xlane.f32.xlu1 %v5413_v42  ;;  %v5410_v45 = vsel %vm1212_vm3, %v13650_v23, 0.0 }
 0x89f   :  { %11360 = vpow2.f32 %v5339_v30 }
 0x8a0   :  { %v13652_v46 = vpop.eup %11348 }
 0x8a1   :  { %v5416_v9 = vsel %vm1212_vm3, %v13652_v46, 0.0  ;;  %v13656_v60 = vpop.eup %11350 }
 0x8a2   :  { %5417 = vadd.xlane.f32.xlu0 %v5416_v9  ;;  %5411 = vadd.xlane.f32.xlu1 %v5410_v45  ;;  %v5419_v25 = vsel %vm1212_vm3, %v13656_v60, 0.0 }
 0x8a4   :  { %v13660_v50 = vpop.eup %11352 }
 0x8a5   :  { %v5425_v29 = vsel %vm1212_vm3, %v13660_v50, 0.0  ;;  %v13666_v56 = vpop.eup %11354 }
 0x8a6   :  { %5420 = vadd.xlane.f32.xlu0 %v5419_v25  ;;  %5426 = vadd.xlane.f32.xlu1 %v5425_v29  ;;  %v5422_v55 = vsel %vm1212_vm3, %v13666_v56, 0.0 }
 0x8a8   :  { %v13668_v3 = vpop.eup %11356 }
 0x8a9   :  { %v5428_v0 = vsel %vm1212_vm3, %v13668_v3, 0.0  ;;  %v13672_v59 = vpop.eup %11358 }
 0x8aa   :  { %5429 = vadd.xlane.f32.xlu0 %v5428_v0  ;;  %5423 = vadd.xlane.f32.xlu1 %v5422_v55  ;;  %v5431_v34 = vsel %vm1212_vm3, %v13672_v59, 0.0 }
 0x8ac   :  { %v13693_v40 = vpop.eup %11360 }
 0x8ad   :  { %v5434_v24 = vsel %vm1212_vm3, %v13693_v40, 0.0 }
 0x8ae   :  { %5432 = vadd.xlane.f32.xlu0 %v5431_v34 }
 0x8bb   :  { %6303 = vrot.lane.b32.xlu1 %v11758_v6, %s11658_s29 }
 0x8c4   :  { %6354 = vrot.lane.b32.xlu0 %v11755_v4, %s11658_s29 }
 0x8c8   :  { %6405 = vrot.lane.b32.xlu0 %v11767_v19, %s11658_s29 }
 0x8cc   :  { %6456 = vrot.lane.b32.xlu0 %v11772_v22, %s11658_s29 }
 0x8d0   :  { %6507 = vrot.lane.b32.xlu0 %v11782_v35, %s11658_s29 }
 0x8d4   :  { %6558 = vrot.lane.b32.xlu0 %v11779_v32, %s11658_s29 }
 0x8d8   :  { %6609 = vrot.lane.b32.xlu0 %v11798_v53, %s11658_s29 }
 0x8dc   :  { %6660 = vrot.lane.b32.xlu0 %v11793_v48, %s11658_s29 }
 0x8df   :  { %5435 = vadd.xlane.f32.xlu1 %v5434_v24 }
 0x8e0   :  { %6711 = vrot.lane.b32.xlu0 %v11808_v57, %s11658_s29 }
 0x8e4   :  { %6762 = vrot.lane.b32.xlu0 %v11802_v54, %s11658_s29 }
 0x8e5   :  { %v5343_v27 = vpop.xlane.xlu0 %5342 }
 0x8e6   :  { %11362 = vrcp.f32 %v5343_v27 }
 0x8e8   :  { %6813 = vrot.lane.b32.xlu0 %v11822_v7, %s11658_s29 }
 0x8e9   :  { %v5346_v42 = vpop.xlane.xlu1 %5345 }
 0x8ea   :  { %11364 = vrcp.f32 %v5346_v42 }
 0x8ec   :  { %6864 = vrot.lane.b32.xlu0 %v11816_v1, %s11658_s29 }
 0x8f0   :  { %6915 = vrot.lane.b32.xlu0 %v11830_v11, %s11658_s29  ;;  %6301 = vrot.lane.b32.xlu1 %v11758_v6, %s11659_s30 }
 0x8f3   :  { %v11363_v9 = vpop.eup %11362 }
 0x8f4   :  { %6966 = vrot.lane.b32.xlu0 %v11824_v8, %s11658_s29  ;;  %6352 = vrot.lane.b32.xlu1 %v11755_v4, %s11659_s30  ;;  %v5501_v25 = vmul.f32 %v11363_v9, %v13525_v52 }
 0x8f7   :  { %v11365_v45 = vpop.eup %11364 }
 0x8f8   :  { %v5502_v29 = vmul.f32 %v11365_v45, %v13529_v16  ;;  %7017 = vrot.lane.b32.xlu0 %v15484_v49, %s11658_s29  ;;  %6403 = vrot.lane.b32.xlu1 %v11767_v19, %s11659_s30 }
 0x8fa   :  { %v5533_v0 = vpack.c.bf16 %v5502_v29, %v5501_v25 }
 0x8fb   :  { %v5349_v55 = vpop.xlane.xlu0 %5348 }
 0x8fc   :  { %7068 = vrot.lane.b32.xlu0 %v11836_v14, %s11658_s29  ;;  %10451 = vmatmul.mubr.msk.bf16.vlgmr.msra.gmra.mxu0 %vm1212_vm3, %v5533_v0  ;;  %11366 = vrcp.f32 %v5349_v55 }
 0x8fd   :  { %6454 = vrot.lane.b32.xlu1 %v11772_v22, %s11659_s30  ;;  %10461 = vmatpush3.bf16.msra.mxu0 %v13501_v61 }
 0x8fe   :  { %10462 = vmatprep.mubr.msk.bf16.mxu0 %vm11650_vm1, %v15482_v38  ;;  %10472 = vmatprep.subr.bf16.mxu0 %v15482_v38 }
 0x8ff   :  { %v5352_v52 = vpop.xlane.xlu1 %5351 }
 0x900   :  { %11368 = vrcp.f32 %v5352_v52  ;;  %v5355_v16 = vpop.xlane.xlu0 %5354  ;;  %7066 = vrot.lane.b32.xlu0 %v11836_v14, %s11659_s30 }
 0x901   :  { %6505 = vrot.lane.b32.xlu1 %v11782_v35, %s11659_s30  ;;  %11370 = vrcp.f32 %v5355_v16 }
 0x903   :  { %v5358_v34 = vpop.xlane.xlu1 %5357 }
 0x904   :  { %11372 = vrcp.f32 %v5358_v34  ;;  %v5361_v28 = vpop.xlane.xlu0 %5360  ;;  %7517 = vrot.lane.b32.xlu0 %v11758_v6, %s11660_s9 }
 0x905   :  { %6556 = vrot.lane.b32.xlu1 %v11779_v32, %s11659_s30  ;;  %11374 = vrcp.f32 %v5361_v28 }
 0x907   :  { %v5364_v61 = vpop.xlane.xlu1 %5363 }
 0x908   :  { %11376 = vrcp.f32 %v5364_v61  ;;  %v5367_v18 = vpop.xlane.xlu0 %5366  ;;  %7611 = vrot.lane.b32.xlu0 %v11767_v19, %s11660_s9  ;;  %v15595_v61 = vld [vmem:[#allocation80_spill] sm:$0xff] }
 0x909   :  { %6607 = vrot.lane.b32.xlu1 %v11798_v53, %s11659_s30  ;;  %11378 = vrcp.f32 %v5367_v18  ;;  %v11367_v30 = vpop.eup %11366 }
 0x90a   :  { %v5503_v42 = vmul.f32 %v11367_v30, %v13542_v44 }
 0x90b   :  { %v5370_v24 = vpop.xlane.xlu1 %5369 }
 0x90c   :  { %11380 = vrcp.f32 %v5370_v24  ;;  %v5373_v27 = vpop.xlane.xlu0 %5372  ;;  %7705 = vrot.lane.b32.xlu0 %v11782_v35, %s11660_s9 }
 0x90d   :  { %v11369_v6 = vpop.eup %11368  ;;  %6658 = vrot.lane.b32.xlu1 %v11793_v48, %s11659_s30  ;;  %11382 = vrcp.f32 %v5373_v27  ;;  %v15596_v27 = vld [vmem:[#allocation78_spill] sm:$0xff] }
 0x90e   :  { %v5504_v9 = vmul.f32 %v11369_v6, %v13548_v39  ;;  %v11371_v19 = vpop.eup %11370  ;;  %v15594_v39 = vld [vmem:[#allocation77_spill] sm:$0xff] }
 0x90f   :  { %v5376_v45 = vpop.xlane.xlu1 %5375  ;;  %v5505_v35 = vmul.f32 %v11371_v19, %v13550_v20 }
 0x910   :  { %11384 = vrcp.f32 %v5376_v45  ;;  %v5379_v25 = vpop.xlane.xlu0 %5378  ;;  %7799 = vrot.lane.b32.xlu0 %v11798_v53, %s11660_s9  ;;  %v5534_v29 = vpack.c.bf16 %v5504_v9, %v5503_v42 }
 0x911   :  { %v11373_v0 = vpop.eup %11372  ;;  %6709 = vrot.lane.b32.xlu1 %v11808_v57, %s11659_s30  ;;  %11386 = vrcp.f32 %v5379_v25  ;;  %v15597_v25 = vld [vmem:[#allocation82_spill] sm:$0xff] }
 0x912   :  { %v5506_v55 = vmul.f32 %v11373_v0, %v13558_v47  ;;  %10457 = vmatmul.mubr.msk.bf16.vlgmr.msra.gmra.mxu1 %vm1212_vm3, %v5534_v29  ;;  %v11375_v44 = vpop.eup %11374 }
 0x913   :  { %10467 = vmatpush3.bf16.msra.mxu1 %v15594_v39  ;;  %v5382_v52 = vpop.xlane.xlu1 %5381  ;;  %10468 = vmatprep.mubr.msk.bf16.mxu1 %vm11650_vm1, %v15482_v38  ;;  %v5507_v47 = vmul.f32 %v11375_v44, %v13560_v58 }
 0x914   :  { %11388 = vrcp.f32 %v5382_v52  ;;  %7893 = vrot.lane.b32.xlu0 %v11808_v57, %s11660_s9  ;;  %v5535_v53 = vpack.c.bf16 %v5506_v55, %v5505_v35  ;;  %10478 = vmatprep.subr.bf16.mxu1 %v15482_v38  ;;  %v5385_v28 = vpop.xlane.xlu0 %5384 }
 0x915   :  { %v11377_v20 = vpop.eup %11376  ;;  %6760 = vrot.lane.b32.xlu1 %v11802_v54, %s11659_s30 }
 0x916   :  { %v5508_v16 = vmul.f32 %v11377_v20, %v13568_v43  ;;  %10463 = vmatmul.mubr.msk.bf16.vlgmr.msra.gmra.mxu0 %vm1212_vm3, %v5535_v53  ;;  %v11379_v34 = vpop.eup %11378 }
 0x917   :  { %10473 = vmatpush3.bf16.msra.mxu0 %v15595_v61  ;;  %10474 = vmatprep.mubr.msk.bf16.mxu0 %vm11650_vm1, %v15482_v38  ;;  %v5391_v57 = vpop.xlane.xlu1 %5390  ;;  %v5509_v58 = vmul.f32 %v11379_v34, %v13570_v15 }
 0x918   :  { %8034 = vrot.lane.b32.xlu0 %v11816_v1, %s11660_s9  ;;  %v5536_v18 = vpack.c.bf16 %v5508_v16, %v5507_v47  ;;  %10484 = vmatprep.subr.bf16.mxu0 %v15482_v38  ;;  %11390 = vrcp.f32 %v5391_v57 }
 0x919   :  { %v11381_v30 = vpop.eup %11380  ;;  %6811 = vrot.lane.b32.xlu1 %v11822_v7, %s11659_s30  ;;  %11392 = vrcp.f32 %v5385_v28 }
 0x91a   :  { %v5510_v43 = vmul.f32 %v11381_v30, %v13578_v10  ;;  %10469 = vmatmul.mubr.msk.bf16.vlgmr.msra.gmra.mxu1 %vm1212_vm3, %v5536_v18  ;;  %v11383_v24 = vpop.eup %11382 }
 0x91b   :  { %10479 = vmatpush3.bf16.msra.mxu1 %v15596_v27  ;;  %v5394_v6 = vpop.xlane.xlu0 %5393  ;;  %10480 = vmatprep.mubr.msk.bf16.mxu1 %vm11650_vm1, %v15482_v38  ;;  %v5388_v42 = vpop.xlane.xlu1 %5387  ;;  %v5511_v15 = vmul.f32 %v11383_v24, %v13580_v41 }
 0x91c   :  { %11394 = vrcp.f32 %v5394_v6  ;;  %v5537_v9 = vpack.c.bf16 %v5510_v43, %v5509_v58  ;;  %10490 = vmatprep.subr.bf16.mxu1 %v15482_v38 }
 0x91d   :  { %v11385_v19 = vpop.eup %11384  ;;  %11396 = vrcp.f32 %v5388_v42  ;;  %6862 = vrot.lane.b32.xlu1 %v11816_v1, %s11659_s30 }
 0x91e   :  { %v5512_v10 = vmul.f32 %v11385_v19, %v13588_v63  ;;  %10475 = vmatmul.mubr.msk.bf16.vlgmr.msra.gmra.mxu0 %vm1212_vm3, %v5537_v9  ;;  %v11387_v45 = vpop.eup %11386  ;;  %v15598_v63 = vld [vmem:[#allocation79_spill] sm:$0xff] }
 0x91f   :  { %10485 = vmatpush3.bf16.msra.mxu0 %v15597_v25  ;;  %v5397_v29 = vpop.xlane.xlu0 %5396  ;;  %10486 = vmatprep.mubr.msk.bf16.mxu0 %vm11650_vm1, %v15482_v38  ;;  %v5403_v0 = vpop.xlane.xlu1 %5402  ;;  %v5513_v1 = vmul.f32 %v11387_v45, %v13590_v17 }
 0x920   :  { %v5538_v35 = vpack.c.bf16 %v5512_v10, %v5511_v15  ;;  %10496 = vmatprep.subr.bf16.mxu0 %v15482_v38  ;;  %11398 = vrcp.f32 %v5403_v0  ;;  %v15603_v0 = vld [vmem:[#allocation86_spill] sm:$0xff] }
 0x921   :  { %v11389_v55 = vpop.eup %11388  ;;  %6913 = vrot.lane.b32.xlu1 %v11830_v11, %s11659_s30  ;;  %11400 = vrcp.f32 %v5397_v29  ;;  %v15602_v29 = vld [vmem:[#allocation85_spill] sm:$0xff] }
 0x922   :  { %v5514_v41 = vmul.f32 %v11389_v55, %v13598_v12  ;;  %10481 = vmatmul.mubr.msk.bf16.vlgmr.msra.gmra.mxu1 %vm1212_vm3, %v5538_v35  ;;  %v15599_v12 = vld [vmem:[#allocation84_spill] sm:$0xff] }
 0x923   :  { %10491 = vmatpush3.bf16.msra.mxu1 %v15598_v63  ;;  %v5406_v44 = vpop.xlane.xlu0 %5405  ;;  %10492 = vmatprep.mubr.msk.bf16.mxu1 %vm11650_vm1, %v15482_v38  ;;  %v5400_v39 = vpop.xlane.xlu1 %5399 }
 0x924   :  { %11402 = vrcp.f32 %v5406_v44  ;;  %v5539_v52 = vpack.c.bf16 %v5514_v41, %v5513_v1  ;;  %10502 = vmatprep.subr.bf16.mxu1 %v15482_v38 }
 0x925   :  { %11404 = vrcp.f32 %v5400_v39  ;;  %6964 = vrot.lane.b32.xlu1 %v11824_v8, %s11659_s30  ;;  %v11391_v17 = vpop.eup %11390 }
 0x926   :  { %10487 = vmatmul.mubr.msk.bf16.vlgmr.msra.gmra.mxu0 %vm1212_vm3, %v5539_v52  ;;  %v11393_v20 = vpop.eup %11392  ;;  %v5517_v28 = vmul.f32 %v11391_v17, %v13608_v33  ;;  %v15605_v52 = vld [vmem:[#allocation88_spill] sm:$0xff] }
 0x927   :  { %10497 = vmatpush3.bf16.msra.mxu0 %v15599_v12  ;;  %v5409_v53 = vpop.xlane.xlu0 %5408  ;;  %10498 = vmatprep.mubr.msk.bf16.mxu0 %vm11650_vm1, %v15482_v38  ;;  %v5415_v47 = vpop.xlane.xlu1 %5414  ;;  %v5515_v57 = vmul.f32 %v11393_v20, %v13600_v21 }
 0x928   :  { %10508 = vmatprep.subr.bf16.mxu0 %v15482_v38  ;;  %11406 = vrcp.f32 %v5415_v47 }
 0x929   :  { %v11395_v16 = vpop.eup %11394  ;;  %7015 = vrot.lane.b32.xlu1 %v15484_v49, %s11659_s30  ;;  %11408 = vrcp.f32 %v5409_v53 }
 0x92a   :  { %v11397_v34 = vpop.eup %11396  ;;  %v5518_v61 = vmul.f32 %v11395_v16, %v13616_v26  ;;  %v15600_v26 = vld [vmem:[#allocation83_spill] sm:$0xff] }
 0x92b   :  { %v5516_v18 = vmul.f32 %v11397_v34, %v13612_v36  ;;  %v5418_v30 = vpop.xlane.xlu0 %5417  ;;  %v5412_v58 = vpop.xlane.xlu1 %5411  ;;  %v15601_v36 = vld [vmem:[#allocation81_spill] sm:$0xff] }
 0x92c   :  { %11410 = vrcp.f32 %v5418_v30  ;;  %v5541_v43 = vpack.c.bf16 %v5518_v61, %v5517_v28 }
 0x92d   :  { %11412 = vrcp.f32 %v5412_v58  ;;  %7564 = vrot.lane.b32.xlu1 %v11755_v4, %s11660_s9  ;;  %v5540_v24 = vpack.c.bf16 %v5516_v18, %v5515_v57  ;;  %v11399_v33 = vpop.eup %11398 }
 0x92e   :  { %10499 = vmatmul.mubr.msk.bf16.vlgmr.msra.gmra.mxu0 %vm1212_vm3, %v5541_v43  ;;  %v11401_v27 = vpop.eup %11400  ;;  %v5521_v9 = vmul.f32 %v11399_v33, %v13626_v31 }
 0x92f   :  { %10493 = vmatmul.mubr.msk.bf16.vlgmr.msra.gmra.mxu1 %vm1212_vm3, %v5540_v24  ;;  %10509 = vmatpush3.bf16.msra.mxu0 %v15600_v26  ;;  %v5421_v21 = vpop.xlane.xlu0 %5420  ;;  %v5427_v6 = vpop.xlane.xlu1 %5426  ;;  %v5519_v15 = vmul.f32 %v11401_v27, %v13620_v62 }
 0x930   :  { %10503 = vmatpush3.bf16.msra.mxu1 %v15601_v36  ;;  %10504 = vmatprep.mubr.msk.bf16.mxu1 %vm11650_vm1, %v15482_v38  ;;  %11414 = vrcp.f32 %v5427_v6 }
 0x931   :  { %v11403_v42 = vpop.eup %11402  ;;  %7658 = vrot.lane.b32.xlu1 %v11772_v22, %s11660_s9  ;;  %10510 = vmatprep.mubr.msk.bf16.mxu0 %vm11650_vm1, %v15482_v38  ;;  %11416 = vrcp.f32 %v5421_v21 }
 0x932   :  { %v11405_v4 = vpop.eup %11404  ;;  %v5522_v19 = vmul.f32 %v11403_v42, %v13636_v5  ;;  %10514 = vmatprep.subr.bf16.mxu1 %v15482_v38  ;;  %10520 = vmatprep.subr.bf16.mxu0 %v15482_v38 }
 0x933   :  { %v5520_v10 = vmul.f32 %v11405_v4, %v13632_v37  ;;  %v5430_v45 = vpop.xlane.xlu0 %5429  ;;  %v5424_v22 = vpop.xlane.xlu1 %5423 }
 0x934   :  { %11418 = vrcp.f32 %v5430_v45  ;;  %v5543_v25 = vpack.c.bf16 %v5522_v19, %v5521_v9 }
 0x935   :  { %11420 = vrcp.f32 %v5424_v22  ;;  %7752 = vrot.lane.b32.xlu1 %v11779_v32, %s11660_s9  ;;  %v5542_v31 = vpack.c.bf16 %v5520_v10, %v5519_v15  ;;  %v11407_v5 = vpop.eup %11406 }
 0x936   :  { %10511 = vmatmul.mubr.msk.bf16.vlgmr.msra.gmra.mxu0 %vm1212_vm3, %v5543_v25  ;;  %v11409_v62 = vpop.eup %11408  ;;  %v5525_v35 = vmul.f32 %v11407_v5, %v13644_v51  ;;  %v15604_v51 = vld [vmem:[#allocation87_spill] sm:$0xff] }
 0x937   :  { %10505 = vmatmul.mubr.msk.bf16.vlgmr.msra.gmra.mxu1 %vm1212_vm3, %v5542_v31  ;;  %10521 = vmatpush3.bf16.msra.mxu0 %v15602_v29  ;;  %v5523_v1 = vmul.f32 %v11409_v62, %v13640_v2  ;;  %v5433_v39 = vpop.xlane.xlu0 %5432  ;;  %v6304_v20 = vpop.permute.xlu1 %6303 }
 0x938   :  { %10515 = vmatpush3.bf16.msra.mxu1 %v15603_v0  ;;  %10516 = vmatprep.mubr.msk.bf16.mxu1 %vm11650_vm1, %v15482_v38  ;;  %11422 = vrcp.f32 %v5433_v39 }
 0x939   :  { %v11411_v37 = vpop.eup %11410  ;;  %7846 = vrot.lane.b32.xlu1 %v11793_v48, %s11660_s9  ;;  %10522 = vmatprep.mubr.msk.bf16.mxu0 %vm11650_vm1, %v15482_v38 }
 0x93a   :  { %v11413_v32 = vpop.eup %11412  ;;  %v5526_v55 = vmul.f32 %v11411_v37, %v13652_v46  ;;  %10526 = vmatprep.subr.bf16.mxu1 %v15482_v38  ;;  %10532 = vmatprep.subr.bf16.mxu0 %v15482_v38 }
 0x93b   :  { %v5524_v41 = vmul.f32 %v11413_v32, %v13650_v23  ;;  %v6355_v34 = vpop.permute.xlu0 %6354 }
 0x93c   :  { %v5545_v63 = vpack.c.bf16 %v5526_v55, %v5525_v35  ;;  %v6360_v4 = vsel %vm414_vm2, %v6355_v34, 0 }
 0x93d   :  { %7940 = vrot.lane.b32.xlu1 %v11802_v54, %s11660_s9  ;;  %v5544_v48 = vpack.c.bf16 %v5524_v41, %v5523_v1  ;;  %v11415_v44 = vpop.eup %11414 }
 0x93e   :  { %10523 = vmatmul.mubr.msk.bf16.vlgmr.msra.gmra.mxu0 %vm1212_vm3, %v5545_v63  ;;  %v11417_v46 = vpop.eup %11416  ;;  %v5529_v23 = vmul.f32 %v11415_v44, %v13660_v50 }
 0x93f   :  { %10517 = vmatmul.mubr.msk.bf16.vlgmr.msra.gmra.mxu1 %vm1212_vm3, %v5544_v48  ;;  %10533 = vmatpush3.bf16.msra.mxu0 %v15604_v51  ;;  %v5527_v12 = vmul.f32 %v11417_v46, %v13656_v60  ;;  %v6406_v60 = vpop.permute.xlu0 %6405 }
 0x940   :  { %10527 = vmatpush3.bf16.msra.mxu1 %v15605_v52  ;;  %10528 = vmatprep.mubr.msk.bf16.mxu1 %vm11650_vm1, %v15482_v38  ;;  %v6411_v18 = vsel %vm414_vm2, %v6406_v60, 0 }
 0x941   :  { %v11419_v2 = vpop.eup %11418  ;;  %7987 = vrot.lane.b32.xlu1 %v11822_v7, %s11660_s9  ;;  %10534 = vmatprep.mubr.msk.bf16.mxu0 %vm11650_vm1, %v15482_v38  ;;  %v6309_v7 = vsel %vm414_vm2, %v6304_v20, 0 }
 0x942   :  { %v11421_v54 = vpop.eup %11420  ;;  %v5530_v17 = vmul.f32 %v11419_v2, %v13668_v3  ;;  %10538 = vmatprep.subr.bf16.mxu1 %v15482_v38  ;;  %10544 = vmatprep.subr.bf16.mxu0 %v15482_v38 }
 0x943   :  { %v5528_v53 = vmul.f32 %v11421_v54, %v13666_v56  ;;  %v6457_v50 = vpop.permute.xlu0 %6456 }
 0x944   :  { %v5547_v47 = vpack.c.bf16 %v5530_v17, %v5529_v23  ;;  %v6462_v10 = vsel %vm414_vm2, %v6457_v50, 0 }
 0x945   :  { %v5546_v16 = vpack.c.bf16 %v5528_v53, %v5527_v12  ;;  %v11423_v43 = vpop.eup %11422 }
 0x946   :  { %10535 = vmatmul.mubr.msk.bf16.vlgmr.msra.gmra.mxu0 %vm1212_vm3, %v5547_v47  ;;  %v5531_v27 = vmul.f32 %v11423_v43, %v13672_v59 }
 0x947   :  { %10529 = vmatmul.mubr.msk.bf16.vlgmr.msra.gmra.mxu1 %vm1212_vm3, %v5546_v16  ;;  %10545 = vmatpush3.bf16.xpose.msra.mxu0 %v6309_v7  ;;  %v6508_v56 = vpop.permute.xlu0 %6507 }
 0x948   :  { %10539 = vmatpush3.bf16.msra.mxu1 %v13701_v13  ;;  %10546 = vmatprep.mubr.msk.bf16.mxu0 %vm11650_vm1, %v15482_v38  ;;  %v6513_v33 = vsel %vm414_vm2, %v6508_v56, 0 }
 0x949   :  { %10556 = vmatprep.subr.bf16.mxu0 %v15482_v38  ;;  %10540 = vmatprep.mubr.msk.bf16.mxu1 %vm11650_vm1, %v15482_v38 }
 0x94a   :  { %10550 = vmatprep.subr.bf16.mxu1 %v15482_v38 }
 0x94b   :  { %v6559_v3 = vpop.permute.xlu0 %6558 }
 0x94c   :  { %v6564_v5 = vsel %vm414_vm2, %v6559_v3, 0 }
 0x94f   :  { %v6610_v28 = vpop.permute.xlu0 %6609 }
 0x950   :  { %v6615_v15 = vsel %vm414_vm2, %v6610_v28, 0 }
 0x953   :  { %v13878_v57 = vpop.permute.xlu0 %6660 }
 0x954   :  { %v6666_v32 = vsel %vm414_vm2, %v13878_v57, 0 }
 0x957   :  { %v6712_v30 = vpop.permute.xlu0 %6711 }
 0x958   :  { %v6717_v22 = vsel %vm414_vm2, %v6712_v30, 0 }
 0x95b   :  { %v13886_v26 = vpop.permute.xlu0 %6762 }
 0x95c   :  { %v6768_v48 = vsel %vm414_vm2, %v13886_v26, 0 }
 0x95f   :  { %v6814_v9 = vpop.permute.xlu0 %6813 }
 0x960   :  { %v6819_v62 = vsel %vm414_vm2, %v6814_v9, 0 }
 0x968   :  { %v5436_v61 = vpop.xlane.xlu1 %5435 }
 0x969   :  { %11424 = vrcp.f32 %v5436_v61 }
 0x96c   :  { %v6302_v13 = vpop.permute.xlu1 %6301 }
 0x96d   :  { %10547 = vmatmul.mubr.msk.bf16.vlgmr.msra.gmra.mxu0 %vm414_vm2, %v6302_v13 }
 0x96e   :  { %10557 = vmatpush3.bf16.xpose.msra.mxu0 %v6411_v18  ;;  %10558 = vmatprep.mubr.msk.bf16.mxu0 %vm11650_vm1, %v15482_v38 }
 0x96f   :  { %10568 = vmatprep.subr.bf16.mxu0 %v15482_v38 }
 0x970   :  { %v6353_v58 = vpop.permute.xlu1 %6352 }
 0x974   :  { %v6404_v24 = vpop.permute.xlu1 %6403 }
 0x975   :  { %10559 = vmatmul.mubr.msk.bf16.vlgmr.msra.gmra.mxu0 %vm414_vm2, %v6404_v24 }
 0x976   :  { %v11425_v21 = vpop.eup %11424  ;;  %10569 = vmatpush3.bf16.xpose.msra.mxu0 %v6513_v33  ;;  %10570 = vmatprep.mubr.msk.bf16.mxu0 %vm11650_vm1, %v15482_v38 }
 0x977   :  { %v5532_v36 = vmul.f32 %v11425_v21, %v13693_v40  ;;  %10580 = vmatprep.subr.bf16.mxu0 %v15482_v38  ;;  %v6865_v40 = vpop.permute.xlu0 %6864 }
 0x978   :  { %v6455_v6 = vpop.permute.xlu1 %6454  ;;  %v6870_v52 = vsel %vm414_vm2, %v6865_v40, 0 }
 0x979   :  { %v5548_v42 = vpack.c.bf16 %v5532_v36, %v5531_v27 }
 0x97b   :  { %10541 = vmatmul.mubr.msk.bf16.vlgmr.msra.gmra.mxu1 %vm1212_vm3, %v5548_v42  ;;  %v6916_v25 = vpop.permute.xlu0 %6915 }
 0x97c   :  { %10551 = vmatpush3.bf16.xpose.msra.mxu1 %v6360_v4  ;;  %v6506_v19 = vpop.permute.xlu1 %6505  ;;  %10552 = vmatprep.mubr.msk.bf16.mxu1 %vm11650_vm1, %v15482_v38  ;;  %v6921_v1 = vsel %vm414_vm2, %v6916_v25, 0 }
 0x97d   :  { %10571 = vmatmul.mubr.msk.bf16.vlgmr.msra.gmra.mxu0 %vm414_vm2, %v6506_v19  ;;  %10562 = vmatprep.subr.bf16.mxu1 %v15482_v38 }
 0x97e   :  { %10581 = vmatpush3.bf16.xpose.msra.mxu0 %v6615_v15  ;;  %10582 = vmatprep.mubr.msk.bf16.mxu0 %vm11650_vm1, %v15482_v38 }
 0x97f   :  { %10592 = vmatprep.subr.bf16.mxu0 %v15482_v38  ;;  %v6967_v0 = vpop.permute.xlu0 %6966 }
 0x980   :  { %v6557_v59 = vpop.permute.xlu1 %6556  ;;  %v6972_v23 = vsel %vm414_vm2, %v6967_v0, 0 }
 0x983   :  { %10553 = vmatmul.mubr.msk.bf16.vlgmr.msra.gmra.mxu1 %vm414_vm2, %v6353_v58  ;;  %v7018_v35 = vpop.permute.xlu0 %7017 }
 0x984   :  { %10563 = vmatpush3.bf16.xpose.msra.mxu1 %v6462_v10  ;;  %v6608_v45 = vpop.permute.xlu1 %6607  ;;  %10564 = vmatprep.mubr.msk.bf16.mxu1 %vm11650_vm1, %v15482_v38  ;;  %v7023_v51 = vsel %vm414_vm2, %v7018_v35, 0 }
 0x985   :  { %10583 = vmatmul.mubr.msk.bf16.vlgmr.msra.gmra.mxu0 %vm414_vm2, %v6608_v45  ;;  %10574 = vmatprep.subr.bf16.mxu1 %v15482_v38 }
 0x986   :  { %10593 = vmatpush3.bf16.xpose.msra.mxu0 %v6717_v22  ;;  %10594 = vmatprep.mubr.msk.bf16.mxu0 %vm11650_vm1, %v15482_v38 }
 0x987   :  { %10604 = vmatprep.subr.bf16.mxu0 %v15482_v38  ;;  %v7069_v63 = vpop.permute.xlu0 %7068 }
 0x988   :  { %v6659_v31 = vpop.permute.xlu1 %6658  ;;  %v7074_v17 = vsel %vm414_vm2, %v7069_v63, 0 }
 0x98b   :  { %10565 = vmatmul.mubr.msk.bf16.vlgmr.msra.gmra.mxu1 %vm414_vm2, %v6455_v6  ;;  %v7067_v46 = vpop.permute.xlu0 %7066 }
 0x98c   :  { %10575 = vmatpush3.bf16.xpose.msra.mxu1 %v6564_v5  ;;  %v6710_v29 = vpop.permute.xlu1 %6709  ;;  %10576 = vmatprep.mubr.msk.bf16.mxu1 %vm11650_vm1, %v15482_v38 }
 0x98d   :  { %10595 = vmatmul.mubr.msk.bf16.vlgmr.msra.gmra.mxu0 %vm414_vm2, %v6710_v29  ;;  %10586 = vmatprep.subr.bf16.mxu1 %v15482_v38 }
 0x98e   :  { %10605 = vmatpush3.bf16.xpose.msra.mxu0 %v6819_v62  ;;  %10606 = vmatprep.mubr.msk.bf16.mxu0 %vm11650_vm1, %v15482_v38 }
 0x98f   :  { %10616 = vmatprep.subr.bf16.mxu0 %v15482_v38  ;;  %v7518_v54 = vpop.permute.xlu0 %7517 }
 0x990   :  { %v6761_v37 = vpop.permute.xlu1 %6760 }
 0x993   :  { %10577 = vmatmul.mubr.msk.bf16.vlgmr.msra.gmra.mxu1 %vm414_vm2, %v6557_v59 }
 0x994   :  { %10587 = vmatpush3.bf16.xpose.msra.mxu1 %v6666_v32  ;;  %v6812_v55 = vpop.permute.xlu1 %6811  ;;  %10588 = vmatprep.mubr.msk.bf16.mxu1 %vm11650_vm1, %v15482_v38 }
 0x995   :  { %10607 = vmatmul.mubr.msk.bf16.vlgmr.msra.gmra.mxu0 %vm414_vm2, %v6812_v55  ;;  %10598 = vmatprep.subr.bf16.mxu1 %v15482_v38 }
 0x996   :  { %10617 = vmatpush3.bf16.xpose.msra.mxu0 %v6921_v1  ;;  %10618 = vmatprep.mubr.msk.bf16.mxu0 %vm11650_vm1, %v15482_v38 }
 0x997   :  { %10628 = vmatprep.subr.bf16.mxu0 %v15482_v38 }
 0x998   :  { %v6863_v41 = vpop.permute.xlu1 %6862 }
 0x99b   :  { %10589 = vmatmul.mubr.msk.bf16.vlgmr.msra.gmra.mxu1 %vm414_vm2, %v6659_v31 }
 0x99c   :  { %10599 = vmatpush3.bf16.xpose.msra.mxu1 %v6768_v48  ;;  %v6914_v44 = vpop.permute.xlu1 %6913  ;;  %10600 = vmatprep.mubr.msk.bf16.mxu1 %vm11650_vm1, %v15482_v38 }
 0x99d   :  { %10619 = vmatmul.mubr.msk.bf16.vlgmr.msra.gmra.mxu0 %vm414_vm2, %v6914_v44  ;;  %10610 = vmatprep.subr.bf16.mxu1 %v15482_v38 }
 0x99e   :  { %10629 = vmatpush3.bf16.xpose.msra.mxu0 %v7023_v51  ;;  %10630 = vmatprep.mubr.msk.bf16.mxu0 %vm11650_vm1, %v15482_v38 }
 0x99f   :  { %10640 = vmatprep.subr.bf16.mxu0 %v15482_v38 }
 0x9a0   :  { %v6965_v39 = vpop.permute.xlu1 %6964 }
 0x9a3   :  { %10601 = vmatmul.mubr.msk.bf16.vlgmr.msra.gmra.mxu1 %vm414_vm2, %v6761_v37 }
 0x9a4   :  { %10611 = vmatpush3.bf16.xpose.msra.mxu1 %v6870_v52  ;;  %v7016_v2 = vpop.permute.xlu1 %7015  ;;  %10612 = vmatprep.mubr.msk.bf16.mxu1 %vm11650_vm1, %v15482_v38 }
 0x9a5   :  { %10631 = vmatmul.mubr.msk.bf16.vlgmr.msra.gmra.mxu0 %vm414_vm2, %v7016_v2  ;;  %10622 = vmatprep.subr.bf16.mxu1 %v15482_v38 }
 0x9a6   :  { %10641 = vmatpush3.bf16.msra.mxu0 %v7518_v54  ;;  %10642 = vmatprep.mubr.msk.bf16.mxu0 %vm11650_vm1, %v15482_v38 }
 0x9a7   :  { %10652 = vmatprep.subr.bf16.mxu0 %v15482_v38 }
 0x9a8   :  { %v7565_v12 = vpop.permute.xlu1 %7564 }
 0x9ab   :  { %10613 = vmatmul.mubr.msk.bf16.vlgmr.msra.gmra.mxu1 %vm414_vm2, %v6863_v41 }
 0x9ac   :  { %10623 = vmatpush3.bf16.xpose.msra.mxu1 %v6972_v23  ;;  %10624 = vmatprep.mubr.msk.bf16.mxu1 %vm11650_vm1, %v15482_v38 }
 0x9ad   :  { %10634 = vmatprep.subr.bf16.mxu1 %v15482_v38 }
 0x9b3   :  { %10625 = vmatmul.mubr.msk.bf16.vlgmr.msra.gmra.mxu1 %vm414_vm2, %v6965_v39 }
 0x9b4   :  { %10635 = vmatpush3.bf16.xpose.msra.mxu1 %v7074_v17  ;;  %10636 = vmatprep.mubr.msk.bf16.mxu1 %vm11650_vm1, %v15482_v38 }
 0x9b5   :  { %10646 = vmatprep.subr.bf16.mxu1 %v15482_v38 }
 0x9bb   :  { %10637 = vmatmul.mubr.msk.bf16.vlgmr.msra.gmra.mxu1 %vm414_vm2, %v7067_v46 }
 0x9bc   :  { %v13966_v53 = vpop.f32.mrf.mxu0  ;;  %10647 = vmatpush3.bf16.msra.mxu1 %v7565_v12  ;;  %10648 = vmatprep.mubr.msk.bf16.mxu1 %vm11650_vm1, %v15482_v38 }
 0x9bd   :  { %10658 = vmatprep.subr.bf16.mxu1 %v15482_v38 }
 0x9be   :  { %v10452_v20 = vpop.f32.mrf.mxu0 }
 0x9c0   :  { %v13971_v47 = vpop.f32.mrf.mxu0 }
 0x9c2   :  { %v10453_v7 = vpop.f32.mrf.mxu0 }
 0x9d2   :  { %v13975_v34 = vpop.f32.mrf.mxu1 }
 0x9d4   :  { %v10458_v60 = vpop.f32.mrf.mxu1 }
 0x9d6   :  { %v13977_v50 = vpop.f32.mrf.mxu1  ;;  %v13979_v56 = vpop.f32.mrf.mxu0 }
 0x9d8   :  { %v10459_v28 = vpop.f32.mrf.mxu1  ;;  %v10464_v61 = vpop.f32.mrf.mxu0 }
 0x9da   :  { %v13983_v57 = vpop.f32.mrf.mxu0  ;;  %v13985_v13 = vpop.f32.mrf.mxu1 }
 0x9dc   :  { %v10465_v30 = vpop.f32.mrf.mxu0  ;;  %v10470_v58 = vpop.f32.mrf.mxu1 }
 0x9de   :  { %v13989_v43 = vpop.f32.mrf.mxu1  ;;  %v13991_v24 = vpop.f32.mrf.mxu0 }
 0x9e0   :  { %v10471_v26 = vpop.f32.mrf.mxu1  ;;  %v10476_v21 = vpop.f32.mrf.mxu0 }
 0x9e2   :  { %v13995_v27 = vpop.f32.mrf.mxu0  ;;  %v13997_v36 = vpop.f32.mrf.mxu1 }
 0x9e4   :  { %v10477_v42 = vpop.f32.mrf.mxu0  ;;  %v10482_v4 = vpop.f32.mrf.mxu1 }
 0x9e6   :  { %v14001_v9 = vpop.f32.mrf.mxu1  ;;  %v14003_v19 = vpop.f32.mrf.mxu0 }
 0x9e8   :  { %v10483_v59 = vpop.f32.mrf.mxu1  ;;  %v10488_v40 = vpop.f32.mrf.mxu0 }
 0x9ea   :  { %v14007_v10 = vpop.f32.mrf.mxu0 }
 0x9ec   :  { %v10489_v22 = vpop.f32.mrf.mxu0 }
 0x9ee   :  { %v14011_v25 = vpop.f32.mrf.mxu0 }
 0x9ef   :  { %15606 = vst [vmem:[#allocation77_spill] sm:$0xff] %v14011_v25  ;;  %v14013_v31 = vpop.f32.mrf.mxu1 }
 0x9f0   :  { %v10500_v5 = vpop.f32.mrf.mxu0 }
 0x9f1   :  { %v10494_v29 = vpop.f32.mrf.mxu1 }
 0x9f2   :  { %v14015_v62 = vpop.f32.mrf.mxu0 }
 0x9f3   :  { %15607 = vst [vmem:[#allocation80_spill] sm:$0xff] %v14015_v62  ;;  %v14017_v0 = vpop.f32.mrf.mxu1 }
 0x9f4   :  { %v10501_v35 = vpop.f32.mrf.mxu0 }
 0x9f5   :  { %v10495_v55 = vpop.f32.mrf.mxu1 }
 0x9f6   :  { %v14023_v1 = vpop.f32.mrf.mxu0 }
 0x9f7   :  { %15608 = vst [vmem:[#allocation78_spill] sm:$0xff] %v14023_v1  ;;  %v14025_v41 = vpop.f32.mrf.mxu1 }
 0x9f8   :  { %15609 = vst [vmem:[#allocation82_spill] sm:$0xff] %v14025_v41  ;;  %v10512_v63 = vpop.f32.mrf.mxu0 }
 0x9f9   :  { %v10506_v48 = vpop.f32.mrf.mxu1 }
 0x9fa   :  { %v14027_v44 = vpop.f32.mrf.mxu0 }
 0x9fb   :  { %15610 = vst [vmem:[#allocation79_spill] sm:$0xff] %v14027_v44  ;;  %v14029_v51 = vpop.f32.mrf.mxu1 }
 0x9fc   :  { %15611 = vst [vmem:[#allocation84_spill] sm:$0xff] %v14029_v51  ;;  %v10513_v52 = vpop.f32.mrf.mxu0 }
 0x9fd   :  { %v10507_v2 = vpop.f32.mrf.mxu1 }
 0x9fe   :  { %v14035_v54 = vpop.f32.mrf.mxu0 }
 0x9ff   :  { %15612 = vst [vmem:[#allocation83_spill] sm:$0xff] %v14035_v54  ;;  %v14037_v23 = vpop.f32.mrf.mxu1 }
 0xa00   :  { %15613 = vst [vmem:[#allocation81_spill] sm:$0xff] %v14037_v23  ;;  %v10524_v17 = vpop.f32.mrf.mxu0 }
 0xa01   :  { %v10518_v12 = vpop.f32.mrf.mxu1 }
 0xa02   :  { %v14039_v20 = vpop.f32.mrf.mxu0 }
 0xa03   :  { %15614 = vst [vmem:[#allocation85_spill] sm:$0xff] %v14039_v20  ;;  %v14041_v7 = vpop.f32.mrf.mxu1 }
 0xa04   :  { %15615 = vst [vmem:[#allocation86_spill] sm:$0xff] %v14041_v7  ;;  %v10525_v61 = vpop.f32.mrf.mxu0 }
 0xa05   :  { %v10519_v30 = vpop.f32.mrf.mxu1 }
 0xa06   :  { %v14047_v58 = vpop.f32.mrf.mxu0 }
 0xa07   :  { %15616 = vst [vmem:[#allocation87_spill] sm:$0xff] %v14047_v58  ;;  %v14049_v26 = vpop.f32.mrf.mxu1 }
 0xa08   :  { %15617 = vst [vmem:[#allocation88_spill] sm:$0xff] %v14049_v26  ;;  %v10536_v21 = vpop.f32.mrf.mxu0 }
 0xa09   :  { %v10530_v42 = vpop.f32.mrf.mxu1 }
 0xa0a   :  { %v14051_v4 = vpop.f32.mrf.mxu0 }
 0xa0b   :  { %15618 = vst [vmem:[#allocation89_spill] sm:$0xff] %v14051_v4  ;;  %v14053_v59 = vpop.f32.mrf.mxu1 }
 0xa0c   :  { %15619 = vst [vmem:[#allocation90_spill] sm:$0xff] %v14053_v59  ;;  %v10537_v5 = vpop.f32.mrf.mxu0 }
 0xa0d   :  { %v10531_v29 = vpop.f32.mrf.mxu1 }
 0xa2d   :  { %v14059_v35 = vpop.f32.mrf.mxu0 }
 0xa2e   :  { %v7117_v55 = vsel %vm1212_vm3, %v14059_v35, -inf }
 0xa2f   :  { %7118 = vmax.xlane.f32.xlu1 %v7117_v55  ;;  %v10548_v63 = vpop.f32.mrf.mxu0 }
 0xa31   :  { %v14063_v48 = vpop.f32.mrf.mxu0 }
 0xa32   :  { %v7120_v52 = vsel %vm1212_vm3, %v14063_v48, -inf }
 0xa33   :  { %7121 = vmax.xlane.f32.xlu0 %v7120_v52  ;;  %v10549_v2 = vpop.f32.mrf.mxu0 }
 0xa35   :  { %v14067_v17 = vpop.f32.mrf.mxu0 }
 0xa37   :  { %v10560_v12 = vpop.f32.mrf.mxu0 }
 0xa39   :  { %v14069_v61 = vpop.f32.mrf.mxu0 }
 0xa3b   :  { %v14071_v30 = vpop.f32.mrf.mxu1  ;;  %v10561_v21 = vpop.f32.mrf.mxu0 }
 0xa3c   :  { %15620 = vst [vmem:[#allocation91_spill] sm:$0xff] %v14071_v30 }
 0xa3d   :  { %v10542_v42 = vpop.f32.mrf.mxu1  ;;  %v14073_v5 = vpop.f32.mrf.mxu0 }
 0xa3f   :  { %v14075_v29 = vpop.f32.mrf.mxu1  ;;  %v10572_v55 = vpop.f32.mrf.mxu0 }
 0xa40   :  { %15621 = vst [vmem:[#allocation92_spill] sm:$0xff] %v14075_v29 }
 0xa41   :  { %v10543_v40 = vpop.f32.mrf.mxu1  ;;  %v14079_v52 = vpop.f32.mrf.mxu0 }
 0xa42   :  { %v7129_v40 = vsel %vm1212_vm3, %v14067_v17, -inf }
 0xa43   :  { %v14081_v2 = vpop.f32.mrf.mxu1  ;;  %v10573_v12 = vpop.f32.mrf.mxu0 }
 0xa44   :  { %v7123_v22 = vsel %vm1212_vm3, %v14081_v2, -inf }
 0xa45   :  { %7124 = vmax.xlane.f32.xlu0 %v7123_v22  ;;  %v10554_v21 = vpop.f32.mrf.mxu1  ;;  %v14085_v42 = vpop.f32.mrf.mxu0 }
 0xa46   :  { %v7132_v21 = vsel %vm1212_vm3, %v14069_v61, -inf }
 0xa47   :  { %v14087_v60 = vpop.f32.mrf.mxu1  ;;  %v10584_v28 = vpop.f32.mrf.mxu0 }
 0xa48   :  { %v7126_v55 = vsel %vm1212_vm3, %v14087_v60, -inf }
 0xa49   :  { %7127 = vmax.xlane.f32.xlu1 %v7126_v55  ;;  %v10555_v63 = vpop.f32.mrf.mxu1  ;;  %7130 = vmax.xlane.f32.xlu0 %v7129_v40  ;;  %v14093_v12 = vpop.f32.mrf.mxu0  ;;  %v7141_v40 = vsel %vm1212_vm3, %v14073_v5, -inf }
 0xa4b   :  { %v14095_v46 = vpop.f32.mrf.mxu1  ;;  %v10585_v22 = vpop.f32.mrf.mxu0 }
 0xa4c   :  { %v7135_v28 = vsel %vm1212_vm3, %v14095_v46, -inf }
 0xa4d   :  { %7133 = vmax.xlane.f32.xlu1 %v7132_v21  ;;  %7136 = vmax.xlane.f32.xlu0 %v7135_v28  ;;  %v10566_v39 = vpop.f32.mrf.mxu1  ;;  %v14101_v37 = vpop.f32.mrf.mxu0 }
 0xa4e   :  { %v7144_v39 = vsel %vm1212_vm3, %v14079_v52, -inf }
 0xa4f   :  { %v14103_v32 = vpop.f32.mrf.mxu1  ;;  %v10596_v63 = vpop.f32.mrf.mxu0 }
 0xa50   :  { %v7138_v55 = vsel %vm1212_vm3, %v14103_v32, -inf }
 0xa51   :  { %7139 = vmax.xlane.f32.xlu1 %v7138_v55  ;;  %v10567_v22 = vpop.f32.mrf.mxu1  ;;  %7142 = vmax.xlane.f32.xlu0 %v7141_v40  ;;  %v14109_v45 = vpop.f32.mrf.mxu0 }
 0xa52   :  { %v7153_v22 = vsel %vm1212_vm3, %v14085_v42, -inf }
 0xa53   :  { %v14111_v15 = vpop.f32.mrf.mxu1  ;;  %v10597_v21 = vpop.f32.mrf.mxu0 }
 0xa54   :  { %v7147_v28 = vsel %vm1212_vm3, %v14111_v15, -inf }
 0xa55   :  { %7145 = vmax.xlane.f32.xlu1 %v7144_v39  ;;  %7148 = vmax.xlane.f32.xlu0 %v7147_v28  ;;  %v10578_v63 = vpop.f32.mrf.mxu1  ;;  %v14117_v6 = vpop.f32.mrf.mxu0  ;;  %v7156_v28 = vsel %vm1212_vm3, %v14093_v12, -inf }
 0xa57   :  { %v14119_v33 = vpop.f32.mrf.mxu1  ;;  %v10608_v55 = vpop.f32.mrf.mxu0 }
 0xa58   :  { %v7150_v40 = vsel %vm1212_vm3, %v14119_v33, -inf }
 0xa59   :  { %7151 = vmax.xlane.f32.xlu1 %v7150_v40  ;;  %v10579_v21 = vpop.f32.mrf.mxu1  ;;  %7154 = vmax.xlane.f32.xlu0 %v7153_v22  ;;  %v14125_v18 = vpop.f32.mrf.mxu0 }
 0xa5a   :  { %v7165_v21 = vsel %vm1212_vm3, %v14101_v37, -inf }
 0xa5b   :  { %v14127_v3 = vpop.f32.mrf.mxu1  ;;  %v10609_v39 = vpop.f32.mrf.mxu0 }
 0xa5c   :  { %v7159_v63 = vsel %vm1212_vm3, %v14127_v3, -inf }
 0xa5d   :  { %7157 = vmax.xlane.f32.xlu1 %v7156_v28  ;;  %7160 = vmax.xlane.f32.xlu0 %v7159_v63  ;;  %v10590_v55 = vpop.f32.mrf.mxu1  ;;  %v14133_v16 = vpop.f32.mrf.mxu0  ;;  %v7168_v63 = vsel %vm1212_vm3, %v14109_v45, -inf }
 0xa5f   :  { %v14135_v30 = vpop.f32.mrf.mxu1  ;;  %v10620_v40 = vpop.f32.mrf.mxu0 }
 0xa60   :  { %v7162_v22 = vsel %vm1212_vm3, %v14135_v30, -inf }
 0xa61   :  { %7163 = vmax.xlane.f32.xlu1 %v7162_v22  ;;  %v10591_v39 = vpop.f32.mrf.mxu1  ;;  %7166 = vmax.xlane.f32.xlu0 %v7165_v21  ;;  %v14141_v29 = vpop.f32.mrf.mxu0 }
 0xa62   :  { %v7177_v39 = vsel %vm1212_vm3, %v14117_v6, -inf  ;;  %v7192_v23 = vsel %vm1212_vm3, %v14141_v29, -inf }
 0xa63   :  { %v14143_v58 = vpop.f32.mrf.mxu1  ;;  %v10621_v28 = vpop.f32.mrf.mxu0 }
 0xa64   :  { %v7171_v55 = vsel %vm1212_vm3, %v14143_v58, -inf }
 0xa65   :  { %7169 = vmax.xlane.f32.xlu1 %v7168_v63  ;;  %7172 = vmax.xlane.f32.xlu0 %v7171_v55  ;;  %v10602_v40 = vpop.f32.mrf.mxu1  ;;  %v14149_v4 = vpop.f32.mrf.mxu0  ;;  %v7180_v55 = vsel %vm1212_vm3, %v14125_v18, -inf }
 0xa67   :  { %v14151_v26 = vpop.f32.mrf.mxu1  ;;  %v10632_v22 = vpop.f32.mrf.mxu0 }
 0xa68   :  { %v7174_v21 = vsel %vm1212_vm3, %v14151_v26, -inf }
 0xa69   :  { %7175 = vmax.xlane.f32.xlu1 %v7174_v21  ;;  %v10603_v28 = vpop.f32.mrf.mxu1  ;;  %7178 = vmax.xlane.f32.xlu0 %v7177_v39  ;;  %v14157_v59 = vpop.f32.mrf.mxu0  ;;  %v7189_v39 = vsel %vm1212_vm3, %v14133_v16, -inf }
 0xa6a   :  { %v7204_v1 = vsel %vm1212_vm3, %v14157_v59, -inf }
 0xa6b   :  { %v14159_v54 = vpop.f32.mrf.mxu1  ;;  %v10633_v63 = vpop.f32.mrf.mxu0 }
 0xa6c   :  { %v7183_v40 = vsel %vm1212_vm3, %v14159_v54, -inf }
 0xa6d   :  { %7181 = vmax.xlane.f32.xlu1 %v7180_v55  ;;  %7184 = vmax.xlane.f32.xlu0 %v7183_v40  ;;  %v10614_v22 = vpop.f32.mrf.mxu1 }
 0xa6f   :  { %v14165_v20 = vpop.f32.mrf.mxu1 }
 0xa70   :  { %v7186_v21 = vsel %vm1212_vm3, %v14165_v20, -inf }
 0xa71   :  { %7187 = vmax.xlane.f32.xlu1 %v7186_v21  ;;  %v10615_v28 = vpop.f32.mrf.mxu1  ;;  %7190 = vmax.xlane.f32.xlu0 %v7189_v39  ;;  %v7201_v21 = vsel %vm1212_vm3, %v14149_v4, -inf }
 0xa73   :  { %v14171_v63 = vpop.f32.mrf.mxu1 }
 0xa74   :  { %v7195_v55 = vsel %vm1212_vm3, %v14171_v63, -inf }
 0xa75   :  { %7193 = vmax.xlane.f32.xlu1 %v7192_v23  ;;  %7196 = vmax.xlane.f32.xlu0 %v7195_v55  ;;  %v10626_v40 = vpop.f32.mrf.mxu1 }
 0xa77   :  { %v14177_v22 = vpop.f32.mrf.mxu1 }
 0xa78   :  { %v7198_v7 = vsel %vm1212_vm3, %v14177_v22, -inf }
 0xa79   :  { %7199 = vmax.xlane.f32.xlu1 %v7198_v7  ;;  %v10627_v39 = vpop.f32.mrf.mxu1  ;;  %7202 = vmax.xlane.f32.xlu0 %v7201_v21  ;;  %v14197_v21 = vpop.permute.xlu1 %7658 }
 0xa7a   :  { %15622 = vst [vmem:[#allocation93_spill] sm:$0xff] %v14197_v21  ;;  %v14199_v39 = vpop.permute.xlu0 %7611 }
 0xa7b   :  { %v14183_v28 = vpop.f32.mrf.mxu1  ;;  %15623 = vst [vmem:[#allocation94_spill] sm:$0xff] %v14199_v39 }
 0xa7c   :  { %v7207_v23 = vsel %vm1212_vm3, %v14183_v28, -inf }
 0xa7d   :  { %7205 = vmax.xlane.f32.xlu1 %v7204_v1  ;;  %7208 = vmax.xlane.f32.xlu0 %v7207_v23  ;;  %v10638_v55 = vpop.f32.mrf.mxu1  ;;  %v14201_v1 = vpop.permute.xlu1 %7752 }
 0xa7e   :  { %15624 = vst [vmem:[#allocation95_spill] sm:$0xff] %v14201_v1  ;;  %v14203_v23 = vpop.permute.xlu0 %7705 }
 0xa7f   :  { %v14189_v40 = vpop.f32.mrf.mxu1  ;;  %15625 = vst [vmem:[#allocation96_spill] sm:$0xff] %v14203_v23 }
 0xa80   :  { %v7210_v44 = vsel %vm1212_vm3, %v14189_v40, -inf }
 0xa81   :  { %7211 = vmax.xlane.f32.xlu1 %v7210_v44  ;;  %v10639_v7 = vpop.f32.mrf.mxu1  ;;  %v14205_v55 = vpop.permute.xlu1 %7846 }
 0xa82   :  { %15626 = vst [vmem:[#allocation97_spill] sm:$0xff] %v14205_v55  ;;  %v14207_v41 = vpop.permute.xlu0 %7799 }
 0xa83   :  { %15627 = vst [vmem:[#allocation98_spill] sm:$0xff] %v14207_v41 }
 0xa85   :  { %v14209_v44 = vpop.permute.xlu1 %7940 }
 0xa86   :  { %15628 = vst [vmem:[#allocation99_spill] sm:$0xff] %v14209_v44  ;;  %v14211_v7 = vpop.permute.xlu0 %7893 }
 0xa87   :  { %15629 = vst [vmem:[#allocation100_spill] sm:$0xff] %v14211_v7 }
 0xa8a   :  { %v14215_v51 = vpop.permute.xlu0 %8034 }
 0xa8b   :  { %15631 = vst [vmem:[#allocation102_spill] sm:$0xff] %v14215_v51 }
 0xa92   :  { %8081 = vrot.lane.b32.xlu1 %v11830_v11, %s11660_s9  ;;  %v14213_v11 = vpop.permute.xlu1 %7987 }
 0xa93   :  { %8128 = vrot.lane.b32.xlu0 %v11824_v8, %s11660_s9  ;;  %15630 = vst [vmem:[#allocation101_spill] sm:$0xff] %v14213_v11 }
 0xab8   :  { %v7119_v8 = vpop.xlane.xlu1 %7118 }
 0xab9   :  { %v7213_v25 = vsub.f32 %v14059_v35, %v7119_v8 }
 0xabb   :  { %v7245_v62 = vmul.f32 1.442695, %v7213_v25 }
 0xabc   :  { %v7122_v21 = vpop.xlane.xlu0 %7121 }
 0xabd   :  { %11426 = vpow2.f32 %v7245_v62  ;;  %v7214_v1 = vsub.f32 %v14063_v48, %v7122_v21 }
 0xabf   :  { %v7247_v23 = vmul.f32 1.442695, %v7214_v1 }
 0xac1   :  { %11428 = vpow2.f32 %v7247_v23 }
 0xaca   :  { %v14219_v55 = vpop.eup %11426 }
 0xacb   :  { %v7309_v44 = vsel %vm1212_vm3, %v14219_v55, 0.0 }
 0xacc   :  { %7310 = vadd.xlane.f32.xlu0 %v7309_v44 }
 0xace   :  { %v14223_v7 = vpop.eup %11428  ;;  %v7125_v11 = vpop.xlane.xlu0 %7124 }
 0xacf   :  { %v7215_v51 = vsub.f32 %v14081_v2, %v7125_v11  ;;  %v7312_v25 = vsel %vm1212_vm3, %v14223_v7, 0.0 }
 0xad0   :  { %7313 = vadd.xlane.f32.xlu1 %v7312_v25 }
 0xad1   :  { %v7249_v62 = vmul.f32 1.442695, %v7215_v51 }
 0xad2   :  { %v7128_v35 = vpop.xlane.xlu1 %7127  ;;  %v7131_v48 = vpop.xlane.xlu0 %7130 }
 0xad3   :  { %11430 = vpow2.f32 %v7249_v62  ;;  %v7216_v21 = vsub.f32 %v14087_v60, %v7128_v35  ;;  %v7217_v1 = vsub.f32 %v14067_v17, %v7131_v48 }
 0xad5   :  { %v7251_v23 = vmul.f32 1.442695, %v7216_v21  ;;  %v7253_v8 = vmul.f32 1.442695, %v7217_v1 }
 0xad6   :  { %v7134_v44 = vpop.xlane.xlu1 %7133  ;;  %v7137_v41 = vpop.xlane.xlu0 %7136 }
 0xad7   :  { %11432 = vpow2.f32 %v7251_v23  ;;  %v7218_v38 = vsub.f32 %v14069_v61, %v7134_v44  ;;  %v7219_v2 = vsub.f32 %v14095_v46, %v7137_v41 }
 0xad8   :  { %11434 = vpow2.f32 %v7253_v8 }
 0xad9   :  { %v7255_v11 = vmul.f32 1.442695, %v7218_v38  ;;  %v7257_v25 = vmul.f32 1.442695, %v7219_v2 }
 0xada   :  { %v7140_v51 = vpop.xlane.xlu1 %7139  ;;  %v7143_v39 = vpop.xlane.xlu0 %7142 }
 0xadb   :  { %11436 = vpow2.f32 %v7255_v11  ;;  %v7220_v62 = vsub.f32 %v14103_v32, %v7140_v51  ;;  %v7221_v60 = vsub.f32 %v14073_v5, %v7143_v39 }
 0xadc   :  { %11438 = vpow2.f32 %v7257_v25 }
 0xadd   :  { %v7259_v17 = vmul.f32 1.442695, %v7220_v62  ;;  %v7261_v35 = vmul.f32 1.442695, %v7221_v60 }
 0xade   :  { %v7146_v48 = vpop.xlane.xlu1 %7145  ;;  %v7149_v21 = vpop.xlane.xlu0 %7148 }
 0xadf   :  { %11440 = vpow2.f32 %v7259_v17  ;;  %v7222_v61 = vsub.f32 %v14079_v52, %v7146_v48  ;;  %v7223_v41 = vsub.f32 %v14111_v15, %v7149_v21 }
 0xae0   :  { %v14236_v46 = vpop.eup %11430  ;;  %11442 = vpow2.f32 %v7261_v35 }
 0xae1   :  { %v7263_v38 = vmul.f32 1.442695, %v7222_v61  ;;  %v7265_v1 = vmul.f32 1.442695, %v7223_v41  ;;  %v7315_v32 = vsel %vm1212_vm3, %v14236_v46, 0.0 }
 0xae2   :  { %v7152_v23 = vpop.xlane.xlu1 %7151  ;;  %7316 = vadd.xlane.f32.xlu0 %v7315_v32  ;;  %v7155_v5 = vpop.xlane.xlu0 %7154 }
 0xae3   :  { %11444 = vpow2.f32 %v7263_v38  ;;  %v7224_v39 = vsub.f32 %v14119_v33, %v7152_v23  ;;  %v7225_v8 = vsub.f32 %v14085_v42, %v7155_v5 }
 0xae4   :  { %v14242_v44 = vpop.eup %11432  ;;  %11446 = vpow2.f32 %v7265_v1 }
 0xae5   :  { %v14244_v15 = vpop.eup %11434  ;;  %v7267_v52 = vmul.f32 1.442695, %v7224_v39  ;;  %v7269_v2 = vmul.f32 1.442695, %v7225_v8  ;;  %v7318_v11 = vsel %vm1212_vm3, %v14242_v44, 0.0 }
 0xae6   :  { %v7158_v25 = vpop.xlane.xlu1 %7157  ;;  %7319 = vadd.xlane.f32.xlu1 %v7318_v11  ;;  %v7321_v51 = vsel %vm1212_vm3, %v14244_v15, 0.0  ;;  %v7161_v62 = vpop.xlane.xlu0 %7160 }
 0xae7   :  { %11448 = vpow2.f32 %v7267_v52  ;;  %v7226_v33 = vsub.f32 %v14093_v12, %v7158_v25  ;;  %7322 = vadd.xlane.f32.xlu0 %v7321_v51  ;;  %v7227_v42 = vsub.f32 %v14127_v3, %v7161_v62 }
 0xae8   :  { %v14252_v60 = vpop.eup %11436  ;;  %11450 = vpow2.f32 %v7269_v2 }
 0xae9   :  { %v14254_v17 = vpop.eup %11438  ;;  %v7271_v35 = vmul.f32 1.442695, %v7226_v33  ;;  %v7273_v48 = vmul.f32 1.442695, %v7227_v42  ;;  %v7324_v21 = vsel %vm1212_vm3, %v14252_v60, 0.0 }
 0xaea   :  { %v7164_v61 = vpop.xlane.xlu1 %7163  ;;  %7325 = vadd.xlane.f32.xlu1 %v7324_v21  ;;  %v7327_v41 = vsel %vm1212_vm3, %v14254_v17, 0.0  ;;  %v7167_v38 = vpop.xlane.xlu0 %7166 }
 0xaeb   :  { %11452 = vpow2.f32 %v7271_v35  ;;  %v7228_v12 = vsub.f32 %v14135_v30, %v7164_v61  ;;  %7328 = vadd.xlane.f32.xlu0 %v7327_v41  ;;  %v7229_v3 = vsub.f32 %v14101_v37, %v7167_v38 }
 0xaec   :  { %v14262_v1 = vpop.eup %11440  ;;  %11454 = vpow2.f32 %v7273_v48 }
 0xaed   :  { %v14264_v32 = vpop.eup %11442  ;;  %v7277_v23 = vmul.f32 1.442695, %v7229_v3  ;;  %v7330_v5 = vsel %vm1212_vm3, %v14262_v1, 0.0  ;;  %v7275_v39 = vmul.f32 1.442695, %v7228_v12 }
 0xaee   :  { %v7170_v8 = vpop.xlane.xlu1 %7169  ;;  %7331 = vadd.xlane.f32.xlu1 %v7330_v5  ;;  %v7333_v52 = vsel %vm1212_vm3, %v14264_v32, 0.0  ;;  %v7173_v2 = vpop.xlane.xlu0 %7172 }
 0xaef   :  { %v7230_v30 = vsub.f32 %v14109_v45, %v7170_v8  ;;  %7334 = vadd.xlane.f32.xlu0 %v7333_v52  ;;  %v7231_v37 = vsub.f32 %v14143_v58, %v7173_v2  ;;  %11456 = vpow2.f32 %v7277_v23 }
 0xaf0   :  { %v14272_v11 = vpop.eup %11444  ;;  %11458 = vpow2.f32 %v7275_v39 }
 0xaf1   :  { %v14274_v25 = vpop.eup %11446  ;;  %v7279_v51 = vmul.f32 1.442695, %v7230_v30  ;;  %v7281_v62 = vmul.f32 1.442695, %v7231_v37  ;;  %v7336_v33 = vsel %vm1212_vm3, %v14272_v11, 0.0 }
 0xaf2   :  { %v7176_v42 = vpop.xlane.xlu1 %7175  ;;  %7337 = vadd.xlane.f32.xlu1 %v7336_v33  ;;  %v7339_v35 = vsel %vm1212_vm3, %v14274_v25, 0.0  ;;  %v7179_v45 = vpop.xlane.xlu0 %7178 }
 0xaf3   :  { %11460 = vpow2.f32 %v7279_v51  ;;  %v7232_v58 = vsub.f32 %v14151_v26, %v7176_v42  ;;  %7340 = vadd.xlane.f32.xlu0 %v7339_v35  ;;  %v7233_v48 = vsub.f32 %v14117_v6, %v7179_v45 }
 0xaf4   :  { %v14282_v21 = vpop.eup %11448  ;;  %11462 = vpow2.f32 %v7281_v62 }
 0xaf5   :  { %v14284_v61 = vpop.eup %11450  ;;  %v7285_v41 = vmul.f32 1.442695, %v7233_v48  ;;  %v7342_v38 = vsel %vm1212_vm3, %v14282_v21, 0.0  ;;  %v7283_v12 = vmul.f32 1.442695, %v7232_v58 }
 0xaf6   :  { %v7182_v3 = vpop.xlane.xlu1 %7181  ;;  %7343 = vadd.xlane.f32.xlu1 %v7342_v38  ;;  %v7345_v23 = vsel %vm1212_vm3, %v14284_v61, 0.0  ;;  %v7185_v5 = vpop.xlane.xlu0 %7184 }
 0xaf7   :  { %v7234_v26 = vsub.f32 %v14125_v18, %v7182_v3  ;;  %7346 = vadd.xlane.f32.xlu0 %v7345_v23  ;;  %v7235_v6 = vsub.f32 %v14159_v54, %v7185_v5  ;;  %11464 = vpow2.f32 %v7285_v41 }
 0xaf8   :  { %v14292_v39 = vpop.eup %11452  ;;  %11466 = vpow2.f32 %v7283_v12 }
 0xaf9   :  { %v14294_v8 = vpop.eup %11454  ;;  %v7287_v52 = vmul.f32 1.442695, %v7234_v26  ;;  %v7289_v2 = vmul.f32 1.442695, %v7235_v6  ;;  %v7348_v30 = vsel %vm1212_vm3, %v14292_v39, 0.0 }
 0xafa   :  { %v7188_v37 = vpop.xlane.xlu1 %7187  ;;  %7349 = vadd.xlane.f32.xlu1 %v7348_v30  ;;  %v7351_v51 = vsel %vm1212_vm3, %v14294_v8, 0.0  ;;  %v7191_v18 = vpop.xlane.xlu0 %7190 }
 0xafb   :  { %11468 = vpow2.f32 %v7287_v52  ;;  %v7236_v54 = vsub.f32 %v14165_v20, %v7188_v37  ;;  %7352 = vadd.xlane.f32.xlu0 %v7351_v51  ;;  %v7237_v62 = vsub.f32 %v14133_v16, %v7191_v18 }
 0xafc   :  { %v14302_v33 = vpop.eup %11456  ;;  %11470 = vpow2.f32 %v7289_v2 }
 0xafd   :  { %v7293_v42 = vmul.f32 1.442695, %v7237_v62  ;;  %v7291_v35 = vmul.f32 1.442695, %v7236_v54  ;;  %v7357_v58 = vsel %vm1212_vm3, %v14302_v33, 0.0  ;;  %v14306_v41 = vpop.eup %11458 }
 0xafe   :  { %v7194_v45 = vpop.xlane.xlu1 %7193  ;;  %v7197_v48 = vpop.xlane.xlu0 %7196  ;;  %7358 = vadd.xlane.f32.xlu1 %v7357_v58  ;;  %v7354_v6 = vsel %vm1212_vm3, %v14306_v41, 0.0 }
 0xaff   :  { %v7238_v38 = vsub.f32 %v14141_v29, %v7194_v45  ;;  %v7239_v20 = vsub.f32 %v14171_v63, %v7197_v48  ;;  %11472 = vpow2.f32 %v7293_v42 }
 0xb00   :  { %v14310_v12 = vpop.eup %11460  ;;  %11474 = vpow2.f32 %v7291_v35 }
 0xb01   :  { %v7295_v16 = vmul.f32 1.442695, %v7238_v38  ;;  %v7297_v3 = vmul.f32 1.442695, %v7239_v20  ;;  %v7360_v23 = vsel %vm1212_vm3, %v14310_v12, 0.0  ;;  %v14314_v5 = vpop.eup %11462 }
 0xb02   :  { %v7200_v26 = vpop.xlane.xlu1 %7199  ;;  %7361 = vadd.xlane.f32.xlu0 %v7360_v23  ;;  %v7203_v29 = vpop.xlane.xlu0 %7202  ;;  %7355 = vadd.xlane.f32.xlu1 %v7354_v6  ;;  %v7363_v37 = vsel %vm1212_vm3, %v14314_v5, 0.0 }
 0xb03   :  { %11476 = vpow2.f32 %v7295_v16  ;;  %v7240_v63 = vsub.f32 %v14177_v22, %v7200_v26  ;;  %v7241_v52 = vsub.f32 %v14149_v4, %v7203_v29 }
 0xb04   :  { %v14320_v2 = vpop.eup %11464  ;;  %11478 = vpow2.f32 %v7297_v3 }
 0xb05   :  { %v7301_v30 = vmul.f32 1.442695, %v7241_v52  ;;  %v7299_v51 = vmul.f32 1.442695, %v7240_v63  ;;  %v7369_v54 = vsel %vm1212_vm3, %v14320_v2, 0.0  ;;  %v14326_v42 = vpop.eup %11466 }
 0xb06   :  { %v7206_v18 = vpop.xlane.xlu1 %7205  ;;  %7364 = vadd.xlane.f32.xlu0 %v7363_v37  ;;  %v7209_v62 = vpop.xlane.xlu0 %7208  ;;  %7370 = vadd.xlane.f32.xlu1 %v7369_v54  ;;  %v7366_v16 = vsel %vm1212_vm3, %v14326_v42, 0.0 }
 0xb07   :  { %v7242_v22 = vsub.f32 %v14157_v59, %v7206_v18  ;;  %v7243_v4 = vsub.f32 %v14183_v28, %v7209_v62  ;;  %11480 = vpow2.f32 %v7301_v30 }
 0xb08   :  { %v14330_v35 = vpop.eup %11468  ;;  %11482 = vpow2.f32 %v7299_v51 }
 0xb09   :  { %v7303_v45 = vmul.f32 1.442695, %v7242_v22  ;;  %v7305_v58 = vmul.f32 1.442695, %v7243_v4  ;;  %v7372_v48 = vsel %vm1212_vm3, %v14330_v35, 0.0  ;;  %v14334_v38 = vpop.eup %11470 }
 0xb0a   :  { %v7212_v20 = vpop.xlane.xlu1 %7211  ;;  %7373 = vadd.xlane.f32.xlu0 %v7372_v48  ;;  %7367 = vadd.xlane.f32.xlu1 %v7366_v16  ;;  %v7375_v23 = vsel %vm1212_vm3, %v14334_v38, 0.0  ;;  %v15633_v16 = vld [vmem:[#allocation45_spill] sm:$0xff] }
 0xb0b   :  { %11484 = vpow2.f32 %v7303_v45  ;;  %v7244_v59 = vsub.f32 %v14189_v40, %v7212_v20  ;;  %v15632_v20 = vld [vmem:[#allocation48_spill] sm:$0xff] }
 0xb0c   :  { %v14339_v28 = vpop.eup %11472  ;;  %11486 = vpow2.f32 %v7305_v58 }
 0xb0d   :  { %v7307_v3 = vmul.f32 1.442695, %v7244_v59  ;;  %v7381_v26 = vsel %vm1212_vm3, %v14339_v28, 0.0  ;;  %v14345_v6 = vpop.eup %11474  ;;  %v15634_v59 = vpack.i.bf16 %v15632_v20, %v15633_v16  ;;  %v15655_v16 = vld [vmem:[#allocation58_spill] sm:$0xff] }
 0xb0e   :  { %7376 = vadd.xlane.f32.xlu0 %v7375_v23  ;;  %7382 = vadd.xlane.f32.xlu1 %v7381_v26  ;;  %v7378_v52 = vsel %vm1212_vm3, %v14345_v6, 0.0  ;;  %v15636_v23 = vld [vmem:[#allocation50_spill] sm:$0xff] }
 0xb0f   :  { %11488 = vpow2.f32 %v7307_v3  ;;  %v15635_v3 = vpack.i.bf16 %v13971_v47, %v13966_v53  ;;  %v15637_v26 = vld [vmem:[#allocation46_spill] sm:$0xff]  ;;  %v15643_v53 = vpack.i.bf16 %v13983_v57, %v13979_v56  ;;  %v15644_v47 = vld [vmem:[#allocation49_spill] sm:$0xff]  ;;  %v15652_v56 = vld [vmem:[#allocation56_spill] sm:$0xff] }
 0xb10   :  { %v14347_v29 = vpop.eup %11476  ;;  %v15653_v57 = vld [vmem:[#allocation55_spill] sm:$0xff] }
 0xb11   :  { %v7384_v40 = vsel %vm1212_vm3, %v14347_v29, 0.0  ;;  %v14351_v63 = vpop.eup %11478  ;;  %v15654_v20 = vpack.i.bf16 %v15652_v56, %v15653_v57 }
 0xb12   :  { %7385 = vadd.xlane.f32.xlu0 %v7384_v40  ;;  %7379 = vadd.xlane.f32.xlu1 %v7378_v52  ;;  %v7387_v37 = vsel %vm1212_vm3, %v14351_v63, 0.0  ;;  %v15638_v40 = vpack.i.bf16 %v15636_v23, %v15637_v26  ;;  %v15640_v52 = vld [vmem:[#allocation47_spill] sm:$0xff]  ;;  %v14441_v26 = vpop.permute.xlu0 %8128 }
 0xb14   :  { %v14355_v30 = vpop.eup %11480 }
 0xb15   :  { %v7393_v51 = vsel %vm1212_vm3, %v14355_v30, 0.0  ;;  %v14361_v18 = vpop.eup %11482 }
 0xb16   :  { %7388 = vadd.xlane.f32.xlu0 %v7387_v37  ;;  %7394 = vadd.xlane.f32.xlu1 %v7393_v51  ;;  %v7390_v4 = vsel %vm1212_vm3, %v14361_v18, 0.0  ;;  %v15645_v51 = vld [vmem:[#allocation51_spill] sm:$0xff] }
 0xb18   :  { %v14363_v54 = vpop.eup %11484 }
 0xb19   :  { %v7396_v62 = vsel %vm1212_vm3, %v14363_v54, 0.0  ;;  %v14367_v22 = vpop.eup %11486 }
 0xb1a   :  { %7397 = vadd.xlane.f32.xlu0 %v7396_v62  ;;  %7391 = vadd.xlane.f32.xlu1 %v7390_v4  ;;  %v7399_v48 = vsel %vm1212_vm3, %v14367_v22, 0.0  ;;  %v15646_v62 = vpack.i.bf16 %v15644_v47, %v15645_v51  ;;  %v15647_v4 = vld [vmem:[#allocation54_spill] sm:$0xff] }
 0xb1c   :  { %v14371_v45 = vpop.eup %11488 }
 0xb1d   :  { %v7402_v58 = vsel %vm1212_vm3, %v14371_v45, 0.0 }
 0xb1e   :  { %7400 = vadd.xlane.f32.xlu0 %v7399_v48  ;;  %7403 = vadd.xlane.f32.xlu1 %v7402_v58  ;;  %v15648_v58 = vld [vmem:[#allocation53_spill] sm:$0xff] }
 0xb1f   :  { %v15649_v48 = vpack.i.bf16 %v15647_v4, %v15648_v58 }
 0xb2f   :  { %8175 = vrot.lane.b32.xlu1 %v15484_v49, %s11660_s9  ;;  %v15639_v49 = vld [vmem:[#allocation52_spill] sm:$0xff] }
 0xb30   :  { %v15641_v37 = vpack.i.bf16 %v15639_v49, %v15640_v52  ;;  %v15664_v49 = vld [vmem:[#allocation59_spill] sm:$0xff] }
 0xb33   :  { %10799 = vrot.lane.b32.xlu1 %v15634_v59, %s11647_s16  ;;  %v15656_v59 = vld [vmem:[#allocation57_spill] sm:$0xff] }
 0xb34   :  { %8222 = vrot.lane.b32.xlu0 %v11836_v14, %s11660_s9  ;;  %v15642_v14 = vpack.i.bf16 %v13977_v50, %v13975_v34  ;;  %v15650_v34 = vpack.i.bf16 %v13989_v43, %v13985_v13  ;;  %v15651_v50 = vpack.i.bf16 %v13995_v27, %v13991_v24  ;;  %v15658_v13 = vpack.i.bf16 %v14001_v9, %v13997_v36  ;;  %v15660_v24 = vld [vmem:[#allocation62_spill] sm:$0xff]  ;;  %v15661_v27 = vld [vmem:[#allocation60_spill] sm:$0xff]  ;;  %v14451_v9 = vpop.permute.xlu1 %8081 }
 0xb35   :  { %v15659_v43 = vpack.i.bf16 %v14007_v10, %v14003_v19  ;;  %v15662_v23 = vpack.i.bf16 %v15660_v24, %v15661_v27  ;;  %v15666_v36 = vpack.i.bf16 %v14017_v0, %v14013_v31  ;;  %v15667_v10 = vld [vmem:[#allocation66_spill] sm:$0xff] }
 0xb36   :  { %v15670_v0 = vld [vmem:[#allocation94_spill] sm:$0xff] }
 0xb37   :  { %10809 = vrot.lane.b32.xlu1 %v15635_v3, %s11661_s10  ;;  %v15657_v3 = vpack.i.bf16 %v15655_v16, %v15656_v59 }
 0xb38   :  { %10804 = vrot.lane.b32.xlu0 %v15638_v40, %s11647_s16  ;;  %v15663_v40 = vld [vmem:[#allocation61_spill] sm:$0xff] }
 0xb39   :  { %v15665_v52 = vpack.i.bf16 %v15663_v40, %v15664_v49 }
 0xb3b   :  { %10819 = vrot.lane.b32.xlu1 %v15641_v37, %s11647_s16  ;;  %v15668_v37 = vld [vmem:[#allocation64_spill] sm:$0xff] }
 0xb3c   :  { %10814 = vrot.lane.b32.xlu0 %v15642_v14, %s11661_s10  ;;  %v15669_v14 = vpack.i.bf16 %v15667_v10, %v15668_v37  ;;  %v15672_v10 = vld [vmem:[#allocation93_spill] sm:$0xff] }
 0xb3f   :  { %10829 = vrot.lane.b32.xlu1 %v15643_v53, %s11661_s10 }
 0xb40   :  { %10824 = vrot.lane.b32.xlu0 %v15646_v62, %s11647_s16 }
 0xb43   :  { %10839 = vrot.lane.b32.xlu1 %v15649_v48, %s11647_s16  ;;  %v15671_v48 = vmov 0.0  }
 0xb44   :  { %10834 = vrot.lane.b32.xlu0 %v15650_v34, %s11661_s10 }
 0xb47   :  { %10849 = vrot.lane.b32.xlu1 %v15651_v50, %s11661_s10 }
 0xb48   :  { %10844 = vrot.lane.b32.xlu0 %v15654_v20, %s11647_s16 }
 0xb4b   :  { %10859 = vrot.lane.b32.xlu1 %v15657_v3, %s11647_s16 }
 0xb4c   :  { %10854 = vrot.lane.b32.xlu0 %v15658_v13, %s11661_s10 }
 0xb4f   :  { %10869 = vrot.lane.b32.xlu1 %v15659_v43, %s11661_s10 }
 0xb50   :  { %10864 = vrot.lane.b32.xlu0 %v15662_v23, %s11647_s16 }
 0xb53   :  { %10879 = vrot.lane.b32.xlu1 %v15665_v52, %s11647_s16 }
 0xb54   :  { %10874 = vrot.lane.b32.xlu0 %v15666_v36, %s11661_s10 }
 0xb55   :  { %v7311_v19 = vpop.xlane.xlu0 %7310 }
 0xb56   :  { %11490 = vrcp.f32 %v7311_v19 }
 0xb58   :  { %10884 = vrot.lane.b32.xlu0 %v15669_v14, %s11647_s16 }
 0xb59   :  { %v7314_v53 = vpop.xlane.xlu1 %7313 }
 0xb5a   :  { %11492 = vrcp.f32 %v7314_v53 }
 0xb63   :  { %v11491_v47 = vpop.eup %11490 }
 0xb64   :  { %v7469_v62 = vmul.f32 %v11491_v47, %v14219_v55  ;;  %v15673_v47 = vld [vmem:[#allocation96_spill] sm:$0xff] }
 0xb67   :  { %v11493_v51 = vpop.eup %11492 }
 0xb68   :  { %v7470_v4 = vmul.f32 %v11493_v51, %v14223_v7 }
 0xb6a   :  { %v7501_v58 = vpack.c.bf16 %v7470_v4, %v7469_v62 }
 0xb6b   :  { %v7317_v31 = vpop.xlane.xlu0 %7316 }
 0xb6c   :  { %10643 = vmatmul.mubr.msk.bf16.vlgmr.msra.gmra.mxu0 %vm1212_vm3, %v7501_v58  ;;  %11494 = vrcp.f32 %v7317_v31  ;;  %v15674_v31 = vld [vmem:[#allocation95_spill] sm:$0xff] }
 0xb6d   :  { %10653 = vmatpush3.bf16.msra.mxu0 %v15670_v0  ;;  %10654 = vmatprep.mubr.msk.bf16.mxu0 %vm11650_vm1, %v15671_v48 }
 0xb6e   :  { %10664 = vmatprep.subr.bf16.mxu0 %v15671_v48 }
 0xb6f   :  { %v7320_v34 = vpop.xlane.xlu1 %7319 }
 0xb70   :  { %11496 = vrcp.f32 %v7320_v34  ;;  %v7323_v50 = vpop.xlane.xlu0 %7322 }
 0xb71   :  { %11498 = vrcp.f32 %v7323_v50 }
 0xb73   :  { %v7326_v56 = vpop.xlane.xlu1 %7325 }
 0xb74   :  { %11500 = vrcp.f32 %v7326_v56  ;;  %v7329_v55 = vpop.xlane.xlu0 %7328 }
 0xb75   :  { %11502 = vrcp.f32 %v7329_v55 }
 0xb77   :  { %v7332_v7 = vpop.xlane.xlu1 %7331 }
 0xb78   :  { %11504 = vrcp.f32 %v7332_v7  ;;  %v7335_v57 = vpop.xlane.xlu0 %7334  ;;  %v15675_v7 = vld [vmem:[#allocation98_spill] sm:$0xff] }
 0xb79   :  { %11506 = vrcp.f32 %v7335_v57  ;;  %v11495_v20 = vpop.eup %11494 }
 0xb7a   :  { %v7471_v13 = vmul.f32 %v11495_v20, %v14236_v46 }
 0xb7b   :  { %v7338_v16 = vpop.xlane.xlu1 %7337 }
 0xb7c   :  { %11508 = vrcp.f32 %v7338_v16  ;;  %v7341_v59 = vpop.xlane.xlu0 %7340 }
 0xb7d   :  { %v11497_v3 = vpop.eup %11496  ;;  %11510 = vrcp.f32 %v7341_v59 }
 0xb7e   :  { %v7472_v43 = vmul.f32 %v11497_v3, %v14242_v44  ;;  %v11499_v24 = vpop.eup %11498 }
 0xb7f   :  { %v7344_v27 = vpop.xlane.xlu1 %7343  ;;  %v7473_v52 = vmul.f32 %v11499_v24, %v14244_v15 }
 0xb80   :  { %v7502_v23 = vpack.c.bf16 %v7472_v43, %v7471_v13  ;;  %11512 = vrcp.f32 %v7344_v27  ;;  %v7347_v40 = vpop.xlane.xlu0 %7346 }
 0xb81   :  { %v11501_v49 = vpop.eup %11500  ;;  %11514 = vrcp.f32 %v7347_v40 }
 0xb82   :  { %v7474_v36 = vmul.f32 %v11501_v49, %v14252_v60  ;;  %10649 = vmatmul.mubr.msk.bf16.vlgmr.msra.gmra.mxu1 %vm1212_vm3, %v7502_v23  ;;  %v11503_v19 = vpop.eup %11502 }
 0xb83   :  { %10659 = vmatpush3.bf16.msra.mxu1 %v15672_v10  ;;  %v7350_v46 = vpop.xlane.xlu1 %7349  ;;  %10660 = vmatprep.mubr.msk.bf16.mxu1 %vm11650_vm1, %v15671_v48  ;;  %v7475_v14 = vmul.f32 %v11503_v19, %v14254_v17 }
 0xb84   :  { %v7503_v44 = vpack.c.bf16 %v7474_v36, %v7473_v52  ;;  %11516 = vrcp.f32 %v7350_v46  ;;  %10670 = vmatprep.subr.bf16.mxu1 %v15671_v48  ;;  %v7353_v53 = vpop.xlane.xlu0 %7352 }
 0xb85   :  { %v11505_v37 = vpop.eup %11504 }
 0xb86   :  { %v7476_v15 = vmul.f32 %v11505_v37, %v14262_v1  ;;  %10655 = vmatmul.mubr.msk.bf16.vlgmr.msra.gmra.mxu0 %vm1212_vm3, %v7503_v44  ;;  %v11507_v60 = vpop.eup %11506 }
 0xb87   :  { %10665 = vmatpush3.bf16.msra.mxu0 %v15673_v47  ;;  %10666 = vmatprep.mubr.msk.bf16.mxu0 %vm11650_vm1, %v15671_v48  ;;  %v7359_v62 = vpop.xlane.xlu1 %7358  ;;  %v7477_v58 = vmul.f32 %v11507_v60, %v14264_v32  ;;  %v15679_v47 = vld [vmem:[#allocation99_spill] sm:$0xff] }
 0xb88   :  { %v7504_v51 = vpack.c.bf16 %v7476_v15, %v7475_v14  ;;  %10676 = vmatprep.subr.bf16.mxu0 %v15671_v48  ;;  %11518 = vrcp.f32 %v7359_v62 }
 0xb89   :  { %v11509_v4 = vpop.eup %11508  ;;  %11520 = vrcp.f32 %v7353_v53 }
 0xb8a   :  { %v7478_v17 = vmul.f32 %v11509_v4, %v14272_v11  ;;  %10661 = vmatmul.mubr.msk.bf16.vlgmr.msra.gmra.mxu1 %vm1212_vm3, %v7504_v51  ;;  %v11511_v1 = vpop.eup %11510 }
 0xb8b   :  { %10671 = vmatpush3.bf16.msra.mxu1 %v15674_v31  ;;  %v7362_v0 = vpop.xlane.xlu0 %7361  ;;  %10672 = vmatprep.mubr.msk.bf16.mxu1 %vm11650_vm1, %v15671_v48  ;;  %v7356_v50 = vpop.xlane.xlu1 %7355  ;;  %v7479_v32 = vmul.f32 %v11511_v1, %v14274_v25 }
 0xb8c   :  { %v7505_v34 = vpack.c.bf16 %v7478_v17, %v7477_v58  ;;  %11522 = vrcp.f32 %v7362_v0  ;;  %10682 = vmatprep.subr.bf16.mxu1 %v15671_v48 }
 0xb8d   :  { %v11513_v56 = vpop.eup %11512  ;;  %11524 = vrcp.f32 %v7356_v50 }
 0xb8e   :  { %v7480_v11 = vmul.f32 %v11513_v56, %v14282_v21  ;;  %10667 = vmatmul.mubr.msk.bf16.vlgmr.msra.gmra.mxu0 %vm1212_vm3, %v7505_v34  ;;  %v11515_v55 = vpop.eup %11514  ;;  %v15676_v21 = vld [vmem:[#allocation97_spill] sm:$0xff]  ;;  %v15680_v56 = vld [vmem:[#allocation102_spill] sm:$0xff] }
 0xb8f   :  { %10677 = vmatpush3.bf16.msra.mxu0 %v15675_v7  ;;  %v7365_v57 = vpop.xlane.xlu0 %7364  ;;  %10678 = vmatprep.mubr.msk.bf16.mxu0 %vm11650_vm1, %v15671_v48  ;;  %v7371_v16 = vpop.xlane.xlu1 %7370  ;;  %v7481_v3 = vmul.f32 %v11515_v55, %v14284_v61 }
 0xb90   :  { %v7506_v20 = vpack.c.bf16 %v7480_v11, %v7479_v32  ;;  %10688 = vmatprep.subr.bf16.mxu0 %v15671_v48  ;;  %11526 = vrcp.f32 %v7371_v16 }
 0xb91   :  { %v11517_v59 = vpop.eup %11516  ;;  %11528 = vrcp.f32 %v7365_v57 }
 0xb92   :  { %v7482_v25 = vmul.f32 %v11517_v59, %v14292_v39  ;;  %10673 = vmatmul.mubr.msk.bf16.vlgmr.msra.gmra.mxu1 %vm1212_vm3, %v7506_v20  ;;  %v15677_v39 = vld [vmem:[#allocation100_spill] sm:$0xff] }
 0xb93   :  { %10683 = vmatpush3.bf16.msra.mxu1 %v15676_v21  ;;  %v7374_v13 = vpop.xlane.xlu0 %7373  ;;  %10684 = vmatprep.mubr.msk.bf16.mxu1 %vm11650_vm1, %v15671_v48  ;;  %v7368_v24 = vpop.xlane.xlu1 %7367 }
 0xb94   :  { %v7507_v43 = vpack.c.bf16 %v7482_v25, %v7481_v3  ;;  %11530 = vrcp.f32 %v7374_v13  ;;  %10694 = vmatprep.subr.bf16.mxu1 %v15671_v48 }
 0xb95   :  { %11532 = vrcp.f32 %v7368_v24  ;;  %v11519_v61 = vpop.eup %11518 }
 0xb96   :  { %10679 = vmatmul.mubr.msk.bf16.vlgmr.msra.gmra.mxu0 %vm1212_vm3, %v7507_v43  ;;  %v11521_v23 = vpop.eup %11520  ;;  %v7485_v36 = vmul.f32 %v11519_v61, %v14302_v33  ;;  %v15678_v33 = vld [vmem:[#allocation101_spill] sm:$0xff] }
 0xb97   :  { %10689 = vmatpush3.bf16.msra.mxu0 %v15677_v39  ;;  %v7377_v27 = vpop.xlane.xlu0 %7376  ;;  %10690 = vmatprep.mubr.msk.bf16.mxu0 %vm11650_vm1, %v15671_v48  ;;  %v7383_v40 = vpop.xlane.xlu1 %7382  ;;  %v7483_v10 = vmul.f32 %v11521_v23, %v14294_v8  ;;  %v11040_v39 = vld [vmem:[#allocation8 + $0x8] sm:$0xff]  }
 0xb98   :  { %10700 = vmatprep.subr.bf16.mxu0 %v15671_v48  ;;  %11534 = vrcp.f32 %v7383_v40 }
 0xb99   :  { %v11523_v49 = vpop.eup %11522  ;;  %11536 = vrcp.f32 %v7377_v27 }
 0xb9a   :  { %v11525_v52 = vpop.eup %11524  ;;  %v7486_v19 = vmul.f32 %v11523_v49, %v14310_v12 }
 0xb9b   :  { %v7484_v46 = vmul.f32 %v11525_v52, %v14306_v41  ;;  %v7386_v44 = vpop.xlane.xlu0 %7385  ;;  %v7380_v14 = vpop.xlane.xlu1 %7379  ;;  %v15682_v52 = vld [vmem:[#allocation77_spill] sm:$0xff] }
 0xb9c   :  { %v7509_v37 = vpack.c.bf16 %v7486_v19, %v7485_v36  ;;  %11538 = vrcp.f32 %v7386_v44 }
 0xb9d   :  { %v7508_v15 = vpack.c.bf16 %v7484_v46, %v7483_v10  ;;  %11540 = vrcp.f32 %v7380_v14  ;;  %v11527_v60 = vpop.eup %11526 }
 0xb9e   :  { %10691 = vmatmul.mubr.msk.bf16.vlgmr.msra.gmra.mxu0 %vm1212_vm3, %v7509_v37  ;;  %v11529_v53 = vpop.eup %11528  ;;  %v7489_v62 = vmul.f32 %v11527_v60, %v14320_v2 }
 0xb9f   :  { %10685 = vmatmul.mubr.msk.bf16.vlgmr.msra.gmra.mxu1 %vm1212_vm3, %v7508_v15  ;;  %10701 = vmatpush3.bf16.msra.mxu0 %v15678_v33  ;;  %v7389_v12 = vpop.xlane.xlu0 %7388  ;;  %v7395_v8 = vpop.xlane.xlu1 %7394  ;;  %v7487_v58 = vmul.f32 %v11529_v53, %v14314_v5 }
 0xba0   :  { %10695 = vmatpush3.bf16.msra.mxu1 %v15679_v47  ;;  %10696 = vmatprep.mubr.msk.bf16.mxu1 %vm11650_vm1, %v15671_v48  ;;  %11542 = vrcp.f32 %v7395_v8  ;;  %v15684_v47 = vld [vmem:[#allocation84_spill] sm:$0xff]  ;;  %v15685_v8 = vld [vmem:[#allocation82_spill] sm:$0xff] }
 0xba1   :  { %v11531_v41 = vpop.eup %11530  ;;  %10702 = vmatprep.mubr.msk.bf16.mxu0 %vm11650_vm1, %v15671_v48  ;;  %10706 = vmatprep.subr.bf16.mxu1 %v15671_v48  ;;  %11544 = vrcp.f32 %v7389_v12 }
 0xba2   :  { %v11533_v51 = vpop.eup %11532  ;;  %v7490_v4 = vmul.f32 %v11531_v41, %v14330_v35  ;;  %10712 = vmatprep.subr.bf16.mxu0 %v15671_v48  ;;  %v15686_v41 = vpack.i.bf16 %v15684_v47, %v15685_v8 }
 0xba3   :  { %v7488_v17 = vmul.f32 %v11533_v51, %v14326_v42  ;;  %v7398_v1 = vpop.xlane.xlu0 %7397  ;;  %v7392_v0 = vpop.xlane.xlu1 %7391 }
 0xba4   :  { %v7511_v31 = vpack.c.bf16 %v7490_v4, %v7489_v62  ;;  %11546 = vrcp.f32 %v7398_v1  ;;  %v15687_v1 = vld [vmem:[#allocation65_spill] sm:$0xff] }
 0xba5   :  { %v7510_v34 = vpack.c.bf16 %v7488_v17, %v7487_v58  ;;  %11548 = vrcp.f32 %v7392_v0  ;;  %v11535_v50 = vpop.eup %11534 }
 0xba6   :  { %10703 = vmatmul.mubr.msk.bf16.vlgmr.msra.gmra.mxu0 %vm1212_vm3, %v7511_v31  ;;  %v11537_v35 = vpop.eup %11536  ;;  %v7493_v11 = vmul.f32 %v11535_v50, %v14339_v28  ;;  %v15688_v31 = vld [vmem:[#allocation63_spill] sm:$0xff] }
 0xba7   :  { %10697 = vmatmul.mubr.msk.bf16.vlgmr.msra.gmra.mxu1 %vm1212_vm3, %v7510_v34  ;;  %10713 = vmatpush3.bf16.msra.mxu0 %v14451_v9  ;;  %v7401_v2 = vpop.xlane.xlu0 %7400  ;;  %v7404_v5 = vpop.xlane.xlu1 %7403  ;;  %v7491_v55 = vmul.f32 %v11537_v35, %v14334_v38  ;;  %v15689_v0 = vpack.i.bf16 %v15687_v1, %v15688_v31 }
 0xba8   :  { %10707 = vmatpush3.bf16.msra.mxu1 %v15680_v56  ;;  %11550 = vrcp.f32 %v7401_v2  ;;  %10708 = vmatprep.mubr.msk.bf16.mxu1 %vm11650_vm1, %v15671_v48 }
 0xba9   :  { %v11539_v42 = vpop.eup %11538  ;;  %11552 = vrcp.f32 %v7404_v5  ;;  %10714 = vmatprep.mubr.msk.bf16.mxu0 %vm11650_vm1, %v15671_v48  ;;  %10718 = vmatprep.subr.bf16.mxu1 %v15671_v48  ;;  %v15690_v5 = vld [vmem:[#allocation70_spill] sm:$0xff] }
 0xbaa   :  { %v11541_v32 = vpop.eup %11540  ;;  %v7494_v9 = vmul.f32 %v11539_v42, %v14347_v29  ;;  %10724 = vmatprep.subr.bf16.mxu0 %v15671_v48  ;;  %v15691_v42 = vld [vmem:[#allocation68_spill] sm:$0xff] }
 0xbab   :  { %v7492_v7 = vmul.f32 %v11541_v32, %v14345_v6  ;;  %v8176_v16 = vpop.permute.xlu1 %8175  ;;  %v8223_v61 = vpop.permute.xlu0 %8222  ;;  %v15692_v32 = vpack.i.bf16 %v15690_v5, %v15691_v42 }
 0xbac   :  { %v7513_v57 = vpack.c.bf16 %v7494_v9, %v7493_v11 }
 0xbad   :  { %v7512_v20 = vpack.c.bf16 %v7492_v7, %v7491_v55  ;;  %v11543_v59 = vpop.eup %11542 }
 0xbae   :  { %10715 = vmatmul.mubr.msk.bf16.vlgmr.msra.gmra.mxu0 %vm1212_vm3, %v7513_v57  ;;  %v11545_v3 = vpop.eup %11544  ;;  %v7497_v6 = vmul.f32 %v11543_v59, %v14355_v30 }
 0xbaf   :  { %10709 = vmatmul.mubr.msk.bf16.vlgmr.msra.gmra.mxu1 %vm1212_vm3, %v7512_v20  ;;  %10725 = vmatpush3.bf16.msra.mxu0 %v8176_v16  ;;  %v7495_v25 = vmul.f32 %v11545_v3, %v14351_v63  ;;  %v15693_v20 = vld [vmem:[#allocation79_spill] sm:$0xff]  ;;  %v15694_v16 = vld [vmem:[#allocation78_spill] sm:$0xff]  ;;  %v10800_v8 = vpop.permute.xlu1 %10799 }
 0xbb0   :  { %10719 = vmatpush3.bf16.msra.mxu1 %v14441_v26  ;;  %10720 = vmatprep.mubr.msk.bf16.mxu1 %vm11650_vm1, %v15671_v48  ;;  %v15695_v59 = vpack.i.bf16 %v15693_v20, %v15694_v16  ;;  %v15718_v20 = vld [vmem:[#allocation75_spill] sm:$0xff] }
 0xbb1   :  { %v11547_v28 = vpop.eup %11546  ;;  %10726 = vmatprep.mubr.msk.bf16.mxu0 %vm11650_vm1, %v15671_v48  ;;  %10730 = vmatprep.subr.bf16.mxu1 %v15671_v48 }
 0xbb2   :  { %v11549_v38 = vpop.eup %11548  ;;  %v7498_v29 = vmul.f32 %v11547_v28, %v14363_v54  ;;  %10736 = vmatprep.subr.bf16.mxu0 %v11040_v39 }
 0xbb3   :  { %v7496_v21 = vmul.f32 %v11549_v38, %v14361_v18  ;;  %v10810_v5 = vpop.permute.xlu1 %10809 }
 0xbb4   :  { %v7515_v13 = vpack.c.bf16 %v7498_v29, %v7497_v6  ;;  %v15696_v6 = vld [vmem:[#allocation86_spill] sm:$0xff]  ;;  %v15697_v29 = vld [vmem:[#allocation81_spill] sm:$0xff] }
 0xbb5   :  { %v11551_v26 = vpop.eup %11550  ;;  %v7514_v43 = vpack.c.bf16 %v7496_v21, %v7495_v25  ;;  %v15698_v25 = vpack.i.bf16 %v15696_v6, %v15697_v29 }
 0xbb6   :  { %v11553_v24 = vpop.eup %11552  ;;  %10727 = vmatmul.mubr.msk.bf16.vlgmr.msra.gmra.mxu0 %vm1212_vm3, %v7515_v13  ;;  %v7499_v54 = vmul.f32 %v11551_v26, %v14367_v22  ;;  %v11041_v22 = vld [vmem:[#allocation8] sm:$0xff]  }
 0xbb7   :  { %10721 = vmatmul.mubr.msk.bf16.vlgmr.msra.gmra.mxu1 %vm1212_vm3, %v7514_v43  ;;  %v7500_v30 = vmul.f32 %v11553_v24, %v14371_v45  ;;  %10737 = vmatpush3.bf16.msra.mxu0 %v11040_v39  ;;  %v15699_v24 = vld [vmem:[#allocation69_spill] sm:$0xff]  ;;  %v14622_v29 = vpop.permute.xlu1 %10819 }
 0xbb8   :  { %10731 = vmatpush3.bf16.msra.mxu1 %v8223_v61  ;;  %10732 = vmatprep.mubr.msk.bf16.mxu1 %vm11650_vm1, %v15671_v48  ;;  %v15681_v48 = vld [vmem:[#allocation80_spill] sm:$0xff]  ;;  %v15700_v61 = vld [vmem:[#allocation67_spill] sm:$0xff] }
 0xbb9   :  { %v7516_v63 = vpack.c.bf16 %v7500_v30, %v7499_v54  ;;  %v15683_v45 = vpack.i.bf16 %v15681_v48, %v15682_v52  ;;  %10738 = vmatprep.subr.bf16.mxu0 %v11041_v22  ;;  %v15701_v30 = vpack.i.bf16 %v15699_v24, %v15700_v61 }
 0xbbb   :  { %10739 = vmatpush3.bf16.msra.mxu0 %v11041_v22  ;;  %v15703_v22 = vld [vmem:[#allocation83_spill] sm:$0xff]  ;;  %v14630_v61 = vpop.permute.xlu1 %10829 }
 0xbbf   :  { %10733 = vmatmul.mubr.msk.bf16.vlgmr.msra.gmra.mxu1 %vm1212_vm3, %v7516_v63 }
 0xc2c   :  { %v7557_v18 = vpop.f32.mrf.mxu0 }
 0xc2e   :  { %v10644_v27 = vpop.f32.mrf.mxu0 }
 0xc30   :  { %v7560_v23 = vpop.f32.mrf.mxu0 }
 0xc31   :  { %v10888_v40 = vpack.i.bf16 %v7560_v23, %v7557_v18 }
 0xc32   :  { %v10645_v49 = vpop.f32.mrf.mxu0 }
 0xc33   :  { %10889 = vrot.lane.b32.xlu1 %v10888_v40, %s11662_s11 }
 0xc37   :  { %10894 = vrot.lane.b32.xlu1 %v15683_v45, %s11661_s10  ;;  %v15702_v45 = vld [vmem:[#allocation85_spill] sm:$0xff] }
 0xc42   :  { %v7604_v36 = vpop.f32.mrf.mxu1 }
 0xc44   :  { %v10650_v19 = vpop.f32.mrf.mxu1 }
 0xc45   :  { %v15705_v19 = vld [vmem:[#allocation74_spill] sm:$0xff] }
 0xc46   :  { %v7607_v10 = vpop.f32.mrf.mxu1  ;;  %v7651_v46 = vpop.f32.mrf.mxu0 }
 0xc47   :  { %v10898_v44 = vpack.i.bf16 %v7607_v10, %v7604_v36  ;;  %v15704_v36 = vpack.i.bf16 %v15702_v45, %v15703_v22  ;;  %v15706_v10 = vld [vmem:[#allocation72_spill] sm:$0xff] }
 0xc48   :  { %v10651_v37 = vpop.f32.mrf.mxu1  ;;  %v10656_v14 = vpop.f32.mrf.mxu0 }
 0xc49   :  { %10899 = vrot.lane.b32.xlu0 %v10898_v44, %s11662_s11 }
 0xc4a   :  { %v7654_v15 = vpop.f32.mrf.mxu0  ;;  %v7698_v60 = vpop.f32.mrf.mxu1 }
 0xc4b   :  { %v10908_v33 = vpack.i.bf16 %v7654_v15, %v7651_v46  ;;  %v15707_v46 = vpack.i.bf16 %v15705_v19, %v15706_v10  ;;  %v10801_v19 = vunpack.i.l.bf16 %v10800_v8  ;;  %v10812_v10 = vunpack.i.h.bf16 %v10810_v5 }
 0xc4c   :  { %v10657_v12 = vpop.f32.mrf.mxu0  ;;  %v10662_v53 = vpop.f32.mrf.mxu1 }
 0xc4d   :  { %10904 = vrot.lane.b32.xlu0 %v15686_v41, %s11661_s10  ;;  %10909 = vrot.lane.b32.xlu1 %v10908_v33, %s11662_s11 }
 0xc4e   :  { %v7701_v51 = vpop.f32.mrf.mxu1  ;;  %v7745_v62 = vpop.f32.mrf.mxu0 }
 0xc4f   :  { %v10918_v4 = vpack.i.bf16 %v7701_v51, %v7698_v60  ;;  %v15708_v51 = vld [vmem:[#allocation73_spill] sm:$0xff] }
 0xc50   :  { %v10663_v58 = vpop.f32.mrf.mxu1  ;;  %v10668_v17 = vpop.f32.mrf.mxu0 }
 0xc51   :  { %10914 = vrot.lane.b32.xlu1 %v15689_v0, %s11647_s16  ;;  %10919 = vrot.lane.b32.xlu0 %v10918_v4, %s11662_s11  ;;  %v15711_v58 = vld [vmem:[#allocation90_spill] sm:$0xff]  ;;  %v15712_v17 = vld [vmem:[#allocation88_spill] sm:$0xff] }
 0xc52   :  { %v7748_v34 = vpop.f32.mrf.mxu0  ;;  %v7792_v50 = vpop.f32.mrf.mxu1  ;;  %v15713_v1 = vpack.i.bf16 %v15711_v58, %v15712_v17 }
 0xc53   :  { %v10928_v2 = vpack.i.bf16 %v7748_v34, %v7745_v62  ;;  %v15709_v62 = vld [vmem:[#allocation71_spill] sm:$0xff] }
 0xc54   :  { %v10669_v35 = vpop.f32.mrf.mxu0  ;;  %v10674_v56 = vpop.f32.mrf.mxu1  ;;  %v15710_v4 = vpack.i.bf16 %v15708_v51, %v15709_v62 }
 0xc55   :  { %10924 = vrot.lane.b32.xlu0 %v15692_v32, %s11647_s16  ;;  %10929 = vrot.lane.b32.xlu1 %v10928_v2, %s11662_s11 }
 0xc56   :  { %v7795_v11 = vpop.f32.mrf.mxu1  ;;  %v7839_v9 = vpop.f32.mrf.mxu0 }
 0xc57   :  { %v10938_v55 = vpack.i.bf16 %v7795_v11, %v7792_v50 }
 0xc58   :  { %v10675_v7 = vpop.f32.mrf.mxu1  ;;  %v10680_v57 = vpop.f32.mrf.mxu0 }
 0xc59   :  { %10934 = vrot.lane.b32.xlu1 %v15695_v59, %s11661_s10  ;;  %10939 = vrot.lane.b32.xlu0 %v10938_v55, %s11662_s11  ;;  %v15715_v55 = vld [vmem:[#allocation87_spill] sm:$0xff]  ;;  %v15717_v57 = vld [vmem:[#allocation76_spill] sm:$0xff] }
 0xc5a   :  { %v7842_v3 = vpop.f32.mrf.mxu0  ;;  %v15719_v16 = vpack.i.bf16 %v15717_v57, %v15718_v20  ;;  %v10832_v20 = vunpack.i.h.bf16 %v14630_v61 }
 0xc5b   :  { %v10948_v28 = vpack.i.bf16 %v7842_v3, %v7839_v9  ;;  %v15714_v9 = vld [vmem:[#allocation89_spill] sm:$0xff] }
 0xc5c   :  { %v10681_v38 = vpop.f32.mrf.mxu0  ;;  %v15716_v7 = vpack.i.bf16 %v15714_v9, %v15715_v55 }
 0xc5d   :  { %10944 = vrot.lane.b32.xlu0 %v15698_v25, %s11661_s10  ;;  %10949 = vrot.lane.b32.xlu1 %v10948_v28, %s11662_s11 }
 0xc5e   :  { %v7933_v21 = vpop.f32.mrf.mxu0 }
 0xc5f   :  { %v7886_v13 = vpop.f32.mrf.mxu1 }
 0xc60   :  { %v10692_v26 = vpop.f32.mrf.mxu0 }
 0xc61   :  { %v10686_v43 = vpop.f32.mrf.mxu1  ;;  %10954 = vrot.lane.b32.xlu1 %v15701_v30, %s11647_s16  ;;  %v15720_v26 = vld [vmem:[#allocation92_spill] sm:$0xff] }
 0xc62   :  { %v7936_v54 = vpop.f32.mrf.mxu0  ;;  %v15721_v43 = vld [vmem:[#allocation91_spill] sm:$0xff] }
 0xc63   :  { %v7889_v63 = vpop.f32.mrf.mxu1  ;;  %v10968_v18 = vpack.i.bf16 %v7936_v54, %v7933_v21  ;;  %v15722_v24 = vpack.i.bf16 %v15720_v26, %v15721_v43  ;;  %v15728_v26 = vld [vmem:[#allocation20_spill] sm:$0xff] }
 0xc64   :  { %v10958_v39 = vpack.i.bf16 %v7889_v63, %v7886_v13  ;;  %v10693_v27 = vpop.f32.mrf.mxu0 }
 0xc65   :  { %v10687_v23 = vpop.f32.mrf.mxu1  ;;  %10969 = vrot.lane.b32.xlu1 %v10968_v18, %s11662_s11  ;;  %v10805_v18 = vpop.permute.xlu0 %10804 }
 0xc66   :  { %10959 = vrot.lane.b32.xlu0 %v10958_v39, %s11662_s11  ;;  %v8027_v40 = vpop.f32.mrf.mxu0  ;;  %v14633_v39 = vpop.permute.xlu1 %10839  ;;  %v10807_v17 = vunpack.i.h.bf16 %v10805_v18 }
 0xc67   :  { %v7980_v49 = vpop.f32.mrf.mxu1 }
 0xc68   :  { %v10704_v48 = vpop.f32.mrf.mxu0 }
 0xc69   :  { %v10698_v52 = vpop.f32.mrf.mxu1  ;;  %10974 = vrot.lane.b32.xlu1 %v15704_v36, %s11661_s10  ;;  %v10815_v27 = vpop.permute.xlu0 %10814  ;;  %v10802_v36 = vunpack.i.h.bf16 %v10800_v8 }
 0xc6a   :  { %10964 = vrot.lane.b32.xlu0 %v15707_v46, %s11647_s16  ;;  %v8030_v44 = vpop.f32.mrf.mxu0  ;;  %v14635_v23 = vpop.permute.xlu1 %10849  ;;  %v10811_v46 = vunpack.i.l.bf16 %v10810_v5 }
 0xc6b   :  { %v7983_v37 = vpop.f32.mrf.mxu1  ;;  %v10988_v14 = vpack.i.bf16 %v8030_v44, %v8027_v40 }
 0xc6c   :  { %v10978_v15 = vpack.i.bf16 %v7983_v37, %v7980_v49  ;;  %v10705_v60 = vpop.f32.mrf.mxu0 }
 0xc6d   :  { %v10699_v33 = vpop.f32.mrf.mxu1  ;;  %10989 = vrot.lane.b32.xlu1 %v10988_v14, %s11662_s11  ;;  %v14637_v40 = vpop.permute.xlu0 %10824  ;;  %v15723_v14 = vld [vmem:[#allocation13_spill] sm:$0xff]  ;;  %v15724_v60 = vld [vmem:[#allocation14_spill] sm:$0xff] }
 0xc6e   :  { %10979 = vrot.lane.b32.xlu0 %v10978_v15, %s11662_s11  ;;  %v8121_v12 = vpop.f32.mrf.mxu0  ;;  %v14639_v49 = vpop.permute.xlu1 %10859  ;;  %v8654_v15 = vsel %vm414_vm2, %v15723_v14, %v10802_v36  ;;  %v8653_v33 = vsel %vm414_vm2, %v15724_v60, %v10801_v19  ;;  %v15729_v36 = vld [vmem:[#allocation21_spill] sm:$0xff]  ;;  %v10842_v60 = vunpack.i.h.bf16 %v14633_v39 }
 0xc6f   :  { %v8074_v53 = vpop.f32.mrf.mxu1 }
 0xc70   :  { %v10716_v47 = vpop.f32.mrf.mxu0 }
 0xc71   :  { %v10710_v41 = vpop.f32.mrf.mxu1  ;;  %10994 = vrot.lane.b32.xlu1 %v15710_v4, %s11647_s16  ;;  %v14641_v48 = vpop.permute.xlu0 %10834  ;;  %v8685_v47 = vsel %vm1212_vm3, %v8653_v33, %v10811_v46 }
 0xc72   :  { %10984 = vrot.lane.b32.xlu0 %v15713_v1, %s11661_s10  ;;  %v8124_v31 = vpop.f32.mrf.mxu0  ;;  %v14643_v52 = vpop.permute.xlu1 %10869  ;;  %v8686_v41 = vsel %vm1212_vm3, %v8654_v15, %v10812_v10  ;;  %v10806_v1 = vunpack.i.l.bf16 %v10805_v18  ;;  %v10836_v18 = vunpack.i.l.bf16 %v14641_v48  ;;  %v15730_v10 = vld [vmem:[#allocation17_spill] sm:$0xff] }
 0xc73   :  { %v8077_v0 = vpop.f32.mrf.mxu1  ;;  %v11008_v34 = vpack.i.bf16 %v8124_v31, %v8121_v12 }
 0xc74   :  { %v10998_v50 = vpack.i.bf16 %v8077_v0, %v8074_v53  ;;  %v10717_v2 = vpop.f32.mrf.mxu0  ;;  %v10817_v0 = vunpack.i.h.bf16 %v10815_v27 }
 0xc75   :  { %v10711_v35 = vpop.f32.mrf.mxu1  ;;  %11009 = vrot.lane.b32.xlu1 %v11008_v34, %s11662_s11  ;;  %v14645_v45 = vpop.permute.xlu0 %10844  ;;  %v10816_v34 = vunpack.i.l.bf16 %v10815_v27 }
 0xc76   :  { %10999 = vrot.lane.b32.xlu0 %v10998_v50, %s11662_s11  ;;  %v8215_v56 = vpop.f32.mrf.mxu0  ;;  %v14647_v22 = vpop.permute.xlu1 %10879  ;;  %v15725_v50 = vld [vmem:[#allocation15_spill] sm:$0xff] }
 0xc77   :  { %v8168_v42 = vpop.f32.mrf.mxu1  ;;  %v8656_v2 = vsel %vm414_vm2, %v15725_v50, %v10807_v17  ;;  %v15726_v35 = vld [vmem:[#allocation23_spill] sm:$0xff]  ;;  %v10847_v17 = vunpack.i.h.bf16 %v14645_v45  ;;  %v15731_v50 = vld [vmem:[#allocation22_spill] sm:$0xff] }
 0xc78   :  { %v10728_v32 = vpop.f32.mrf.mxu0  ;;  %v8688_v57 = vsel %vm1212_vm3, %v8656_v2, %v10817_v0  ;;  %v8662_v2 = vsel %vm414_vm2, %v15731_v50, %v10842_v60 }
 0xc79   :  { %v10722_v11 = vpop.f32.mrf.mxu1  ;;  %11014 = vrot.lane.b32.xlu1 %v15716_v7, %s11661_s10  ;;  %v14649_v44 = vpop.permute.xlu0 %10854  ;;  %v10822_v32 = vunpack.i.h.bf16 %v14622_v29 }
 0xc7a   :  { %11004 = vrot.lane.b32.xlu0 %v15719_v16, %s11647_s16  ;;  %v8218_v59 = vpop.f32.mrf.mxu0  ;;  %v10821_v11 = vunpack.i.l.bf16 %v14622_v29  ;;  %v10831_v16 = vunpack.i.l.bf16 %v14630_v61 }
 0xc7b   :  { %v8171_v3 = vpop.f32.mrf.mxu1  ;;  %v11028_v28 = vpack.i.bf16 %v8218_v59, %v8215_v56  ;;  %v8655_v56 = vsel %vm414_vm2, %v15726_v35, %v10806_v1  ;;  %v15732_v35 = vld [vmem:[#allocation18_spill] sm:$0xff] }
 0xc7c   :  { %v11018_v38 = vpack.i.bf16 %v8171_v3, %v8168_v42  ;;  %v10729_v6 = vpop.f32.mrf.mxu0  ;;  %v8687_v7 = vsel %vm1212_vm3, %v8655_v56, %v10816_v34  ;;  %v8657_v43 = vsel %vm414_vm2, %v15728_v26, %v10821_v11 }
 0xc7d   :  { %v10723_v25 = vpop.f32.mrf.mxu1  ;;  %11029 = vrot.lane.b32.xlu1 %v11028_v28, %s11662_s11  ;;  %v14659_v4 = vpop.permute.xlu0 %10864  ;;  %v10827_v28 = vunpack.i.h.bf16 %v14637_v40 }
 0xc7e   :  { %11019 = vrot.lane.b32.xlu0 %v11018_v38, %s11662_s11  ;;  %v10826_v38 = vunpack.i.l.bf16 %v14637_v40 }
 0xc7f   :  { %v8262_v21 = vpop.f32.mrf.mxu1  ;;  %v8660_v19 = vsel %vm414_vm2, %v15729_v36, %v10827_v28 }
 0xc80   :  { %v8659_v46 = vsel %vm414_vm2, %v15730_v10, %v10826_v38 }
 0xc81   :  { %v10734_v13 = vpop.f32.mrf.mxu1  ;;  %v14662_v58 = vpop.permute.xlu0 %10874 }
 0xc82   :  { %11024 = vrot.lane.b32.xlu0 %v15722_v24, %s11661_s10 }
 0xc83   :  { %v8265_v30 = vpop.f32.mrf.mxu1 }
 0xc84   :  { %v11033_v54 = vpack.i.bf16 %v8265_v30, %v8262_v21  ;;  %v15727_v21 = vld [vmem:[#allocation16_spill] sm:$0xff]  ;;  %v8689_v30 = vsel %vm1212_vm3, %v8657_v43, %v10831_v16  ;;  %v15734_v16 = vld [vmem:[#allocation19_spill] sm:$0xff]  ;;  %v10872_v43 = vunpack.i.h.bf16 %v14643_v52 }
 0xc85   :  { %v10735_v63 = vpop.f32.mrf.mxu1  ;;  %v14664_v31 = vpop.permute.xlu0 %10884  ;;  %v8658_v13 = vsel %vm414_vm2, %v15727_v21, %v10822_v32 }
 0xc86   :  { %11034 = vrot.lane.b32.xlu0 %v11033_v54, %s11662_s11  ;;  %v8690_v54 = vsel %vm1212_vm3, %v8658_v13, %v10832_v20  ;;  %v10837_v63 = vunpack.i.h.bf16 %v14641_v48  ;;  %v10841_v48 = vunpack.i.l.bf16 %v14633_v39  ;;  %v10846_v39 = vunpack.i.l.bf16 %v14645_v45 }
 0xc87   :  { %v10856_v45 = vunpack.i.l.bf16 %v14649_v44 }
 0xca5   :  { %v10890_v37 = vpop.permute.xlu1 %10889 }
 0xca6   :  { %v10892_v12 = vunpack.i.h.bf16 %v10890_v37  ;;  %v10891_v53 = vunpack.i.l.bf16 %v10890_v37 }
 0xca8   :  { %v8719_v8 = vsel %vm8717_vm4, %v8686_v41, %v10892_v12  ;;  %v8718_v51 = vsel %vm8717_vm4, %v8685_v47, %v10891_v53  ;;  %v8691_v53 = vsel %vm1212_vm3, %v8659_v46, %v10836_v18  ;;  %v8692_v47 = vsel %vm1212_vm3, %v8660_v19, %v10837_v63  ;;  %v15735_v18 = vld [vmem:[#allocation26_spill] sm:$0xff] }
 0xca9   :  { %v8750_v62 = vpack.c.bf16 %v8719_v8, %v8718_v51  ;;  %v14670_v5 = vpop.permute.xlu1 %10894  ;;  %v10852_v41 = vunpack.i.h.bf16 %v14635_v23  ;;  %v10851_v8 = vunpack.i.l.bf16 %v14635_v23  ;;  %v8661_v23 = vsel %vm414_vm2, %v15732_v35, %v10841_v48 }
 0xcaa   :  { %v10867_v46 = vunpack.i.h.bf16 %v14659_v4  ;;  %v10877_v48 = vunpack.i.h.bf16 %v14662_v58 }
 0xcab   :  { %10740 = vmatprep.mubr.msk.bf16.mxu0 %vm185_vm0, %v8750_v62  ;;  %v8693_v32 = vsel %vm1212_vm3, %v8661_v23, %v10851_v8  ;;  %v8694_v11 = vsel %vm1212_vm3, %v8662_v2, %v10852_v41  ;;  %v10881_v41 = vunpack.i.l.bf16 %v14647_v22  ;;  %v15739_v2 = vld [vmem:[#allocation30_spill] sm:$0xff]  ;;  %v15740_v23 = vld [vmem:[#allocation29_spill] sm:$0xff] }
 0xcbb   :  { %v10900_v42 = vpop.permute.xlu0 %10899 }
 0xcbc   :  { %v10902_v9 = vunpack.i.h.bf16 %v10900_v42  ;;  %v10901_v55 = vunpack.i.l.bf16 %v10900_v42 }
 0xcbe   :  { %v8720_v59 = vsel %vm8717_vm4, %v8687_v7, %v10901_v55  ;;  %v8721_v3 = vsel %vm8717_vm4, %v8688_v57, %v10902_v9  ;;  %v10857_v9 = vunpack.i.h.bf16 %v14649_v44  ;;  %v15733_v57 = vld [vmem:[#allocation24_spill] sm:$0xff]  ;;  %v10861_v44 = vunpack.i.l.bf16 %v14639_v49 }
 0xcbf   :  { %v8751_v6 = vpack.c.bf16 %v8721_v3, %v8720_v59  ;;  %v10910_v29 = vpop.permute.xlu1 %10909  ;;  %v14682_v25 = vpop.permute.xlu0 %10904  ;;  %v8664_v20 = vsel %vm414_vm2, %v15733_v57, %v10847_v17  ;;  %v8663_v59 = vsel %vm414_vm2, %v15734_v16, %v10846_v39  ;;  %v15738_v39 = vld [vmem:[#allocation27_spill] sm:$0xff] }
 0xcc0   :  { %v10912_v24 = vunpack.i.h.bf16 %v10910_v29  ;;  %v10911_v61 = vunpack.i.l.bf16 %v10910_v29  ;;  %v8695_v13 = vsel %vm1212_vm3, %v8663_v59, %v10856_v45  ;;  %v8696_v26 = vsel %vm1212_vm3, %v8664_v20, %v10857_v9 }
 0xcc1   :  { %10741 = vmatmul.mubr.msk.bf16.vlgmr.msra.gmra.mxu0 %vm185_vm0, %v8751_v6  ;;  %v10862_v6 = vunpack.i.h.bf16 %v14639_v49  ;;  %v10907_v57 = vunpack.i.h.bf16 %v14682_v25  ;;  %v10906_v59 = vunpack.i.l.bf16 %v14682_v25 }
 0xcc2   :  { %v8723_v27 = vsel %vm8717_vm4, %v8690_v54, %v10912_v24  ;;  %v8722_v40 = vsel %vm8717_vm4, %v8689_v30, %v10911_v61  ;;  %v10871_v24 = vunpack.i.l.bf16 %v14643_v52 }
 0xcc3   :  { %v8752_v37 = vpack.c.bf16 %v8723_v27, %v8722_v40  ;;  %v14699_v14 = vpop.permute.xlu1 %10914  ;;  %v10920_v15 = vpop.permute.xlu0 %10919  ;;  %v8666_v49 = vsel %vm414_vm2, %v15735_v18, %v10862_v6  ;;  %v15736_v27 = vld [vmem:[#allocation25_spill] sm:$0xff]  ;;  %v15743_v18 = vld [vmem:[#allocation34_spill] sm:$0xff] }
 0xcc4   :  { %v10922_v33 = vunpack.i.h.bf16 %v10920_v15  ;;  %v10921_v12 = vunpack.i.l.bf16 %v10920_v15  ;;  %v8665_v40 = vsel %vm414_vm2, %v15736_v27, %v10861_v44  ;;  %v8698_v52 = vsel %vm1212_vm3, %v8666_v49, %v10872_v43  ;;  %v15744_v27 = vld [vmem:[#allocation33_spill] sm:$0xff] }
 0xcc5   :  { %10744 = vmatprep.mubr.msk.bf16.mxu0 %vm185_vm0, %v8752_v37  ;;  %v8697_v10 = vsel %vm1212_vm3, %v8665_v40, %v10871_v24  ;;  %v10866_v37 = vunpack.i.l.bf16 %v14659_v4  ;;  %v10896_v4 = vunpack.i.l.bf16 %v14670_v5  ;;  %v15741_v24 = vld [vmem:[#allocation32_spill] sm:$0xff] }
 0xcc6   :  { %v8724_v51 = vsel %vm8717_vm4, %v8691_v53, %v10921_v12  ;;  %v8725_v62 = vsel %vm8717_vm4, %v8692_v47, %v10922_v33  ;;  %v10876_v33 = vunpack.i.l.bf16 %v14662_v58  ;;  %v10882_v47 = vunpack.i.h.bf16 %v14647_v22 }
 0xcc7   :  { %v8753_v1 = vpack.c.bf16 %v8725_v62, %v8724_v51  ;;  %v10930_v0 = vpop.permute.xlu1 %10929  ;;  %v14712_v34 = vpop.permute.xlu0 %10924  ;;  %v10897_v51 = vunpack.i.h.bf16 %v14670_v5  ;;  %v15737_v62 = vld [vmem:[#allocation28_spill] sm:$0xff]  ;;  %v8667_v58 = vsel %vm414_vm2, %v15738_v39, %v10866_v37  ;;  %v10887_v22 = vunpack.i.h.bf16 %v14664_v31 }
 0xcc8   :  { %v10932_v56 = vunpack.i.h.bf16 %v10930_v0  ;;  %v10931_v42 = vunpack.i.l.bf16 %v10930_v0  ;;  %v8668_v17 = vsel %vm414_vm2, %v15737_v62, %v10867_v46  ;;  %v8670_v35 = vsel %vm414_vm2, %v15739_v2, %v10882_v47  ;;  %v15746_v2 = vld [vmem:[#allocation36_spill] sm:$0xff] }
 0xcc9   :  { %10745 = vmatmul.mubr.msk.bf16.gmra.mxu0 %vm185_vm0, %v8753_v1  ;;  %v8699_v1 = vsel %vm1212_vm3, %v8667_v58, %v10876_v33  ;;  %v8700_v0 = vsel %vm1212_vm3, %v8668_v17, %v10877_v48  ;;  %v8669_v5 = vsel %vm414_vm2, %v15740_v23, %v10881_v41  ;;  %v8672_v25 = vsel %vm414_vm2, %v15741_v24, %v10887_v22 }
 0xcca   :  { %v8727_v55 = vsel %vm8717_vm4, %v8694_v11, %v10932_v56  ;;  %v8726_v7 = vsel %vm8717_vm4, %v8693_v32, %v10931_v42  ;;  %v8702_v11 = vsel %vm1212_vm3, %v8670_v35, %v10897_v51  ;;  %v8701_v9 = vsel %vm1212_vm3, %v8669_v5, %v10896_v4 }
 0xccb   :  { %v8754_v3 = vpack.c.bf16 %v8727_v55, %v8726_v7  ;;  %v14729_v28 = vpop.permute.xlu1 %10934  ;;  %v10940_v38 = vpop.permute.xlu0 %10939  ;;  %v10886_v7 = vunpack.i.l.bf16 %v14664_v31 }
 0xccc   :  { %v10942_v29 = vunpack.i.h.bf16 %v10940_v38  ;;  %v10941_v21 = vunpack.i.l.bf16 %v10940_v38  ;;  %v10936_v43 = vunpack.i.l.bf16 %v14729_v28 }
 0xccd   :  { %10748 = vmatprep.mubr.msk.bf16.mxu0 %vm185_vm0, %v8754_v3 }
 0xcce   :  { %v8728_v61 = vsel %vm8717_vm4, %v8695_v13, %v10941_v21  ;;  %v8729_v30 = vsel %vm8717_vm4, %v8696_v26, %v10942_v29  ;;  %v10917_v29 = vunpack.i.h.bf16 %v14699_v14  ;;  %v10916_v21 = vunpack.i.l.bf16 %v14699_v14 }
 0xccf   :  { %v8755_v54 = vpack.c.bf16 %v8729_v30, %v8728_v61  ;;  %v10950_v63 = vpop.permute.xlu1 %10949  ;;  %v14757_v8 = vpop.permute.xlu0 %10944  ;;  %v10937_v26 = vunpack.i.h.bf16 %v14729_v28  ;;  %v15742_v61 = vld [vmem:[#allocation31_spill] sm:$0xff] }
 0xcd0   :  { %v10952_v36 = vunpack.i.h.bf16 %v10950_v63  ;;  %v10951_v19 = vunpack.i.l.bf16 %v10950_v63  ;;  %v8671_v30 = vsel %vm414_vm2, %v15742_v61, %v10886_v7  ;;  %v8704_v63 = vsel %vm1212_vm3, %v8672_v25, %v10907_v57 }
 0xcd1   :  { %10749 = vmatmul.mubr.msk.bf16.gmra.mxu0 %vm185_vm0, %v8755_v54  ;;  %v8703_v54 = vsel %vm1212_vm3, %v8671_v30, %v10906_v59  ;;  %v8674_v49 = vsel %vm414_vm2, %v15743_v18, %v10917_v29  ;;  %v8673_v28 = vsel %vm414_vm2, %v15744_v27, %v10916_v21  ;;  %v15751_v27 = vld [vmem:[#allocation42_spill] sm:$0xff] }
 0xcd2   :  { %v8731_v15 = vsel %vm8717_vm4, %v8698_v52, %v10952_v36  ;;  %v8730_v60 = vsel %vm8717_vm4, %v8697_v10, %v10951_v19  ;;  %v8706_v10 = vsel %vm1212_vm3, %v8674_v49, %v10937_v26  ;;  %v8705_v52 = vsel %vm1212_vm3, %v8673_v28, %v10936_v43 }
 0xcd3   :  { %v8756_v12 = vpack.c.bf16 %v8731_v15, %v8730_v60  ;;  %v14753_v53 = vpop.permute.xlu1 %10954  ;;  %v10927_v15 = vunpack.i.h.bf16 %v14712_v34  ;;  %v10926_v60 = vunpack.i.l.bf16 %v14712_v34 }
 0xcd4   :  { %v10957_v62 = vunpack.i.h.bf16 %v14753_v53  ;;  %v10956_v17 = vunpack.i.l.bf16 %v14753_v53  ;;  %v15747_v53 = vld [vmem:[#allocation38_spill] sm:$0xff] }
 0xcd5   :  { %10752 = vmatprep.mubr.msk.bf16.mxu0 %vm185_vm0, %v8756_v12  ;;  %v10946_v12 = vunpack.i.l.bf16 %v14757_v8  ;;  %v8676_v35 = vsel %vm414_vm2, %v15746_v2, %v10927_v15  ;;  %v15754_v2 = vld [vmem:[#allocation43_spill] sm:$0xff] }
 0xcd7   :  { %v10970_v50 = vpop.permute.xlu1 %10969 }
 0xcd8   :  { %v10972_v56 = vunpack.i.h.bf16 %v10970_v50  ;;  %v10971_v42 = vunpack.i.l.bf16 %v10970_v50  ;;  %v10960_v32 = vpop.permute.xlu0 %10959  ;;  %v10947_v50 = vunpack.i.h.bf16 %v14757_v8 }
 0xcd9   :  { %v10962_v45 = vunpack.i.h.bf16 %v10960_v32  ;;  %v10961_v55 = vunpack.i.l.bf16 %v10960_v32 }
 0xcda   :  { %v8735_v20 = vsel %vm8717_vm4, %v8702_v11, %v10972_v56  ;;  %v8734_v16 = vsel %vm8717_vm4, %v8701_v9, %v10971_v42  ;;  %v8678_v56 = vsel %vm414_vm2, %v15747_v53, %v10957_v62  ;;  %v15748_v42 = vld [vmem:[#allocation37_spill] sm:$0xff] }
 0xcdb   :  { %v8758_v3 = vpack.c.bf16 %v8735_v20, %v8734_v16  ;;  %v8732_v38 = vsel %vm8717_vm4, %v8699_v1, %v10961_v55  ;;  %v8733_v6 = vsel %vm8717_vm4, %v8700_v0, %v10962_v45  ;;  %v10975_v44 = vpop.permute.xlu1 %10974  ;;  %v15745_v0 = vld [vmem:[#allocation35_spill] sm:$0xff]  ;;  %v8677_v32 = vsel %vm414_vm2, %v15748_v42, %v10956_v17 }
 0xcdc   :  { %v8757_v13 = vpack.c.bf16 %v8733_v6, %v8732_v38  ;;  %v14784_v31 = vpop.permute.xlu0 %10964  ;;  %v10977_v1 = vunpack.i.h.bf16 %v10975_v44  ;;  %v10976_v34 = vunpack.i.l.bf16 %v10975_v44  ;;  %v8675_v22 = vsel %vm414_vm2, %v15745_v0, %v10926_v60 }
 0xcdd   :  { %v8707_v23 = vsel %vm1212_vm3, %v8675_v22, %v10946_v12  ;;  %v8708_v20 = vsel %vm1212_vm3, %v8676_v35, %v10947_v50  ;;  %v10967_v16 = vunpack.i.h.bf16 %v14784_v31  ;;  %v10966_v38 = vunpack.i.l.bf16 %v14784_v31  ;;  %v15750_v31 = vld [vmem:[#allocation39_spill] sm:$0xff]  ;;  %v15753_v22 = vld [vmem:[#allocation44_spill] sm:$0xff] }
 0xcde   :  { %10753 = vmatmul.mubr.msk.bf16.gmra.mxu0 %vm185_vm0, %v8757_v13  ;;  %v8710_v8 = vsel %vm1212_vm3, %v8678_v56, %v10977_v1  ;;  %v8709_v55 = vsel %vm1212_vm3, %v8677_v32, %v10976_v34 }
 0xcdf   :  { %10756 = vmatprep.mubr.msk.bf16.mxu0 %vm185_vm0, %v8758_v3  ;;  %v10990_v14 = vpop.permute.xlu1 %10989  ;;  %v8679_v18 = vsel %vm414_vm2, %v15750_v31, %v10966_v38 }
 0xce0   :  { %v10992_v40 = vunpack.i.h.bf16 %v10990_v14  ;;  %v10991_v36 = vunpack.i.l.bf16 %v10990_v14  ;;  %v10980_v19 = vpop.permute.xlu0 %10979 }
 0xce1   :  { %v10982_v46 = vunpack.i.h.bf16 %v10980_v19  ;;  %v10981_v37 = vunpack.i.l.bf16 %v10980_v19 }
 0xce2   :  { %v8739_v48 = vsel %vm8717_vm4, %v8706_v10, %v10992_v40  ;;  %v8738_v33 = vsel %vm8717_vm4, %v8705_v52, %v10991_v36  ;;  %v15752_v40 = vld [vmem:[#allocation41_spill] sm:$0xff] }
 0xce3   :  { %v8760_v47 = vpack.c.bf16 %v8739_v48, %v8738_v33  ;;  %v8736_v41 = vsel %vm8717_vm4, %v8703_v54, %v10981_v37  ;;  %v8737_v51 = vsel %vm8717_vm4, %v8704_v63, %v10982_v46  ;;  %v10995_v4 = vpop.permute.xlu1 %10994  ;;  %v15749_v63 = vld [vmem:[#allocation40_spill] sm:$0xff] }
 0xce4   :  { %v8759_v39 = vpack.c.bf16 %v8737_v51, %v8736_v41  ;;  %v10985_v58 = vpop.permute.xlu0 %10984  ;;  %v10997_v13 = vunpack.i.h.bf16 %v10995_v4  ;;  %v10996_v26 = vunpack.i.l.bf16 %v10995_v4  ;;  %v8680_v14 = vsel %vm414_vm2, %v15749_v63, %v10967_v16 }
 0xce5   :  { %v10987_v30 = vunpack.i.h.bf16 %v10985_v58  ;;  %v10986_v54 = vunpack.i.l.bf16 %v10985_v58 }
 0xce6   :  { %10757 = vmatmul.mubr.msk.bf16.gmra.mxu0 %vm185_vm0, %v8759_v39  ;;  %v8682_v28 = vsel %vm414_vm2, %v15751_v27, %v10997_v13  ;;  %v8681_v36 = vsel %vm414_vm2, %v15752_v40, %v10996_v26 }
 0xce7   :  { %10760 = vmatprep.mubr.msk.bf16.mxu0 %vm185_vm0, %v8760_v47  ;;  %v11010_v5 = vpop.permute.xlu1 %11009  ;;  %v8711_v48 = vsel %vm1212_vm3, %v8679_v18, %v10986_v54  ;;  %v8712_v33 = vsel %vm1212_vm3, %v8680_v14, %v10987_v30 }
 0xce8   :  { %v11012_v11 = vunpack.i.h.bf16 %v11010_v5  ;;  %v11011_v9 = vunpack.i.l.bf16 %v11010_v5  ;;  %v11000_v45 = vpop.permute.xlu0 %10999 }
 0xce9   :  { %v11002_v7 = vunpack.i.h.bf16 %v11000_v45  ;;  %v11001_v57 = vunpack.i.l.bf16 %v11000_v45 }
 0xcea   :  { %v8743_v59 = vsel %vm8717_vm4, %v8710_v8, %v11012_v11  ;;  %v8742_v3 = vsel %vm8717_vm4, %v8709_v55, %v11011_v9  ;;  %v14864_v8 = vld [vmem:[%s15413_s4] ss:$0 sm:$0xff] }
 0xceb   :  { %v8762_v6 = vpack.c.bf16 %v8743_v59, %v8742_v3  ;;  %v8740_v44 = vsel %vm8717_vm4, %v8707_v23, %v11001_v57  ;;  %v8741_v29 = vsel %vm8717_vm4, %v8708_v20, %v11002_v7  ;;  %v11015_v21 = vpop.permute.xlu1 %11014 }
 0xcec   :  { %v8761_v43 = vpack.c.bf16 %v8741_v29, %v8740_v44  ;;  %v11005_v24 = vpop.permute.xlu0 %11004  ;;  %v11017_v25 = vunpack.i.h.bf16 %v11015_v21  ;;  %v11016_v61 = vunpack.i.l.bf16 %v11015_v21 }
 0xced   :  { %v11007_v39 = vunpack.i.h.bf16 %v11005_v24  ;;  %v11006_v58 = vunpack.i.l.bf16 %v11005_v24 }
 0xcee   :  { %10761 = vmatmul.mubr.msk.bf16.gmra.mxu0 %vm185_vm0, %v8761_v43  ;;  %v8714_v46 = vsel %vm1212_vm3, %v8682_v28, %v11017_v25  ;;  %v8713_v37 = vsel %vm1212_vm3, %v8681_v36, %v11016_v61 }
 0xcef   :  { %10764 = vmatprep.mubr.msk.bf16.mxu0 %vm185_vm0, %v8762_v6  ;;  %v11030_v49 = vpop.permute.xlu1 %11029  ;;  %v8684_v50 = vsel %vm414_vm2, %v15753_v22, %v11007_v39  ;;  %v8683_v35 = vsel %vm414_vm2, %v15754_v2, %v11006_v58 }
 0xcf0   :  { %v11032_v19 = vunpack.i.h.bf16 %v11030_v49  ;;  %v11031_v10 = vunpack.i.l.bf16 %v11030_v49  ;;  %v11020_v52 = vpop.permute.xlu0 %11019 }
 0xcf1   :  { %v11022_v15 = vunpack.i.h.bf16 %v11020_v52  ;;  %v11021_v60 = vunpack.i.l.bf16 %v11020_v52 }
 0xcf2   :  { %v8747_v12 = vsel %vm8717_vm4, %v8714_v46, %v11032_v19  ;;  %v8746_v47 = vsel %vm8717_vm4, %v8713_v37, %v11031_v10 }
 0xcf3   :  { %v8764_v41 = vpack.c.bf16 %v8747_v12, %v8746_v47  ;;  %v8744_v51 = vsel %vm8717_vm4, %v8711_v48, %v11021_v60  ;;  %v8745_v4 = vsel %vm8717_vm4, %v8712_v33, %v11022_v15 }
 0xcf4   :  { %v8763_v62 = vpack.c.bf16 %v8745_v4, %v8744_v51  ;;  %v11025_v17 = vpop.permute.xlu0 %11024 }
 0xcf5   :  { %v11027_v1 = vunpack.i.h.bf16 %v11025_v17  ;;  %v11026_v34 = vunpack.i.l.bf16 %v11025_v17 }
 0xcf6   :  { %10765 = vmatmul.mubr.msk.bf16.gmra.mxu0 %vm185_vm0, %v8763_v62 }
 0xcf7   :  { %10768 = vmatprep.mubr.msk.bf16.mxu0 %vm185_vm0, %v8764_v41  ;;  %v8715_v53 = vsel %vm1212_vm3, %v8683_v35, %v11026_v34  ;;  %v8716_v56 = vsel %vm1212_vm3, %v8684_v50, %v11027_v1 }
 0xcf8   :  { %v11035_v0 = vpop.permute.xlu0 %11034 }
 0xcf9   :  { %v11037_v23 = vunpack.i.h.bf16 %v11035_v0  ;;  %v11036_v5 = vunpack.i.l.bf16 %v11035_v0 }
 0xcfb   :  { %v8748_v42 = vsel %vm8717_vm4, %v8715_v53, %v11036_v5  ;;  %v8749_v32 = vsel %vm8717_vm4, %v8716_v56, %v11037_v23 }
 0xcfc   :  { %v8765_v11 = vpack.c.bf16 %v8749_v32, %v8748_v42 }
 0xcfe   :  { %10769 = vmatmul.mubr.msk.bf16.gmra.mxu0 %vm185_vm0, %v8765_v11 }
 0xd81   :  { %v10742_v9 = vpop.f32.mrf.mxu0 }
 0xd82   :  { %v14870_v20 = vadd.f32 %v10742_v9, %v14864_v8 }
 0xd83   :  { %v8871_v45 = vpop.f32.mrf.mxu0 }
 0xd84   :  { %v14867_v7 = vadd.f32 %v14864_v8, %v8871_v45  ;;  %v9001_v21 = vsel %vm185_vm0, %v14870_v20, 0.0 }
 0xd85   :  { %v10743_v55 = vpop.f32.mrf.mxu0 }
 0xd86   :  { %v8998_v3 = vsel %vm185_vm0, %v14867_v7, 0.0  ;;  %v14878_v38 = vadd.f32 %v10743_v55, %v14864_v8 }
 0xd87   :  { %v8874_v57 = vpop.f32.mrf.mxu0 }
 0xd88   :  { %v14873_v16 = vadd.f32 %v14864_v8, %v8874_v57  ;;  %v9003_v24 = vsel %vm185_vm0, %v14878_v38, 0.0 }
 0xd89   :  { %v10746_v59 = vpop.f32.mrf.mxu0 }
 0xd8a   :  { %v8999_v6 = vsel %vm185_vm0, %v14873_v16, 0.0  ;;  %v14890_v30 = vadd.f32 %v10746_v59, %v14864_v8 }
 0xd8b   :  { %v9000_v44 = vadd.f32 %v8999_v6, %v8998_v3  ;;  %v8887_v29 = vpop.f32.mrf.mxu0 }
 0xd8c   :  { %v14885_v13 = vadd.f32 %v14864_v8, %v8887_v29  ;;  %v9009_v40 = vsel %vm185_vm0, %v14890_v30, 0.0 }
 0xd8d   :  { %v9002_v26 = vadd.f32 %v9001_v21, %v9000_v44  ;;  %v10747_v43 = vpop.f32.mrf.mxu0 }
 0xd8e   :  { %v9005_v54 = vsel %vm185_vm0, %v14885_v13, 0.0  ;;  %v14898_v18 = vadd.f32 %v10747_v43, %v14864_v8 }
 0xd8f   :  { %v9004_v25 = vadd.f32 %v9003_v24, %v9002_v26  ;;  %v8890_v61 = vpop.f32.mrf.mxu0 }
 0xd90   :  { %v14895_v63 = vadd.f32 %v14864_v8, %v8890_v61  ;;  %v9011_v52 = vsel %vm185_vm0, %v14898_v18, 0.0 }
 0xd91   :  { %v9006_v14 = vadd.f32 %v9005_v54, %v9004_v25  ;;  %v10750_v31 = vpop.f32.mrf.mxu0 }
 0xd92   :  { %v9007_v49 = vsel %vm185_vm0, %v14895_v63, 0.0  ;;  %v14917_v12 = vadd.f32 %v10750_v31, %v14864_v8 }
 0xd93   :  { %v9008_v27 = vadd.f32 %v9007_v49, %v9006_v14  ;;  %v8903_v28 = vpop.f32.mrf.mxu0 }
 0xd94   :  { %v14905_v36 = vadd.f32 %v14864_v8, %v8903_v28  ;;  %v9017_v51 = vsel %vm185_vm0, %v14917_v12, 0.0 }
 0xd95   :  { %v9010_v19 = vadd.f32 %v9009_v40, %v9008_v27  ;;  %v10751_v10 = vpop.f32.mrf.mxu0 }
 0xd96   :  { %v9013_v15 = vsel %vm185_vm0, %v14905_v36, 0.0  ;;  %v14922_v4 = vadd.f32 %v10751_v10, %v14864_v8 }
 0xd97   :  { %v9012_v46 = vadd.f32 %v9011_v52, %v9010_v19  ;;  %v8906_v37 = vpop.f32.mrf.mxu0 }
 0xd98   :  { %v14912_v60 = vadd.f32 %v14864_v8, %v8906_v37  ;;  %v9019_v1 = vsel %vm185_vm0, %v14922_v4, 0.0 }
 0xd99   :  { %v9014_v48 = vadd.f32 %v9013_v15, %v9012_v46 }
 0xd9a   :  { %v9015_v33 = vsel %vm185_vm0, %v14912_v60, 0.0 }
 0xd9b   :  { %v9016_v47 = vadd.f32 %v9015_v33, %v9014_v48 }
 0xd9d   :  { %v9018_v62 = vadd.f32 %v9017_v51, %v9016_v47 }
 0xd9e   :  { %v10754_v41 = vpop.f32.mrf.mxu0 }
 0xd9f   :  { %v9020_v0 = vadd.f32 %v9019_v1, %v9018_v62  ;;  %v14932_v50 = vadd.f32 %v10754_v41, %v14864_v8 }
 0xda0   :  { %v8919_v17 = vpop.f32.mrf.mxu0 }
 0xda1   :  { %v14925_v39 = vadd.f32 %v14864_v8, %v8919_v17  ;;  %v9025_v32 = vsel %vm185_vm0, %v14932_v50, 0.0 }
 0xda2   :  { %v10755_v58 = vpop.f32.mrf.mxu0 }
 0xda3   :  { %v9021_v34 = vsel %vm185_vm0, %v14925_v39, 0.0  ;;  %v14938_v5 = vadd.f32 %v10755_v58, %v14864_v8 }
 0xda4   :  { %v8922_v22 = vpop.f32.mrf.mxu0  ;;  %v9022_v35 = vadd.f32 %v9021_v34, %v9020_v0 }
 0xda5   :  { %v14935_v2 = vadd.f32 %v14864_v8, %v8922_v22  ;;  %v9027_v55 = vsel %vm185_vm0, %v14938_v5, 0.0 }
 0xda6   :  { %v10758_v23 = vpop.f32.mrf.mxu0 }
 0xda7   :  { %v9023_v53 = vsel %vm185_vm0, %v14935_v2, 0.0  ;;  %v14950_v3 = vadd.f32 %v10758_v23, %v14864_v8 }
 0xda8   :  { %v9024_v56 = vadd.f32 %v9023_v53, %v9022_v35  ;;  %v8935_v42 = vpop.f32.mrf.mxu0 }
 0xda9   :  { %v14945_v11 = vadd.f32 %v14864_v8, %v8935_v42  ;;  %v9033_v61 = vsel %vm185_vm0, %v14950_v3, 0.0 }
 0xdaa   :  { %v9026_v9 = vadd.f32 %v9025_v32, %v9024_v56  ;;  %v10759_v45 = vpop.f32.mrf.mxu0 }
 0xdab   :  { %v9029_v6 = vsel %vm185_vm0, %v14945_v11, 0.0  ;;  %v14958_v26 = vadd.f32 %v10759_v45, %v14864_v8 }
 0xdac   :  { %v9028_v57 = vadd.f32 %v9027_v55, %v9026_v9  ;;  %v8938_v59 = vpop.f32.mrf.mxu0 }
 0xdad   :  { %v14955_v44 = vadd.f32 %v14864_v8, %v8938_v59  ;;  %v9035_v49 = vsel %vm185_vm0, %v14958_v26, 0.0 }
 0xdae   :  { %v9030_v29 = vadd.f32 %v9029_v6, %v9028_v57  ;;  %v10762_v21 = vpop.f32.mrf.mxu0 }
 0xdaf   :  { %v9031_v43 = vsel %vm185_vm0, %v14955_v44, 0.0  ;;  %v14970_v40 = vadd.f32 %v10762_v21, %v14864_v8 }
 0xdb0   :  { %v9032_v24 = vadd.f32 %v9031_v43, %v9030_v29  ;;  %v8951_v25 = vpop.f32.mrf.mxu0 }
 0xdb1   :  { %v14965_v54 = vadd.f32 %v14864_v8, %v8951_v25  ;;  %v9041_v47 = vsel %vm185_vm0, %v14970_v40, 0.0 }
 0xdb2   :  { %v9034_v14 = vadd.f32 %v9033_v61, %v9032_v24  ;;  %v10763_v31 = vpop.f32.mrf.mxu0 }
 0xdb3   :  { %v9037_v19 = vsel %vm185_vm0, %v14965_v54, 0.0  ;;  %v14978_v37 = vadd.f32 %v10763_v31, %v14864_v8 }
 0xdb4   :  { %v9036_v27 = vadd.f32 %v9035_v49, %v9034_v14  ;;  %v8954_v28 = vpop.f32.mrf.mxu0 }
 0xdb5   :  { %v14975_v10 = vadd.f32 %v14864_v8, %v8954_v28  ;;  %v9043_v17 = vsel %vm185_vm0, %v14978_v37, 0.0 }
 0xdb6   :  { %v9038_v52 = vadd.f32 %v9037_v19, %v9036_v27  ;;  %v10766_v46 = vpop.f32.mrf.mxu0 }
 0xdb7   :  { %v9039_v15 = vsel %vm185_vm0, %v14975_v10, 0.0  ;;  %v14990_v34 = vadd.f32 %v10766_v46, %v14864_v8 }
 0xdb8   :  { %v9040_v48 = vadd.f32 %v9039_v15, %v9038_v52  ;;  %v8967_v33 = vpop.f32.mrf.mxu0 }
 0xdb9   :  { %v14985_v41 = vadd.f32 %v14864_v8, %v8967_v33  ;;  %v9049_v9 = vsel %vm185_vm0, %v14990_v34, 0.0 }
 0xdba   :  { %v9042_v51 = vadd.f32 %v9041_v47, %v9040_v48  ;;  %v10767_v62 = vpop.f32.mrf.mxu0 }
 0xdbb   :  { %v9045_v0 = vsel %vm185_vm0, %v14985_v41, 0.0  ;;  %v14998_v53 = vadd.f32 %v10767_v62, %v14864_v8 }
 0xdbc   :  { %v9044_v58 = vadd.f32 %v9043_v17, %v9042_v51  ;;  %v8970_v1 = vpop.f32.mrf.mxu0 }
 0xdbd   :  { %v14995_v22 = vadd.f32 %v14864_v8, %v8970_v1  ;;  %v9051_v59 = vsel %vm185_vm0, %v14998_v53, 0.0 }
 0xdbe   :  { %v9046_v35 = vadd.f32 %v9045_v0, %v9044_v58  ;;  %v10770_v23 = vpop.f32.mrf.mxu0 }
 0xdbf   :  { %v9047_v56 = vsel %vm185_vm0, %v14995_v22, 0.0  ;;  %v15010_v21 = vadd.f32 %v10770_v23, %v14864_v8 }
 0xdc0   :  { %v9048_v42 = vadd.f32 %v9047_v56, %v9046_v35  ;;  %v8983_v32 = vpop.f32.mrf.mxu0 }
 0xdc1   :  { %v15005_v45 = vadd.f32 %v14864_v8, %v8983_v32  ;;  %v9057_v49 = vsel %vm185_vm0, %v15010_v21, 0.0 }
 0xdc2   :  { %v9050_v55 = vadd.f32 %v9049_v9, %v9048_v42  ;;  %v10771_v57 = vpop.f32.mrf.mxu0 }
 0xdc3   :  { %v9053_v43 = vsel %vm185_vm0, %v15005_v45, 0.0  ;;  %v15018_v61 = vadd.f32 %v10771_v57, %v14864_v8 }
 0xdc4   :  { %v9052_v6 = vadd.f32 %v9051_v59, %v9050_v55  ;;  %v8986_v29 = vpop.f32.mrf.mxu0 }
 0xdc5   :  { %v15015_v24 = vadd.f32 %v14864_v8, %v8986_v29  ;;  %v9059_v28 = vsel %vm185_vm0, %v15018_v61, 0.0 }
 0xdc6   :  { %v9054_v25 = vadd.f32 %v9053_v43, %v9052_v6 }
 0xdc7   :  { %v9055_v14 = vsel %vm185_vm0, %v15015_v24, 0.0 }
 0xdc8   :  { %v9056_v31 = vadd.f32 %v9055_v14, %v9054_v25 }
 0xdca   :  { %v9058_v27 = vadd.f32 %v9057_v49, %v9056_v31 }
 0xdcc   :  { %v9060_v19 = vadd.f32 %v9059_v28, %v9058_v27 }
 0xdce   :  { %v9061_v52 = vrot.slane %v9060_v19, 4 }
 0xdd0   :  { %v9062_v46 = vadd.f32 %v9061_v52, %v9060_v19 }
 0xdd2   :  { %v9063_v15 = vrot.slane %v9062_v46, 2 }
 0xdd4   :  { %v9064_v48 = vadd.f32 %v9063_v15, %v9062_v46 }
 0xdd6   :  { %v9065_v33 = vrot.slane %v9064_v48, 1 }
 0xdd8   :  { %v9066_v47 = vadd.f32 %v9065_v33, %v9064_v48 }
 0xdda   :  { %v15026_v8 = vmul.f32 0.00390625, %v9066_v47 }
 0xddc   :  { %v15030_v51 = vsub.f32 %v14867_v7, %v15026_v8  ;;  %v15034_v62 = vsub.f32 %v14873_v16, %v15026_v8  ;;  %v15038_v17 = vsub.f32 %v14870_v20, %v15026_v8  ;;  %v15042_v58 = vsub.f32 %v14878_v38, %v15026_v8 }
 0xddd   :  { %v15050_v7 = vsub.f32 %v14885_v13, %v15026_v8  ;;  %v15056_v20 = vsub.f32 %v14895_v63, %v15026_v8  ;;  %v15064_v42 = vsub.f32 %v14890_v30, %v15026_v8  ;;  %v15071_v63 = vsub.f32 %v14898_v18, %v15026_v8 }
 0xdde   :  { %v9101_v1 = vmul.f32 %v15030_v51, %v15030_v51  ;;  %v9102_v0 = vmul.f32 %v15034_v62, %v15034_v62  ;;  %v9103_v16 = vmul.f32 %v15038_v17, %v15038_v17  ;;  %v9104_v38 = vmul.f32 %v15042_v58, %v15042_v58 }
 0xddf   :  { %v9105_v13 = vmul.f32 %v15050_v7, %v15050_v7  ;;  %v9106_v55 = vmul.f32 %v15056_v20, %v15056_v20  ;;  %v15078_v30 = vsub.f32 %v14905_v36, %v15026_v8  ;;  %v9107_v6 = vmul.f32 %v15064_v42, %v15064_v42 }
 0xde0   :  { %v9133_v35 = vsel %vm185_vm0, %v9101_v1, 0.0  ;;  %v9134_v23 = vsel %vm185_vm0, %v9102_v0, 0.0  ;;  %v9136_v32 = vsel %vm185_vm0, %v9103_v16, 0.0  ;;  %v9138_v57 = vsel %vm185_vm0, %v9104_v38, 0.0 }
 0xde1   :  { %v9135_v56 = vadd.f32 %v9134_v23, %v9133_v35  ;;  %v9140_v29 = vsel %vm185_vm0, %v9105_v13, 0.0  ;;  %v15085_v18 = vsub.f32 %v14912_v60, %v15026_v8  ;;  %v9108_v25 = vmul.f32 %v15071_v63, %v15071_v63 }
 0xde2   :  { %v9142_v14 = vsel %vm185_vm0, %v9106_v55, 0.0  ;;  %v15092_v36 = vsub.f32 %v14917_v12, %v15026_v8  ;;  %v9109_v49 = vmul.f32 %v15078_v30, %v15078_v30  ;;  %v9144_v27 = vsel %vm185_vm0, %v9107_v6, 0.0 }
 0xde3   :  { %v9137_v9 = vadd.f32 %v9136_v32, %v9135_v56  ;;  %v15099_v60 = vsub.f32 %v14922_v4, %v15026_v8  ;;  %v9110_v19 = vmul.f32 %v15085_v18, %v15085_v18  ;;  %v9146_v52 = vsel %vm185_vm0, %v9108_v25, 0.0 }
 0xde4   :  { %v15106_v12 = vsub.f32 %v14925_v39, %v15026_v8  ;;  %v9111_v15 = vmul.f32 %v15092_v36, %v15092_v36  ;;  %v9148_v48 = vsel %vm185_vm0, %v9109_v49, 0.0  ;;  %v15113_v4 = vsub.f32 %v14935_v2, %v15026_v8 }
 0xde5   :  { %v9139_v59 = vadd.f32 %v9138_v57, %v9137_v9  ;;  %v9112_v47 = vmul.f32 %v15099_v60, %v15099_v60  ;;  %v9150_v1 = vsel %vm185_vm0, %v9110_v19, 0.0  ;;  %v15120_v39 = vsub.f32 %v14932_v50, %v15026_v8 }
 0xde6   :  { %v9113_v16 = vmul.f32 %v15106_v12, %v15106_v12  ;;  %v9152_v38 = vsel %vm185_vm0, %v9111_v15, 0.0  ;;  %v15127_v2 = vsub.f32 %v14938_v5, %v15026_v8  ;;  %v9114_v23 = vmul.f32 %v15113_v4, %v15113_v4 }
 0xde7   :  { %v9141_v43 = vadd.f32 %v9140_v29, %v9139_v59  ;;  %v9154_v56 = vsel %vm185_vm0, %v9112_v47, 0.0  ;;  %v15134_v50 = vsub.f32 %v14945_v11, %v15026_v8  ;;  %v9115_v32 = vmul.f32 %v15120_v39, %v15120_v39 }
 0xde8   :  { %v9156_v9 = vsel %vm185_vm0, %v9113_v16, 0.0  ;;  %v15141_v5 = vsub.f32 %v14955_v44, %v15026_v8  ;;  %v9116_v57 = vmul.f32 %v15127_v2, %v15127_v2  ;;  %v9158_v59 = vsel %vm185_vm0, %v9114_v23, 0.0 }
 0xde9   :  { %v9143_v31 = vadd.f32 %v9142_v14, %v9141_v43  ;;  %v15148_v11 = vsub.f32 %v14950_v3, %v15026_v8  ;;  %v9117_v29 = vmul.f32 %v15134_v50, %v15134_v50  ;;  %v9160_v43 = vsel %vm185_vm0, %v9115_v32, 0.0 }
 0xdea   :  { %v15155_v44 = vsub.f32 %v14958_v26, %v15026_v8  ;;  %v9118_v14 = vmul.f32 %v15141_v5, %v15141_v5  ;;  %v15162_v3 = vsub.f32 %v14965_v54, %v15026_v8  ;;  %v15169_v26 = vsub.f32 %v14975_v10, %v15026_v8 }
 0xdeb   :  { %v9145_v28 = vadd.f32 %v9144_v27, %v9143_v31  ;;  %v9162_v31 = vsel %vm185_vm0, %v9116_v57, 0.0  ;;  %v9119_v27 = vmul.f32 %v15148_v11, %v15148_v11  ;;  %v15176_v54 = vsub.f32 %v14970_v40, %v15026_v8 }
 0xdec   :  { %v15183_v10 = vsub.f32 %v14978_v37, %v15026_v8  ;;  %v15190_v40 = vsub.f32 %v14985_v41, %v15026_v8  ;;  %v15197_v37 = vsub.f32 %v14995_v22, %v15026_v8  ;;  %v15204_v41 = vsub.f32 %v14990_v34, %v15026_v8 }
 0xded   :  { %v9147_v46 = vadd.f32 %v9146_v52, %v9145_v28  ;;  %v9164_v28 = vsel %vm185_vm0, %v9117_v29, 0.0  ;;  %v9120_v52 = vmul.f32 %v15155_v44, %v15155_v44  ;;  %v15211_v22 = vsub.f32 %v14998_v53, %v15026_v8 }
 0xdee   :  { %v15218_v34 = vsub.f32 %v15005_v45, %v15026_v8  ;;  %v15225_v53 = vsub.f32 %v15015_v24, %v15026_v8  ;;  %v15232_v45 = vsub.f32 %v15010_v21, %v15026_v8  ;;  %v15239_v24 = vsub.f32 %v15018_v61, %v15026_v8 }
 0xdef   :  { %v9149_v33 = vadd.f32 %v9148_v48, %v9147_v46  ;;  %v9166_v46 = vsel %vm185_vm0, %v9118_v14, 0.0  ;;  %v9121_v48 = vmul.f32 %v15162_v3, %v15162_v3 }
 0xdf0   :  { %v9131_v21 = vmul.f32 %v15232_v45, %v15232_v45 }
 0xdf1   :  { %v9151_v0 = vadd.f32 %v9150_v1, %v9149_v33  ;;  %v9168_v33 = vsel %vm185_vm0, %v9119_v27, 0.0  ;;  %v9122_v1 = vmul.f32 %v15169_v26, %v15169_v26 }
 0xdf2   :  { %v9192_v61 = vsel %vm185_vm0, %v9131_v21, 0.0 }
 0xdf3   :  { %v9153_v35 = vadd.f32 %v9152_v38, %v9151_v0  ;;  %v9170_v0 = vsel %vm185_vm0, %v9120_v52, 0.0  ;;  %v9123_v38 = vmul.f32 %v15176_v54, %v15176_v54 }
 0xdf5   :  { %v9155_v13 = vadd.f32 %v9154_v56, %v9153_v35  ;;  %v9172_v35 = vsel %vm185_vm0, %v9121_v48, 0.0  ;;  %v9124_v56 = vmul.f32 %v15183_v10, %v15183_v10 }
 0xdf7   :  { %v9157_v55 = vadd.f32 %v9156_v9, %v9155_v13  ;;  %v9174_v13 = vsel %vm185_vm0, %v9122_v1, 0.0  ;;  %v9125_v9 = vmul.f32 %v15190_v40, %v15190_v40  ;;  %v9132_v1 = vmul.f32 %v15239_v24, %v15239_v24 }
 0xdf9   :  { %v9159_v6 = vadd.f32 %v9158_v59, %v9157_v55  ;;  %v9176_v55 = vsel %vm185_vm0, %v9123_v38, 0.0  ;;  %v9126_v59 = vmul.f32 %v15197_v37, %v15197_v37  ;;  %v9194_v38 = vsel %vm185_vm0, %v9132_v1, 0.0 }
 0xdfb   :  { %v9161_v25 = vadd.f32 %v9160_v43, %v9159_v6  ;;  %v9178_v6 = vsel %vm185_vm0, %v9124_v56, 0.0  ;;  %v9127_v43 = vmul.f32 %v15204_v41, %v15204_v41 }
 0xdfd   :  { %v9163_v49 = vadd.f32 %v9162_v31, %v9161_v25  ;;  %v9180_v25 = vsel %vm185_vm0, %v9125_v9, 0.0  ;;  %v9128_v31 = vmul.f32 %v15211_v22, %v15211_v22 }
 0xdff   :  { %v9165_v19 = vadd.f32 %v9164_v28, %v9163_v49  ;;  %v9182_v49 = vsel %vm185_vm0, %v9126_v59, 0.0  ;;  %v9129_v28 = vmul.f32 %v15218_v34, %v15218_v34 }
 0xe01   :  { %v9167_v15 = vadd.f32 %v9166_v46, %v9165_v19  ;;  %v9184_v19 = vsel %vm185_vm0, %v9127_v43, 0.0  ;;  %v9130_v46 = vmul.f32 %v15225_v53, %v15225_v53  ;;  %v9203_v43 = vld [vmem:[%s15414_s5] sm:$0x1]  ;;  %s11663_s5 = smov [#allocation9]  }
 0xe03   :  { %v9169_v47 = vadd.f32 %v9168_v33, %v9167_v15  ;;  %v9186_v15 = vsel %vm185_vm0, %v9128_v31, 0.0  ;;  %v9188_v33 = vsel %vm185_vm0, %v9129_v28, 0.0  ;;  %v15262_v28 = vld [vmem:[%s15415_s6] ss:$0 sm:$0xff]  ;;  %s9460_s6 = sshll.u32 %s11663_s5, 4  ;;  %s9461_s6 = int_to_ptr.vmem [resolvable:$true] %s9460_s6 }
 0xe04   :  { %p11621_p2 = scmp.lt.s32.totalorder %s9461_s6, %s9461_s6 }
 0xe05   :  { %v9171_v16 = vadd.f32 %v9170_v0, %v9169_v47  ;;  %v9190_v0 = vsel %vm185_vm0, %v9130_v46, 0.0 }
 0xe07   :  { %v9173_v23 = vadd.f32 %v9172_v35, %v9171_v16 }
 0xe09   :  { %v9175_v32 = vadd.f32 %v9174_v13, %v9173_v23 }
 0xe0b   :  { %v9177_v57 = vadd.f32 %v9176_v55, %v9175_v32 }
 0xe0d   :  { %v9179_v29 = vadd.f32 %v9178_v6, %v9177_v57  ;;  %v9208_v6 = vlaneseq }
 0xe0f   :  { %v9181_v14 = vadd.f32 %v9180_v25, %v9179_v29  ;;  %v9209_v29 = vshrl.u32 %v9208_v6, 7 }
 0xe11   :  { %v9183_v27 = vadd.f32 %v9182_v49, %v9181_v14  ;;  %v9210_v31 = vsub.s32 0, %v9209_v29 }
 0xe13   :  { %v9185_v52 = vadd.f32 %v9184_v19, %v9183_v27  ;;  %v15267_v19 = vstv %s15416_s7  ;;  %s11616_s7 = scalar_lea.vmem %s9461_s6, 1024 }
 0xe14   :  { %p11617_p1 = scmp.ne.s32.totalorder %s9461_s6, %s11616_s7  ;;  %p11622_p3 = scmp.lt.s32.totalorder %s11616_s7, %s11616_s7 }
 0xe15   :  { %v9187_v48 = vadd.f32 %v9186_v15, %v9185_v52 }
 0xe16   :  { %p11623_p4 = por %p11622_p3, %p11621_p2 }
 0xe17   :  { %v9189_v47 = vadd.f32 %v9188_v33, %v9187_v48 }
 0xe18   :  { %p11624_p5 = pnand %p11623_p4, %p11617_p1 }
 0xe19   :  { %v9191_v16 = vadd.f32 %v9190_v0, %v9189_v47 }
 0xe1b   :  { %v9193_v8 = vadd.f32 %v9192_v61, %v9191_v16 }
 0xe1d   :  { %v9195_v35 = vadd.f32 %v9194_v38, %v9193_v8 }
 0xe1f   :  { %v9196_v23 = vrot.slane %v9195_v35, 4 }
 0xe21   :  { %v9197_v56 = vadd.f32 %v9196_v23, %v9195_v35 }
 0xe23   :  { %v9198_v13 = vrot.slane %v9197_v56, 2 }
 0xe25   :  { %v9199_v32 = vadd.f32 %v9198_v13, %v9197_v56 }
 0xe27   :  { %v9200_v9 = vrot.slane %v9199_v32, 1 }
 0xe29   :  { %v9201_v55 = vadd.f32 %v9200_v9, %v9199_v32 }
 0xe2b   :  { %v9202_v57 = vmul.f32 0.00390625, %v9201_v55 }
 0xe2d   :  { %v9204_v59 = vadd.f32 1e-05, %v9202_v57 }
 0xe2f   :  { %11554 = vrsqrt.f32 %v9204_v59 }
 0xe3c   :  { %v11555_v25 = vpop.eup %11554 }
 0xe3d   :  { %v9206_v14 = vmul.f32 %v11555_v25, %v9203_v43 }
 0xe3f   :  { %v15255_v49 = vrot.slane %v9206_v14, %v9210_v31 }
 0xe41   :  { %v9229_v27 = vmul.f32 %v15255_v49, %v15134_v50  ;;  %v9213_v52 = vmul.f32 %v15255_v49, %v15030_v51  ;;  %v9228_v15 = vmul.f32 %v15255_v49, %v15127_v2  ;;  %v9230_v50 = vmul.f32 %v15255_v49, %v15141_v5 }
 0xe42   :  { %v9214_v21 = vmul.f32 %v15255_v49, %v15034_v62  ;;  %v9231_v33 = vmul.f32 %v15255_v49, %v15148_v11  ;;  %v9215_v5 = vmul.f32 %v15255_v49, %v15038_v17  ;;  %v9232_v0 = vmul.f32 %v15255_v49, %v15155_v44 }
 0xe43   :  { %v9268_v46 = vadd.f32 %v15262_v28, %v9229_v27  ;;  %v9252_v51 = vadd.f32 %v15262_v28, %v9213_v52  ;;  %v15283_v1 = vadd.f32 %v15262_v28, %v9228_v15  ;;  %v9269_v2 = vadd.f32 %v15262_v28, %v9230_v50 }
 0xe44   :  { %v9253_v62 = vadd.f32 %v15262_v28, %v9214_v21  ;;  %v9270_v16 = vadd.f32 %v15262_v28, %v9231_v33  ;;  %v9216_v8 = vmul.f32 %v15255_v49, %v15042_v58  ;;  %v9233_v38 = vmul.f32 %v15255_v49, %v15162_v3 }
 0xe45   :  { %vm9301_vm5 = vcmp.ge.f32.partialorder %v9268_v46, 0.0  ;;  %v9334_v48 = vmul.f32 %v15267_v19, %v9268_v46  ;;  %vm9285_vm6 = vcmp.ge.f32.partialorder %v9252_v51, 0.0  ;;  %v9318_v11 = vmul.f32 %v15267_v19, %v9252_v51 }
 0xe46   :  { %vm9302_vm7 = vcmp.ge.f32.partialorder %v9269_v2, 0.0  ;;  %v9335_v61 = vmul.f32 %v15267_v19, %v9269_v2  ;;  %v9254_v17 = vadd.f32 %v15262_v28, %v9215_v5  ;;  %v9271_v44 = vadd.f32 %v15262_v28, %v9232_v0 }
 0xe47   :  { %v9366_v47 = vsel %vm9301_vm5, %v9268_v46, %v9334_v48  ;;  %v9350_v35 = vsel %vm9285_vm6, %v9252_v51, %v9318_v11  ;;  %v9319_v56 = vmul.f32 %v15267_v19, %v9253_v62  ;;  %v9336_v13 = vmul.f32 %v15267_v19, %v9270_v16 }
 0xe48   :  { %9418 = vxpose.xlu0.b32.start [1/16] (narrow) %v9366_v47, 32  ;;  %v9367_v23 = vsel %vm9302_vm7, %v9269_v2, %v9335_v61  ;;  %9382 = vxpose.xlu1.b32.start [1/16] (narrow) %v9350_v35, 32  ;;  %vm9286_vm8 = vcmp.ge.f32.partialorder %v9253_v62, 0.0  ;;  %vm9303_vm9 = vcmp.ge.f32.partialorder %v9270_v16, 0.0  ;;  %v9217_v58 = vmul.f32 %v15255_v49, %v15050_v7 }
 0xe49   :  { %v9234_v3 = vmul.f32 %v15255_v49, %v15169_v26  ;;  %v9255_v32 = vadd.f32 %v15262_v28, %v9216_v8  ;;  %v9272_v9 = vadd.f32 %v15262_v28, %v9233_v38  ;;  %v9351_v55 = vsel %vm9286_vm8, %v9253_v62, %v9319_v56 }
 0xe4a   :  { %v9368_v57 = vsel %vm9303_vm9, %v9270_v16, %v9336_v13  ;;  %v9320_v59 = vmul.f32 %v15267_v19, %v9254_v17  ;;  %v9337_v6 = vmul.f32 %v15267_v19, %v9271_v44  ;;  %vm9287_vm10 = vcmp.ge.f32.partialorder %v9254_v17, 0.0 }
 0xe4b   :  { %vm9304_vm11 = vcmp.ge.f32.partialorder %v9271_v44, 0.0  ;;  %v9218_v7 = vmul.f32 %v15255_v49, %v15056_v20  ;;  %v9235_v26 = vmul.f32 %v15255_v49, %v15176_v54  ;;  %v9256_v29 = vadd.f32 %v15262_v28, %v9217_v58 }
 0xe4c   :  { %9419 = vxpose.xlu0.b32.cont [2/16] (narrow) %v9367_v23, 32  ;;  %9383 = vxpose.xlu1.b32.cont [2/16] (narrow) %v9351_v55, 32  ;;  %v9273_v43 = vadd.f32 %v15262_v28, %v9234_v3  ;;  %v9352_v25 = vsel %vm9287_vm10, %v9254_v17, %v9320_v59  ;;  %v9369_v14 = vsel %vm9304_vm11, %v9271_v44, %v9337_v6  ;;  %vm9288_vm12 = vcmp.ge.f32.partialorder %v9255_v32, 0.0 }
 0xe4d   :  { %v9321_v31 = vmul.f32 %v15267_v19, %v9255_v32  ;;  %v9338_v27 = vmul.f32 %v15267_v19, %v9272_v9  ;;  %vm9305_vm13 = vcmp.ge.f32.partialorder %v9272_v9, 0.0  ;;  %v9219_v20 = vmul.f32 %v15255_v49, %v15064_v42 }
 0xe4e   :  { %v9236_v54 = vmul.f32 %v15255_v49, %v15183_v10  ;;  %v9257_v52 = vadd.f32 %v15262_v28, %v9218_v7  ;;  %v9274_v46 = vadd.f32 %v15262_v28, %v9235_v26  ;;  %v9322_v48 = vmul.f32 %v15267_v19, %v9256_v29 }
 0xe4f   :  { %v9353_v15 = vsel %vm9288_vm12, %v9255_v32, %v9321_v31  ;;  %v9370_v50 = vsel %vm9305_vm13, %v9272_v9, %v9338_v27  ;;  %v9339_v21 = vmul.f32 %v15267_v19, %v9273_v43  ;;  %vm9289_vm14 = vcmp.ge.f32.partialorder %v9256_v29, 0.0 }
 0xe50   :  { %9420 = vxpose.xlu0.b32.cont [3/16] (narrow) %v9368_v57, 32  ;;  %9384 = vxpose.xlu1.b32.cont [3/16] (narrow) %v9352_v25, 32  ;;  %vm9306_vm15 = vcmp.ge.f32.partialorder %v9273_v43, 0.0  ;;  %v9220_v42 = vmul.f32 %v15255_v49, %v15071_v63  ;;  %v9237_v10 = vmul.f32 %v15255_v49, %v15190_v40  ;;  %v9258_v33 = vadd.f32 %v15262_v28, %v9219_v20 }
 0xe51   :  { %v9275_v47 = vadd.f32 %v15262_v28, %v9236_v54  ;;  %v9354_v51 = vsel %vm9289_vm14, %v9256_v29, %v9322_v48  ;;  %v9371_v2 = vsel %vm9306_vm15, %v9273_v43, %v9339_v21  ;;  %v9323_v5 = vmul.f32 %v15267_v19, %v9257_v52 }
 0xe52   :  { %v9340_v0 = vmul.f32 %v15267_v19, %v9274_v46  ;;  %vm9290_vm0 = vcmp.ge.f32.partialorder %v9257_v52, 0.0  ;;  %vm9307_vm1 = vcmp.ge.f32.partialorder %v9274_v46, 0.0  ;;  %v9221_v63 = vmul.f32 %v15255_v49, %v15078_v30 }
 0xe53   :  { %v9238_v40 = vmul.f32 %v15255_v49, %v15197_v37  ;;  %v9259_v62 = vadd.f32 %v15262_v28, %v9220_v42  ;;  %v9276_v16 = vadd.f32 %v15262_v28, %v9237_v10  ;;  %v9324_v11 = vmul.f32 %v15267_v19, %v9258_v33 }
 0xe54   :  { %9421 = vxpose.xlu0.b32.cont [4/16] (narrow) %v9369_v14, 32  ;;  %9385 = vxpose.xlu1.b32.cont [4/16] (narrow) %v9353_v15, 32  ;;  %vm9300_vm2 = vcmp.ge.f32.partialorder %v15283_v1, 0.0  ;;  %v9355_v61 = vsel %vm9290_vm0, %v9257_v52, %v9323_v5  ;;  %v9372_v8 = vsel %vm9307_vm1, %v9274_v46, %v9340_v0  ;;  %v9341_v38 = vmul.f32 %v15267_v19, %v9275_v47 }
 0xe55   :  { %v9333_v17 = vmul.f32 %v15267_v19, %v15283_v1  ;;  %vm9291_vm3 = vcmp.ge.f32.partialorder %v9258_v33, 0.0  ;;  %vm9308_vm4 = vcmp.ge.f32.partialorder %v9275_v47, 0.0  ;;  %v9222_v37 = vmul.f32 %v15255_v49, %v15085_v18 }
 0xe56   :  { %v9239_v44 = vmul.f32 %v15255_v49, %v15204_v41  ;;  %v9260_v35 = vadd.f32 %v15262_v28, %v9221_v63  ;;  %v9277_v23 = vadd.f32 %v15262_v28, %v9238_v40  ;;  %v9356_v56 = vsel %vm9291_vm3, %v9258_v33, %v9324_v11 }
 0xe57   :  { %v15346_v30 = vsel %vm9300_vm2, %v15283_v1, %v9333_v17  ;;  %v9373_v13 = vsel %vm9308_vm4, %v9275_v47, %v9341_v38  ;;  %v9325_v58 = vmul.f32 %v15267_v19, %v9259_v62  ;;  %v9342_v3 = vmul.f32 %v15267_v19, %v9276_v16 }
 0xe58   :  { %9422 = vxpose.xlu0.b32.cont [5/16] (narrow) %v9370_v50, 32  ;;  %9386 = vxpose.xlu1.b32.cont [5/16] (narrow) %v9354_v51, 32  ;;  %vm9292_vm5 = vcmp.ge.f32.partialorder %v9259_v62, 0.0  ;;  %vm9309_vm6 = vcmp.ge.f32.partialorder %v9276_v16, 0.0  ;;  %v9223_v18 = vmul.f32 %v15255_v49, %v15092_v36  ;;  %v9240_v41 = vmul.f32 %v15255_v49, %v15211_v22 }
 0xe59   :  { %v9261_v1 = vadd.f32 %v15262_v28, %v9222_v37  ;;  %v9278_v32 = vadd.f32 %v15262_v28, %v9239_v44  ;;  %v9357_v9 = vsel %vm9292_vm5, %v9259_v62, %v9325_v58  ;;  %v9374_v55 = vsel %vm9309_vm6, %v9276_v16, %v9342_v3 }
 0xe5a   :  { %v9326_v57 = vmul.f32 %v15267_v19, %v9260_v35  ;;  %v9343_v59 = vmul.f32 %v15267_v19, %v9277_v23  ;;  %vm9293_vm7 = vcmp.ge.f32.partialorder %v9260_v35, 0.0  ;;  %vm9310_vm8 = vcmp.ge.f32.partialorder %v9277_v23, 0.0 }
 0xe5b   :  { %v9224_v36 = vmul.f32 %v15255_v49, %v15099_v60  ;;  %v9241_v22 = vmul.f32 %v15255_v49, %v15218_v34  ;;  %v9262_v6 = vadd.f32 %v15262_v28, %v9223_v18  ;;  %v9279_v7 = vadd.f32 %v15262_v28, %v9240_v41 }
 0xe5c   :  { %9423 = vxpose.xlu0.b32.cont [6/16] (narrow) %v9371_v2, 32  ;;  %9387 = vxpose.xlu1.b32.cont [6/16] (narrow) %v9355_v61, 32  ;;  %v9358_v26 = vsel %vm9293_vm7, %v9260_v35, %v9326_v57  ;;  %v9375_v29 = vsel %vm9310_vm8, %v9277_v23, %v9343_v59  ;;  %v9327_v43 = vmul.f32 %v15267_v19, %v9261_v1  ;;  %vm9294_vm9 = vcmp.ge.f32.partialorder %v9261_v1, 0.0 }
 0xe5d   :  { %v9344_v25 = vmul.f32 %v15267_v19, %v9278_v32  ;;  %vm9311_vm10 = vcmp.ge.f32.partialorder %v9278_v32, 0.0  ;;  %v9242_v60 = vmul.f32 %v15255_v49, %v15225_v53  ;;  %v9225_v34 = vmul.f32 %v15255_v49, %v15106_v12 }
 0xe5e   :  { %v9263_v14 = vadd.f32 %v15262_v28, %v9224_v36  ;;  %v9280_v31 = vadd.f32 %v15262_v28, %v9241_v22  ;;  %v9359_v27 = vsel %vm9294_vm9, %v9261_v1, %v9327_v43  ;;  %v9328_v54 = vmul.f32 %v15267_v19, %v9262_v6 }
 0xe5f   :  { %v9376_v20 = vsel %vm9311_vm10, %v9278_v32, %v9344_v25  ;;  %v9345_v52 = vmul.f32 %v15267_v19, %v9279_v7  ;;  %vm9295_vm11 = vcmp.ge.f32.partialorder %v9262_v6, 0.0  ;;  %vm9312_vm12 = vcmp.ge.f32.partialorder %v9279_v7, 0.0 }
 0xe60   :  { %9424 = vxpose.xlu0.b32.cont [7/16] (narrow) %v9372_v8, 32  ;;  %9388 = vxpose.xlu1.b32.cont [7/16] (narrow) %v9356_v56, 32  ;;  %v9281_v46 = vadd.f32 %v15262_v28, %v9242_v60  ;;  %v9226_v53 = vmul.f32 %v15255_v49, %v15113_v4  ;;  %v9243_v12 = vmul.f32 %v15255_v49, %v15232_v45  ;;  %vm9296_vm13 = vcmp.ge.f32.partialorder %v9263_v14, 0.0 }
 0xe61   :  { %v9264_v15 = vadd.f32 %v15262_v28, %v9225_v34  ;;  %v9360_v50 = vsel %vm9295_vm11, %v9262_v6, %v9328_v54  ;;  %v9377_v48 = vsel %vm9312_vm12, %v9279_v7, %v9345_v52  ;;  %v9329_v21 = vmul.f32 %v15267_v19, %v9263_v14 }
 0xe62   :  { %v9346_v42 = vmul.f32 %v15267_v19, %v9280_v31  ;;  %vm9313_vm14 = vcmp.ge.f32.partialorder %v9280_v31, 0.0  ;;  %v9227_v10 = vmul.f32 %v15255_v49, %v15120_v39  ;;  %v9244_v4 = vmul.f32 %v15255_v49, %v15239_v24 }
 0xe63   :  { %v9265_v45 = vadd.f32 %v15262_v28, %v9226_v53  ;;  %v9282_v33 = vadd.f32 %v15262_v28, %v9243_v12  ;;  %v9361_v47 = vsel %vm9296_vm13, %v9263_v14, %v9329_v21  ;;  %v9330_v2 = vmul.f32 %v15267_v19, %v9264_v15 }
 0xe64   :  { %9425 = vxpose.xlu0.b32.cont [8/16] (narrow) %v9373_v13, 32  ;;  %9389 = vxpose.xlu1.b32.cont [8/16] (narrow) %v9357_v9, 32  ;;  %v9378_v51 = vsel %vm9313_vm14, %v9280_v31, %v9346_v42  ;;  %v9347_v5 = vmul.f32 %v15267_v19, %v9281_v46  ;;  %vm9297_vm15 = vcmp.ge.f32.partialorder %v9264_v15, 0.0  ;;  %vm9314_vm0 = vcmp.ge.f32.partialorder %v9281_v46, 0.0 }
 0xe65   :  { %v9266_v0 = vadd.f32 %v15262_v28, %v9227_v10  ;;  %v9283_v39 = vadd.f32 %v15262_v28, %v9244_v4  ;;  %v9362_v63 = vsel %vm9297_vm15, %v9264_v15, %v9330_v2  ;;  %v9331_v49 = vmul.f32 %v15267_v19, %v9265_v45 }
 0xe66   :  { %v9379_v24 = vsel %vm9314_vm0, %v9281_v46, %v9347_v5  ;;  %v9348_v40 = vmul.f32 %v15267_v19, %v9282_v33  ;;  %vm9298_vm1 = vcmp.ge.f32.partialorder %v9265_v45, 0.0  ;;  %vm9315_vm2 = vcmp.ge.f32.partialorder %v9282_v33, 0.0 }
 0xe67   :  { %v9363_v62 = vsel %vm9298_vm1, %v9265_v45, %v9331_v49  ;;  %v9332_v11 = vmul.f32 %v15267_v19, %v9266_v0  ;;  %v9349_v61 = vmul.f32 %v15267_v19, %v9283_v39  ;;  %vm9299_vm3 = vcmp.ge.f32.partialorder %v9266_v0, 0.0 }
 0xe68   :  { %9426 = vxpose.xlu0.b32.cont [9/16] (narrow) %v9374_v55, 32  ;;  %9390 = vxpose.xlu1.b32.cont [9/16] (narrow) %v9358_v26, 32  ;;  %v9380_v16 = vsel %vm9315_vm2, %v9282_v33, %v9348_v40  ;;  %vm9316_vm4 = vcmp.ge.f32.partialorder %v9283_v39, 0.0 }
 0xe69   :  { %v9364_v28 = vsel %vm9299_vm3, %v9266_v0, %v9332_v11  ;;  %v9381_v8 = vsel %vm9316_vm4, %v9283_v39, %v9349_v61 }
 0xe6c   :  { %9427 = vxpose.xlu0.b32.cont [10/16] (narrow) %v9375_v29, 32  ;;  %9391 = vxpose.xlu1.b32.cont [10/16] (narrow) %v9359_v27, 32 }
 0xe70   :  { %9428 = vxpose.xlu0.b32.cont [11/16] (narrow) %v9376_v20, 32  ;;  %9392 = vxpose.xlu1.b32.cont [11/16] (narrow) %v9360_v50, 32 }
 0xe74   :  { %9429 = vxpose.xlu0.b32.cont [12/16] (narrow) %v9377_v48, 32  ;;  %9393 = vxpose.xlu1.b32.cont [12/16] (narrow) %v9361_v47, 32 }
 0xe78   :  { %9430 = vxpose.xlu0.b32.cont [13/16] (narrow) %v9378_v51, 32  ;;  %9394 = vxpose.xlu1.b32.cont [13/16] (narrow) %v9362_v63, 32 }
 0xe7c   :  { %9431 = vxpose.xlu0.b32.cont [14/16] (narrow) %v9379_v24, 32  ;;  %9395 = vxpose.xlu1.b32.cont [14/16] (narrow) %v9363_v62, 32 }
 0xe80   :  { %9432 = vxpose.xlu0.b32.cont [15/16] (narrow) %v9380_v16, 32  ;;  %9396 = vxpose.xlu1.b32.cont [15/16] (narrow) %v9364_v28, 32 }
 0xe84   :  { %9433 = vxpose.xlu0.b32.end [16/16] (narrow) %v9381_v8, 32  ;;  %9397 = vxpose.xlu1.b32.end [16/16] (narrow) %v15346_v30, 32 }
 0xec4   :  { %v9434_v38 = vpop.trf.xlu0  ;;  %v9398_v17 = vpop.trf.xlu1 }
 0xec5   :  { %9451 = vst [vmem:[#allocation9 + $0x20] sm:$0xff] %v9434_v38  ;;  %9414 = vst [vmem:[#allocation9] sm:$0xff] %v9398_v17 }
 0xec8   :  { %v9435_v37 = vpop.trf.xlu0  ;;  %v9399_v44 = vpop.trf.xlu1 }
 0xec9   :  { %9452 = vst [vmem:[#allocation9 + $0x28] sm:$0xff] %v9435_v37  ;;  %9415 = vst [vmem:[#allocation9 + $0x8] sm:$0xff] %v9399_v44 }
 0xecc   :  { %v9436_v35 = vpop.trf.xlu0  ;;  %v9400_v19 = vpop.trf.xlu1 }
 0xecd   :  { %9453 = vst [vmem:[#allocation9 + $0x30] sm:$0xff] %v9436_v35  ;;  %9416 = vst [vmem:[#allocation9 + $0x10] sm:$0xff] %v9400_v19 }
 0xed0   :  { %v9437_v23 = vpop.trf.xlu0  ;;  %v9401_v56 = vpop.trf.xlu1 }
 0xed1   :  { %9454 = vst [vmem:[#allocation9 + $0x38] sm:$0xff] %v9437_v23  ;;  %9417 = vst [vmem:[#allocation9 + $0x18] sm:$0xff] %v9401_v56 }
 0xed2   :  { %11627 = shalt.err (!%p11624_p5)
}
 0xed3   :  { %9466 = dma.vmem_to_hbm [thread:$0]  %s9461_s6, 1024, %s15417_s8, [#allocation5], %s11646_s15, %s11646_s15, %s11647_s16  }
 0xed4   :  { %11640 = dma.done.wait [#allocation5], 1024  }
 0xed5   :  { %11641 = vsyncadd [#allocation5], 4294966272 }
 0xed6   :  { %9470 = vsyncpa [#allocation4], 1 }
 0xed7   :  { %9471 = vsyncpa [#allocation7], 1 }
 0xed8   :  { %9472 = vsyncpa [#allocation5], 1 }

</bundles_post_ra>
